<compile_context>
chip_gen: v5e
topology: v5e:2x2
jax: 0.10.0
libtpu: 0.0.40
codegen_flags: <defaults>
</compile_context>

<pallas_src>
import functools

import jax
import jax.numpy as jnp
from jax import lax
from jax.experimental import pallas as pl
from jax.experimental.pallas import tpu as pltpu

F32 = jnp.float32
BF16 = jnp.bfloat16

VMEM_LIMIT = 48 * 1024 * 1024  # <= 64 MiB so it is valid on v7x as well


def pair(t):
    return t if isinstance(t, tuple) else (t, t)


def _round_up(x, m):
    return (x + m - 1) // m * m


_TN_PREF = None


def _mxu_lane_tile():
    """256-wide N tiles on v6e/v7x (256x256 MXU), 128 elsewhere (v5e/v4)."""
    global _TN_PREF
    if _TN_PREF is None:
        tn = 128
        try:
            kind = jax.devices()[0].device_kind.lower()
            if ("v6" in kind) or ("v7" in kind):
                tn = 256
        except Exception:
            pass
        _TN_PREF = tn
    return _TN_PREF


def _col_tile(N):
    pref = _mxu_lane_tile()
    for t in (pref, 128):
        if N % t == 0:
            return t
    return N  # full dim (e.g. patch_dim=192)


def _row_tile(M, cap=256):
    Mp = _round_up(M, 8)
    tm = min(cap, Mp)
    Mp = _round_up(Mp, tm)
    return Mp, tm


def _pad_rows(x, Mp):
    M = x.shape[0]
    if Mp == M:
        return x
    return jnp.pad(x, ((0, Mp - M), (0, 0)))


# ----------------------------- Pallas kernels ------------------------------

def _gelu_tanh(x):
    # TODO(synk): nn.GELU() default is the exact erf form; the tanh
    # approximation is used here so the activation lowers to EUP ops in-kernel.
    c = 0.7978845608028654  # sqrt(2/pi)
    return 0.5 * x * (1.0 + jnp.tanh(c * (x + 0.044715 * x * x * x)))


def _linear_kernel(x_ref, w_ref, b_ref, o_ref):
    acc = jnp.dot(x_ref[...], w_ref[...], preferred_element_type=jnp.float32)
    o_ref[...] = (acc + b_ref[...]).astype(o_ref.dtype)


def _ln_linear_kernel(x_ref, g_ref, bt_ref, w_ref, b_ref, o_ref, *, gelu):
    x = x_ref[...].astype(jnp.float32)
    mu = jnp.mean(x, axis=-1, keepdims=True)
    var = jnp.mean(jnp.square(x - mu), axis=-1, keepdims=True)
    xn = (x - mu) * lax.rsqrt(var + 1e-5)          # nn.LayerNorm default eps
    xn = (xn * g_ref[...] + bt_ref[...]).astype(jnp.bfloat16)
    acc = jnp.dot(xn, w_ref[...], preferred_element_type=jnp.float32)
    acc = acc + b_ref[...]
    if gelu:
        acc = _gelu_tanh(acc)
    o_ref[...] = acc.astype(o_ref.dtype)


def _linear_res_kernel(x_ref, w_ref, b_ref, r_ref, o_ref):
    acc = jnp.dot(x_ref[...], w_ref[...], preferred_element_type=jnp.float32)
    o_ref[...] = (acc + b_ref[...] + r_ref[...].astype(jnp.float32)).astype(
        o_ref.dtype)


def _attention_kernel(q_ref, k_ref, v_ref, o_ref, *, scale):
    q = q_ref[0] * scale                      # (H, N, Dh) bf16, scale folded in
    k = k_ref[0]
    v = v_ref[0]
    s = jnp.einsum("hqd,hkd->hqk", q, k, preferred_element_type=jnp.float32)
    s = s - jnp.max(s, axis=-1, keepdims=True)
    p = jnp.exp(s)
    p = p * pl.reciprocal(jnp.sum(p, axis=-1, keepdims=True), approx=True)
    o = jnp.einsum("hqk,hkd->hqd", p.astype(v.dtype), v,
                   preferred_element_type=jnp.float32)
    o_ref[0] = o.astype(o_ref.dtype)


# ------------------------------ kernel wrappers -----------------------------

def linear(x, w, b=None, *, out_dtype=F32):
    """y = x @ w + b   (bf16 MXU inputs, f32 accumulation)."""
    M, K = x.shape
    K2, N = w.shape
    assert K == K2
    if b is None:
        b = jnp.zeros((N,), F32)
    Mp, tm = _row_tile(M)
    tn = _col_tile(N)
    xp = _pad_rows(x.astype(BF16), Mp)
    out = pl.pallas_call(
        _linear_kernel,
        out_shape=jax.ShapeDtypeStruct((Mp, N), out_dtype),
        grid_spec=pltpu.PrefetchScalarGridSpec(
            num_scalar_prefetch=0,
            grid=(Mp // tm, N // tn),
            in_specs=[
                pl.BlockSpec((tm, K), lambda i, j: (i, 0)),   # resident over j
                pl.BlockSpec((K, tn), lambda i, j: (0, j)),
                pl.BlockSpec((1, tn), lambda i, j: (0, j)),
            ],
            out_specs=pl.BlockSpec((tm, tn), lambda i, j: (i, j)),
        ),
        compiler_params=pltpu.CompilerParams(
            dimension_semantics=("parallel", "parallel"),
            vmem_limit_bytes=VMEM_LIMIT,
        ),
    )(xp, w.astype(BF16), b.reshape(1, N).astype(F32))
    return out[:M]


def ln_linear(x, gamma, beta, w, b=None, *, gelu=False, out_dtype=F32):
    """y = act(LayerNorm(x) @ w + b) fused in one kernel."""
    M, K = x.shape
    K2, N = w.shape
    assert K == K2
    if b is None:
        b = jnp.zeros((N,), F32)
    Mp, tm = _row_tile(M)
    tn = _col_tile(N)
    xp = _pad_rows(x.astype(F32), Mp)
    kern = functools.partial(_ln_linear_kernel, gelu=gelu)
    out = pl.pallas_call(
        kern,
        out_shape=jax.ShapeDtypeStruct((Mp, N), out_dtype),
        grid_spec=pltpu.PrefetchScalarGridSpec(
            num_scalar_prefetch=0,
            grid=(Mp // tm, N // tn),
            in_specs=[
                pl.BlockSpec((tm, K), lambda i, j: (i, 0)),
                pl.BlockSpec((1, K), lambda i, j: (0, 0)),
                pl.BlockSpec((1, K), lambda i, j: (0, 0)),
                pl.BlockSpec((K, tn), lambda i, j: (0, j)),
                pl.BlockSpec((1, tn), lambda i, j: (0, j)),
            ],
            out_specs=pl.BlockSpec((tm, tn), lambda i, j: (i, j)),
        ),
        compiler_params=pltpu.CompilerParams(
            dimension_semantics=("parallel", "parallel"),
            vmem_limit_bytes=VMEM_LIMIT,
        ),
    )(xp, gamma.reshape(1, K).astype(F32), beta.reshape(1, K).astype(F32),
      w.astype(BF16), b.reshape(1, N).astype(F32))
    return out[:M]


def linear_residual(x, w, b, res, *, out_dtype=F32):
    """y = res + x @ w + b fused in one kernel."""
    M, K = x.shape
    K2, N = w.shape
    assert K == K2 and res.shape == (M, N)
    Mp, tm = _row_tile(M)
    tn = _col_tile(N)
    xp = _pad_rows(x.astype(BF16), Mp)
    rp = _pad_rows(res.astype(F32), Mp)
    out = pl.pallas_call(
        _linear_res_kernel,
        out_shape=jax.ShapeDtypeStruct((Mp, N), out_dtype),
        grid_spec=pltpu.PrefetchScalarGridSpec(
            num_scalar_prefetch=0,
            grid=(Mp // tm, N // tn),
            in_specs=[
                pl.BlockSpec((tm, K), lambda i, j: (i, 0)),
                pl.BlockSpec((K, tn), lambda i, j: (0, j)),
                pl.BlockSpec((1, tn), lambda i, j: (0, j)),
                pl.BlockSpec((tm, tn), lambda i, j: (i, j)),
            ],
            out_specs=pl.BlockSpec((tm, tn), lambda i, j: (i, j)),
        ),
        compiler_params=pltpu.CompilerParams(
            dimension_semantics=("parallel", "parallel"),
            vmem_limit_bytes=VMEM_LIMIT,
        ),
    )(xp, w.astype(BF16), b.reshape(1, N).astype(F32), rp)
    return out[:M]


def attention(q, k, v, scale):
    """softmax(q k^T * scale) v per batch element.  q/k/v: (B, H, N, Dh)."""
    B, H, N, Dh = q.shape
    kern = functools.partial(_attention_kernel, scale=scale)
    spec = pl.BlockSpec((1, H, N, Dh), lambda b: (b, 0, 0, 0))
    return pl.pallas_call(
        kern,
        out_shape=jax.ShapeDtypeStruct((B, H, N, Dh), BF16),
        grid_spec=pltpu.PrefetchScalarGridSpec(
            num_scalar_prefetch=0,
            grid=(B,),
            in_specs=[spec, spec, spec],
            out_specs=spec,
        ),
        compiler_params=pltpu.CompilerParams(
            dimension_semantics=("parallel",)),
    )(q.astype(BF16), k.astype(BF16), v.astype(BF16))


# --------------------------- Transformer (glue) -----------------------------

def transformer_forward(x, layers, heads, dim_head):
    """PreNorm(Attention)+x ; PreNorm(FeedForward)+x, per layer."""
    B, N, D = x.shape
    H, Dh = heads, dim_head
    inner = H * Dh
    scale = dim_head ** (-0.5)
    x2d = x.reshape(B * N, D)
    for lp in layers:
        # --- attention sublayer: fused LN+QKV, fused out-proj+residual ---
        qkv = ln_linear(x2d, lp["ln1_g"], lp["ln1_b"], lp["w_qkv"],
                        None, gelu=False, out_dtype=BF16)       # (B*N, 3*inner)
        qkv = qkv.reshape(B, N, 3, H, Dh).transpose(2, 0, 3, 1, 4)  # (3,B,H,N,Dh)
        o = attention(qkv[0], qkv[1], qkv[2], scale)            # (B,H,N,Dh) bf16
        o2d = o.transpose(0, 2, 1, 3).reshape(B * N, inner)
        x2d = linear_residual(o2d, lp["w_out"], lp["b_out"], x2d)
        # --- feed-forward sublayer: fused LN+FF1+GELU, fused FF2+residual ---
        h1 = ln_linear(x2d, lp["ln2_g"], lp["ln2_b"], lp["w_ff1"],
                       lp["b_ff1"], gelu=True, out_dtype=BF16)
        x2d = linear_residual(h1, lp["w_ff2"], lp["b_ff2"], x2d)
    return x2d.reshape(B, N, D)


# ------------------------------- parameters --------------------------------

def _init_linear(key, d_in, d_out, bias=True):
    kw, kb = jax.random.split(key)
    w = jax.random.normal(kw, (d_in, d_out), F32) / jnp.sqrt(float(d_in))
    b = 0.01 * jax.random.normal(kb, (d_out,), F32) if bias else None
    return w, b


def _init_transformer(key, dim, depth, heads, dim_head, mlp_dim):
    layers = []
    inner = heads * dim_head
    for i in range(depth):
        k = jax.random.fold_in(key, i)
        k1, k2, k3, k4 = jax.random.split(k, 4)
        w_qkv, _ = _init_linear(k1, dim, 3 * inner, bias=False)
        w_out, b_out = _init_linear(k2, inner, dim)
        w_ff1, b_ff1 = _init_linear(k3, dim, mlp_dim)
        w_ff2, b_ff2 = _init_linear(k4, mlp_dim, dim)
        layers.append(dict(
            ln1_g=jnp.ones((dim,), F32), ln1_b=jnp.zeros((dim,), F32),
            w_qkv=w_qkv, w_out=w_out, b_out=b_out,
            ln2_g=jnp.ones((dim,), F32), ln2_b=jnp.zeros((dim,), F32),
            w_ff1=w_ff1, b_ff1=b_ff1, w_ff2=w_ff2, b_ff2=b_ff2,
        ))
    return layers


ENCODER_DIM = 768      # hard-coded in TextDIAE (ViT dim=768, depth=6, heads=8, mlp 2048)
ENCODER_DEPTH = 6
ENCODER_HEADS = 8
ENCODER_DIM_HEAD = 64
ENCODER_MLP = 2048


def init_textdiae_params(key, *, image_size, patch_size, decoder_dim,
                         decoder_depth, decoder_heads, decoder_dim_head):
    ih, iw = pair(image_size)
    ph, pw = pair(patch_size)
    num_patches = (ih // ph) * (iw // pw)
    patch_dim = 3 * ph * pw
    ks = jax.random.split(key, 8)
    patch_w, patch_b = _init_linear(ks[0], patch_dim, ENCODER_DIM)
    pos_embedding = 0.02 * jax.random.normal(
        ks[1], (1, num_patches + 1, ENCODER_DIM), F32)
    enc_layers = _init_transformer(ks[2], ENCODER_DIM, ENCODER_DEPTH,
                                   ENCODER_HEADS, ENCODER_DIM_HEAD, ENCODER_MLP)
    enc2dec_w, enc2dec_b = _init_linear(ks[3], ENCODER_DIM, decoder_dim)
    mask_token = jax.random.normal(ks[4], (decoder_dim,), F32)
    dec_layers = _init_transformer(ks[5], decoder_dim, decoder_depth,
                                   decoder_heads, decoder_dim_head,
                                   decoder_dim * 4)
    # quirk of the reference module: decoder_pos_emb table size is taken from
    # encoder.pos_embedding (= num_patches + 1 rows, cls slot included)
    decoder_pos_emb = 0.02 * jax.random.normal(
        ks[6], (num_patches + 1, decoder_dim), F32)
    clean_w, clean_b = _init_linear(ks[7], decoder_dim, patch_dim)
    return dict(
        patch_w=patch_w, patch_b=patch_b, pos_embedding=pos_embedding,
        enc_layers=enc_layers, enc2dec_w=enc2dec_w, enc2dec_b=enc2dec_b,
        mask_token=mask_token, dec_layers=dec_layers,
        decoder_pos_emb=decoder_pos_emb, clean_w=clean_w, clean_b=clean_b,
    )


# --------------------------------- forward ---------------------------------

def textdiae_forward(params, img, mask_key, *, patch_size,
                     masking_ratio=0.75, decoder_heads=8, decoder_dim_head=64):
    B, C, H, W = img.shape
    ph, pw = pair(patch_size)
    h, w = H // ph, W // pw
    num_patches = h * w
    patch_dim = C * ph * pw

    # to_patch: 'b c (h p1) (w p2) -> b (h w) (p1 p2 c)'
    patches = img.reshape(B, C, h, ph, w, pw)
    patches = patches.transpose(0, 2, 4, 3, 5, 1).reshape(B, num_patches, patch_dim)

    # patch_to_emb + positional embedding (cls slot 0 skipped)
    tokens = linear(patches.reshape(B * num_patches, patch_dim),
                    params["patch_w"], params["patch_b"])
    tokens = tokens.reshape(B, num_patches, ENCODER_DIM)
    tokens = tokens + params["pos_embedding"][:, 1:num_patches + 1]

    # random masking (torch.rand(...).argsort equivalent)
    num_masked = int(masking_ratio * num_patches)
    rand = jax.random.uniform(mask_key, (B, num_patches))
    rand_indices = jnp.argsort(rand, axis=-1)
    masked_indices = rand_indices[:, :num_masked]
    unmasked_indices = rand_indices[:, num_masked:]
    batch_range = jnp.arange(B)[:, None]

    tokens = tokens[batch_range, unmasked_indices]       # (B, n_unmasked, 768)

    # encoder transformer
    encoded = transformer_forward(tokens, params["enc_layers"],
                                  ENCODER_HEADS, ENCODER_DIM_HEAD)

    # enc -> dec projection + decoder positional embeddings
    Bn, Nu, De = encoded.shape
    dec_tokens = linear(encoded.reshape(Bn * Nu, De),
                        params["enc2dec_w"], params["enc2dec_b"])
    dec_dim = dec_tokens.shape[-1]
    dec_tokens = dec_tokens.reshape(B, Nu, dec_dim)
    dec_tokens = dec_tokens + params["decoder_pos_emb"][unmasked_indices]

    mask_tokens = jnp.broadcast_to(params["mask_token"],
                                   (B, num_masked, dec_dim))
    mask_tokens = mask_tokens + params["decoder_pos_emb"][masked_indices]

    dec_in = jnp.concatenate([mask_tokens, dec_tokens], axis=1)
    decoded = transformer_forward(dec_in, params["dec_layers"],
                                  decoder_heads, decoder_dim_head)

    # predict pixels for the masked patches and scatter them back
    mask_out = decoded[:, :num_masked]
    pred_pixels = linear(mask_out.reshape(B * num_masked, dec_dim),
                         params["clean_w"], params["clean_b"])
    pred_pixels = pred_pixels.reshape(B, num_masked, patch_dim)

    reconstructed = patches.astype(F32).at[batch_range, masked_indices].set(
        pred_pixels)

    # inverse rearrange: 'b (h w) (p1 p2 c) -> b c (h p1) (w p2)'
    rec = reconstructed.reshape(B, h, w, ph, pw, C)
    rec = rec.transpose(0, 5, 1, 3, 2, 4).reshape(B, C, H, W)
    return rec


# ----------------------------------- main -----------------------------------

if __name__ == "__main__":
    image_size = (32, 32)
    patch_size = 8
    decoder_dim = 128
    decoder_depth = 1
    decoder_heads = 8
    decoder_dim_head = 64

    key = jax.random.PRNGKey(0)
    pkey, ikey, mkey = jax.random.split(key, 3)

    params = init_textdiae_params(
        pkey, image_size=image_size, patch_size=patch_size,
        decoder_dim=decoder_dim, decoder_depth=decoder_depth,
        decoder_heads=decoder_heads, decoder_dim_head=decoder_dim_head)

    img = jax.random.normal(ikey, (2, 3, 32, 32), F32)   # NCHW, like PyTorch

    fwd = jax.jit(functools.partial(
        textdiae_forward, patch_size=patch_size, masking_ratio=0.75,
        decoder_heads=decoder_heads, decoder_dim_head=decoder_dim_head))

    out = fwd(params, img, mkey)
    jax.block_until_ready(out)
    assert out.shape == (2, 3, 32, 32) and out.dtype == jnp.float32
    print("KERNEL_OK")
</pallas_src>

<mosaic_0001>
module attributes {stable_mosaic.version = 11 : i64} {
  func.func @_linear_kernel(%arg0: i32, %arg1: i32, %arg2: memref<32x192xbf16, #tpu.memory_space<vmem>>, %arg3: memref<192x128xbf16, #tpu.memory_space<vmem>>, %arg4: memref<1x128xf32, #tpu.memory_space<vmem>>, %arg5: memref<32x128xf32, #tpu.memory_space<vmem>>) attributes {dimension_semantics = [#tpu.dimension_semantics<parallel>, #tpu.dimension_semantics<parallel>], iteration_bounds = array<i64: 1, 6>, scalar_prefetch = 0 : i64, scratch_operands = 0 : i64, tpu.core_type = #tpu.core_type<tc>, window_params = [{transform_indices = @transform_0, window_bounds = array<i64: 32, 192>}, {transform_indices = @transform_1, window_bounds = array<i64: 192, 128>}, {transform_indices = @transform_2, window_bounds = array<i64: 1, 128>}, {transform_indices = @transform_3, window_bounds = array<i64: 32, 128>}]} {
    %c0 = arith.constant 0 : index
    %c0_0 = arith.constant 0 : index
    %0 = vector.load %arg2[%c0, %c0_0] : memref<32x192xbf16, #tpu.memory_space<vmem>>, vector<32x192xbf16>
    %c0_1 = arith.constant 0 : index
    %c0_2 = arith.constant 0 : index
    %1 = vector.load %arg3[%c0_1, %c0_2] : memref<192x128xbf16, #tpu.memory_space<vmem>>, vector<192x128xbf16>
    %cst = arith.constant dense<0.000000e+00> : vector<32x128xf32>
    %2 = tpu.matmul %0, %1, %cst {dimension_numbers = #tpu.dot_dimension_numbers<[1], [0], [0], [1], [0, 0, 1, 1], [], []>} : vector<32x192xbf16>, vector<192x128xbf16>, vector<32x128xf32> -> vector<32x128xf32>
    %c0_3 = arith.constant 0 : index
    %c0_4 = arith.constant 0 : index
    %3 = vector.load %arg4[%c0_3, %c0_4] : memref<1x128xf32, #tpu.memory_space<vmem>>, vector<1x128xf32>
    %4 = vector.broadcast %3 : vector<1x128xf32> to vector<32x128xf32>
    %5 = arith.addf %2, %4 : vector<32x128xf32>
    %c0_5 = arith.constant 0 : index
    %c0_6 = arith.constant 0 : index
    %6 = vector.load %arg5[%c0_5, %c0_6] : memref<32x128xf32, #tpu.memory_space<vmem>>, vector<32x128xf32>
    tpu.vector_store %arg5[%c0_5, %c0_6], %5 {strides = array<i32>} : memref<32x128xf32, #tpu.memory_space<vmem>>, vector<32x128xf32>,
    return
  }
  func.func @transform_0(%arg0: i32, %arg1: i32) -> (i32, i32) {
    %c0_i32 = arith.constant 0 : i32
    %c0_i32_0 = arith.constant 0 : i32
    return %arg0, %c0_i32 : i32, i32
  }
  func.func @transform_1(%arg0: i32, %arg1: i32) -> (i32, i32) {
    %c0_i32 = arith.constant 0 : i32
    %c0_i32_0 = arith.constant 0 : i32
    return %c0_i32, %arg1 : i32, i32
  }
  func.func @transform_2(%arg0: i32, %arg1: i32) -> (i32, i32) {
    %c0_i32 = arith.constant 0 : i32
    %c0_i32_0 = arith.constant 0 : i32
    return %c0_i32, %arg1 : i32, i32
  }
  func.func @transform_3(%arg0: i32, %arg1: i32) -> (i32, i32) {
    %c0_i32 = arith.constant 0 : i32
    return %arg0, %arg1 : i32, i32
  }
}

module attributes {stable_mosaic.version = 11 : i64} {
  func.func @_ln_linear_kernel(%arg0: i32, %arg1: i32, %arg2: memref<8x768xf32, #tpu.memory_space<vmem>>, %arg3: memref<1x768xf32, #tpu.memory_space<vmem>>, %arg4: memref<1x768xf32, #tpu.memory_space<vmem>>, %arg5: memref<768x128xbf16, #tpu.memory_space<vmem>>, %arg6: memref<1x128xf32, #tpu.memory_space<vmem>>, %arg7: memref<8x128xbf16, #tpu.memory_space<vmem>>) attributes {dimension_semantics = [#tpu.dimension_semantics<parallel>, #tpu.dimension_semantics<parallel>], iteration_bounds = array<i64: 1, 12>, scalar_prefetch = 0 : i64, scratch_operands = 0 : i64, tpu.core_type = #tpu.core_type<tc>, window_params = [{transform_indices = @transform_0, window_bounds = array<i64: 8, 768>}, {pipeline_mode = #tpu.pipeline_mode<synchronous>, transform_indices = @transform_1, window_bounds = array<i64: 1, 768>}, {pipeline_mode = #tpu.pipeline_mode<synchronous>, transform_indices = @transform_2, window_bounds = array<i64: 1, 768>}, {transform_indices = @transform_3, window_bounds = array<i64: 768, 128>}, {transform_indices = @transform_4, window_bounds = array<i64: 1, 128>}, {transform_indices = @transform_5, window_bounds = array<i64: 8, 128>}]} {
    %c0 = arith.constant 0 : index
    %c0_0 = arith.constant 0 : index
    %0 = vector.load %arg2[%c0, %c0_0] : memref<8x768xf32, #tpu.memory_space<vmem>>, vector<8x768xf32>
    %cst = arith.constant dense<0.000000e+00> : vector<8xf32>
    %1 = vector.multi_reduction <add>, %0, %cst [1] : vector<8x768xf32> to vector<8xf32>
    %2 = vector.shape_cast %1 : vector<8xf32> to vector<8x1xf32>
    %cst_1 = arith.constant 7.680000e+02 : f32
    %3 = vector.broadcast %cst_1 : f32 to vector<8x1xf32>
    %4 = arith.divf %2, %3 : vector<8x1xf32>
    %5 = vector.broadcast %4 : vector<8x1xf32> to vector<8x768xf32>
    %6 = arith.subf %0, %5 : vector<8x768xf32>
    %7 = arith.mulf %6, %6 : vector<8x768xf32>
    %cst_2 = arith.constant dense<0.000000e+00> : vector<8xf32>
    %8 = vector.multi_reduction <add>, %7, %cst_2 [1] : vector<8x768xf32> to vector<8xf32>
    %9 = vector.shape_cast %8 : vector<8xf32> to vector<8x1xf32>
    %cst_3 = arith.constant 7.680000e+02 : f32
    %10 = vector.broadcast %cst_3 : f32 to vector<8x1xf32>
    %11 = arith.divf %9, %10 : vector<8x1xf32>
    %12 = vector.broadcast %4 : vector<8x1xf32> to vector<8x768xf32>
    %13 = arith.subf %0, %12 : vector<8x768xf32>
    %cst_4 = arith.constant 9.99999974E-6 : f32
    %14 = vector.broadcast %cst_4 : f32 to vector<8x1xf32>
    %15 = arith.addf %11, %14 : vector<8x1xf32>
    %16 = math.rsqrt %15 : vector<8x1xf32>
    %17 = vector.broadcast %16 : vector<8x1xf32> to vector<8x768xf32>
    %18 = arith.mulf %13, %17 : vector<8x768xf32>
    %c0_5 = arith.constant 0 : index
    %c0_6 = arith.constant 0 : index
    %19 = vector.load %arg3[%c0_5, %c0_6] : memref<1x768xf32, #tpu.memory_space<vmem>>, vector<1x768xf32>
    %20 = vector.broadcast %19 : vector<1x768xf32> to vector<8x768xf32>
    %21 = arith.mulf %18, %20 : vector<8x768xf32>
    %c0_7 = arith.constant 0 : index
    %c0_8 = arith.constant 0 : index
    %22 = vector.load %arg4[%c0_7, %c0_8] : memref<1x768xf32, #tpu.memory_space<vmem>>, vector<1x768xf32>
    %23 = vector.broadcast %22 : vector<1x768xf32> to vector<8x768xf32>
    %24 = arith.addf %21, %23 : vector<8x768xf32>
    %25 = arith.truncf %24 : vector<8x768xf32> to vector<8x768xbf16>
    %c0_9 = arith.constant 0 : index
    %c0_10 = arith.constant 0 : index
    %26 = vector.load %arg5[%c0_9, %c0_10] : memref<768x128xbf16, #tpu.memory_space<vmem>>, vector<768x128xbf16>
    %cst_11 = arith.constant dense<0.000000e+00> : vector<8x128xf32>
    %27 = tpu.matmul %25, %26, %cst_11 {dimension_numbers = #tpu.dot_dimension_numbers<[1], [0], [0], [1], [0, 0, 1, 1], [], []>} : vector<8x768xbf16>, vector<768x128xbf16>, vector<8x128xf32> -> vector<8x128xf32>
    %c0_12 = arith.constant 0 : index
    %c0_13 = arith.constant 0 : index
    %28 = vector.load %arg6[%c0_12, %c0_13] : memref<1x128xf32, #tpu.memory_space<vmem>>, vector<1x128xf32>
    %29 = vector.broadcast %28 : vector<1x128xf32> to vector<8x128xf32>
    %30 = arith.addf %27, %29 : vector<8x128xf32>
    %31 = arith.truncf %30 : vector<8x128xf32> to vector<8x128xbf16>
    %c0_14 = arith.constant 0 : index
    %c0_15 = arith.constant 0 : index
    %32 = vector.load %arg7[%c0_14, %c0_15] : memref<8x128xbf16, #tpu.memory_space<vmem>>, vector<8x128xbf16>
    tpu.vector_store %arg7[%c0_14, %c0_15], %31 {strides = array<i32>} : memref<8x128xbf16, #tpu.memory_space<vmem>>, vector<8x128xbf16>,
    return
  }
  func.func @transform_0(%arg0: i32, %arg1: i32) -> (i32, i32) {
    %c0_i32 = arith.constant 0 : i32
    %c0_i32_0 = arith.constant 0 : i32
    return %arg0, %c0_i32 : i32, i32
  }
  func.func @transform_1(%arg0: i32, %arg1: i32) -> (i32, i32) {
    %c0_i32 = arith.constant 0 : i32
    %c0_i32_0 = arith.constant 0 : i32
    %c0_i32_1 = arith.constant 0 : i32
    return %c0_i32, %c0_i32_0 : i32, i32
  }
  func.func @transform_2(%arg0: i32, %arg1: i32) -> (i32, i32) {
    %c0_i32 = arith.constant 0 : i32
    %c0_i32_0 = arith.constant 0 : i32
    %c0_i32_1 = arith.constant 0 : i32
    return %c0_i32, %c0_i32_0 : i32, i32
  }
  func.func @transform_3(%arg0: i32, %arg1: i32) -> (i32, i32) {
    %c0_i32 = arith.constant 0 : i32
    %c0_i32_0 = arith.constant 0 : i32
    return %c0_i32, %arg1 : i32, i32
  }
  func.func @transform_4(%arg0: i32, %arg1: i32) -> (i32, i32) {
    %c0_i32 = arith.constant 0 : i32
    %c0_i32_0 = arith.constant 0 : i32
    return %c0_i32, %arg1 : i32, i32
  }
  func.func @transform_5(%arg0: i32, %arg1: i32) -> (i32, i32) {
    %c0_i32 = arith.constant 0 : i32
    return %arg0, %arg1 : i32, i32
  }
}

module attributes {stable_mosaic.version = 11 : i64} {
  func.func @_attention_kernel(%arg0: i32, %arg1: memref<1x8x4x64xbf16, #tpu.memory_space<vmem>>, %arg2: memref<1x8x4x64xbf16, #tpu.memory_space<vmem>>, %arg3: memref<1x8x4x64xbf16, #tpu.memory_space<vmem>>, %arg4: memref<1x8x4x64xbf16, #tpu.memory_space<vmem>>) attributes {dimension_semantics = [#tpu.dimension_semantics<parallel>], iteration_bounds = array<i64: 2>, scalar_prefetch = 0 : i64, scratch_operands = 0 : i64, tpu.core_type = #tpu.core_type<tc>, window_params = [{transform_indices = @transform_0, window_bounds = array<i64: 1, 8, 4, 64>}, {transform_indices = @transform_1, window_bounds = array<i64: 1, 8, 4, 64>}, {transform_indices = @transform_2, window_bounds = array<i64: 1, 8, 4, 64>}, {transform_indices = @transform_3, window_bounds = array<i64: 1, 8, 4, 64>}]} {
    %c0 = arith.constant 0 : index
    %c0_0 = arith.constant 0 : index
    %c0_1 = arith.constant 0 : index
    %c0_2 = arith.constant 0 : index
    %0 = vector.load %arg1[%c0, %c0_0, %c0_1, %c0_2] : memref<1x8x4x64xbf16, #tpu.memory_space<vmem>>, vector<1x8x4x64xbf16>
    %1 = vector.shape_cast %0 : vector<1x8x4x64xbf16> to vector<8x4x64xbf16>
    %cst = arith.constant 1.250000e-01 : bf16
    %2 = vector.broadcast %cst : bf16 to vector<8x4x64xbf16>
    %3 = arith.mulf %1, %2 : vector<8x4x64xbf16>
    %c0_3 = arith.constant 0 : index
    %c0_4 = arith.constant 0 : index
    %c0_5 = arith.constant 0 : index
    %c0_6 = arith.constant 0 : index
    %4 = vector.load %arg2[%c0_3, %c0_4, %c0_5, %c0_6] : memref<1x8x4x64xbf16, #tpu.memory_space<vmem>>, vector<1x8x4x64xbf16>
    %5 = vector.shape_cast %4 : vector<1x8x4x64xbf16> to vector<8x4x64xbf16>
    %c0_7 = arith.constant 0 : index
    %c0_8 = arith.constant 0 : index
    %c0_9 = arith.constant 0 : index
    %c0_10 = arith.constant 0 : index
    %6 = vector.load %arg3[%c0_7, %c0_8, %c0_9, %c0_10] : memref<1x8x4x64xbf16, #tpu.memory_space<vmem>>, vector<1x8x4x64xbf16>
    %7 = vector.shape_cast %6 : vector<1x8x4x64xbf16> to vector<8x4x64xbf16>
    "tpu.trace_start"() <{level = 10 : i32, message = "hqd,hkd->hqk"}> : () -> ()
    %cst_11 = arith.constant dense<0.000000e+00> : vector<8x4x4xf32>
    %8 = tpu.matmul %3, %5, %cst_11 {dimension_numbers = #tpu.dot_dimension_numbers<[2], [2], [1], [1], [0, 0, 0, 1, 1, 1], [0], [0]>} : vector<8x4x64xbf16>, vector<8x4x64xbf16>, vector<8x4x4xf32> -> vector<8x4x4xf32>
    "tpu.trace_stop"() : () -> ()
    %cst_12 = arith.constant dense<0xFF800000> : vector<8x4xf32>
    %9 = vector.multi_reduction <maximumf>, %8, %cst_12 [2] : vector<8x4x4xf32> to vector<8x4xf32>
    %10 = vector.shape_cast %9 : vector<8x4xf32> to vector<8x4x1xf32>
    %11 = vector.broadcast %10 : vector<8x4x1xf32> to vector<8x4x4xf32>
    %12 = arith.subf %8, %11 : vector<8x4x4xf32>
    %13 = math.exp %12 : vector<8x4x4xf32>
    %cst_13 = arith.constant dense<0.000000e+00> : vector<8x4xf32>
    %14 = vector.multi_reduction <add>, %13, %cst_13 [2] : vector<8x4x4xf32> to vector<8x4xf32>
    %15 = vector.shape_cast %14 : vector<8x4xf32> to vector<8x4x1xf32>
    %16 = tpu.reciprocal %15 {approx = true} : vector<8x4x1xf32> -> vector<8x4x1xf32>
    %17 = vector.broadcast %16 : vector<8x4x1xf32> to vector<8x4x4xf32>
    %18 = arith.mulf %13, %17 : vector<8x4x4xf32>
    %19 = arith.truncf %18 : vector<8x4x4xf32> to vector<8x4x4xbf16>
    "tpu.trace_start"() <{level = 10 : i32, message = "hqk,hkd->hqd"}> : () -> ()
    %cst_14 = arith.constant dense<0.000000e+00> : vector<8x4x64xf32>
    %20 = tpu.matmul %19, %7, %cst_14 {dimension_numbers = #tpu.dot_dimension_numbers<[2], [1], [1], [2], [0, 0, 0, 1, 1, 2], [0], [0]>} : vector<8x4x4xbf16>, vector<8x4x64xbf16>, vector<8x4x64xf32> -> vector<8x4x64xf32>
    "tpu.trace_stop"() : () -> ()
    %21 = arith.truncf %20 : vector<8x4x64xf32> to vector<8x4x64xbf16>
    %c0_15 = arith.constant 0 : index
    %c0_16 = arith.constant 0 : index
    %c0_17 = arith.constant 0 : index
    %c0_18 = arith.constant 0 : index
    %22 = vector.load %arg4[%c0_15, %c0_16, %c0_17, %c0_18] : memref<1x8x4x64xbf16, #tpu.memory_space<vmem>>, vector<1x8x4x64xbf16>
    %23 = vector.shape_cast %22 : vector<1x8x4x64xbf16> to vector<8x4x64xbf16>
    %24 = vector.shape_cast %21 : vector<8x4x64xbf16> to vector<1x8x4x64xbf16>
    tpu.vector_store %arg4[%c0_15, %c0_16, %c0_17, %c0_18], %24 {strides = array<i32>} : memref<1x8x4x64xbf16, #tpu.memory_space<vmem>>, vector<1x8x4x64xbf16>,
    return
  }
  func.func @transform_0(%arg0: i32) -> (i32, i32, i32, i32) {
    %c0_i32 = arith.constant 0 : i32
    %c0_i32_0 = arith.constant 0 : i32
    %c0_i32_1 = arith.constant 0 : i32
    %c0_i32_2 = arith.constant 0 : i32
    return %arg0, %c0_i32, %c0_i32_0, %c0_i32_1 : i32, i32, i32, i32
  }
  func.func @transform_1(%arg0: i32) -> (i32, i32, i32, i32) {
    %c0_i32 = arith.constant 0 : i32
    %c0_i32_0 = arith.constant 0 : i32
    %c0_i32_1 = arith.constant 0 : i32
    %c0_i32_2 = arith.constant 0 : i32
    return %arg0, %c0_i32, %c0_i32_0, %c0_i32_1 : i32, i32, i32, i32
  }
  func.func @transform_2(%arg0: i32) -> (i32, i32, i32, i32) {
    %c0_i32 = arith.constant 0 : i32
    %c0_i32_0 = arith.constant 0 : i32
    %c0_i32_1 = arith.constant 0 : i32
    %c0_i32_2 = arith.constant 0 : i32
    return %arg0, %c0_i32, %c0_i32_0, %c0_i32_1 : i32, i32, i32, i32
  }
  func.func @transform_3(%arg0: i32) -> (i32, i32, i32, i32) {
    %c0_i32 = arith.constant 0 : i32
    %c0_i32_0 = arith.constant 0 : i32
    %c0_i32_1 = arith.constant 0 : i32
    %c0_i32_2 = arith.constant 0 : i32
    return %arg0, %c0_i32, %c0_i32_0, %c0_i32_1 : i32, i32, i32, i32
  }
}

module attributes {stable_mosaic.version = 11 : i64} {
  func.func @_linear_res_kernel(%arg0: i32, %arg1: i32, %arg2: memref<8x512xbf16, #tpu.memory_space<vmem>>, %arg3: memref<512x128xbf16, #tpu.memory_space<vmem>>, %arg4: memref<1x128xf32, #tpu.memory_space<vmem>>, %arg5: memref<8x128xf32, #tpu.memory_space<vmem>>, %arg6: memref<8x128xf32, #tpu.memory_space<vmem>>) attributes {dimension_semantics = [#tpu.dimension_semantics<parallel>, #tpu.dimension_semantics<parallel>], iteration_bounds = array<i64: 1, 6>, scalar_prefetch = 0 : i64, scratch_operands = 0 : i64, tpu.core_type = #tpu.core_type<tc>, window_params = [{transform_indices = @transform_0, window_bounds = array<i64: 8, 512>}, {transform_indices = @transform_1, window_bounds = array<i64: 512, 128>}, {transform_indices = @transform_2, window_bounds = array<i64: 1, 128>}, {transform_indices = @transform_3, window_bounds = array<i64: 8, 128>}, {transform_indices = @transform_4, window_bounds = array<i64: 8, 128>}]} {
    %c0 = arith.constant 0 : index
    %c0_0 = arith.constant 0 : index
    %0 = vector.load %arg2[%c0, %c0_0] : memref<8x512xbf16, #tpu.memory_space<vmem>>, vector<8x512xbf16>
    %c0_1 = arith.constant 0 : index
    %c0_2 = arith.constant 0 : index
    %1 = vector.load %arg3[%c0_1, %c0_2] : memref<512x128xbf16, #tpu.memory_space<vmem>>, vector<512x128xbf16>
    %cst = arith.constant dense<0.000000e+00> : vector<8x128xf32>
    %2 = tpu.matmul %0, %1, %cst {dimension_numbers = #tpu.dot_dimension_numbers<[1], [0], [0], [1], [0, 0, 1, 1], [], []>} : vector<8x512xbf16>, vector<512x128xbf16>, vector<8x128xf32> -> vector<8x128xf32>
    %c0_3 = arith.constant 0 : index
    %c0_4 = arith.constant 0 : index
    %3 = vector.load %arg4[%c0_3, %c0_4] : memref<1x128xf32, #tpu.memory_space<vmem>>, vector<1x128xf32>
    %4 = vector.broadcast %3 : vector<1x128xf32> to vector<8x128xf32>
    %5 = arith.addf %2, %4 : vector<8x128xf32>
    %c0_5 = arith.constant 0 : index
    %c0_6 = arith.constant 0 : index
    %6 = vector.load %arg5[%c0_5, %c0_6] : memref<8x128xf32, #tpu.memory_space<vmem>>, vector<8x128xf32>
    %7 = arith.addf %5, %6 : vector<8x128xf32>
    %c0_7 = arith.constant 0 : index
    %c0_8 = arith.constant 0 : index
    %8 = vector.load %arg6[%c0_7, %c0_8] : memref<8x128xf32, #tpu.memory_space<vmem>>, vector<8x128xf32>
    tpu.vector_store %arg6[%c0_7, %c0_8], %7 {strides = array<i32>} : memref<8x128xf32, #tpu.memory_space<vmem>>, vector<8x128xf32>,
    return
  }
  func.func @transform_0(%arg0: i32, %arg1: i32) -> (i32, i32) {
    %c0_i32 = arith.constant 0 : i32
    %c0_i32_0 = arith.constant 0 : i32
    return %arg0, %c0_i32 : i32, i32
  }
  func.func @transform_1(%arg0: i32, %arg1: i32) -> (i32, i32) {
    %c0_i32 = arith.constant 0 : i32
    %c0_i32_0 = arith.constant 0 : i32
    return %c0_i32, %arg1 : i32, i32
  }
  func.func @transform_2(%arg0: i32, %arg1: i32) -> (i32, i32) {
    %c0_i32 = arith.constant 0 : i32
    %c0_i32_0 = arith.constant 0 : i32
    return %c0_i32, %arg1 : i32, i32
  }
  func.func @transform_3(%arg0: i32, %arg1: i32) -> (i32, i32) {
    %c0_i32 = arith.constant 0 : i32
    return %arg0, %arg1 : i32, i32
  }
  func.func @transform_4(%arg0: i32, %arg1: i32) -> (i32, i32) {
    %c0_i32 = arith.constant 0 : i32
    return %arg0, %arg1 : i32, i32
  }
}

module attributes {stable_mosaic.version = 11 : i64} {
  func.func @_ln_linear_kernel(%arg0: i32, %arg1: i32, %arg2: memref<8x768xf32, #tpu.memory_space<vmem>>, %arg3: memref<1x768xf32, #tpu.memory_space<vmem>>, %arg4: memref<1x768xf32, #tpu.memory_space<vmem>>, %arg5: memref<768x128xbf16, #tpu.memory_space<vmem>>, %arg6: memref<1x128xf32, #tpu.memory_space<vmem>>, %arg7: memref<8x128xbf16, #tpu.memory_space<vmem>>) attributes {dimension_semantics = [#tpu.dimension_semantics<parallel>, #tpu.dimension_semantics<parallel>], iteration_bounds = array<i64: 1, 16>, scalar_prefetch = 0 : i64, scratch_operands = 0 : i64, tpu.core_type = #tpu.core_type<tc>, window_params = [{transform_indices = @transform_0, window_bounds = array<i64: 8, 768>}, {pipeline_mode = #tpu.pipeline_mode<synchronous>, transform_indices = @transform_1, window_bounds = array<i64: 1, 768>}, {pipeline_mode = #tpu.pipeline_mode<synchronous>, transform_indices = @transform_2, window_bounds = array<i64: 1, 768>}, {transform_indices = @transform_3, window_bounds = array<i64: 768, 128>}, {transform_indices = @transform_4, window_bounds = array<i64: 1, 128>}, {transform_indices = @transform_5, window_bounds = array<i64: 8, 128>}]} {
    %c0 = arith.constant 0 : index
    %c0_0 = arith.constant 0 : index
    %0 = vector.load %arg2[%c0, %c0_0] : memref<8x768xf32, #tpu.memory_space<vmem>>, vector<8x768xf32>
    %cst = arith.constant dense<0.000000e+00> : vector<8xf32>
    %1 = vector.multi_reduction <add>, %0, %cst [1] : vector<8x768xf32> to vector<8xf32>
    %2 = vector.shape_cast %1 : vector<8xf32> to vector<8x1xf32>
    %cst_1 = arith.constant 7.680000e+02 : f32
    %3 = vector.broadcast %cst_1 : f32 to vector<8x1xf32>
    %4 = arith.divf %2, %3 : vector<8x1xf32>
    %5 = vector.broadcast %4 : vector<8x1xf32> to vector<8x768xf32>
    %6 = arith.subf %0, %5 : vector<8x768xf32>
    %7 = arith.mulf %6, %6 : vector<8x768xf32>
    %cst_2 = arith.constant dense<0.000000e+00> : vector<8xf32>
    %8 = vector.multi_reduction <add>, %7, %cst_2 [1] : vector<8x768xf32> to vector<8xf32>
    %9 = vector.shape_cast %8 : vector<8xf32> to vector<8x1xf32>
    %cst_3 = arith.constant 7.680000e+02 : f32
    %10 = vector.broadcast %cst_3 : f32 to vector<8x1xf32>
    %11 = arith.divf %9, %10 : vector<8x1xf32>
    %12 = vector.broadcast %4 : vector<8x1xf32> to vector<8x768xf32>
    %13 = arith.subf %0, %12 : vector<8x768xf32>
    %cst_4 = arith.constant 9.99999974E-6 : f32
    %14 = vector.broadcast %cst_4 : f32 to vector<8x1xf32>
    %15 = arith.addf %11, %14 : vector<8x1xf32>
    %16 = math.rsqrt %15 : vector<8x1xf32>
    %17 = vector.broadcast %16 : vector<8x1xf32> to vector<8x768xf32>
    %18 = arith.mulf %13, %17 : vector<8x768xf32>
    %c0_5 = arith.constant 0 : index
    %c0_6 = arith.constant 0 : index
    %19 = vector.load %arg3[%c0_5, %c0_6] : memref<1x768xf32, #tpu.memory_space<vmem>>, vector<1x768xf32>
    %20 = vector.broadcast %19 : vector<1x768xf32> to vector<8x768xf32>
    %21 = arith.mulf %18, %20 : vector<8x768xf32>
    %c0_7 = arith.constant 0 : index
    %c0_8 = arith.constant 0 : index
    %22 = vector.load %arg4[%c0_7, %c0_8] : memref<1x768xf32, #tpu.memory_space<vmem>>, vector<1x768xf32>
    %23 = vector.broadcast %22 : vector<1x768xf32> to vector<8x768xf32>
    %24 = arith.addf %21, %23 : vector<8x768xf32>
    %25 = arith.truncf %24 : vector<8x768xf32> to vector<8x768xbf16>
    %c0_9 = arith.constant 0 : index
    %c0_10 = arith.constant 0 : index
    %26 = vector.load %arg5[%c0_9, %c0_10] : memref<768x128xbf16, #tpu.memory_space<vmem>>, vector<768x128xbf16>
    %cst_11 = arith.constant dense<0.000000e+00> : vector<8x128xf32>
    %27 = tpu.matmul %25, %26, %cst_11 {dimension_numbers = #tpu.dot_dimension_numbers<[1], [0], [0], [1], [0, 0, 1, 1], [], []>} : vector<8x768xbf16>, vector<768x128xbf16>, vector<8x128xf32> -> vector<8x128xf32>
    %c0_12 = arith.constant 0 : index
    %c0_13 = arith.constant 0 : index
    %28 = vector.load %arg6[%c0_12, %c0_13] : memref<1x128xf32, #tpu.memory_space<vmem>>, vector<1x128xf32>
    %29 = vector.broadcast %28 : vector<1x128xf32> to vector<8x128xf32>
    %30 = arith.addf %27, %29 : vector<8x128xf32>
    %cst_14 = arith.constant 5.000000e-01 : f32
    %31 = vector.broadcast %cst_14 : f32 to vector<8x128xf32>
    %32 = arith.mulf %31, %30 : vector<8x128xf32>
    %cst_15 = arith.constant 4.471500e-02 : f32
    %33 = vector.broadcast %cst_15 : f32 to vector<8x128xf32>
    %34 = arith.mulf %33, %30 : vector<8x128xf32>
    %35 = arith.mulf %34, %30 : vector<8x128xf32>
    %36 = arith.mulf %35, %30 : vector<8x128xf32>
    %37 = arith.addf %30, %36 : vector<8x128xf32>
    %cst_16 = arith.constant 0.797884583 : f32
    %38 = vector.broadcast %cst_16 : f32 to vector<8x128xf32>
    %39 = arith.mulf %38, %37 : vector<8x128xf32>
    %40 = math.tanh %39 : vector<8x128xf32>
    %cst_17 = arith.constant 1.000000e+00 : f32
    %41 = vector.broadcast %cst_17 : f32 to vector<8x128xf32>
    %42 = arith.addf %41, %40 : vector<8x128xf32>
    %43 = arith.mulf %32, %42 : vector<8x128xf32>
    %44 = arith.truncf %43 : vector<8x128xf32> to vector<8x128xbf16>
    %c0_18 = arith.constant 0 : index
    %c0_19 = arith.constant 0 : index
    %45 = vector.load %arg7[%c0_18, %c0_19] : memref<8x128xbf16, #tpu.memory_space<vmem>>, vector<8x128xbf16>
    tpu.vector_store %arg7[%c0_18, %c0_19], %44 {strides = array<i32>} : memref<8x128xbf16, #tpu.memory_space<vmem>>, vector<8x128xbf16>,
    return
  }
  func.func @transform_0(%arg0: i32, %arg1: i32) -> (i32, i32) {
    %c0_i32 = arith.constant 0 : i32
    %c0_i32_0 = arith.constant 0 : i32
    return %arg0, %c0_i32 : i32, i32
  }
  func.func @transform_1(%arg0: i32, %arg1: i32) -> (i32, i32) {
    %c0_i32 = arith.constant 0 : i32
    %c0_i32_0 = arith.constant 0 : i32
    %c0_i32_1 = arith.constant 0 : i32
    return %c0_i32, %c0_i32_0 : i32, i32
  }
  func.func @transform_2(%arg0: i32, %arg1: i32) -> (i32, i32) {
    %c0_i32 = arith.constant 0 : i32
    %c0_i32_0 = arith.constant 0 : i32
    %c0_i32_1 = arith.constant 0 : i32
    return %c0_i32, %c0_i32_0 : i32, i32
  }
  func.func @transform_3(%arg0: i32, %arg1: i32) -> (i32, i32) {
    %c0_i32 = arith.constant 0 : i32
    %c0_i32_0 = arith.constant 0 : i32
    return %c0_i32, %arg1 : i32, i32
  }
  func.func @transform_4(%arg0: i32, %arg1: i32) -> (i32, i32) {
    %c0_i32 = arith.constant 0 : i32
    %c0_i32_0 = arith.constant 0 : i32
    return %c0_i32, %arg1 : i32, i32
  }
  func.func @transform_5(%arg0: i32, %arg1: i32) -> (i32, i32) {
    %c0_i32 = arith.constant 0 : i32
    return %arg0, %arg1 : i32, i32
  }
}

module attributes {stable_mosaic.version = 11 : i64} {
  func.func @_linear_res_kernel(%arg0: i32, %arg1: i32, %arg2: memref<8x2048xbf16, #tpu.memory_space<vmem>>, %arg3: memref<2048x128xbf16, #tpu.memory_space<vmem>>, %arg4: memref<1x128xf32, #tpu.memory_space<vmem>>, %arg5: memref<8x128xf32, #tpu.memory_space<vmem>>, %arg6: memref<8x128xf32, #tpu.memory_space<vmem>>) attributes {dimension_semantics = [#tpu.dimension_semantics<parallel>, #tpu.dimension_semantics<parallel>], iteration_bounds = array<i64: 1, 6>, scalar_prefetch = 0 : i64, scratch_operands = 0 : i64, tpu.core_type = #tpu.core_type<tc>, window_params = [{transform_indices = @transform_0, window_bounds = array<i64: 8, 2048>}, {transform_indices = @transform_1, window_bounds = array<i64: 2048, 128>}, {transform_indices = @transform_2, window_bounds = array<i64: 1, 128>}, {transform_indices = @transform_3, window_bounds = array<i64: 8, 128>}, {transform_indices = @transform_4, window_bounds = array<i64: 8, 128>}]} {
    %c0 = arith.constant 0 : index
    %c0_0 = arith.constant 0 : index
    %0 = vector.load %arg2[%c0, %c0_0] : memref<8x2048xbf16, #tpu.memory_space<vmem>>, vector<8x2048xbf16>
    %c0_1 = arith.constant 0 : index
    %c0_2 = arith.constant 0 : index
    %1 = vector.load %arg3[%c0_1, %c0_2] : memref<2048x128xbf16, #tpu.memory_space<vmem>>, vector<2048x128xbf16>
    %cst = arith.constant dense<0.000000e+00> : vector<8x128xf32>
    %2 = tpu.matmul %0, %1, %cst {dimension_numbers = #tpu.dot_dimension_numbers<[1], [0], [0], [1], [0, 0, 1, 1], [], []>} : vector<8x2048xbf16>, vector<2048x128xbf16>, vector<8x128xf32> -> vector<8x128xf32>
    %c0_3 = arith.constant 0 : index
    %c0_4 = arith.constant 0 : index
    %3 = vector.load %arg4[%c0_3, %c0_4] : memref<1x128xf32, #tpu.memory_space<vmem>>, vector<1x128xf32>
    %4 = vector.broadcast %3 : vector<1x128xf32> to vector<8x128xf32>
    %5 = arith.addf %2, %4 : vector<8x128xf32>
    %c0_5 = arith.constant 0 : index
    %c0_6 = arith.constant 0 : index
    %6 = vector.load %arg5[%c0_5, %c0_6] : memref<8x128xf32, #tpu.memory_space<vmem>>, vector<8x128xf32>
    %7 = arith.addf %5, %6 : vector<8x128xf32>
    %c0_7 = arith.constant 0 : index
    %c0_8 = arith.constant 0 : index
    %8 = vector.load %arg6[%c0_7, %c0_8] : memref<8x128xf32, #tpu.memory_space<vmem>>, vector<8x128xf32>
    tpu.vector_store %arg6[%c0_7, %c0_8], %7 {strides = array<i32>} : memref<8x128xf32, #tpu.memory_space<vmem>>, vector<8x128xf32>,
    return
  }
  func.func @transform_0(%arg0: i32, %arg1: i32) -> (i32, i32) {
    %c0_i32 = arith.constant 0 : i32
    %c0_i32_0 = arith.constant 0 : i32
    return %arg0, %c0_i32 : i32, i32
  }
  func.func @transform_1(%arg0: i32, %arg1: i32) -> (i32, i32) {
    %c0_i32 = arith.constant 0 : i32
    %c0_i32_0 = arith.constant 0 : i32
    return %c0_i32, %arg1 : i32, i32
  }
  func.func @transform_2(%arg0: i32, %arg1: i32) -> (i32, i32) {
    %c0_i32 = arith.constant 0 : i32
    %c0_i32_0 = arith.constant 0 : i32
    return %c0_i32, %arg1 : i32, i32
  }
  func.func @transform_3(%arg0: i32, %arg1: i32) -> (i32, i32) {
    %c0_i32 = arith.constant 0 : i32
    return %arg0, %arg1 : i32, i32
  }
  func.func @transform_4(%arg0: i32, %arg1: i32) -> (i32, i32) {
    %c0_i32 = arith.constant 0 : i32
    return %arg0, %arg1 : i32, i32
  }
}

module attributes {stable_mosaic.version = 11 : i64} {
  func.func @_linear_kernel(%arg0: i32, %arg1: i32, %arg2: memref<8x768xbf16, #tpu.memory_space<vmem>>, %arg3: memref<768x128xbf16, #tpu.memory_space<vmem>>, %arg4: memref<1x128xf32, #tpu.memory_space<vmem>>, %arg5: memref<8x128xf32, #tpu.memory_space<vmem>>) attributes {dimension_semantics = [#tpu.dimension_semantics<parallel>, #tpu.dimension_semantics<parallel>], iteration_bounds = array<i64: 1, 1>, scalar_prefetch = 0 : i64, scratch_operands = 0 : i64, tpu.core_type = #tpu.core_type<tc>, window_params = [{transform_indices = @transform_0, window_bounds = array<i64: 8, 768>}, {transform_indices = @transform_1, window_bounds = array<i64: 768, 128>}, {transform_indices = @transform_2, window_bounds = array<i64: 1, 128>}, {transform_indices = @transform_3, window_bounds = array<i64: 8, 128>}]} {
    %c0 = arith.constant 0 : index
    %c0_0 = arith.constant 0 : index
    %0 = vector.load %arg2[%c0, %c0_0] : memref<8x768xbf16, #tpu.memory_space<vmem>>, vector<8x768xbf16>
    %c0_1 = arith.constant 0 : index
    %c0_2 = arith.constant 0 : index
    %1 = vector.load %arg3[%c0_1, %c0_2] : memref<768x128xbf16, #tpu.memory_space<vmem>>, vector<768x128xbf16>
    %cst = arith.constant dense<0.000000e+00> : vector<8x128xf32>
    %2 = tpu.matmul %0, %1, %cst {dimension_numbers = #tpu.dot_dimension_numbers<[1], [0], [0], [1], [0, 0, 1, 1], [], []>} : vector<8x768xbf16>, vector<768x128xbf16>, vector<8x128xf32> -> vector<8x128xf32>
    %c0_3 = arith.constant 0 : index
    %c0_4 = arith.constant 0 : index
    %3 = vector.load %arg4[%c0_3, %c0_4] : memref<1x128xf32, #tpu.memory_space<vmem>>, vector<1x128xf32>
    %4 = vector.broadcast %3 : vector<1x128xf32> to vector<8x128xf32>
    %5 = arith.addf %2, %4 : vector<8x128xf32>
    %c0_5 = arith.constant 0 : index
    %c0_6 = arith.constant 0 : index
    %6 = vector.load %arg5[%c0_5, %c0_6] : memref<8x128xf32, #tpu.memory_space<vmem>>, vector<8x128xf32>
    tpu.vector_store %arg5[%c0_5, %c0_6], %5 {strides = array<i32>} : memref<8x128xf32, #tpu.memory_space<vmem>>, vector<8x128xf32>,
    return
  }
  func.func @transform_0(%arg0: i32, %arg1: i32) -> (i32, i32) {
    %c0_i32 = arith.constant 0 : i32
    %c0_i32_0 = arith.constant 0 : i32
    return %arg0, %c0_i32 : i32, i32
  }
  func.func @transform_1(%arg0: i32, %arg1: i32) -> (i32, i32) {
    %c0_i32 = arith.constant 0 : i32
    %c0_i32_0 = arith.constant 0 : i32
    return %c0_i32, %arg1 : i32, i32
  }
  func.func @transform_2(%arg0: i32, %arg1: i32) -> (i32, i32) {
    %c0_i32 = arith.constant 0 : i32
    %c0_i32_0 = arith.constant 0 : i32
    return %c0_i32, %arg1 : i32, i32
  }
  func.func @transform_3(%arg0: i32, %arg1: i32) -> (i32, i32) {
    %c0_i32 = arith.constant 0 : i32
    return %arg0, %arg1 : i32, i32
  }
}

module attributes {stable_mosaic.version = 11 : i64} {
  func.func @_ln_linear_kernel(%arg0: i32, %arg1: i32, %arg2: memref<32x128xf32, #tpu.memory_space<vmem>>, %arg3: memref<1x128xf32, #tpu.memory_space<vmem>>, %arg4: memref<1x128xf32, #tpu.memory_space<vmem>>, %arg5: memref<128x128xbf16, #tpu.memory_space<vmem>>, %arg6: memref<1x128xf32, #tpu.memory_space<vmem>>, %arg7: memref<32x128xbf16, #tpu.memory_space<vmem>>) attributes {dimension_semantics = [#tpu.dimension_semantics<parallel>, #tpu.dimension_semantics<parallel>], iteration_bounds = array<i64: 1, 12>, scalar_prefetch = 0 : i64, scratch_operands = 0 : i64, tpu.core_type = #tpu.core_type<tc>, window_params = [{transform_indices = @transform_0, window_bounds = array<i64: 32, 128>}, {pipeline_mode = #tpu.pipeline_mode<synchronous>, transform_indices = @transform_1, window_bounds = array<i64: 1, 128>}, {pipeline_mode = #tpu.pipeline_mode<synchronous>, transform_indices = @transform_2, window_bounds = array<i64: 1, 128>}, {transform_indices = @transform_3, window_bounds = array<i64: 128, 128>}, {transform_indices = @transform_4, window_bounds = array<i64: 1, 128>}, {transform_indices = @transform_5, window_bounds = array<i64: 32, 128>}]} {
    %c0 = arith.constant 0 : index
    %c0_0 = arith.constant 0 : index
    %0 = vector.load %arg2[%c0, %c0_0] : memref<32x128xf32, #tpu.memory_space<vmem>>, vector<32x128xf32>
    %cst = arith.constant dense<0.000000e+00> : vector<32xf32>
    %1 = vector.multi_reduction <add>, %0, %cst [1] : vector<32x128xf32> to vector<32xf32>
    %2 = vector.shape_cast %1 : vector<32xf32> to vector<32x1xf32>
    %cst_1 = arith.constant 1.280000e+02 : f32
    %3 = vector.broadcast %cst_1 : f32 to vector<32x1xf32>
    %4 = arith.divf %2, %3 : vector<32x1xf32>
    %5 = vector.broadcast %4 : vector<32x1xf32> to vector<32x128xf32>
    %6 = arith.subf %0, %5 : vector<32x128xf32>
    %7 = arith.mulf %6, %6 : vector<32x128xf32>
    %cst_2 = arith.constant dense<0.000000e+00> : vector<32xf32>
    %8 = vector.multi_reduction <add>, %7, %cst_2 [1] : vector<32x128xf32> to vector<32xf32>
    %9 = vector.shape_cast %8 : vector<32xf32> to vector<32x1xf32>
    %cst_3 = arith.constant 1.280000e+02 : f32
    %10 = vector.broadcast %cst_3 : f32 to vector<32x1xf32>
    %11 = arith.divf %9, %10 : vector<32x1xf32>
    %12 = vector.broadcast %4 : vector<32x1xf32> to vector<32x128xf32>
    %13 = arith.subf %0, %12 : vector<32x128xf32>
    %cst_4 = arith.constant 9.99999974E-6 : f32
    %14 = vector.broadcast %cst_4 : f32 to vector<32x1xf32>
    %15 = arith.addf %11, %14 : vector<32x1xf32>
    %16 = math.rsqrt %15 : vector<32x1xf32>
    %17 = vector.broadcast %16 : vector<32x1xf32> to vector<32x128xf32>
    %18 = arith.mulf %13, %17 : vector<32x128xf32>
    %c0_5 = arith.constant 0 : index
    %c0_6 = arith.constant 0 : index
    %19 = vector.load %arg3[%c0_5, %c0_6] : memref<1x128xf32, #tpu.memory_space<vmem>>, vector<1x128xf32>
    %20 = vector.broadcast %19 : vector<1x128xf32> to vector<32x128xf32>
    %21 = arith.mulf %18, %20 : vector<32x128xf32>
    %c0_7 = arith.constant 0 : index
    %c0_8 = arith.constant 0 : index
    %22 = vector.load %arg4[%c0_7, %c0_8] : memref<1x128xf32, #tpu.memory_space<vmem>>, vector<1x128xf32>
    %23 = vector.broadcast %22 : vector<1x128xf32> to vector<32x128xf32>
    %24 = arith.addf %21, %23 : vector<32x128xf32>
    %25 = arith.truncf %24 : vector<32x128xf32> to vector<32x128xbf16>
    %c0_9 = arith.constant 0 : index
    %c0_10 = arith.constant 0 : index
    %26 = vector.load %arg5[%c0_9, %c0_10] : memref<128x128xbf16, #tpu.memory_space<vmem>>, vector<128x128xbf16>
    %cst_11 = arith.constant dense<0.000000e+00> : vector<32x128xf32>
    %27 = tpu.matmul %25, %26, %cst_11 {dimension_numbers = #tpu.dot_dimension_numbers<[1], [0], [0], [1], [0, 0, 1, 1], [], []>} : vector<32x128xbf16>, vector<128x128xbf16>, vector<32x128xf32> -> vector<32x128xf32>
    %c0_12 = arith.constant 0 : index
    %c0_13 = arith.constant 0 : index
    %28 = vector.load %arg6[%c0_12, %c0_13] : memref<1x128xf32, #tpu.memory_space<vmem>>, vector<1x128xf32>
    %29 = vector.broadcast %28 : vector<1x128xf32> to vector<32x128xf32>
    %30 = arith.addf %27, %29 : vector<32x128xf32>
    %31 = arith.truncf %30 : vector<32x128xf32> to vector<32x128xbf16>
    %c0_14 = arith.constant 0 : index
    %c0_15 = arith.constant 0 : index
    %32 = vector.load %arg7[%c0_14, %c0_15] : memref<32x128xbf16, #tpu.memory_space<vmem>>, vector<32x128xbf16>
    tpu.vector_store %arg7[%c0_14, %c0_15], %31 {strides = array<i32>} : memref<32x128xbf16, #tpu.memory_space<vmem>>, vector<32x128xbf16>,
    return
  }
  func.func @transform_0(%arg0: i32, %arg1: i32) -> (i32, i32) {
    %c0_i32 = arith.constant 0 : i32
    %c0_i32_0 = arith.constant 0 : i32
    return %arg0, %c0_i32 : i32, i32
  }
  func.func @transform_1(%arg0: i32, %arg1: i32) -> (i32, i32) {
    %c0_i32 = arith.constant 0 : i32
    %c0_i32_0 = arith.constant 0 : i32
    %c0_i32_1 = arith.constant 0 : i32
    return %c0_i32, %c0_i32_0 : i32, i32
  }
  func.func @transform_2(%arg0: i32, %arg1: i32) -> (i32, i32) {
    %c0_i32 = arith.constant 0 : i32
    %c0_i32_0 = arith.constant 0 : i32
    %c0_i32_1 = arith.constant 0 : i32
    return %c0_i32, %c0_i32_0 : i32, i32
  }
  func.func @transform_3(%arg0: i32, %arg1: i32) -> (i32, i32) {
    %c0_i32 = arith.constant 0 : i32
    %c0_i32_0 = arith.constant 0 : i32
    return %c0_i32, %arg1 : i32, i32
  }
  func.func @transform_4(%arg0: i32, %arg1: i32) -> (i32, i32) {
    %c0_i32 = arith.constant 0 : i32
    %c0_i32_0 = arith.constant 0 : i32
    return %c0_i32, %arg1 : i32, i32
  }
  func.func @transform_5(%arg0: i32, %arg1: i32) -> (i32, i32) {
    %c0_i32 = arith.constant 0 : i32
    return %arg0, %arg1 : i32, i32
  }
}

module attributes {stable_mosaic.version = 11 : i64} {
  func.func @_attention_kernel(%arg0: i32, %arg1: memref<1x8x16x64xbf16, #tpu.memory_space<vmem>>, %arg2: memref<1x8x16x64xbf16, #tpu.memory_space<vmem>>, %arg3: memref<1x8x16x64xbf16, #tpu.memory_space<vmem>>, %arg4: memref<1x8x16x64xbf16, #tpu.memory_space<vmem>>) attributes {dimension_semantics = [#tpu.dimension_semantics<parallel>], iteration_bounds = array<i64: 2>, scalar_prefetch = 0 : i64, scratch_operands = 0 : i64, tpu.core_type = #tpu.core_type<tc>, window_params = [{transform_indices = @transform_0, window_bounds = array<i64: 1, 8, 16, 64>}, {transform_indices = @transform_1, window_bounds = array<i64: 1, 8, 16, 64>}, {transform_indices = @transform_2, window_bounds = array<i64: 1, 8, 16, 64>}, {transform_indices = @transform_3, window_bounds = array<i64: 1, 8, 16, 64>}]} {
    %c0 = arith.constant 0 : index
    %c0_0 = arith.constant 0 : index
    %c0_1 = arith.constant 0 : index
    %c0_2 = arith.constant 0 : index
    %0 = vector.load %arg1[%c0, %c0_0, %c0_1, %c0_2] : memref<1x8x16x64xbf16, #tpu.memory_space<vmem>>, vector<1x8x16x64xbf16>
    %1 = vector.shape_cast %0 : vector<1x8x16x64xbf16> to vector<8x16x64xbf16>
    %cst = arith.constant 1.250000e-01 : bf16
    %2 = vector.broadcast %cst : bf16 to vector<8x16x64xbf16>
    %3 = arith.mulf %1, %2 : vector<8x16x64xbf16>
    %c0_3 = arith.constant 0 : index
    %c0_4 = arith.constant 0 : index
    %c0_5 = arith.constant 0 : index
    %c0_6 = arith.constant 0 : index
    %4 = vector.load %arg2[%c0_3, %c0_4, %c0_5, %c0_6] : memref<1x8x16x64xbf16, #tpu.memory_space<vmem>>, vector<1x8x16x64xbf16>
    %5 = vector.shape_cast %4 : vector<1x8x16x64xbf16> to vector<8x16x64xbf16>
    %c0_7 = arith.constant 0 : index
    %c0_8 = arith.constant 0 : index
    %c0_9 = arith.constant 0 : index
    %c0_10 = arith.constant 0 : index
    %6 = vector.load %arg3[%c0_7, %c0_8, %c0_9, %c0_10] : memref<1x8x16x64xbf16, #tpu.memory_space<vmem>>, vector<1x8x16x64xbf16>
    %7 = vector.shape_cast %6 : vector<1x8x16x64xbf16> to vector<8x16x64xbf16>
    "tpu.trace_start"() <{level = 10 : i32, message = "hqd,hkd->hqk"}> : () -> ()
    %cst_11 = arith.constant dense<0.000000e+00> : vector<8x16x16xf32>
    %8 = tpu.matmul %3, %5, %cst_11 {dimension_numbers = #tpu.dot_dimension_numbers<[2], [2], [1], [1], [0, 0, 0, 1, 1, 1], [0], [0]>} : vector<8x16x64xbf16>, vector<8x16x64xbf16>, vector<8x16x16xf32> -> vector<8x16x16xf32>
    "tpu.trace_stop"() : () -> ()
    %cst_12 = arith.constant dense<0xFF800000> : vector<8x16xf32>
    %9 = vector.multi_reduction <maximumf>, %8, %cst_12 [2] : vector<8x16x16xf32> to vector<8x16xf32>
    %10 = vector.shape_cast %9 : vector<8x16xf32> to vector<8x16x1xf32>
    %11 = vector.broadcast %10 : vector<8x16x1xf32> to vector<8x16x16xf32>
    %12 = arith.subf %8, %11 : vector<8x16x16xf32>
    %13 = math.exp %12 : vector<8x16x16xf32>
    %cst_13 = arith.constant dense<0.000000e+00> : vector<8x16xf32>
    %14 = vector.multi_reduction <add>, %13, %cst_13 [2] : vector<8x16x16xf32> to vector<8x16xf32>
    %15 = vector.shape_cast %14 : vector<8x16xf32> to vector<8x16x1xf32>
    %16 = tpu.reciprocal %15 {approx = true} : vector<8x16x1xf32> -> vector<8x16x1xf32>
    %17 = vector.broadcast %16 : vector<8x16x1xf32> to vector<8x16x16xf32>
    %18 = arith.mulf %13, %17 : vector<8x16x16xf32>
    %19 = arith.truncf %18 : vector<8x16x16xf32> to vector<8x16x16xbf16>
    "tpu.trace_start"() <{level = 10 : i32, message = "hqk,hkd->hqd"}> : () -> ()
    %cst_14 = arith.constant dense<0.000000e+00> : vector<8x16x64xf32>
    %20 = tpu.matmul %19, %7, %cst_14 {dimension_numbers = #tpu.dot_dimension_numbers<[2], [1], [1], [2], [0, 0, 0, 1, 1, 2], [0], [0]>} : vector<8x16x16xbf16>, vector<8x16x64xbf16>, vector<8x16x64xf32> -> vector<8x16x64xf32>
    "tpu.trace_stop"() : () -> ()
    %21 = arith.truncf %20 : vector<8x16x64xf32> to vector<8x16x64xbf16>
    %c0_15 = arith.constant 0 : index
    %c0_16 = arith.constant 0 : index
    %c0_17 = arith.constant 0 : index
    %c0_18 = arith.constant 0 : index
    %22 = vector.load %arg4[%c0_15, %c0_16, %c0_17, %c0_18] : memref<1x8x16x64xbf16, #tpu.memory_space<vmem>>, vector<1x8x16x64xbf16>
    %23 = vector.shape_cast %22 : vector<1x8x16x64xbf16> to vector<8x16x64xbf16>
    %24 = vector.shape_cast %21 : vector<8x16x64xbf16> to vector<1x8x16x64xbf16>
    tpu.vector_store %arg4[%c0_15, %c0_16, %c0_17, %c0_18], %24 {strides = array<i32>} : memref<1x8x16x64xbf16, #tpu.memory_space<vmem>>, vector<1x8x16x64xbf16>,
    return
  }
  func.func @transform_0(%arg0: i32) -> (i32, i32, i32, i32) {
    %c0_i32 = arith.constant 0 : i32
    %c0_i32_0 = arith.constant 0 : i32
    %c0_i32_1 = arith.constant 0 : i32
    %c0_i32_2 = arith.constant 0 : i32
    return %arg0, %c0_i32, %c0_i32_0, %c0_i32_1 : i32, i32, i32, i32
  }
  func.func @transform_1(%arg0: i32) -> (i32, i32, i32, i32) {
    %c0_i32 = arith.constant 0 : i32
    %c0_i32_0 = arith.constant 0 : i32
    %c0_i32_1 = arith.constant 0 : i32
    %c0_i32_2 = arith.constant 0 : i32
    return %arg0, %c0_i32, %c0_i32_0, %c0_i32_1 : i32, i32, i32, i32
  }
  func.func @transform_2(%arg0: i32) -> (i32, i32, i32, i32) {
    %c0_i32 = arith.constant 0 : i32
    %c0_i32_0 = arith.constant 0 : i32
    %c0_i32_1 = arith.constant 0 : i32
    %c0_i32_2 = arith.constant 0 : i32
    return %arg0, %c0_i32, %c0_i32_0, %c0_i32_1 : i32, i32, i32, i32
  }
  func.func @transform_3(%arg0: i32) -> (i32, i32, i32, i32) {
    %c0_i32 = arith.constant 0 : i32
    %c0_i32_0 = arith.constant 0 : i32
    %c0_i32_1 = arith.constant 0 : i32
    %c0_i32_2 = arith.constant 0 : i32
    return %arg0, %c0_i32, %c0_i32_0, %c0_i32_1 : i32, i32, i32, i32
  }
}

module attributes {stable_mosaic.version = 11 : i64} {
  func.func @_linear_res_kernel(%arg0: i32, %arg1: i32, %arg2: memref<32x512xbf16, #tpu.memory_space<vmem>>, %arg3: memref<512x128xbf16, #tpu.memory_space<vmem>>, %arg4: memref<1x128xf32, #tpu.memory_space<vmem>>, %arg5: memref<32x128xf32, #tpu.memory_space<vmem>>, %arg6: memref<32x128xf32, #tpu.memory_space<vmem>>) attributes {dimension_semantics = [#tpu.dimension_semantics<parallel>, #tpu.dimension_semantics<parallel>], iteration_bounds = array<i64: 1, 1>, scalar_prefetch = 0 : i64, scratch_operands = 0 : i64, tpu.core_type = #tpu.core_type<tc>, window_params = [{transform_indices = @transform_0, window_bounds = array<i64: 32, 512>}, {transform_indices = @transform_1, window_bounds = array<i64: 512, 128>}, {transform_indices = @transform_2, window_bounds = array<i64: 1, 128>}, {transform_indices = @transform_3, window_bounds = array<i64: 32, 128>}, {transform_indices = @transform_4, window_bounds = array<i64: 32, 128>}]} {
    %c0 = arith.constant 0 : index
    %c0_0 = arith.constant 0 : index
    %0 = vector.load %arg2[%c0, %c0_0] : memref<32x512xbf16, #tpu.memory_space<vmem>>, vector<32x512xbf16>
    %c0_1 = arith.constant 0 : index
    %c0_2 = arith.constant 0 : index
    %1 = vector.load %arg3[%c0_1, %c0_2] : memref<512x128xbf16, #tpu.memory_space<vmem>>, vector<512x128xbf16>
    %cst = arith.constant dense<0.000000e+00> : vector<32x128xf32>
    %2 = tpu.matmul %0, %1, %cst {dimension_numbers = #tpu.dot_dimension_numbers<[1], [0], [0], [1], [0, 0, 1, 1], [], []>} : vector<32x512xbf16>, vector<512x128xbf16>, vector<32x128xf32> -> vector<32x128xf32>
    %c0_3 = arith.constant 0 : index
    %c0_4 = arith.constant 0 : index
    %3 = vector.load %arg4[%c0_3, %c0_4] : memref<1x128xf32, #tpu.memory_space<vmem>>, vector<1x128xf32>
    %4 = vector.broadcast %3 : vector<1x128xf32> to vector<32x128xf32>
    %5 = arith.addf %2, %4 : vector<32x128xf32>
    %c0_5 = arith.constant 0 : index
    %c0_6 = arith.constant 0 : index
    %6 = vector.load %arg5[%c0_5, %c0_6] : memref<32x128xf32, #tpu.memory_space<vmem>>, vector<32x128xf32>
    %7 = arith.addf %5, %6 : vector<32x128xf32>
    %c0_7 = arith.constant 0 : index
    %c0_8 = arith.constant 0 : index
    %8 = vector.load %arg6[%c0_7, %c0_8] : memref<32x128xf32, #tpu.memory_space<vmem>>, vector<32x128xf32>
    tpu.vector_store %arg6[%c0_7, %c0_8], %7 {strides = array<i32>} : memref<32x128xf32, #tpu.memory_space<vmem>>, vector<32x128xf32>,
    return
  }
  func.func @transform_0(%arg0: i32, %arg1: i32) -> (i32, i32) {
    %c0_i32 = arith.constant 0 : i32
    %c0_i32_0 = arith.constant 0 : i32
    return %arg0, %c0_i32 : i32, i32
  }
  func.func @transform_1(%arg0: i32, %arg1: i32) -> (i32, i32) {
    %c0_i32 = arith.constant 0 : i32
    %c0_i32_0 = arith.constant 0 : i32
    return %c0_i32, %arg1 : i32, i32
  }
  func.func @transform_2(%arg0: i32, %arg1: i32) -> (i32, i32) {
    %c0_i32 = arith.constant 0 : i32
    %c0_i32_0 = arith.constant 0 : i32
    return %c0_i32, %arg1 : i32, i32
  }
  func.func @transform_3(%arg0: i32, %arg1: i32) -> (i32, i32) {
    %c0_i32 = arith.constant 0 : i32
    return %arg0, %arg1 : i32, i32
  }
  func.func @transform_4(%arg0: i32, %arg1: i32) -> (i32, i32) {
    %c0_i32 = arith.constant 0 : i32
    return %arg0, %arg1 : i32, i32
  }
}

module attributes {stable_mosaic.version = 11 : i64} {
  func.func @_ln_linear_kernel(%arg0: i32, %arg1: i32, %arg2: memref<32x128xf32, #tpu.memory_space<vmem>>, %arg3: memref<1x128xf32, #tpu.memory_space<vmem>>, %arg4: memref<1x128xf32, #tpu.memory_space<vmem>>, %arg5: memref<128x128xbf16, #tpu.memory_space<vmem>>, %arg6: memref<1x128xf32, #tpu.memory_space<vmem>>, %arg7: memref<32x128xbf16, #tpu.memory_space<vmem>>) attributes {dimension_semantics = [#tpu.dimension_semantics<parallel>, #tpu.dimension_semantics<parallel>], iteration_bounds = array<i64: 1, 4>, scalar_prefetch = 0 : i64, scratch_operands = 0 : i64, tpu.core_type = #tpu.core_type<tc>, window_params = [{transform_indices = @transform_0, window_bounds = array<i64: 32, 128>}, {pipeline_mode = #tpu.pipeline_mode<synchronous>, transform_indices = @transform_1, window_bounds = array<i64: 1, 128>}, {pipeline_mode = #tpu.pipeline_mode<synchronous>, transform_indices = @transform_2, window_bounds = array<i64: 1, 128>}, {transform_indices = @transform_3, window_bounds = array<i64: 128, 128>}, {transform_indices = @transform_4, window_bounds = array<i64: 1, 128>}, {transform_indices = @transform_5, window_bounds = array<i64: 32, 128>}]} {
    %c0 = arith.constant 0 : index
    %c0_0 = arith.constant 0 : index
    %0 = vector.load %arg2[%c0, %c0_0] : memref<32x128xf32, #tpu.memory_space<vmem>>, vector<32x128xf32>
    %cst = arith.constant dense<0.000000e+00> : vector<32xf32>
    %1 = vector.multi_reduction <add>, %0, %cst [1] : vector<32x128xf32> to vector<32xf32>
    %2 = vector.shape_cast %1 : vector<32xf32> to vector<32x1xf32>
    %cst_1 = arith.constant 1.280000e+02 : f32
    %3 = vector.broadcast %cst_1 : f32 to vector<32x1xf32>
    %4 = arith.divf %2, %3 : vector<32x1xf32>
    %5 = vector.broadcast %4 : vector<32x1xf32> to vector<32x128xf32>
    %6 = arith.subf %0, %5 : vector<32x128xf32>
    %7 = arith.mulf %6, %6 : vector<32x128xf32>
    %cst_2 = arith.constant dense<0.000000e+00> : vector<32xf32>
    %8 = vector.multi_reduction <add>, %7, %cst_2 [1] : vector<32x128xf32> to vector<32xf32>
    %9 = vector.shape_cast %8 : vector<32xf32> to vector<32x1xf32>
    %cst_3 = arith.constant 1.280000e+02 : f32
    %10 = vector.broadcast %cst_3 : f32 to vector<32x1xf32>
    %11 = arith.divf %9, %10 : vector<32x1xf32>
    %12 = vector.broadcast %4 : vector<32x1xf32> to vector<32x128xf32>
    %13 = arith.subf %0, %12 : vector<32x128xf32>
    %cst_4 = arith.constant 9.99999974E-6 : f32
    %14 = vector.broadcast %cst_4 : f32 to vector<32x1xf32>
    %15 = arith.addf %11, %14 : vector<32x1xf32>
    %16 = math.rsqrt %15 : vector<32x1xf32>
    %17 = vector.broadcast %16 : vector<32x1xf32> to vector<32x128xf32>
    %18 = arith.mulf %13, %17 : vector<32x128xf32>
    %c0_5 = arith.constant 0 : index
    %c0_6 = arith.constant 0 : index
    %19 = vector.load %arg3[%c0_5, %c0_6] : memref<1x128xf32, #tpu.memory_space<vmem>>, vector<1x128xf32>
    %20 = vector.broadcast %19 : vector<1x128xf32> to vector<32x128xf32>
    %21 = arith.mulf %18, %20 : vector<32x128xf32>
    %c0_7 = arith.constant 0 : index
    %c0_8 = arith.constant 0 : index
    %22 = vector.load %arg4[%c0_7, %c0_8] : memref<1x128xf32, #tpu.memory_space<vmem>>, vector<1x128xf32>
    %23 = vector.broadcast %22 : vector<1x128xf32> to vector<32x128xf32>
    %24 = arith.addf %21, %23 : vector<32x128xf32>
    %25 = arith.truncf %24 : vector<32x128xf32> to vector<32x128xbf16>
    %c0_9 = arith.constant 0 : index
    %c0_10 = arith.constant 0 : index
    %26 = vector.load %arg5[%c0_9, %c0_10] : memref<128x128xbf16, #tpu.memory_space<vmem>>, vector<128x128xbf16>
    %cst_11 = arith.constant dense<0.000000e+00> : vector<32x128xf32>
    %27 = tpu.matmul %25, %26, %cst_11 {dimension_numbers = #tpu.dot_dimension_numbers<[1], [0], [0], [1], [0, 0, 1, 1], [], []>} : vector<32x128xbf16>, vector<128x128xbf16>, vector<32x128xf32> -> vector<32x128xf32>
    %c0_12 = arith.constant 0 : index
    %c0_13 = arith.constant 0 : index
    %28 = vector.load %arg6[%c0_12, %c0_13] : memref<1x128xf32, #tpu.memory_space<vmem>>, vector<1x128xf32>
    %29 = vector.broadcast %28 : vector<1x128xf32> to vector<32x128xf32>
    %30 = arith.addf %27, %29 : vector<32x128xf32>
    %cst_14 = arith.constant 5.000000e-01 : f32
    %31 = vector.broadcast %cst_14 : f32 to vector<32x128xf32>
    %32 = arith.mulf %31, %30 : vector<32x128xf32>
    %cst_15 = arith.constant 4.471500e-02 : f32
    %33 = vector.broadcast %cst_15 : f32 to vector<32x128xf32>
    %34 = arith.mulf %33, %30 : vector<32x128xf32>
    %35 = arith.mulf %34, %30 : vector<32x128xf32>
    %36 = arith.mulf %35, %30 : vector<32x128xf32>
    %37 = arith.addf %30, %36 : vector<32x128xf32>
    %cst_16 = arith.constant 0.797884583 : f32
    %38 = vector.broadcast %cst_16 : f32 to vector<32x128xf32>
    %39 = arith.mulf %38, %37 : vector<32x128xf32>
    %40 = math.tanh %39 : vector<32x128xf32>
    %cst_17 = arith.constant 1.000000e+00 : f32
    %41 = vector.broadcast %cst_17 : f32 to vector<32x128xf32>
    %42 = arith.addf %41, %40 : vector<32x128xf32>
    %43 = arith.mulf %32, %42 : vector<32x128xf32>
    %44 = arith.truncf %43 : vector<32x128xf32> to vector<32x128xbf16>
    %c0_18 = arith.constant 0 : index
    %c0_19 = arith.constant 0 : index
    %45 = vector.load %arg7[%c0_18, %c0_19] : memref<32x128xbf16, #tpu.memory_space<vmem>>, vector<32x128xbf16>
    tpu.vector_store %arg7[%c0_18, %c0_19], %44 {strides = array<i32>} : memref<32x128xbf16, #tpu.memory_space<vmem>>, vector<32x128xbf16>,
    return
  }
  func.func @transform_0(%arg0: i32, %arg1: i32) -> (i32, i32) {
    %c0_i32 = arith.constant 0 : i32
    %c0_i32_0 = arith.constant 0 : i32
    return %arg0, %c0_i32 : i32, i32
  }
  func.func @transform_1(%arg0: i32, %arg1: i32) -> (i32, i32) {
    %c0_i32 = arith.constant 0 : i32
    %c0_i32_0 = arith.constant 0 : i32
    %c0_i32_1 = arith.constant 0 : i32
    return %c0_i32, %c0_i32_0 : i32, i32
  }
  func.func @transform_2(%arg0: i32, %arg1: i32) -> (i32, i32) {
    %c0_i32 = arith.constant 0 : i32
    %c0_i32_0 = arith.constant 0 : i32
    %c0_i32_1 = arith.constant 0 : i32
    return %c0_i32, %c0_i32_0 : i32, i32
  }
  func.func @transform_3(%arg0: i32, %arg1: i32) -> (i32, i32) {
    %c0_i32 = arith.constant 0 : i32
    %c0_i32_0 = arith.constant 0 : i32
    return %c0_i32, %arg1 : i32, i32
  }
  func.func @transform_4(%arg0: i32, %arg1: i32) -> (i32, i32) {
    %c0_i32 = arith.constant 0 : i32
    %c0_i32_0 = arith.constant 0 : i32
    return %c0_i32, %arg1 : i32, i32
  }
  func.func @transform_5(%arg0: i32, %arg1: i32) -> (i32, i32) {
    %c0_i32 = arith.constant 0 : i32
    return %arg0, %arg1 : i32, i32
  }
}

module attributes {stable_mosaic.version = 11 : i64} {
  func.func @_linear_kernel(%arg0: i32, %arg1: i32, %arg2: memref<24x128xbf16, #tpu.memory_space<vmem>>, %arg3: memref<128x192xbf16, #tpu.memory_space<vmem>>, %arg4: memref<1x192xf32, #tpu.memory_space<vmem>>, %arg5: memref<24x192xf32, #tpu.memory_space<vmem>>) attributes {dimension_semantics = [#tpu.dimension_semantics<parallel>, #tpu.dimension_semantics<parallel>], iteration_bounds = array<i64: 1, 1>, scalar_prefetch = 0 : i64, scratch_operands = 0 : i64, tpu.core_type = #tpu.core_type<tc>, window_params = [{transform_indices = @transform_0, window_bounds = array<i64: 24, 128>}, {transform_indices = @transform_1, window_bounds = array<i64: 128, 192>}, {transform_indices = @transform_2, window_bounds = array<i64: 1, 192>}, {transform_indices = @transform_3, window_bounds = array<i64: 24, 192>}]} {
    %c0 = arith.constant 0 : index
    %c0_0 = arith.constant 0 : index
    %0 = vector.load %arg2[%c0, %c0_0] : memref<24x128xbf16, #tpu.memory_space<vmem>>, vector<24x128xbf16>
    %c0_1 = arith.constant 0 : index
    %c0_2 = arith.constant 0 : index
    %1 = vector.load %arg3[%c0_1, %c0_2] : memref<128x192xbf16, #tpu.memory_space<vmem>>, vector<128x192xbf16>
    %cst = arith.constant dense<0.000000e+00> : vector<24x192xf32>
    %2 = tpu.matmul %0, %1, %cst {dimension_numbers = #tpu.dot_dimension_numbers<[1], [0], [0], [1], [0, 0, 1, 1], [], []>} : vector<24x128xbf16>, vector<128x192xbf16>, vector<24x192xf32> -> vector<24x192xf32>
    %c0_3 = arith.constant 0 : index
    %c0_4 = arith.constant 0 : index
    %3 = vector.load %arg4[%c0_3, %c0_4] : memref<1x192xf32, #tpu.memory_space<vmem>>, vector<1x192xf32>
    %4 = vector.broadcast %3 : vector<1x192xf32> to vector<24x192xf32>
    %5 = arith.addf %2, %4 : vector<24x192xf32>
    %c0_5 = arith.constant 0 : index
    %c0_6 = arith.constant 0 : index
    %6 = vector.load %arg5[%c0_5, %c0_6] : memref<24x192xf32, #tpu.memory_space<vmem>>, vector<24x192xf32>
    tpu.vector_store %arg5[%c0_5, %c0_6], %5 {strides = array<i32>} : memref<24x192xf32, #tpu.memory_space<vmem>>, vector<24x192xf32>,
    return
  }
  func.func @transform_0(%arg0: i32, %arg1: i32) -> (i32, i32) {
    %c0_i32 = arith.constant 0 : i32
    %c0_i32_0 = arith.constant 0 : i32
    return %arg0, %c0_i32 : i32, i32
  }
  func.func @transform_1(%arg0: i32, %arg1: i32) -> (i32, i32) {
    %c0_i32 = arith.constant 0 : i32
    %c0_i32_0 = arith.constant 0 : i32
    return %c0_i32, %arg1 : i32, i32
  }
  func.func @transform_2(%arg0: i32, %arg1: i32) -> (i32, i32) {
    %c0_i32 = arith.constant 0 : i32
    %c0_i32_0 = arith.constant 0 : i32
    return %c0_i32, %arg1 : i32, i32
  }
  func.func @transform_3(%arg0: i32, %arg1: i32) -> (i32, i32) {
    %c0_i32 = arith.constant 0 : i32
    return %arg0, %arg1 : i32, i32
  }
}

</mosaic_0001>

<bundles_post_ra>
// kernel: textdiae_forward.38
= control target key start
LH: loop header
LB: loop body
LE: loop exit
PB: predicated region body
PF: predicated region fallthrough
CT: control target
= control target key end

     0   :  { %s879_s12 = smov 0   ;;  %s881_s13 = smov 0   ;;  %s1052_s0 = inlined_call_operand.vmem [shape: bf16[32,192], index: 0, kind: input, shape index: {}]   ;;  %s1053_s1 = inlined_call_operand.vmem [shape: bf16[192,768], index: 1, kind: input, shape index: {}]   ;;  %s1054_s2 = inlined_call_operand.vmem [shape: f32[1,768], index: 2, kind: input, shape index: {}]   ;;  %s1055_s3 = inlined_call_operand.vmem [shape: f32[32,768], index: 3, kind: output, shape index: {}]  }
   0x1   :  { %s883_s14 = smov 0   ;;  %s885_s15 = smov 0  }
   0x2   :  { %s887_s16 = smov 0  }
   0x3 LB: > { %s22_s17 = sadd.s32 1, %s853_s15  ;;  %s674_s18 = sadd.s32 4294967295, %s857_s16   ;;  %s857_s16 = sphi %s887_s16, %s13_s16   ;;  %s853_s15 = sphi %s885_s15, %s1060_s15   ;;  %s849_s14 = sphi %s883_s14, %s1059_s14   ;;  %s845_s13 = sphi %s881_s13, %s1058_s13   ;;  %s841_s12 = sphi %s879_s12, %s1057_s12  }
   0x4   : > { %p23_p0 = scmp.ge.s32.totalorder %s22_s17, 6  ;;  %p65_p1 = scmp.ne.s32.totalorder %s845_s13, %s841_s12 }
   0x5   : > { %p66_p2 = scmp.eq.s32.totalorder %s857_s16, 0  ;;  %p123_p4 = scmp.eq.s32.totalorder %s674_s18, 5 }
   0x6   : > { %s1062_s17 = smov (%p23_p0, %s22_s17), 0  ;;  %s58_s20 = sadd.s32 1, %s845_s13 }
   0x7   : > { %p67_p3 = por %p66_p2, %p65_p1  ;;  %s55_s19 = ssub.s32 %s853_s15, %s1062_s17 }
   0x8   : > { %p56_p5 = scmp.eq.s32.totalorder %s55_s19, 0  ;;  %p914_p6 = por %p123_p4, %p65_p1 }
   0x9   : > { %p678_p7 = scmp.ge.s32.totalorder %s857_s16, 6 }
   0xa   : > { %s919_s22 = scalar_select %p56_p5, %s845_s13, %s58_s20  }
   0xb   : > { %155 = sbr.rel (%p678_p7) target bundleno = 45 (0x2d), region = 20 }
  0x10   : > { %158 = sbr.rel (!%p67_p3) target bundleno = 45 (0x2d), region = 24  ;;  %s160_s23 = sand.u32 (%p67_p3), 1, %s845_s13  }
  0x11   : > { %s679_s24 = sshll.u32 (%p67_p3), %s853_s15, 2  ;;  %s776_s25 = smul.u32 (%p67_p3), 96, %s160_s23 }
  0x12   : > { %s927_s28 = scalar_lea.vmem (%p67_p3), %s1053_s1, %s679_s24 }
  0x13   : > { %v181_v0 = vld [vmem:[%s927_s28] sm:$0xf] (%p67_p3)  ;;  %v183_v1 = vld [vmem:[%s927_s28 + $0x18] sm:$0xf] (%p67_p3)  ;;  %v185_v2 = vld [vmem:[%s927_s28 + $0x30] sm:$0xf] (%p67_p3) }
  0x14   : > { %s932_s29 = scalar_lea.vmem (%p67_p3), [#allocation2], %s776_s25  ;;  %v187_v3 = vld [vmem:[%s927_s28 + $0x48] sm:$0xf] (%p67_p3)  ;;  %v189_v4 = vld [vmem:[%s927_s28 + $0x60] sm:$0xf] (%p67_p3) }
  0x15   : > { %182 = vst [vmem:[%s932_s29] sm:$0xf] %v181_v0  ;;  %v191_v5 = vld [vmem:[%s927_s28 + $0x78] sm:$0xf]  ;;  %v193_v6 = vld [vmem:[%s927_s28 + $0x90] sm:$0xf] }
  0x16   : > { %184 = vst [vmem:[%s932_s29 + $0x4] sm:$0xf] %v183_v1  ;;  %v195_v7 = vld [vmem:[%s927_s28 + $0xa8] sm:$0xf]  ;;  %v197_v8 = vld [vmem:[%s927_s28 + $0xc0] sm:$0xf] }
  0x17   : > { %186 = vst [vmem:[%s932_s29 + $0x8] sm:$0xf] %v185_v2  ;;  %v199_v9 = vld [vmem:[%s927_s28 + $0xd8] sm:$0xf]  ;;  %v201_v10 = vld [vmem:[%s927_s28 + $0xf0] sm:$0xf] }
  0x18   : > { %188 = vst [vmem:[%s932_s29 + $0xc] sm:$0xf] %v187_v3  ;;  %v203_v11 = vld [vmem:[%s927_s28 + $0x108] sm:$0xf]  ;;  %v205_v12 = vld [vmem:[%s927_s28 + $0x120] sm:$0xf] }
  0x19   : > { %190 = vst [vmem:[%s932_s29 + $0x10] sm:$0xf] %v189_v4  ;;  %v207_v13 = vld [vmem:[%s927_s28 + $0x138] sm:$0xf]  ;;  %v209_v14 = vld [vmem:[%s927_s28 + $0x150] sm:$0xf] }
  0x1a   : > { %192 = vst [vmem:[%s932_s29 + $0x14] sm:$0xf] %v191_v5  ;;  %v211_v15 = vld [vmem:[%s927_s28 + $0x168] sm:$0xf]  ;;  %v213_v16 = vld [vmem:[%s927_s28 + $0x180] sm:$0xf] }
  0x1b   : > { %194 = vst [vmem:[%s932_s29 + $0x18] sm:$0xf] %v193_v6  ;;  %v215_v17 = vld [vmem:[%s927_s28 + $0x198] sm:$0xf]  ;;  %v217_v18 = vld [vmem:[%s927_s28 + $0x1b0] sm:$0xf] }
  0x1c   : > { %196 = vst [vmem:[%s932_s29 + $0x1c] sm:$0xf] %v195_v7  ;;  %v219_v19 = vld [vmem:[%s927_s28 + $0x1c8] sm:$0xf]  ;;  %v221_v20 = vld [vmem:[%s927_s28 + $0x1e0] sm:$0xf] }
  0x1d   : > { %198 = vst [vmem:[%s932_s29 + $0x20] sm:$0xf] %v197_v8  ;;  %v223_v21 = vld [vmem:[%s927_s28 + $0x1f8] sm:$0xf]  ;;  %v225_v22 = vld [vmem:[%s927_s28 + $0x210] sm:$0xf] }
  0x1e   : > { %200 = vst [vmem:[%s932_s29 + $0x24] sm:$0xf] %v199_v9  ;;  %v227_v23 = vld [vmem:[%s927_s28 + $0x228] sm:$0xf] }
  0x1f   : > { %202 = vst [vmem:[%s932_s29 + $0x28] sm:$0xf] %v201_v10 }
  0x20   : > { %204 = vst [vmem:[%s932_s29 + $0x2c] sm:$0xf] %v203_v11 }
  0x21   : > { %206 = vst [vmem:[%s932_s29 + $0x30] sm:$0xf] %v205_v12 }
  0x22   : > { %208 = vst [vmem:[%s932_s29 + $0x34] sm:$0xf] %v207_v13 }
  0x23   : > { %210 = vst [vmem:[%s932_s29 + $0x38] sm:$0xf] %v209_v14 }
  0x24   : > { %212 = vst [vmem:[%s932_s29 + $0x3c] sm:$0xf] %v211_v15 }
  0x25   : > { %214 = vst [vmem:[%s932_s29 + $0x40] sm:$0xf] %v213_v16 }
  0x26   : > { %216 = vst [vmem:[%s932_s29 + $0x44] sm:$0xf] %v215_v17 }
  0x27   : > { %218 = vst [vmem:[%s932_s29 + $0x48] sm:$0xf] %v217_v18 }
  0x28   : > { %220 = vst [vmem:[%s932_s29 + $0x4c] sm:$0xf] %v219_v19 }
  0x29   : > { %222 = vst [vmem:[%s932_s29 + $0x50] sm:$0xf] %v221_v20 }
  0x2a   : > { %224 = vst [vmem:[%s932_s29 + $0x54] sm:$0xf] %v223_v21 }
  0x2b   : > { %226 = vst [vmem:[%s932_s29 + $0x58] sm:$0xf] %v225_v22 }
  0x2c   : > { %228 = vst [vmem:[%s932_s29 + $0x5c] sm:$0xf] %v227_v23 }
  0x2d PF: > { %p680_p8 = scmp.ge.s32.totalorder %s857_s16, 1  ;;  %p305_p9 = scmp.lt.s32.totalorder %s857_s16, 7 }
  0x2f   : > { %p306_p10 = pnand %p680_p8, %p305_p9 }
  0x30   : > { %s312_s30 = sand.u32 (!%p306_p10), 1, %s841_s12   ;;  %p350_p11 = scmp.lt.s32.totalorder (!%p306_p10), %s849_s14, 5 }
  0x31   : > { %309 = sbr.rel (%p306_p10) target bundleno = 240 (0xf0), region = 69  ;;  %s681_s8 = sshll.u32 (!%p306_p10), %s312_s30, 5 }
  0x32   : > { %s777_s4 = smul.u32 (!%p306_p10), 96, %s312_s30  ;;  %s342_s9 = scalar_lea.vmem (!%p306_p10), [#allocation3], %s681_s8 }
  0x34   : > { %s984_s5 = scalar_lea.vmem (!%p306_p10), [#allocation2], %s777_s4 }
  0x36   : > { %v763_v24 = vld [vmem:[%s984_s5 + $0x38] sm:$0xff]  ;;  %v762_v26 = vld [vmem:[%s984_s5 + $0x30] sm:$0xff]  ;;  %v761_v28 = vld [vmem:[%s984_s5 + $0x28] sm:$0xff]  ;;  %vm477_vm0 = vcmask 523264   ;;  %s351_s18 = scalar_select %p350_p11, %s849_s14, 5 }
  0x37   : > { %v767_v25 = vld [vmem:[%s984_s5 + $0x58] sm:$0xff]  ;;  %484 = vmatpush.bf16.msra.mxu0 %v763_v24  ;;  %768 = vmatpush.bf16.msra.mxu2 %v763_v24  ;;  %v766_v27 = vld [vmem:[%s984_s5 + $0x50] sm:$0xff]  ;;  %v765_v29 = vld [vmem:[%s984_s5 + $0x48] sm:$0xff]  ;;  %s749_s12 = sshll.u32 (%p914_p6), %s849_s14, 3 }
  0x38   : > { %507 = vmatpush.bf16.msra.mxu1 %v767_v25  ;;  %v760_v30 = vld [vmem:[%s984_s5 + $0x20] sm:$0xff]  ;;  %v686_v33 = vld [vmem:[%s1052_s0 + $0x8] sm:$0xf0]  ;;  %v759_v35 = vld [vmem:[%s984_s5 + $0x18] sm:$0xff]  ;;  %s352_s7 = scalar_lea.vmem %s1054_s2, %s351_s18  ;;  %s537_s11 = scalar_lea.vmem (%p914_p6), %s1055_s3, %s749_s12 }
  0x39   : > { %v764_v31 = vld [vmem:[%s984_s5 + $0x40] sm:$0xff]  ;;  %v758_v36 = vld [vmem:[%s984_s5 + $0x10] sm:$0xff]  ;;  %v757_v37 = vld [vmem:[%s984_s5 + $0x8] sm:$0xff] }
  0x3a   : > { %v752_v32 = vld [vmem:[%s1052_s0 + $0x4] sm:$0xf]  ;;  %v684_v38 = vld [vmem:[%s1052_s0] sm:$0xf]  ;;  %v753_v40 = vld [vmem:[%s1052_s0 + $0x4] sm:$0xf0] }
  0x3b   : > { %485 = vmatpush.bf16.msra.mxu0 %v762_v26  ;;  %769 = vmatpush.bf16.msra.mxu2 %v762_v26  ;;  %v689_v34 = vor.u32 %v752_v32, %v686_v33  ;;  %v756_v39 = vld [vmem:[%s984_s5] sm:$0xff]  ;;  %v692_v41 = vld [vmem:[%s1052_s0 + $0x10] sm:$0xf]  ;;  %v755_v42 = vld [vmem:[%s1052_s0 + $0x14] sm:$0xf0]  ;;  %v685_v45 = vor.u32 %v753_v40, %v684_v38 }
  0x3c   : > { %508 = vmatpush.bf16.msra.mxu1 %v766_v27  ;;  %v754_v43 = vld [vmem:[%s1052_s0 + $0x14] sm:$0xf]  ;;  %v694_v44 = vld [vmem:[%s1052_s0 + $0x18] sm:$0xf0]  ;;  %v693_v46 = vor.u32 %v755_v42, %v692_v41  ;;  %v818_v50 = vld [vmem:[%s352_s7] ss:$0 sm:$0xff] }
  0x3d   : > { %v697_v47 = vor.u32 %v754_v43, %v694_v44 }
  0x3f   : > { %486 = vmatpush.bf16.msra.mxu0 %v761_v28  ;;  %770 = vmatpush.bf16.msra.mxu2 %v761_v28 }
  0x40   : > { %509 = vmatpush.bf16.msra.mxu1 %v765_v29 }
  0x43   : > { %487 = vmatpush.bf16.msra.mxu0 %v760_v30  ;;  %771 = vmatpush.bf16.msra.mxu2 %v760_v30 }
  0x44   : > { %510 = vmatpush.bf16.msra.mxu1 %v764_v31 }
  0x47   : > { %746 = vmatmul.msk.bf16.vlgmr.msra.gmra.mxu1 %vm477_vm0, %v689_v34  ;;  %488 = vmatpush.bf16.msra.mxu0 %v759_v35 }
  0x48   : > { %772 = vmatpush.bf16.msra.mxu2 %v759_v35 }
  0x4b   : > { %489 = vmatpush.bf16.msra.mxu0 %v758_v36 }
  0x4c   : > { %773 = vmatpush.bf16.msra.mxu2 %v758_v36 }
  0x4f   : > { %490 = vmatpush.bf16.msra.mxu0 %v757_v37 }
  0x50   : > { %774 = vmatpush.bf16.msra.mxu2 %v757_v37 }
  0x53   : > { %491 = vmatpush.bf16.msra.mxu0 %v756_v39 }
  0x54   : > { %775 = vmatpush.bf16.msra.mxu2 %v756_v39 }
  0x56   : > { %492 = vmatmul.bf16.vlgmr.msra.gmra.mxu0 %v685_v45 }
  0x57   : > { %497 = vmatmul.bf16.vlgmr.msra.gmra.mxu2 %v693_v46  ;;  %747 = vmatmul.msk.bf16.gmra.mxu1 %vm477_vm0, %v697_v47 }
  0xc4   : > { %v512_v48 = vpop.f32.mrf.mxu1 }
  0xcc   : > { %v514_v49 = vpop.f32.mrf.mxu1 }
  0xd3   : > { %v493_v51 = vpop.f32.mrf.mxu0 }
  0xd4   : > { %v494_v52 = vadd.f32 %v818_v50, %v493_v51  ;;  %v517_v54 = vpop.f32.mrf.mxu1 }
  0xd6   : > { %v513_v53 = vadd.f32 %v512_v48, %v494_v52 }
  0xd8   : > { %522 = vst [vmem:[%s342_s9] sm:$0xff] %v513_v53 }
  0xda   : > { %v498_v55 = vpop.f32.mrf.mxu2 }
  0xdb   : > { %v499_v56 = vadd.f32 %v818_v50, %v498_v55  ;;  %v495_v57 = vpop.f32.mrf.mxu0 }
  0xdc   : > { %v496_v58 = vadd.f32 %v818_v50, %v495_v57  ;;  %v519_v63 = vpop.f32.mrf.mxu1 }
  0xdd   : > { %v518_v59 = vadd.f32 %v517_v54, %v499_v56 }
  0xde   : > { %v515_v60 = vadd.f32 %v514_v49, %v496_v58 }
  0xdf   : > { %524 = vst [vmem:[%s342_s9 + $0x10] sm:$0xff] %v518_v59  ;;  %v572_v1 = vld [vmem:[%s342_s9] sm:$0xff] (%p914_p6) }
  0xe0   : > { %523 = vst [vmem:[%s342_s9 + $0x8] sm:$0xff] %v515_v60 }
  0xe1   : > { %573 = vst [vmem:[%s537_s11] sm:$0xff] (%p914_p6), %v572_v1 }
  0xe2   : > { %v500_v61 = vpop.f32.mrf.mxu2 }
  0xe3   : > { %v501_v62 = vadd.f32 %v818_v50, %v500_v61  ;;  %532 = sbr.rel (!%p914_p6) target bundleno = 240 (0xf0), region = 77 }
  0xe5   : > { %v520_v0 = vadd.f32 %v519_v63, %v501_v62 }
  0xe6   : > { %v576_v3 = vld [vmem:[%s342_s9 + $0x10] sm:$0xff] (%p914_p6) }
  0xe7   : > { %525 = vst [vmem:[%s342_s9 + $0x18] sm:$0xff] %v520_v0  ;;  %v574_v2 = vld [vmem:[%s342_s9 + $0x8] sm:$0xff] (%p914_p6) }
  0xe8   : > { %575 = vst [vmem:[%s537_s11 + $0x30] sm:$0xff] %v574_v2 }
  0xe9   : > { %577 = vst [vmem:[%s537_s11 + $0x60] sm:$0xff] %v576_v3 }
  0xee   : > { %v578_v4 = vld [vmem:[%s342_s9 + $0x18] sm:$0xff] }
  0xef   : > { %579 = vst [vmem:[%s537_s11 + $0x90] sm:$0xff] %v578_v4 }
  0xf0 PF: > { %s13_s16 = sadd.s32 1, %s857_s16   ;;  %s1057_s12 = smov %s845_s13 }
  0xf1   : > { %p10_p12 = scmp.ge.s32.totalorder %s13_s16, 8   ;;  %s1058_s13 = smov %s919_s22 }
  0xf2   : > { %s1059_s14 = smov %s853_s15  ;;  %s1060_s15 = smov %s1062_s17 }
  0xf3   :  { %12 = sbr.rel (!%p10_p12) target bundleno = 3 (0x3), region = 152 }

// kernel: textdiae_forward.39
= control target key start
LH: loop header
LB: loop body
LE: loop exit
PB: predicated region body
PF: predicated region fallthrough
CT: control target
= control target key end

     0   :  { %s1751_s18 = smov 0   ;;  %s1753_s19 = smov 0   ;;  %s2133_s0 = inlined_call_operand.vmem [shape: f32[8,768], index: 0, kind: input, shape index: {}]   ;;  %s2134_s1 = inlined_call_operand.vmem [shape: f32[1,768], index: 1, kind: input, shape index: {}]   ;;  %s2135_s2 = inlined_call_operand.vmem [shape: f32[1,768], index: 2, kind: input, shape index: {}]   ;;  %s2136_s3 = inlined_call_operand.vmem [shape: bf16[768,1536], index: 3, kind: input, shape index: {}]   ;;  %s2137_s4 = inlined_call_operand.vmem [shape: f32[1,1536], index: 4, kind: input, shape index: {}]   ;;  %s2138_s5 = inlined_call_operand.vmem [shape: bf16[8,1536], index: 5, kind: output, shape index: {}]  }
   0x1   :  { %s1755_s20 = smov 0   ;;  %s1757_s21 = smov 0  }
   0x2   :  { %s1759_s22 = smov 0  }
   0x3 LB: > { %s24_s23 = sadd.s32 1, %s1714_s21  ;;  %p109_p1 = scmp.ne.s32.totalorder %s1706_s19, %s1702_s18  ;;  %s1718_s22 = sphi %s1759_s22, %s15_s22   ;;  %s1714_s21 = sphi %s1757_s21, %s2142_s21   ;;  %s1710_s20 = sphi %s1755_s20, %s2141_s20   ;;  %s1706_s19 = sphi %s1753_s19, %s2140_s19   ;;  %s1702_s18 = sphi %s1751_s18, %s2139_s18  }
   0x4   : > { %p25_p0 = scmp.ge.s32.totalorder %s24_s23, 12  ;;  %p110_p2 = scmp.eq.s32.totalorder %s1718_s22, 0 }
   0x5   : > { %s102_s25 = sadd.s32 1, %s1706_s19  ;;  %p1386_p5 = scmp.ge.s32.totalorder %s1718_s22, 12 }
   0x6   : > { %s2144_s23 = smov (%p25_p0, %s24_s23), 0  ;;  %p111_p3 = por %p110_p2, %p109_p1 }
   0x7   : > { %s99_s24 = ssub.s32 %s1714_s21, %s2144_s23  ;;  %203 = sbr.rel (%p1386_p5) target bundleno = 112 (0x70), region = 28 }
   0x8   : > { %p100_p4 = scmp.eq.s32.totalorder %s99_s24, 0 }
   0xa   : > { %s1786_s26 = scalar_select %p100_p4, %s1706_s19, %s102_s25  }
   0xc   : > { %206 = sbr.rel (!%p111_p3) target bundleno = 112 (0x70), region = 32  ;;  %s208_s27 = sand.u32 (%p111_p3), 1, %s1706_s19  }
   0xd   : > { %s1387_s28 = sshll.u32 (%p111_p3), %s1714_s21, 2  ;;  %s1632_s29 = smul.u32 (%p111_p3), 384, %s208_s27 }
   0xe   : > { %s1794_s7 = scalar_lea.vmem (%p111_p3), %s2136_s3, %s1387_s28 }
   0xf   : > { %v229_v0 = vld [vmem:[%s1794_s7] sm:$0xf] (%p111_p3)  ;;  %v231_v1 = vld [vmem:[%s1794_s7 + $0x30] sm:$0xf] (%p111_p3)  ;;  %s1799_s8 = scalar_lea.vmem (%p111_p3), [#allocation2], %s1632_s29 }
  0x10   : > { %v233_v2 = vld [vmem:[%s1794_s7 + $0x60] sm:$0xf] (%p111_p3)  ;;  %230 = vst [vmem:[%s1799_s8] sm:$0xf] (%p111_p3), %v229_v0  ;;  %v235_v3 = vld [vmem:[%s1794_s7 + $0x90] sm:$0xf] (%p111_p3) }
  0x11   : > { %232 = vst [vmem:[%s1799_s8 + $0x4] sm:$0xf] %v231_v1  ;;  %v237_v4 = vld [vmem:[%s1794_s7 + $0xc0] sm:$0xf]  ;;  %v239_v5 = vld [vmem:[%s1794_s7 + $0xf0] sm:$0xf] }
  0x12   : > { %234 = vst [vmem:[%s1799_s8 + $0x8] sm:$0xf] %v233_v2  ;;  %v241_v6 = vld [vmem:[%s1794_s7 + $0x120] sm:$0xf]  ;;  %v243_v7 = vld [vmem:[%s1794_s7 + $0x150] sm:$0xf] }
  0x13   : > { %236 = vst [vmem:[%s1799_s8 + $0xc] sm:$0xf] %v235_v3  ;;  %v245_v8 = vld [vmem:[%s1794_s7 + $0x180] sm:$0xf]  ;;  %v247_v9 = vld [vmem:[%s1794_s7 + $0x1b0] sm:$0xf] }
  0x14   : > { %238 = vst [vmem:[%s1799_s8 + $0x10] sm:$0xf] %v237_v4  ;;  %v249_v10 = vld [vmem:[%s1794_s7 + $0x1e0] sm:$0xf]  ;;  %v251_v11 = vld [vmem:[%s1794_s7 + $0x210] sm:$0xf] }
  0x15   : > { %240 = vst [vmem:[%s1799_s8 + $0x14] sm:$0xf] %v239_v5  ;;  %v253_v12 = vld [vmem:[%s1794_s7 + $0x240] sm:$0xf]  ;;  %v255_v13 = vld [vmem:[%s1794_s7 + $0x270] sm:$0xf] }
  0x16   : > { %242 = vst [vmem:[%s1799_s8 + $0x18] sm:$0xf] %v241_v6  ;;  %v257_v14 = vld [vmem:[%s1794_s7 + $0x2a0] sm:$0xf]  ;;  %v259_v15 = vld [vmem:[%s1794_s7 + $0x2d0] sm:$0xf] }
  0x17   : > { %244 = vst [vmem:[%s1799_s8 + $0x1c] sm:$0xf] %v243_v7  ;;  %v261_v16 = vld [vmem:[%s1794_s7 + $0x300] sm:$0xf]  ;;  %v263_v17 = vld [vmem:[%s1794_s7 + $0x330] sm:$0xf] }
  0x18   : > { %246 = vst [vmem:[%s1799_s8 + $0x20] sm:$0xf] %v245_v8  ;;  %v265_v18 = vld [vmem:[%s1794_s7 + $0x360] sm:$0xf]  ;;  %v267_v19 = vld [vmem:[%s1794_s7 + $0x390] sm:$0xf] }
  0x19   : > { %248 = vst [vmem:[%s1799_s8 + $0x24] sm:$0xf] %v247_v9  ;;  %v269_v20 = vld [vmem:[%s1794_s7 + $0x3c0] sm:$0xf]  ;;  %v271_v21 = vld [vmem:[%s1794_s7 + $0x3f0] sm:$0xf] }
  0x1a   : > { %250 = vst [vmem:[%s1799_s8 + $0x28] sm:$0xf] %v249_v10  ;;  %v273_v22 = vld [vmem:[%s1794_s7 + $0x420] sm:$0xf]  ;;  %v275_v23 = vld [vmem:[%s1794_s7 + $0x450] sm:$0xf] }
  0x1b   : > { %252 = vst [vmem:[%s1799_s8 + $0x2c] sm:$0xf] %v251_v11  ;;  %v277_v24 = vld [vmem:[%s1794_s7 + $0x480] sm:$0xf]  ;;  %v279_v25 = vld [vmem:[%s1794_s7 + $0x4b0] sm:$0xf] }
  0x1c   : > { %254 = vst [vmem:[%s1799_s8 + $0x30] sm:$0xf] %v253_v12  ;;  %v281_v26 = vld [vmem:[%s1794_s7 + $0x4e0] sm:$0xf]  ;;  %v283_v27 = vld [vmem:[%s1794_s7 + $0x510] sm:$0xf] }
  0x1d   : > { %256 = vst [vmem:[%s1799_s8 + $0x34] sm:$0xf] %v255_v13  ;;  %v285_v28 = vld [vmem:[%s1794_s7 + $0x540] sm:$0xf]  ;;  %v287_v29 = vld [vmem:[%s1794_s7 + $0x570] sm:$0xf] }
  0x1e   : > { %258 = vst [vmem:[%s1799_s8 + $0x38] sm:$0xf] %v257_v14  ;;  %v289_v30 = vld [vmem:[%s1794_s7 + $0x5a0] sm:$0xf]  ;;  %v291_v31 = vld [vmem:[%s1794_s7 + $0x5d0] sm:$0xf] }
  0x1f   : > { %260 = vst [vmem:[%s1799_s8 + $0x3c] sm:$0xf] %v259_v15  ;;  %v293_v32 = vld [vmem:[%s1794_s7 + $0x600] sm:$0xf]  ;;  %v295_v33 = vld [vmem:[%s1794_s7 + $0x630] sm:$0xf] }
  0x20   : > { %262 = vst [vmem:[%s1799_s8 + $0x40] sm:$0xf] %v261_v16  ;;  %v297_v34 = vld [vmem:[%s1794_s7 + $0x660] sm:$0xf]  ;;  %v299_v35 = vld [vmem:[%s1794_s7 + $0x690] sm:$0xf] }
  0x21   : > { %264 = vst [vmem:[%s1799_s8 + $0x44] sm:$0xf] %v263_v17  ;;  %v301_v36 = vld [vmem:[%s1794_s7 + $0x6c0] sm:$0xf]  ;;  %v303_v37 = vld [vmem:[%s1794_s7 + $0x6f0] sm:$0xf] }
  0x22   : > { %266 = vst [vmem:[%s1799_s8 + $0x48] sm:$0xf] %v265_v18  ;;  %v305_v38 = vld [vmem:[%s1794_s7 + $0x720] sm:$0xf]  ;;  %v307_v39 = vld [vmem:[%s1794_s7 + $0x750] sm:$0xf] }
  0x23   : > { %268 = vst [vmem:[%s1799_s8 + $0x4c] sm:$0xf] %v267_v19  ;;  %v309_v40 = vld [vmem:[%s1794_s7 + $0x780] sm:$0xf]  ;;  %v311_v41 = vld [vmem:[%s1794_s7 + $0x7b0] sm:$0xf] }
  0x24   : > { %270 = vst [vmem:[%s1799_s8 + $0x50] sm:$0xf] %v269_v20  ;;  %v313_v42 = vld [vmem:[%s1794_s7 + $0x7e0] sm:$0xf]  ;;  %v315_v43 = vld [vmem:[%s1794_s7 + $0x810] sm:$0xf] }
  0x25   : > { %272 = vst [vmem:[%s1799_s8 + $0x54] sm:$0xf] %v271_v21  ;;  %v317_v44 = vld [vmem:[%s1794_s7 + $0x840] sm:$0xf]  ;;  %v319_v45 = vld [vmem:[%s1794_s7 + $0x870] sm:$0xf] }
  0x26   : > { %274 = vst [vmem:[%s1799_s8 + $0x58] sm:$0xf] %v273_v22  ;;  %v321_v46 = vld [vmem:[%s1794_s7 + $0x8a0] sm:$0xf]  ;;  %v323_v47 = vld [vmem:[%s1794_s7 + $0x8d0] sm:$0xf] }
  0x27   : > { %276 = vst [vmem:[%s1799_s8 + $0x5c] sm:$0xf] %v275_v23  ;;  %v325_v48 = vld [vmem:[%s1794_s7 + $0x900] sm:$0xf]  ;;  %v327_v49 = vld [vmem:[%s1794_s7 + $0x930] sm:$0xf] }
  0x28   : > { %278 = vst [vmem:[%s1799_s8 + $0x60] sm:$0xf] %v277_v24  ;;  %v329_v50 = vld [vmem:[%s1794_s7 + $0x960] sm:$0xf]  ;;  %v331_v51 = vld [vmem:[%s1794_s7 + $0x990] sm:$0xf] }
  0x29   : > { %280 = vst [vmem:[%s1799_s8 + $0x64] sm:$0xf] %v279_v25  ;;  %v333_v52 = vld [vmem:[%s1794_s7 + $0x9c0] sm:$0xf]  ;;  %v335_v53 = vld [vmem:[%s1794_s7 + $0x9f0] sm:$0xf] }
  0x2a   : > { %282 = vst [vmem:[%s1799_s8 + $0x68] sm:$0xf] %v281_v26  ;;  %v337_v54 = vld [vmem:[%s1794_s7 + $0xa20] sm:$0xf]  ;;  %v339_v55 = vld [vmem:[%s1794_s7 + $0xa50] sm:$0xf] }
  0x2b   : > { %284 = vst [vmem:[%s1799_s8 + $0x6c] sm:$0xf] %v283_v27  ;;  %v341_v56 = vld [vmem:[%s1794_s7 + $0xa80] sm:$0xf]  ;;  %v343_v57 = vld [vmem:[%s1794_s7 + $0xab0] sm:$0xf] }
  0x2c   : > { %286 = vst [vmem:[%s1799_s8 + $0x70] sm:$0xf] %v285_v28  ;;  %v345_v58 = vld [vmem:[%s1794_s7 + $0xae0] sm:$0xf]  ;;  %v347_v59 = vld [vmem:[%s1794_s7 + $0xb10] sm:$0xf] }
  0x2d   : > { %288 = vst [vmem:[%s1799_s8 + $0x74] sm:$0xf] %v287_v29  ;;  %v349_v60 = vld [vmem:[%s1794_s7 + $0xb40] sm:$0xf]  ;;  %v351_v61 = vld [vmem:[%s1794_s7 + $0xb70] sm:$0xf] }
  0x2e   : > { %290 = vst [vmem:[%s1799_s8 + $0x78] sm:$0xf] %v289_v30  ;;  %v353_v62 = vld [vmem:[%s1794_s7 + $0xba0] sm:$0xf]  ;;  %v355_v63 = vld [vmem:[%s1794_s7 + $0xbd0] sm:$0xf] }
  0x2f   : > { %292 = vst [vmem:[%s1799_s8 + $0x7c] sm:$0xf] %v291_v31  ;;  %v357_v0 = vld [vmem:[%s1794_s7 + $0xc00] sm:$0xf]  ;;  %v359_v1 = vld [vmem:[%s1794_s7 + $0xc30] sm:$0xf] }
  0x30   : > { %294 = vst [vmem:[%s1799_s8 + $0x80] sm:$0xf] %v293_v32  ;;  %v361_v2 = vld [vmem:[%s1794_s7 + $0xc60] sm:$0xf]  ;;  %v363_v3 = vld [vmem:[%s1794_s7 + $0xc90] sm:$0xf] }
  0x31   : > { %296 = vst [vmem:[%s1799_s8 + $0x84] sm:$0xf] %v295_v33  ;;  %v365_v4 = vld [vmem:[%s1794_s7 + $0xcc0] sm:$0xf]  ;;  %v367_v5 = vld [vmem:[%s1794_s7 + $0xcf0] sm:$0xf] }
  0x32   : > { %298 = vst [vmem:[%s1799_s8 + $0x88] sm:$0xf] %v297_v34  ;;  %v369_v6 = vld [vmem:[%s1794_s7 + $0xd20] sm:$0xf]  ;;  %v371_v7 = vld [vmem:[%s1794_s7 + $0xd50] sm:$0xf] }
  0x33   : > { %300 = vst [vmem:[%s1799_s8 + $0x8c] sm:$0xf] %v299_v35  ;;  %v373_v8 = vld [vmem:[%s1794_s7 + $0xd80] sm:$0xf]  ;;  %v375_v9 = vld [vmem:[%s1794_s7 + $0xdb0] sm:$0xf] }
  0x34   : > { %302 = vst [vmem:[%s1799_s8 + $0x90] sm:$0xf] %v301_v36  ;;  %v377_v10 = vld [vmem:[%s1794_s7 + $0xde0] sm:$0xf]  ;;  %v379_v11 = vld [vmem:[%s1794_s7 + $0xe10] sm:$0xf] }
  0x35   : > { %304 = vst [vmem:[%s1799_s8 + $0x94] sm:$0xf] %v303_v37  ;;  %v381_v12 = vld [vmem:[%s1794_s7 + $0xe40] sm:$0xf]  ;;  %v383_v13 = vld [vmem:[%s1794_s7 + $0xe70] sm:$0xf] }
  0x36   : > { %306 = vst [vmem:[%s1799_s8 + $0x98] sm:$0xf] %v305_v38  ;;  %v385_v14 = vld [vmem:[%s1794_s7 + $0xea0] sm:$0xf]  ;;  %v387_v15 = vld [vmem:[%s1794_s7 + $0xed0] sm:$0xf] }
  0x37   : > { %308 = vst [vmem:[%s1799_s8 + $0x9c] sm:$0xf] %v307_v39  ;;  %v389_v16 = vld [vmem:[%s1794_s7 + $0xf00] sm:$0xf]  ;;  %v391_v17 = vld [vmem:[%s1794_s7 + $0xf30] sm:$0xf] }
  0x38   : > { %310 = vst [vmem:[%s1799_s8 + $0xa0] sm:$0xf] %v309_v40  ;;  %v393_v18 = vld [vmem:[%s1794_s7 + $0xf60] sm:$0xf]  ;;  %v395_v19 = vld [vmem:[%s1794_s7 + $0xf90] sm:$0xf] }
  0x39   : > { %312 = vst [vmem:[%s1799_s8 + $0xa4] sm:$0xf] %v311_v41  ;;  %v397_v20 = vld [vmem:[%s1794_s7 + $0xfc0] sm:$0xf]  ;;  %v399_v21 = vld [vmem:[%s1794_s7 + $0xff0] sm:$0xf] }
  0x3a   : > { %314 = vst [vmem:[%s1799_s8 + $0xa8] sm:$0xf] %v313_v42  ;;  %v401_v22 = vld [vmem:[%s1794_s7 + $0x1020] sm:$0xf]  ;;  %v403_v23 = vld [vmem:[%s1794_s7 + $0x1050] sm:$0xf] }
  0x3b   : > { %316 = vst [vmem:[%s1799_s8 + $0xac] sm:$0xf] %v315_v43  ;;  %v405_v24 = vld [vmem:[%s1794_s7 + $0x1080] sm:$0xf]  ;;  %v407_v25 = vld [vmem:[%s1794_s7 + $0x10b0] sm:$0xf] }
  0x3c   : > { %318 = vst [vmem:[%s1799_s8 + $0xb0] sm:$0xf] %v317_v44  ;;  %v409_v26 = vld [vmem:[%s1794_s7 + $0x10e0] sm:$0xf]  ;;  %v411_v27 = vld [vmem:[%s1794_s7 + $0x1110] sm:$0xf] }
  0x3d   : > { %320 = vst [vmem:[%s1799_s8 + $0xb4] sm:$0xf] %v319_v45  ;;  %v413_v28 = vld [vmem:[%s1794_s7 + $0x1140] sm:$0xf]  ;;  %v415_v29 = vld [vmem:[%s1794_s7 + $0x1170] sm:$0xf] }
  0x3e   : > { %322 = vst [vmem:[%s1799_s8 + $0xb8] sm:$0xf] %v321_v46  ;;  %v417_v30 = vld [vmem:[%s1794_s7 + $0x11a0] sm:$0xf]  ;;  %v419_v31 = vld [vmem:[%s1794_s7 + $0x11d0] sm:$0xf] }
  0x3f   : > { %324 = vst [vmem:[%s1799_s8 + $0xbc] sm:$0xf] %v323_v47 }
  0x40   : > { %326 = vst [vmem:[%s1799_s8 + $0xc0] sm:$0xf] %v325_v48 }
  0x41   : > { %328 = vst [vmem:[%s1799_s8 + $0xc4] sm:$0xf] %v327_v49 }
  0x42   : > { %330 = vst [vmem:[%s1799_s8 + $0xc8] sm:$0xf] %v329_v50 }
  0x43   : > { %332 = vst [vmem:[%s1799_s8 + $0xcc] sm:$0xf] %v331_v51 }
  0x44   : > { %334 = vst [vmem:[%s1799_s8 + $0xd0] sm:$0xf] %v333_v52 }
  0x45   : > { %336 = vst [vmem:[%s1799_s8 + $0xd4] sm:$0xf] %v335_v53 }
  0x46   : > { %338 = vst [vmem:[%s1799_s8 + $0xd8] sm:$0xf] %v337_v54 }
  0x47   : > { %340 = vst [vmem:[%s1799_s8 + $0xdc] sm:$0xf] %v339_v55 }
  0x48   : > { %342 = vst [vmem:[%s1799_s8 + $0xe0] sm:$0xf] %v341_v56 }
  0x49   : > { %344 = vst [vmem:[%s1799_s8 + $0xe4] sm:$0xf] %v343_v57 }
  0x4a   : > { %346 = vst [vmem:[%s1799_s8 + $0xe8] sm:$0xf] %v345_v58 }
  0x4b   : > { %348 = vst [vmem:[%s1799_s8 + $0xec] sm:$0xf] %v347_v59 }
  0x4c   : > { %350 = vst [vmem:[%s1799_s8 + $0xf0] sm:$0xf] %v349_v60 }
  0x4d   : > { %352 = vst [vmem:[%s1799_s8 + $0xf4] sm:$0xf] %v351_v61 }
  0x4e   : > { %354 = vst [vmem:[%s1799_s8 + $0xf8] sm:$0xf] %v353_v62 }
  0x4f   : > { %356 = vst [vmem:[%s1799_s8 + $0xfc] sm:$0xf] %v355_v63 }
  0x50   : > { %358 = vst [vmem:[%s1799_s8 + $0x100] sm:$0xf] %v357_v0 }
  0x51   : > { %360 = vst [vmem:[%s1799_s8 + $0x104] sm:$0xf] %v359_v1 }
  0x52   : > { %362 = vst [vmem:[%s1799_s8 + $0x108] sm:$0xf] %v361_v2 }
  0x53   : > { %364 = vst [vmem:[%s1799_s8 + $0x10c] sm:$0xf] %v363_v3 }
  0x54   : > { %366 = vst [vmem:[%s1799_s8 + $0x110] sm:$0xf] %v365_v4 }
  0x55   : > { %368 = vst [vmem:[%s1799_s8 + $0x114] sm:$0xf] %v367_v5 }
  0x56   : > { %370 = vst [vmem:[%s1799_s8 + $0x118] sm:$0xf] %v369_v6 }
  0x57   : > { %372 = vst [vmem:[%s1799_s8 + $0x11c] sm:$0xf] %v371_v7 }
  0x58   : > { %374 = vst [vmem:[%s1799_s8 + $0x120] sm:$0xf] %v373_v8 }
  0x59   : > { %376 = vst [vmem:[%s1799_s8 + $0x124] sm:$0xf] %v375_v9 }
  0x5a   : > { %378 = vst [vmem:[%s1799_s8 + $0x128] sm:$0xf] %v377_v10 }
  0x5b   : > { %380 = vst [vmem:[%s1799_s8 + $0x12c] sm:$0xf] %v379_v11 }
  0x5c   : > { %382 = vst [vmem:[%s1799_s8 + $0x130] sm:$0xf] %v381_v12 }
  0x5d   : > { %384 = vst [vmem:[%s1799_s8 + $0x134] sm:$0xf] %v383_v13 }
  0x5e   : > { %386 = vst [vmem:[%s1799_s8 + $0x138] sm:$0xf] %v385_v14 }
  0x5f   : > { %388 = vst [vmem:[%s1799_s8 + $0x13c] sm:$0xf] %v387_v15 }
  0x60   : > { %390 = vst [vmem:[%s1799_s8 + $0x140] sm:$0xf] %v389_v16 }
  0x61   : > { %392 = vst [vmem:[%s1799_s8 + $0x144] sm:$0xf] %v391_v17 }
  0x62   : > { %394 = vst [vmem:[%s1799_s8 + $0x148] sm:$0xf] %v393_v18 }
  0x63   : > { %396 = vst [vmem:[%s1799_s8 + $0x14c] sm:$0xf] %v395_v19 }
  0x64   : > { %398 = vst [vmem:[%s1799_s8 + $0x150] sm:$0xf] %v397_v20 }
  0x65   : > { %400 = vst [vmem:[%s1799_s8 + $0x154] sm:$0xf] %v399_v21 }
  0x66   : > { %402 = vst [vmem:[%s1799_s8 + $0x158] sm:$0xf] %v401_v22 }
  0x67   : > { %404 = vst [vmem:[%s1799_s8 + $0x15c] sm:$0xf] %v403_v23 }
  0x68   : > { %406 = vst [vmem:[%s1799_s8 + $0x160] sm:$0xf] %v405_v24 }
  0x69   : > { %408 = vst [vmem:[%s1799_s8 + $0x164] sm:$0xf] %v407_v25 }
  0x6a   : > { %410 = vst [vmem:[%s1799_s8 + $0x168] sm:$0xf] %v409_v26 }
  0x6b   : > { %412 = vst [vmem:[%s1799_s8 + $0x16c] sm:$0xf] %v411_v27 }
  0x6c   : > { %414 = vst [vmem:[%s1799_s8 + $0x170] sm:$0xf] %v413_v28 }
  0x6d   : > { %416 = vst [vmem:[%s1799_s8 + $0x174] sm:$0xf] %v415_v29 }
  0x6e   : > { %418 = vst [vmem:[%s1799_s8 + $0x178] sm:$0xf] %v417_v30 }
  0x6f   : > { %420 = vst [vmem:[%s1799_s8 + $0x17c] sm:$0xf] %v419_v31 }
  0x70 PF: > { %p1388_p6 = scmp.ge.s32.totalorder %s1718_s22, 1  ;;  %p641_p7 = scmp.lt.s32.totalorder %s1718_s22, 13 }
  0x72   : > { %p642_p8 = pnand %p1388_p6, %p641_p7 }
  0x73   : > { %s648_s28 = sand.u32 (!%p642_p8), 1, %s1702_s18   ;;  %p691_p9 = scmp.lt.s32.totalorder (!%p642_p8), %s1710_s20, 11 }
  0x74   : > { %645 = sbr.rel (%p642_p8) target bundleno = 560 (0x230), region = 77 }
  0x75   : > { %s1633_s29 = smul.u32 (!%p642_p8), 384, %s648_s28 }
  0x77   : > { %s2011_s30 = scalar_lea.vmem (!%p642_p8), [#allocation2], %s1633_s29 }
  0x79   : > { %v702_v32 = vld [vmem:[%s2133_s0] sm:$0xff]  ;;  %v703_v33 = vld [vmem:[%s2133_s0 + $0x8] sm:$0xff]  ;;  %v704_v34 = vld [vmem:[%s2133_s0 + $0x10] sm:$0xff]  ;;  %v1720_v43 = vmov 768.0   ;;  %s2146_s20 = smov (!%p691_p9, %s1710_s20), 11 }
  0x7a   : > { %v708_v35 = vadd.f32 %v703_v33, %v702_v32  ;;  %v705_v36 = vld [vmem:[%s2133_s0 + $0x18] sm:$0xff]  ;;  %v706_v38 = vld [vmem:[%s2133_s0 + $0x20] sm:$0xff]  ;;  %v707_v40 = vld [vmem:[%s2133_s0 + $0x28] sm:$0xff]  ;;  %1676 = vrcp.f32 %v1720_v43  ;;  %s693_s7 = scalar_lea.vmem %s2137_s4, %s2146_s20  ;;  %s1389_s14 = sshll.u32 %s2146_s20, 2 }
  0x7b   : > { %v1591_v46 = vld [vmem:[%s2011_s30 + $0x38] sm:$0xff]  ;;  %v1590_v49 = vld [vmem:[%s2011_s30 + $0x30] sm:$0xff]  ;;  %v1589_v52 = vld [vmem:[%s2011_s30 + $0x28] sm:$0xff]  ;;  %s701_s17 = scalar_lea.vmem %s2138_s5, %s1389_s14 }
  0x7c   : > { %v709_v37 = vadd.f32 %v708_v35, %v704_v34  ;;  %v1599_v47 = vld [vmem:[%s2011_s30 + $0x78] sm:$0xff]  ;;  %1194 = vmatpush.bf16.msra.mxu0 %v1591_v46  ;;  %v1598_v50 = vld [vmem:[%s2011_s30 + $0x70] sm:$0xff]  ;;  %v1597_v53 = vld [vmem:[%s2011_s30 + $0x68] sm:$0xff] }
  0x7d   : > { %1207 = vmatpush.bf16.msra.mxu1 %v1599_v47  ;;  %v1588_v55 = vld [vmem:[%s2011_s30 + $0x20] sm:$0xff]  ;;  %v1607_v13 = vld [vmem:[%s2011_s30 + $0xb8] sm:$0xff]  ;;  %v1606_v17 = vld [vmem:[%s2011_s30 + $0xb0] sm:$0xff] }
  0x7e   : > { %v710_v39 = vadd.f32 %v709_v37, %v705_v36  ;;  %v1596_v56 = vld [vmem:[%s2011_s30 + $0x60] sm:$0xff]  ;;  %v1615_v14 = vld [vmem:[%s2011_s30 + $0xf8] sm:$0xff]  ;;  %1220 = vmatpush.bf16.msra.mxu2 %v1607_v13  ;;  %v1614_v18 = vld [vmem:[%s2011_s30 + $0xf0] sm:$0xff] }
  0x7f   : > { %1233 = vmatpush.bf16.msra.mxu3 %v1615_v14  ;;  %v1587_v15 = vld [vmem:[%s2011_s30 + $0x18] sm:$0xff]  ;;  %v1586_v19 = vld [vmem:[%s2011_s30 + $0x10] sm:$0xff]  ;;  %v1605_v21 = vld [vmem:[%s2011_s30 + $0xa8] sm:$0xff] }
  0x80   : > { %v711_v41 = vadd.f32 %v710_v39, %v706_v38  ;;  %v1677_v44 = vpop.eup %1676  ;;  %1195 = vmatpush.bf16.msra.mxu0 %v1590_v49  ;;  %v1595_v16 = vld [vmem:[%s2011_s30 + $0x58] sm:$0xff]  ;;  %v1594_v20 = vld [vmem:[%s2011_s30 + $0x50] sm:$0xff]  ;;  %v1613_v22 = vld [vmem:[%s2011_s30 + $0xe8] sm:$0xff] }
  0x81   : > { %v716_v45 = vmul.f32 768.0, %v1677_v44  ;;  %1208 = vmatpush.bf16.msra.mxu1 %v1598_v50  ;;  %vm720_vm0 = vweird.f32 %v1677_v44  ;;  %v1585_v23 = vld [vmem:[%s2011_s30 + $0x8] sm:$0xff]  ;;  %v1604_v25 = vld [vmem:[%s2011_s30 + $0xa0] sm:$0xff]  ;;  %v1603_v29 = vld [vmem:[%s2011_s30 + $0x98] sm:$0xff] }
  0x82   : > { %v712_v42 = vadd.f32 %v711_v41, %v707_v40  ;;  %1221 = vmatpush.bf16.msra.mxu2 %v1606_v17  ;;  %v1593_v24 = vld [vmem:[%s2011_s30 + $0x48] sm:$0xff]  ;;  %v1612_v26 = vld [vmem:[%s2011_s30 + $0xe0] sm:$0xff]  ;;  %v1611_v30 = vld [vmem:[%s2011_s30 + $0xd8] sm:$0xff] }
  0x83   : > { %v717_v48 = vsub.f32 1.0, %v716_v45  ;;  %1234 = vmatpush.bf16.msra.mxu3 %v1614_v18  ;;  %v1584_v27 = vld [vmem:[%s2011_s30] sm:$0xff]  ;;  %v1623_v31 = vld [vmem:[%s2011_s30 + $0x138] sm:$0xff]  ;;  %v1622_v35 = vld [vmem:[%s2011_s30 + $0x130] sm:$0xff] }
  0x84   : > { %713 = vadd.xlane.f32.xlu0 %v712_v42  ;;  %1196 = vmatpush.bf16.msra.mxu0 %v1589_v52  ;;  %v1592_v28 = vld [vmem:[%s2011_s30 + $0x40] sm:$0xff]  ;;  %v1601_v37 = vld [vmem:[%s2011_s30 + $0x88] sm:$0xff]  ;;  %v1619_v45 = vld [vmem:[%s2011_s30 + $0x118] sm:$0xff] }
  0x85   : > { %v718_v51 = vmul.f32 %v1677_v44, %v717_v48  ;;  %1209 = vmatpush.bf16.msra.mxu1 %v1597_v53  ;;  %v1621_v39 = vld [vmem:[%s2011_s30 + $0x128] sm:$0xff]  ;;  %v1600_v41 = vld [vmem:[%s2011_s30 + $0x80] sm:$0xff]  ;;  %v1627_v46 = vld [vmem:[%s2011_s30 + $0x158] sm:$0xff] }
  0x86   : > { %1222 = vmatpush.bf16.msra.mxu2 %v1605_v21  ;;  %v1608_v42 = vld [vmem:[%s2011_s30 + $0xc0] sm:$0xff]  ;;  %v1618_v49 = vld [vmem:[%s2011_s30 + $0x110] sm:$0xff]  ;;  %v1617_v52 = vld [vmem:[%s2011_s30 + $0x108] sm:$0xff] }
  0x87   : > { %v719_v54 = vadd.f32 %v1677_v44, %v718_v51  ;;  %1235 = vmatpush.bf16.msra.mxu3 %v1613_v22  ;;  %v1620_v43 = vld [vmem:[%s2011_s30 + $0x120] sm:$0xff]  ;;  %v1626_v50 = vld [vmem:[%s2011_s30 + $0x150] sm:$0xff]  ;;  %v1625_v53 = vld [vmem:[%s2011_s30 + $0x148] sm:$0xff] }
  0x88   : > { %1197 = vmatpush.bf16.msra.mxu0 %v1588_v55  ;;  %v1624_v55 = vld [vmem:[%s2011_s30 + $0x140] sm:$0xff] }
  0x89   : > { %v2021_v57 = vsel %vm720_vm0, %v1677_v44, %v719_v54  ;;  %1210 = vmatpush.bf16.msra.mxu1 %v1596_v56  ;;  %v1628_v44 = vld [vmem:[%s2011_s30 + $0x160] sm:$0xff] }
  0x8a   : > { %1223 = vmatpush.bf16.msra.mxu2 %v1604_v25  ;;  %v1616_v54 = vld [vmem:[%s2011_s30 + $0x100] sm:$0xff] }
  0x8b   : > { %1236 = vmatpush.bf16.msra.mxu3 %v1612_v26 }
  0x8c   : > { %1198 = vmatpush.bf16.msra.mxu0 %v1587_v15 }
  0x8d   : > { %1211 = vmatpush.bf16.msra.mxu1 %v1595_v16 }
  0x8e   : > { %1224 = vmatpush.bf16.msra.mxu2 %v1603_v29 }
  0x8f   : > { %1237 = vmatpush.bf16.msra.mxu3 %v1611_v30 }
  0x90   : > { %1199 = vmatpush.bf16.msra.mxu0 %v1586_v19 }
  0x91   : > { %1212 = vmatpush.bf16.msra.mxu1 %v1594_v20 }
  0x94   : > { %1200 = vmatpush.bf16.msra.mxu0 %v1585_v23 }
  0x95   : > { %1213 = vmatpush.bf16.msra.mxu1 %v1593_v24 }
  0x98   : > { %1201 = vmatpush.bf16.msra.mxu0 %v1584_v27 }
  0x99   : > { %1214 = vmatpush.bf16.msra.mxu1 %v1592_v28 }
  0x9c   : > { %1246 = vmatpush.bf16.msrb.mxu0 %v1623_v31 }
  0xa0   : > { %1247 = vmatpush.bf16.msrb.mxu0 %v1622_v35 }
  0xa4   : > { %1248 = vmatpush.bf16.msrb.mxu0 %v1621_v39 }
  0xa8   : > { %1249 = vmatpush.bf16.msrb.mxu0 %v1620_v43 }
  0xac   : > { %1250 = vmatpush.bf16.msrb.mxu0 %v1619_v45 }
  0xb0   : > { %1251 = vmatpush.bf16.msrb.mxu0 %v1618_v49 }
  0xb4   : > { %1252 = vmatpush.bf16.msrb.mxu0 %v1617_v52 }
  0xb8   : > { %1253 = vmatpush.bf16.msrb.mxu0 %v1616_v54 }
  0xf7   : > { %v714_v58 = vpop.xlane.xlu0 %713 }
  0xf8   : > { %v722_v59 = vmul.f32 %v2021_v57, %v714_v58 }
  0xfa   : > { %v2024_v60 = vsub.f32 %v702_v32, %v722_v59  ;;  %v2026_v61 = vsub.f32 %v703_v33, %v722_v59  ;;  %v2028_v62 = vsub.f32 %v704_v34, %v722_v59  ;;  %v2030_v63 = vsub.f32 %v705_v36, %v722_v59  ;;  %v1631_v32 = vld [vmem:[%s2011_s30 + $0x178] sm:$0xff]  ;;  %v1602_v33 = vld [vmem:[%s2011_s30 + $0x90] sm:$0xff] }
  0xfb   : > { %v2036_v2 = vsub.f32 %v706_v38, %v722_v59  ;;  %v2040_v5 = vsub.f32 %v707_v40, %v722_v59  ;;  %1259 = vmatpush.bf16.msrb.mxu1 %v1631_v32  ;;  %v1610_v34 = vld [vmem:[%s2011_s30 + $0xd0] sm:$0xff]  ;;  %1225 = vmatpush.bf16.msra.mxu2 %v1602_v33  ;;  %v1609_v38 = vld [vmem:[%s2011_s30 + $0xc8] sm:$0xff] }
  0xfc   : > { %v729_v0 = vmul.f32 %v2024_v60, %v2024_v60  ;;  %v730_v1 = vmul.f32 %v2026_v61, %v2026_v61  ;;  %v731_v3 = vmul.f32 %v2028_v62, %v2028_v62  ;;  %v732_v6 = vmul.f32 %v2030_v63, %v2030_v63  ;;  %v1630_v36 = vld [vmem:[%s2011_s30 + $0x170] sm:$0xff]  ;;  %1238 = vmatpush.bf16.msra.mxu3 %v1610_v34  ;;  %v1629_v40 = vld [vmem:[%s2011_s30 + $0x168] sm:$0xff] }
  0xfd   : > { %v733_v8 = vmul.f32 %v2036_v2, %v2036_v2  ;;  %v734_v10 = vmul.f32 %v2040_v5, %v2040_v5 }
  0xfe   : > { %v735_v4 = vadd.f32 %v730_v1, %v729_v0  ;;  %v760_v0 = vld [vmem:[%s2134_s1] sm:$0x3f] }
  0xff   : > { %1260 = vmatpush.bf16.msrb.mxu1 %v1630_v36  ;;  %1226 = vmatpush.bf16.msra.mxu2 %v1601_v37 }
 0x100   : > { %v736_v7 = vadd.f32 %v735_v4, %v731_v3  ;;  %1239 = vmatpush.bf16.msra.mxu3 %v1609_v38  ;;  %v780_v3 = vld [vmem:[%s2135_s2] sm:$0x3f] }
 0x101   : > { %v784_v13 = vperm.slane %v780_v3, 2  ;;  %v785_v14 = vperm.slane %v780_v3, 3  ;;  %v786_v32 = vperm.slane %v780_v3, 4  ;;  %v787_v34 = vperm.slane %v780_v3, 5 }
 0x102   : > { %v737_v9 = vadd.f32 %v736_v7, %v732_v6  ;;  %v762_v6 = vperm.slane %v760_v0, 0  ;;  %v782_v7 = vperm.slane %v780_v3, 0 }
 0x103   : > { %1261 = vmatpush.bf16.msrb.mxu1 %v1629_v40  ;;  %1227 = vmatpush.bf16.msra.mxu2 %v1600_v41 }
 0x104   : > { %v738_v11 = vadd.f32 %v737_v9, %v733_v8  ;;  %1240 = vmatpush.bf16.msra.mxu3 %v1608_v42  ;;  %v763_v8 = vperm.slane %v760_v0, 1  ;;  %v764_v9 = vperm.slane %v760_v0, 2 }
 0x106   : > { %v739_v12 = vadd.f32 %v738_v11, %v734_v10  ;;  %v765_v10 = vperm.slane %v760_v0, 3 }
 0x107   : > { %1262 = vmatpush.bf16.msrb.mxu1 %v1628_v44 }
 0x108   : > { %740 = vadd.xlane.f32.xlu0 %v739_v12  ;;  %v783_v12 = vperm.slane %v780_v3, 1 }
 0x10b   : > { %1263 = vmatpush.bf16.msrb.mxu1 %v1627_v46 }
 0x10f   : > { %1264 = vmatpush.bf16.msrb.mxu1 %v1626_v50 }
 0x113   : > { %1265 = vmatpush.bf16.msrb.mxu1 %v1625_v53 }
 0x117   : > { %1266 = vmatpush.bf16.msrb.mxu1 %v1624_v55 }
 0x17b   : > { %v741_v47 = vpop.xlane.xlu0 %740 }
 0x17c   : > { %v742_v48 = vmul.f32 %v741_v47, %v2021_v57 }
 0x17e   : > { %v743_v51 = vadd.f32 1e-05, %v742_v48 }
 0x180   : > { %1678 = vrsqrt.f32 %v743_v51  ;;  %vm750_vm2 = vweird.f32 %v743_v51 }
 0x186   : > { %v1679_v56 = vpop.eup %1678 }
 0x187   : > { %v745_v58 = vmul.f32 %v1679_v56, %v743_v51  ;;  %vm751_vm1 = vweird.f32 %v1679_v56 }
 0x188   : > { %vm752_vm3 = vmor %vm750_vm2, %vm751_vm1 }
 0x189   : > { %v746_v59 = vmul.f32 %v1679_v56, %v745_v58 }
 0x18b   : > { %v747_v57 = vmul.f32 0.5, %v746_v59 }
 0x18d   : > { %v748_v1 = vsub.f32 1.5, %v747_v57 }
 0x18f   : > { %v749_v4 = vmul.f32 %v1679_v56, %v748_v1 }
 0x191   : > { %v753_v11 = vsel %vm752_vm3, %v1679_v56, %v749_v4 }
 0x192   : > { %v754_v15 = vmul.f32 %v753_v11, %v2024_v60  ;;  %v755_v16 = vmul.f32 %v753_v11, %v2026_v61  ;;  %v756_v17 = vmul.f32 %v753_v11, %v2028_v62  ;;  %v757_v18 = vmul.f32 %v753_v11, %v2030_v63 }
 0x193   : > { %v758_v60 = vmul.f32 %v753_v11, %v2036_v2  ;;  %v766_v61 = vperm.slane %v760_v0, 4  ;;  %v759_v62 = vmul.f32 %v753_v11, %v2040_v5  ;;  %v767_v63 = vperm.slane %v760_v0, 5  ;;  %v1675_v2 = vld [vmem:[%s693_s7] ss:$0 sm:$0xff] }
 0x194   : > { %v774_v19 = vmul.f32 %v762_v6, %v754_v15  ;;  %v775_v20 = vmul.f32 %v763_v8, %v755_v16  ;;  %v776_v21 = vmul.f32 %v764_v9, %v756_v17  ;;  %v777_v22 = vmul.f32 %v765_v10, %v757_v18 }
 0x195   : > { %v778_v31 = vmul.f32 %v766_v61, %v758_v60  ;;  %v779_v33 = vmul.f32 %v767_v63, %v759_v62 }
 0x196   : > { %v794_v23 = vadd.f32 %v782_v7, %v774_v19  ;;  %v795_v24 = vadd.f32 %v783_v12, %v775_v20  ;;  %v796_v25 = vadd.f32 %v784_v13, %v776_v21  ;;  %v797_v26 = vadd.f32 %v785_v14, %v777_v22 }
 0x197   : > { %v798_v35 = vadd.f32 %v786_v32, %v778_v31  ;;  %v799_v36 = vadd.f32 %v787_v34, %v779_v33 }
 0x198   : > { %v800_v27 = vpack.c.bf16 %v794_v23, %v794_v23  ;;  %v801_v28 = vpack.c.bf16 %v795_v24, %v795_v24  ;;  %v802_v29 = vpack.c.bf16 %v796_v25, %v796_v25  ;;  %v803_v30 = vpack.c.bf16 %v797_v26, %v797_v26 }
 0x199   : > { %v804_v37 = vpack.c.bf16 %v798_v35, %v798_v35  ;;  %v805_v38 = vpack.c.bf16 %v799_v36, %v799_v36 }
 0x19a   : > { %1202 = vmatmul.bf16.vlgmr.msra.gmra.mxu0 %v800_v27  ;;  %1215 = vmatmul.bf16.vlgmr.msra.gmra.mxu1 %v801_v28 }
 0x19b   : > { %1228 = vmatmul.bf16.vlgmr.msra.gmra.mxu2 %v802_v29  ;;  %1241 = vmatmul.bf16.vlgmr.msra.gmra.mxu3 %v803_v30 }
 0x1aa   : > { %1254 = vmatmul.bf16.vlgmr.msrb.gmra.mxu0 %v804_v37  ;;  %1267 = vmatmul.bf16.vlgmr.msrb.gmra.mxu1 %v805_v38 }
 0x217   : > { %v1203_v39 = vpop.f32.mrf.mxu0  ;;  %v1216_v40 = vpop.f32.mrf.mxu1 }
 0x218   : > { %v1204_v5 = vadd.f32 %v1675_v2, %v1203_v39 }
 0x21a   : > { %v1217_v45 = vadd.f32 %v1216_v40, %v1204_v5 }
 0x21e   : > { %v1229_v41 = vpop.f32.mrf.mxu2  ;;  %v1242_v42 = vpop.f32.mrf.mxu3 }
 0x21f   : > { %v1205_v43 = vpop.f32.mrf.mxu0  ;;  %v1218_v44 = vpop.f32.mrf.mxu1  ;;  %v1230_v46 = vadd.f32 %v1229_v41, %v1217_v45 }
 0x221   : > { %v1243_v47 = vadd.f32 %v1242_v42, %v1230_v46 }
 0x226   : > { %v1231_v48 = vpop.f32.mrf.mxu2  ;;  %v1244_v49 = vpop.f32.mrf.mxu3 }
 0x227   : > { %v1255_v50 = vpop.f32.mrf.mxu0  ;;  %v1268_v51 = vpop.f32.mrf.mxu1 }
 0x228   : > { %v1256_v52 = vadd.f32 %v1255_v50, %v1243_v47 }
 0x22a   : > { %v1269_v53 = vadd.f32 %v1268_v51, %v1256_v52 }
 0x22c   : > { %v1272_v54 = vpack.c.bf16 %v1269_v53, %v1269_v53 }
 0x22e   : > { %1273 = vst [vmem:[%s701_s17] sm:$0xf] %v1272_v54 }
 0x22f   : > { %v1257_v55 = vpop.f32.mrf.mxu0  ;;  %v1270_v56 = vpop.f32.mrf.mxu1 }
 0x230 PF: > { %s15_s22 = sadd.s32 1, %s1718_s22   ;;  %s2139_s18 = smov %s1706_s19 }
 0x231   : > { %p12_p10 = scmp.ge.s32.totalorder %s15_s22, 14   ;;  %s2140_s19 = smov %s1786_s26 }
 0x232   : > { %s2141_s20 = smov %s1714_s21  ;;  %s2142_s21 = smov %s2144_s23 }
 0x233   :  { %14 = sbr.rel (!%p12_p10) target bundleno = 3 (0x3), region = 122 }

// kernel: textdiae_forward.40
= control target key start
LH: loop header
LB: loop body
LE: loop exit
PB: predicated region body
PF: predicated region fallthrough
CT: control target
= control target key end

     0   :  { %s863_s12 = smov 0   ;;  %s1010_s0 = inlined_call_operand.vmem [shape: bf16[2,8,4,64], index: 0, kind: input, shape index: {}]   ;;  %s1011_s1 = inlined_call_operand.vmem [shape: bf16[2,8,4,64], index: 1, kind: input, shape index: {}]   ;;  %s1012_s2 = inlined_call_operand.vmem [shape: bf16[2,8,4,64], index: 2, kind: input, shape index: {}]   ;;  %s1013_s3 = inlined_call_operand.vmem [shape: bf16[2,8,4,64], index: 3, kind: output, shape index: {}]  }
   0x1 LB: > { %s760_s13 = sadd.s32 4294967295, %s841_s12   ;;  %p764_p0 = scmp.ge.s32.totalorder %s841_s12, 1  ;;  %s841_s12 = sphi %s863_s12, %s13_s12  }
   0x2   : > { %p157_p1 = scmp.lt.s32.totalorder %s841_s12, 3 }
   0x4   : > { %p158_p2 = pnand %p764_p0, %p157_p1 }
   0x5   : > { %p191_p3 = scmp.lt.s32.totalorder (!%p158_p2), %s760_s13, 1 }
   0x6   : > { %161 = sbr.rel (%p158_p2) target bundleno = 579 (0x243), region = 32 }
   0xb   : > { %s1015_s13 = smov (!%p191_p3, %s760_s13), 1  ;;  %vm260_vm0 = vcmask 523264   ;;  %vm413_vm1 = vcmask 27648   ;;  %vm514_vm2 = vcmask 1041408   ;;  %vm510_vm3 = vcmask 31744  }
   0xc   : > { %s871_s14 = sshll.u32 %s1015_s13, 4  ;;  %vm672_vm4 = vcmask 517120  }
   0xd   : > { %s877_s17 = scalar_lea.vmem %s1011_s1, %s871_s14  ;;  %s883_s20 = scalar_lea.vmem %s1010_s0, %s871_s14 }
   0xe   : > { %v244_v0 = vld [vmem:[%s877_s17] sm:$0x3]  ;;  %v245_v1 = vld [vmem:[%s877_s17 + $0x2] sm:$0x3]  ;;  %v246_v2 = vld [vmem:[%s877_s17 + $0x4] sm:$0x3]  ;;  %s205_s23 = scalar_lea.vmem %s1012_s2, %s871_s14  ;;  %s989_s26 = scalar_lea.vmem %s1013_s3, %s871_s14 }
   0xf   : > { %v265_v3 = vsel %vm260_vm0, %v244_v0, 0  ;;  %v284_v4 = vsel %vm260_vm0, %v245_v1, 0  ;;  %v303_v5 = vsel %vm260_vm0, %v246_v2, 0  ;;  %v247_v6 = vld [vmem:[%s877_s17 + $0x6] sm:$0x3] }
  0x10   : > { %274 = vmatpush.bf16.xpose.msra.mxu0 %v265_v3  ;;  %293 = vmatpush.bf16.xpose.msra.mxu1 %v284_v4  ;;  %v322_v7 = vsel %vm260_vm0, %v247_v6, 0  ;;  %v212_v8 = vld [vmem:[%s883_s20] sm:$0x3]  ;;  %v213_v9 = vld [vmem:[%s883_s20 + $0x2] sm:$0x3] }
  0x11   : > { %312 = vmatpush.bf16.xpose.msra.mxu2 %v303_v5  ;;  %331 = vmatpush.bf16.xpose.msra.mxu3 %v322_v7  ;;  %v220_v10 = vunpack.c.l.bf16 %v212_v8  ;;  %v221_v11 = vunpack.c.l.bf16 %v213_v9  ;;  %v214_v12 = vld [vmem:[%s883_s20 + $0x4] sm:$0x3]  ;;  %v215_v13 = vld [vmem:[%s883_s20 + $0x6] sm:$0x3]  ;;  %v250_v14 = vld [vmem:[%s877_s17 + $0xc] sm:$0x3] }
  0x12   : > { %v222_v15 = vunpack.c.l.bf16 %v214_v12  ;;  %v223_v16 = vunpack.c.l.bf16 %v215_v13  ;;  %v379_v17 = vsel %vm260_vm0, %v250_v14, 0  ;;  %v251_v18 = vld [vmem:[%s877_s17 + $0xe] sm:$0x3]  ;;  %v249_v19 = vld [vmem:[%s877_s17 + $0xa] sm:$0x3] }
  0x13   : > { %v228_v20 = vmul.f32 0.125, %v220_v10  ;;  %v229_v21 = vmul.f32 0.125, %v221_v11  ;;  %v398_v22 = vsel %vm260_vm0, %v251_v18, 0  ;;  %v360_v23 = vsel %vm260_vm0, %v249_v19, 0  ;;  %v248_v24 = vld [vmem:[%s877_s17 + $0x8] sm:$0x3] }
  0x14   : > { %v230_v25 = vmul.f32 0.125, %v222_v15  ;;  %v231_v26 = vmul.f32 0.125, %v223_v16  ;;  %v341_v27 = vsel %vm260_vm0, %v248_v24, 0  ;;  %v217_v32 = vld [vmem:[%s883_s20 + $0xa] sm:$0x3] }
  0x15   : > { %v236_v28 = vpack.c.bf16 %v228_v20, %v228_v20  ;;  %v237_v29 = vpack.c.bf16 %v229_v21, %v229_v21  ;;  %v216_v33 = vld [vmem:[%s883_s20 + $0x8] sm:$0x3]  ;;  %v218_v34 = vld [vmem:[%s883_s20 + $0xc] sm:$0x3]  ;;  %v219_v35 = vld [vmem:[%s883_s20 + $0xe] sm:$0x3]  ;;  %v225_v36 = vunpack.c.l.bf16 %v217_v32 }
  0x16   : > { %v238_v30 = vpack.c.bf16 %v230_v25, %v230_v25  ;;  %v239_v31 = vpack.c.bf16 %v231_v26, %v231_v26  ;;  %v224_v37 = vunpack.c.l.bf16 %v216_v33  ;;  %v226_v38 = vunpack.c.l.bf16 %v218_v34 }
  0x17   : > { %773 = vmatmul.msk.bf16.vlgmr.msra.gmra.mxu0 %vm260_vm0, %v236_v28  ;;  %774 = vmatmul.msk.bf16.vlgmr.msra.gmra.mxu1 %vm260_vm0, %v237_v29  ;;  %v227_v39 = vunpack.c.l.bf16 %v219_v35  ;;  %v233_v40 = vmul.f32 0.125, %v225_v36 }
  0x18   : > { %369 = vmatpush.bf16.xpose.msrb.mxu1 %v360_v23  ;;  %350 = vmatpush.bf16.xpose.msrb.mxu0 %v341_v27  ;;  %v232_v41 = vmul.f32 0.125, %v224_v37  ;;  %v234_v42 = vmul.f32 0.125, %v226_v38 }
  0x19   : > { %388 = vmatpush.bf16.xpose.msrb.mxu2 %v379_v17  ;;  %407 = vmatpush.bf16.xpose.msrb.mxu3 %v398_v22  ;;  %v235_v43 = vmul.f32 0.125, %v227_v39  ;;  %v241_v44 = vpack.c.bf16 %v233_v40, %v233_v40 }
  0x1a   : > { %775 = vmatmul.msk.bf16.vlgmr.msra.gmra.mxu2 %vm260_vm0, %v238_v30  ;;  %776 = vmatmul.msk.bf16.vlgmr.msra.gmra.mxu3 %vm260_vm0, %v239_v31  ;;  %v240_v45 = vpack.c.bf16 %v232_v41, %v232_v41  ;;  %v242_v46 = vpack.c.bf16 %v234_v42, %v234_v42 }
  0x1b   : > { %v243_v47 = vpack.c.bf16 %v235_v43, %v235_v43 }
  0x27   : > { %778 = vmatmul.msk.bf16.vlgmr.msrb.gmra.mxu1 %vm260_vm0, %v241_v44  ;;  %777 = vmatmul.msk.bf16.vlgmr.msrb.gmra.mxu0 %vm260_vm0, %v240_v45 }
  0x2a   : > { %779 = vmatmul.msk.bf16.vlgmr.msrb.gmra.mxu2 %vm260_vm0, %v242_v46  ;;  %780 = vmatmul.msk.bf16.vlgmr.msrb.gmra.mxu3 %vm260_vm0, %v243_v47 }
  0x94   : > { %v276_v48 = vpop.f32.mrf.mxu0  ;;  %v295_v49 = vpop.f32.mrf.mxu1 }
  0x95   : > { %v414_v50 = vsel %vm413_vm1, %v276_v48, -inf  ;;  %v417_v53 = vsel %vm413_vm1, %v295_v49, -inf }
  0x96   : > { %415 = vmax.xlane.f32.xlu1 %v414_v50  ;;  %v254_v50 = vld [vmem:[%s205_s23 + $0x4] sm:$0x3] }
  0x9c   : > { %v297_v55 = vpop.f32.mrf.mxu1  ;;  %v278_v56 = vpop.f32.mrf.mxu0 }
  0x9d   : > { %v314_v51 = vpop.f32.mrf.mxu2  ;;  %v333_v52 = vpop.f32.mrf.mxu3  ;;  %v258_v56 = vld [vmem:[%s205_s23 + $0xc] sm:$0x3] }
  0x9e   : > { %v420_v54 = vsel %vm413_vm1, %v314_v51, -inf  ;;  %418 = vmax.xlane.f32.xlu1 %v417_v53  ;;  %v423_v57 = vsel %vm413_vm1, %v333_v52, -inf }
  0x9f   : > { %421 = vmax.xlane.f32.xlu0 %v420_v54  ;;  %v253_v54 = vld [vmem:[%s205_s23 + $0x2] sm:$0x3] }
  0xa0   : > { %v535_v55 = vsel %vm514_vm2, %v253_v54, 0 }
  0xa1   : > { %544 = vmatpush.bf16.msra.mxu1 %v535_v55 }
  0xa4   : > { %v371_v60 = vpop.f32.mrf.mxu1  ;;  %v352_v61 = vpop.f32.mrf.mxu0 }
  0xa5   : > { %v316_v58 = vpop.f32.mrf.mxu2  ;;  %v335_v59 = vpop.f32.mrf.mxu3  ;;  %v429_v62 = vsel %vm413_vm1, %v371_v60, -inf  ;;  %v426_v63 = vsel %vm413_vm1, %v352_v61, -inf }
  0xa6   : > { %430 = vmax.xlane.f32.xlu1 %v429_v62  ;;  %v630_v59 = vsel %vm514_vm2, %v258_v56, 0 }
  0xa7   : > { %424 = vmax.xlane.f32.xlu0 %v423_v57  ;;  %v256_v57 = vld [vmem:[%s205_s23 + $0x8] sm:$0x3] }
  0xac   : > { %v354_v3 = vpop.f32.mrf.mxu0  ;;  %v373_v4 = vpop.f32.mrf.mxu1 }
  0xad   : > { %v390_v0 = vpop.f32.mrf.mxu2  ;;  %v409_v1 = vpop.f32.mrf.mxu3 }
  0xae   : > { %v432_v2 = vsel %vm413_vm1, %v390_v0, -inf  ;;  %v435_v5 = vsel %vm413_vm1, %v409_v1, -inf }
  0xaf   : > { %433 = vmax.xlane.f32.xlu2 %v432_v2  ;;  %427 = vmax.xlane.f32.xlu0 %v426_v63 }
  0xb5   : > { %v392_v6 = vpop.f32.mrf.mxu2  ;;  %v411_v7 = vpop.f32.mrf.mxu3 }
  0xb7   : > { %436 = vmax.xlane.f32.xlu2 %v435_v5 }
 0x109   : > { %v416_v8 = vpop.xlane.xlu1 %415 }
 0x10a   : > { %v438_v9 = vsub.f32 %v276_v48, %v416_v8  ;;  %v252_v48 = vld [vmem:[%s205_s23] sm:$0x3] }
 0x10c   : > { %v446_v10 = vmul.f32 1.442695, %v438_v9 }
 0x10e   : > { %803 = vpow2.f32 %v446_v10 }
 0x111   : > { %v419_v13 = vpop.xlane.xlu1 %418 }
 0x112   : > { %v422_v11 = vpop.xlane.xlu0 %421  ;;  %v439_v15 = vsub.f32 %v295_v49, %v419_v13  ;;  %v516_v49 = vsel %vm514_vm2, %v252_v48, 0 }
 0x113   : > { %v440_v12 = vsub.f32 %v314_v51, %v422_v11  ;;  %525 = vmatpush.bf16.msra.mxu0 %v516_v49  ;;  %v554_v51 = vsel %vm514_vm2, %v254_v50, 0 }
 0x114   : > { %v925_v16 = vpop.eup %803  ;;  %v448_v18 = vmul.f32 1.442695, %v439_v15  ;;  %563 = vmatpush.bf16.msra.mxu2 %v554_v51 }
 0x115   : > { %v450_v14 = vmul.f32 1.442695, %v440_v12  ;;  %v462_v17 = vsel %vm413_vm1, %v925_v16, 0.0 }
 0x116   : > { %463 = vadd.xlane.f32.xlu1 %v462_v17 }
 0x117   : > { %805 = vpow2.f32 %v450_v14 }
 0x118   : > { %807 = vpow2.f32 %v448_v18  ;;  %639 = vmatpush.bf16.msrb.mxu2 %v630_v59 }
 0x119   : > { %v431_v24 = vpop.xlane.xlu1 %430 }
 0x11a   : > { %v425_v19 = vpop.xlane.xlu0 %424  ;;  %v443_v31 = vsub.f32 %v371_v60, %v431_v24  ;;  %v592_v60 = vsel %vm514_vm2, %v256_v57, 0 }
 0x11b   : > { %v441_v20 = vsub.f32 %v333_v52, %v425_v19  ;;  %v255_v52 = vld [vmem:[%s205_s23 + $0x6] sm:$0x3]  ;;  %601 = vmatpush.bf16.msrb.mxu0 %v592_v60 }
 0x11c   : > { %v456_v36 = vmul.f32 1.442695, %v443_v31  ;;  %v573_v53 = vsel %vm514_vm2, %v255_v52, 0 }
 0x11d   : > { %v929_v21 = vpop.eup %805  ;;  %v452_v22 = vmul.f32 1.442695, %v441_v20  ;;  %582 = vmatpush.bf16.msra.mxu3 %v573_v53 }
 0x11e   : > { %v468_v23 = vsel %vm413_vm1, %v929_v21, 0.0  ;;  %v933_v27 = vpop.eup %807 }
 0x11f   : > { %809 = vpow2.f32 %v452_v22  ;;  %469 = vadd.xlane.f32.xlu2 %v468_v23  ;;  %v465_v34 = vsel %vm413_vm1, %v933_v27, 0.0 }
 0x122   : > { %v434_v25 = vpop.xlane.xlu2 %433  ;;  %v428_v26 = vpop.xlane.xlu0 %427 }
 0x123   : > { %v444_v28 = vsub.f32 %v390_v0, %v434_v25  ;;  %v442_v29 = vsub.f32 %v352_v61, %v428_v26  ;;  %v259_v61 = vld [vmem:[%s205_s23 + $0xe] sm:$0x3] }
 0x124   : > { %v649_v62 = vsel %vm514_vm2, %v259_v61, 0 }
 0x125   : > { %v935_v30 = vpop.eup %809  ;;  %v458_v32 = vmul.f32 1.442695, %v444_v28  ;;  %v454_v33 = vmul.f32 1.442695, %v442_v29  ;;  %658 = vmatpush.bf16.msrb.mxu3 %v649_v62 }
 0x126   : > { %v471_v35 = vsel %vm413_vm1, %v935_v30, 0.0 }
 0x127   : > { %811 = vpow2.f32 %v458_v32  ;;  %466 = vadd.xlane.f32.xlu2 %v465_v34  ;;  %472 = vadd.xlane.f32.xlu0 %v471_v35 }
 0x128   : > { %813 = vpow2.f32 %v454_v33 }
 0x129   : > { %815 = vpow2.f32 %v456_v36 }
 0x12a   : > { %v437_v37 = vpop.xlane.xlu2 %436 }
 0x12b   : > { %v445_v38 = vsub.f32 %v409_v1, %v437_v37  ;;  %v257_v1 = vld [vmem:[%s205_s23 + $0xa] sm:$0x3] }
 0x12c   : > { %v611_v3 = vsel %vm514_vm2, %v257_v1, 0 }
 0x12d   : > { %v941_v39 = vpop.eup %811  ;;  %v460_v40 = vmul.f32 1.442695, %v445_v38  ;;  %620 = vmatpush.bf16.msrb.mxu1 %v611_v3 }
 0x12e   : > { %v943_v41 = vpop.eup %813  ;;  %v480_v42 = vsel %vm413_vm1, %v941_v39, 0.0 }
 0x12f   : > { %817 = vpow2.f32 %v460_v40  ;;  %481 = vadd.xlane.f32.xlu0 %v480_v42  ;;  %v474_v43 = vsel %vm413_vm1, %v943_v41, 0.0  ;;  %v949_v44 = vpop.eup %815 }
 0x130   : > { %475 = vadd.xlane.f32.xlu2 %v474_v43  ;;  %v477_v47 = vsel %vm413_vm1, %v949_v44, 0.0 }
 0x135   : > { %v951_v45 = vpop.eup %817 }
 0x136   : > { %v483_v46 = vsel %vm413_vm1, %v951_v45, 0.0 }
 0x137   : > { %484 = vadd.xlane.f32.xlu1 %v483_v46  ;;  %478 = vadd.xlane.f32.xlu0 %v477_v47 }
 0x189   : > { %v464_v58 = vpop.xlane.xlu1 %463 }
 0x18a   : > { %819 = vrcp.f32 %v464_v58 }
 0x190   : > { %v820_v63 = vpop.eup %819 }
 0x191   : > { %v494_v2 = vmul.f32 %v820_v63, %v925_v16 }
 0x192   : > { %v470_v0 = vpop.xlane.xlu2 %469 }
 0x193   : > { %821 = vrcp.f32 %v470_v0  ;;  %v502_v4 = vpack.c.bf16 %v494_v2, %v494_v2 }
 0x195   : > { %781 = vmatmul.msk.bf16.vlgmr.msra.gmra.mxu0 %vm510_vm3, %v502_v4 }
 0x199   : > { %v822_v5 = vpop.eup %821 }
 0x19a   : > { %v496_v6 = vmul.f32 %v822_v5, %v929_v21  ;;  %v467_v7 = vpop.xlane.xlu2 %466  ;;  %v473_v8 = vpop.xlane.xlu0 %472 }
 0x19b   : > { %823 = vrcp.f32 %v467_v7 }
 0x19c   : > { %v504_v9 = vpack.c.bf16 %v496_v6, %v496_v6  ;;  %825 = vrcp.f32 %v473_v8 }
 0x19e   : > { %783 = vmatmul.msk.bf16.vlgmr.msra.gmra.mxu2 %vm510_vm3, %v504_v9 }
 0x1a1   : > { %v824_v10 = vpop.eup %823 }
 0x1a2   : > { %v826_v11 = vpop.eup %825  ;;  %v495_v12 = vmul.f32 %v824_v10, %v933_v27  ;;  %v482_v13 = vpop.xlane.xlu0 %481 }
 0x1a3   : > { %v497_v14 = vmul.f32 %v826_v11, %v935_v30  ;;  %v476_v15 = vpop.xlane.xlu2 %475  ;;  %827 = vrcp.f32 %v482_v13 }
 0x1a4   : > { %v503_v16 = vpack.c.bf16 %v495_v12, %v495_v12  ;;  %829 = vrcp.f32 %v476_v15 }
 0x1a5   : > { %v505_v17 = vpack.c.bf16 %v497_v14, %v497_v14 }
 0x1a6   : > { %782 = vmatmul.msk.bf16.vlgmr.msra.gmra.mxu1 %vm510_vm3, %v503_v16 }
 0x1a7   : > { %784 = vmatmul.msk.bf16.vlgmr.msra.gmra.mxu3 %vm510_vm3, %v505_v17 }
 0x1a9   : > { %v828_v18 = vpop.eup %827 }
 0x1aa   : > { %v830_v19 = vpop.eup %829  ;;  %v500_v20 = vmul.f32 %v828_v18, %v941_v39  ;;  %v485_v21 = vpop.xlane.xlu1 %484 }
 0x1ab   : > { %v479_v22 = vpop.xlane.xlu0 %478  ;;  %v498_v23 = vmul.f32 %v830_v19, %v943_v41  ;;  %831 = vrcp.f32 %v485_v21 }
 0x1ac   : > { %v508_v24 = vpack.c.bf16 %v500_v20, %v500_v20  ;;  %833 = vrcp.f32 %v479_v22 }
 0x1ad   : > { %v506_v25 = vpack.c.bf16 %v498_v23, %v498_v23 }
 0x1ae   : > { %787 = vmatmul.msk.bf16.vlgmr.msrb.gmra.mxu2 %vm510_vm3, %v508_v24 }
 0x1af   : > { %785 = vmatmul.msk.bf16.vlgmr.msrb.gmra.mxu0 %vm510_vm3, %v506_v25 }
 0x1b1   : > { %v832_v26 = vpop.eup %831 }
 0x1b2   : > { %v834_v27 = vpop.eup %833  ;;  %v501_v28 = vmul.f32 %v832_v26, %v951_v45 }
 0x1b3   : > { %v499_v29 = vmul.f32 %v834_v27, %v949_v44 }
 0x1b4   : > { %v509_v30 = vpack.c.bf16 %v501_v28, %v501_v28 }
 0x1b5   : > { %v507_v31 = vpack.c.bf16 %v499_v29, %v499_v29 }
 0x1b7   : > { %786 = vmatmul.msk.bf16.vlgmr.msrb.gmra.mxu1 %vm510_vm3, %v507_v31  ;;  %788 = vmatmul.msk.bf16.vlgmr.msrb.gmra.mxu3 %vm510_vm3, %v509_v30 }
 0x212   : > { %v527_v32 = vpop.f32.mrf.mxu0 }
 0x213   : > { %v664_v33 = vpack.c.bf16 %v527_v32, %v527_v32 }
 0x215   : > { %673 = vst.msk [vmem:[%s989_s26] sm:$0x3] %vm672_vm4, %v664_v33 }
 0x21a   : > { %v529_v34 = vpop.f32.mrf.mxu0 }
 0x221   : > { %v565_v35 = vpop.f32.mrf.mxu2 }
 0x222   : > { %v666_v36 = vpack.c.bf16 %v565_v35, %v565_v35 }
 0x223   : > { %v546_v37 = vpop.f32.mrf.mxu1 }
 0x224   : > { %675 = vst.msk [vmem:[%s989_s26 + $0x4] sm:$0x3] %vm672_vm4, %v666_v36  ;;  %v665_v38 = vpack.c.bf16 %v546_v37, %v546_v37 }
 0x226   : > { %674 = vst.msk [vmem:[%s989_s26 + $0x2] sm:$0x3] %vm672_vm4, %v665_v38 }
 0x229   : > { %v567_v39 = vpop.f32.mrf.mxu2 }
 0x22a   : > { %v584_v40 = vpop.f32.mrf.mxu3 }
 0x22b   : > { %v667_v41 = vpack.c.bf16 %v584_v40, %v584_v40  ;;  %v548_v42 = vpop.f32.mrf.mxu1 }
 0x22c   : > { %v603_v43 = vpop.f32.mrf.mxu0 }
 0x22d   : > { %676 = vst.msk [vmem:[%s989_s26 + $0x6] sm:$0x3] %vm672_vm4, %v667_v41  ;;  %v668_v44 = vpack.c.bf16 %v603_v43, %v603_v43 }
 0x22f   : > { %677 = vst.msk [vmem:[%s989_s26 + $0x8] sm:$0x3] %vm672_vm4, %v668_v44 }
 0x231   : > { %v641_v45 = vpop.f32.mrf.mxu2 }
 0x232   : > { %v586_v46 = vpop.f32.mrf.mxu3  ;;  %v670_v47 = vpack.c.bf16 %v641_v45, %v641_v45 }
 0x234   : > { %679 = vst.msk [vmem:[%s989_s26 + $0xc] sm:$0x3] %vm672_vm4, %v670_v47  ;;  %v605_v48 = vpop.f32.mrf.mxu0  ;;  %v622_v49 = vpop.f32.mrf.mxu1 }
 0x235   : > { %v669_v50 = vpack.c.bf16 %v622_v49, %v622_v49 }
 0x237   : > { %678 = vst.msk [vmem:[%s989_s26 + $0xa] sm:$0x3] %vm672_vm4, %v669_v50 }
 0x239   : > { %v643_v51 = vpop.f32.mrf.mxu2 }
 0x23a   : > { %v660_v52 = vpop.f32.mrf.mxu3 }
 0x23b   : > { %v671_v53 = vpack.c.bf16 %v660_v52, %v660_v52 }
 0x23c   : > { %v624_v54 = vpop.f32.mrf.mxu1 }
 0x23d   : > { %680 = vst.msk [vmem:[%s989_s26 + $0xe] sm:$0x3] %vm672_vm4, %v671_v53 }
 0x242   : > { %v662_v55 = vpop.f32.mrf.mxu3 }
 0x243 PF: > { %s13_s12 = sadd.s32 1, %s841_s12  }
 0x244   : > { %p10_p4 = scmp.ge.s32.totalorder %s13_s12, 4  }
 0x246   :  { %12 = sbr.rel (!%p10_p4) target bundleno = 1 (0x1), region = 68 }

// kernel: textdiae_forward.41
= control target key start
LH: loop header
LB: loop body
LE: loop exit
PB: predicated region body
PF: predicated region fallthrough
CT: control target
= control target key end

     0   :  { %s1314_s15 = smov 0   ;;  %s1316_s16 = smov 0   ;;  %s1567_s0 = inlined_call_operand.vmem [shape: bf16[8,512], index: 0, kind: input, shape index: {}]   ;;  %s1568_s1 = inlined_call_operand.vmem [shape: bf16[512,768], index: 1, kind: input, shape index: {}]   ;;  %s1569_s2 = inlined_call_operand.vmem [shape: f32[1,768], index: 2, kind: input, shape index: {}]   ;;  %s1570_s3 = inlined_call_operand.vmem [shape: f32[8,768], index: 3, kind: input, shape index: {}]   ;;  %s1571_s4 = inlined_call_operand.vmem [shape: f32[8,768], index: 4, kind: output, shape index: {}]  }
   0x1   :  { %s1318_s17 = smov 0   ;;  %s1320_s18 = smov 0  }
   0x2   :  { %s1322_s19 = smov 0  }
   0x3 LB: > { %s23_s20 = sadd.s32 1, %s1283_s18  ;;  %p66_p1 = scmp.ne.s32.totalorder %s1275_s16, %s1271_s15  ;;  %s1287_s19 = sphi %s1322_s19, %s14_s19   ;;  %s1283_s18 = sphi %s1320_s18, %s1575_s18   ;;  %s1279_s17 = sphi %s1318_s17, %s1574_s17   ;;  %s1275_s16 = sphi %s1316_s16, %s1573_s16   ;;  %s1271_s15 = sphi %s1314_s15, %s1572_s15  }
   0x4   : > { %p24_p0 = scmp.ge.s32.totalorder %s23_s20, 6  ;;  %p67_p2 = scmp.eq.s32.totalorder %s1287_s19, 0 }
   0x5   : > { %s59_s22 = sadd.s32 1, %s1275_s16  ;;  %p1039_p5 = scmp.ge.s32.totalorder %s1287_s19, 6 }
   0x6   : > { %s1577_s20 = smov (%p24_p0, %s23_s20), 0  ;;  %p68_p3 = por %p67_p2, %p66_p1 }
   0x7   : > { %s56_s21 = ssub.s32 %s1283_s18, %s1577_s20  ;;  %182 = sbr.rel (%p1039_p5) target bundleno = 80 (0x50), region = 20 }
   0x8   : > { %p57_p4 = scmp.eq.s32.totalorder %s56_s21, 0 }
   0xa   : > { %s1349_s23 = scalar_select %p57_p4, %s1275_s16, %s59_s22  }
   0xc   : > { %185 = sbr.rel (!%p68_p3) target bundleno = 80 (0x50), region = 24  ;;  %s187_s24 = sand.u32 (%p68_p3), 1, %s1275_s16  }
   0xd   : > { %s1041_s25 = sshll.u32 (%p68_p3), %s1283_s18, 2  ;;  %s1040_s26 = sshll.u32 (%p68_p3), %s187_s24, 8 }
   0xe   : > { %s1357_s29 = scalar_lea.vmem (%p68_p3), %s1568_s1, %s1041_s25  ;;  %s1361_s30 = scalar_lea.vmem (%p68_p3), [#allocation2], %s1040_s26 }
   0xf   : > { %v208_v0 = vld [vmem:[%s1357_s29] sm:$0xf] (%p68_p3)  ;;  %v210_v1 = vld [vmem:[%s1357_s29 + $0x18] sm:$0xf] (%p68_p3)  ;;  %v212_v2 = vld [vmem:[%s1357_s29 + $0x30] sm:$0xf] (%p68_p3) }
  0x10   : > { %209 = vst [vmem:[%s1361_s30] sm:$0xf] (%p68_p3), %v208_v0  ;;  %v214_v3 = vld [vmem:[%s1357_s29 + $0x48] sm:$0xf] (%p68_p3)  ;;  %v216_v4 = vld [vmem:[%s1357_s29 + $0x60] sm:$0xf] (%p68_p3) }
  0x11   : > { %211 = vst [vmem:[%s1361_s30 + $0x4] sm:$0xf] %v210_v1  ;;  %v218_v5 = vld [vmem:[%s1357_s29 + $0x78] sm:$0xf]  ;;  %v220_v6 = vld [vmem:[%s1357_s29 + $0x90] sm:$0xf] }
  0x12   : > { %213 = vst [vmem:[%s1361_s30 + $0x8] sm:$0xf] %v212_v2  ;;  %v222_v7 = vld [vmem:[%s1357_s29 + $0xa8] sm:$0xf]  ;;  %v224_v8 = vld [vmem:[%s1357_s29 + $0xc0] sm:$0xf] }
  0x13   : > { %215 = vst [vmem:[%s1361_s30 + $0xc] sm:$0xf] %v214_v3  ;;  %v226_v9 = vld [vmem:[%s1357_s29 + $0xd8] sm:$0xf]  ;;  %v228_v10 = vld [vmem:[%s1357_s29 + $0xf0] sm:$0xf] }
  0x14   : > { %217 = vst [vmem:[%s1361_s30 + $0x10] sm:$0xf] %v216_v4  ;;  %v230_v11 = vld [vmem:[%s1357_s29 + $0x108] sm:$0xf]  ;;  %v232_v12 = vld [vmem:[%s1357_s29 + $0x120] sm:$0xf] }
  0x15   : > { %219 = vst [vmem:[%s1361_s30 + $0x14] sm:$0xf] %v218_v5  ;;  %v234_v13 = vld [vmem:[%s1357_s29 + $0x138] sm:$0xf]  ;;  %v236_v14 = vld [vmem:[%s1357_s29 + $0x150] sm:$0xf] }
  0x16   : > { %221 = vst [vmem:[%s1361_s30 + $0x18] sm:$0xf] %v220_v6  ;;  %v238_v15 = vld [vmem:[%s1357_s29 + $0x168] sm:$0xf]  ;;  %v240_v16 = vld [vmem:[%s1357_s29 + $0x180] sm:$0xf] }
  0x17   : > { %223 = vst [vmem:[%s1361_s30 + $0x1c] sm:$0xf] %v222_v7  ;;  %v242_v17 = vld [vmem:[%s1357_s29 + $0x198] sm:$0xf]  ;;  %v244_v18 = vld [vmem:[%s1357_s29 + $0x1b0] sm:$0xf] }
  0x18   : > { %225 = vst [vmem:[%s1361_s30 + $0x20] sm:$0xf] %v224_v8  ;;  %v246_v19 = vld [vmem:[%s1357_s29 + $0x1c8] sm:$0xf]  ;;  %v248_v20 = vld [vmem:[%s1357_s29 + $0x1e0] sm:$0xf] }
  0x19   : > { %227 = vst [vmem:[%s1361_s30 + $0x24] sm:$0xf] %v226_v9  ;;  %v250_v21 = vld [vmem:[%s1357_s29 + $0x1f8] sm:$0xf]  ;;  %v252_v22 = vld [vmem:[%s1357_s29 + $0x210] sm:$0xf] }
  0x1a   : > { %229 = vst [vmem:[%s1361_s30 + $0x28] sm:$0xf] %v228_v10  ;;  %v254_v23 = vld [vmem:[%s1357_s29 + $0x228] sm:$0xf]  ;;  %v256_v24 = vld [vmem:[%s1357_s29 + $0x240] sm:$0xf] }
  0x1b   : > { %231 = vst [vmem:[%s1361_s30 + $0x2c] sm:$0xf] %v230_v11  ;;  %v258_v25 = vld [vmem:[%s1357_s29 + $0x258] sm:$0xf]  ;;  %v260_v26 = vld [vmem:[%s1357_s29 + $0x270] sm:$0xf] }
  0x1c   : > { %233 = vst [vmem:[%s1361_s30 + $0x30] sm:$0xf] %v232_v12  ;;  %v262_v27 = vld [vmem:[%s1357_s29 + $0x288] sm:$0xf]  ;;  %v264_v28 = vld [vmem:[%s1357_s29 + $0x2a0] sm:$0xf] }
  0x1d   : > { %235 = vst [vmem:[%s1361_s30 + $0x34] sm:$0xf] %v234_v13  ;;  %v266_v29 = vld [vmem:[%s1357_s29 + $0x2b8] sm:$0xf]  ;;  %v268_v30 = vld [vmem:[%s1357_s29 + $0x2d0] sm:$0xf] }
  0x1e   : > { %237 = vst [vmem:[%s1361_s30 + $0x38] sm:$0xf] %v236_v14  ;;  %v270_v31 = vld [vmem:[%s1357_s29 + $0x2e8] sm:$0xf]  ;;  %v272_v32 = vld [vmem:[%s1357_s29 + $0x300] sm:$0xf] }
  0x1f   : > { %239 = vst [vmem:[%s1361_s30 + $0x3c] sm:$0xf] %v238_v15  ;;  %v274_v33 = vld [vmem:[%s1357_s29 + $0x318] sm:$0xf]  ;;  %v276_v34 = vld [vmem:[%s1357_s29 + $0x330] sm:$0xf] }
  0x20   : > { %241 = vst [vmem:[%s1361_s30 + $0x40] sm:$0xf] %v240_v16  ;;  %v278_v35 = vld [vmem:[%s1357_s29 + $0x348] sm:$0xf]  ;;  %v280_v36 = vld [vmem:[%s1357_s29 + $0x360] sm:$0xf] }
  0x21   : > { %243 = vst [vmem:[%s1361_s30 + $0x44] sm:$0xf] %v242_v17  ;;  %v282_v37 = vld [vmem:[%s1357_s29 + $0x378] sm:$0xf]  ;;  %v284_v38 = vld [vmem:[%s1357_s29 + $0x390] sm:$0xf] }
  0x22   : > { %245 = vst [vmem:[%s1361_s30 + $0x48] sm:$0xf] %v244_v18  ;;  %v286_v39 = vld [vmem:[%s1357_s29 + $0x3a8] sm:$0xf]  ;;  %v288_v40 = vld [vmem:[%s1357_s29 + $0x3c0] sm:$0xf] }
  0x23   : > { %247 = vst [vmem:[%s1361_s30 + $0x4c] sm:$0xf] %v246_v19  ;;  %v290_v41 = vld [vmem:[%s1357_s29 + $0x3d8] sm:$0xf]  ;;  %v292_v42 = vld [vmem:[%s1357_s29 + $0x3f0] sm:$0xf] }
  0x24   : > { %249 = vst [vmem:[%s1361_s30 + $0x50] sm:$0xf] %v248_v20  ;;  %v294_v43 = vld [vmem:[%s1357_s29 + $0x408] sm:$0xf]  ;;  %v296_v44 = vld [vmem:[%s1357_s29 + $0x420] sm:$0xf] }
  0x25   : > { %251 = vst [vmem:[%s1361_s30 + $0x54] sm:$0xf] %v250_v21  ;;  %v298_v45 = vld [vmem:[%s1357_s29 + $0x438] sm:$0xf]  ;;  %v300_v46 = vld [vmem:[%s1357_s29 + $0x450] sm:$0xf] }
  0x26   : > { %253 = vst [vmem:[%s1361_s30 + $0x58] sm:$0xf] %v252_v22  ;;  %v302_v47 = vld [vmem:[%s1357_s29 + $0x468] sm:$0xf]  ;;  %v304_v48 = vld [vmem:[%s1357_s29 + $0x480] sm:$0xf] }
  0x27   : > { %255 = vst [vmem:[%s1361_s30 + $0x5c] sm:$0xf] %v254_v23  ;;  %v306_v49 = vld [vmem:[%s1357_s29 + $0x498] sm:$0xf]  ;;  %v308_v50 = vld [vmem:[%s1357_s29 + $0x4b0] sm:$0xf] }
  0x28   : > { %257 = vst [vmem:[%s1361_s30 + $0x60] sm:$0xf] %v256_v24  ;;  %v310_v51 = vld [vmem:[%s1357_s29 + $0x4c8] sm:$0xf]  ;;  %v312_v52 = vld [vmem:[%s1357_s29 + $0x4e0] sm:$0xf] }
  0x29   : > { %259 = vst [vmem:[%s1361_s30 + $0x64] sm:$0xf] %v258_v25  ;;  %v314_v53 = vld [vmem:[%s1357_s29 + $0x4f8] sm:$0xf]  ;;  %v316_v54 = vld [vmem:[%s1357_s29 + $0x510] sm:$0xf] }
  0x2a   : > { %261 = vst [vmem:[%s1361_s30 + $0x68] sm:$0xf] %v260_v26  ;;  %v318_v55 = vld [vmem:[%s1357_s29 + $0x528] sm:$0xf]  ;;  %v320_v56 = vld [vmem:[%s1357_s29 + $0x540] sm:$0xf] }
  0x2b   : > { %263 = vst [vmem:[%s1361_s30 + $0x6c] sm:$0xf] %v262_v27  ;;  %v322_v57 = vld [vmem:[%s1357_s29 + $0x558] sm:$0xf]  ;;  %v324_v58 = vld [vmem:[%s1357_s29 + $0x570] sm:$0xf] }
  0x2c   : > { %265 = vst [vmem:[%s1361_s30 + $0x70] sm:$0xf] %v264_v28  ;;  %v326_v59 = vld [vmem:[%s1357_s29 + $0x588] sm:$0xf]  ;;  %v328_v60 = vld [vmem:[%s1357_s29 + $0x5a0] sm:$0xf] }
  0x2d   : > { %267 = vst [vmem:[%s1361_s30 + $0x74] sm:$0xf] %v266_v29  ;;  %v330_v61 = vld [vmem:[%s1357_s29 + $0x5b8] sm:$0xf]  ;;  %v332_v62 = vld [vmem:[%s1357_s29 + $0x5d0] sm:$0xf] }
  0x2e   : > { %269 = vst [vmem:[%s1361_s30 + $0x78] sm:$0xf] %v268_v30  ;;  %v334_v63 = vld [vmem:[%s1357_s29 + $0x5e8] sm:$0xf] }
  0x2f   : > { %271 = vst [vmem:[%s1361_s30 + $0x7c] sm:$0xf] %v270_v31 }
  0x30   : > { %273 = vst [vmem:[%s1361_s30 + $0x80] sm:$0xf] %v272_v32 }
  0x31   : > { %275 = vst [vmem:[%s1361_s30 + $0x84] sm:$0xf] %v274_v33 }
  0x32   : > { %277 = vst [vmem:[%s1361_s30 + $0x88] sm:$0xf] %v276_v34 }
  0x33   : > { %279 = vst [vmem:[%s1361_s30 + $0x8c] sm:$0xf] %v278_v35 }
  0x34   : > { %281 = vst [vmem:[%s1361_s30 + $0x90] sm:$0xf] %v280_v36 }
  0x35   : > { %283 = vst [vmem:[%s1361_s30 + $0x94] sm:$0xf] %v282_v37 }
  0x36   : > { %285 = vst [vmem:[%s1361_s30 + $0x98] sm:$0xf] %v284_v38 }
  0x37   : > { %287 = vst [vmem:[%s1361_s30 + $0x9c] sm:$0xf] %v286_v39 }
  0x38   : > { %289 = vst [vmem:[%s1361_s30 + $0xa0] sm:$0xf] %v288_v40 }
  0x39   : > { %291 = vst [vmem:[%s1361_s30 + $0xa4] sm:$0xf] %v290_v41 }
  0x3a   : > { %293 = vst [vmem:[%s1361_s30 + $0xa8] sm:$0xf] %v292_v42 }
  0x3b   : > { %295 = vst [vmem:[%s1361_s30 + $0xac] sm:$0xf] %v294_v43 }
  0x3c   : > { %297 = vst [vmem:[%s1361_s30 + $0xb0] sm:$0xf] %v296_v44 }
  0x3d   : > { %299 = vst [vmem:[%s1361_s30 + $0xb4] sm:$0xf] %v298_v45 }
  0x3e   : > { %301 = vst [vmem:[%s1361_s30 + $0xb8] sm:$0xf] %v300_v46 }
  0x3f   : > { %303 = vst [vmem:[%s1361_s30 + $0xbc] sm:$0xf] %v302_v47 }
  0x40   : > { %305 = vst [vmem:[%s1361_s30 + $0xc0] sm:$0xf] %v304_v48 }
  0x41   : > { %307 = vst [vmem:[%s1361_s30 + $0xc4] sm:$0xf] %v306_v49 }
  0x42   : > { %309 = vst [vmem:[%s1361_s30 + $0xc8] sm:$0xf] %v308_v50 }
  0x43   : > { %311 = vst [vmem:[%s1361_s30 + $0xcc] sm:$0xf] %v310_v51 }
  0x44   : > { %313 = vst [vmem:[%s1361_s30 + $0xd0] sm:$0xf] %v312_v52 }
  0x45   : > { %315 = vst [vmem:[%s1361_s30 + $0xd4] sm:$0xf] %v314_v53 }
  0x46   : > { %317 = vst [vmem:[%s1361_s30 + $0xd8] sm:$0xf] %v316_v54 }
  0x47   : > { %319 = vst [vmem:[%s1361_s30 + $0xdc] sm:$0xf] %v318_v55 }
  0x48   : > { %321 = vst [vmem:[%s1361_s30 + $0xe0] sm:$0xf] %v320_v56 }
  0x49   : > { %323 = vst [vmem:[%s1361_s30 + $0xe4] sm:$0xf] %v322_v57 }
  0x4a   : > { %325 = vst [vmem:[%s1361_s30 + $0xe8] sm:$0xf] %v324_v58 }
  0x4b   : > { %327 = vst [vmem:[%s1361_s30 + $0xec] sm:$0xf] %v326_v59 }
  0x4c   : > { %329 = vst [vmem:[%s1361_s30 + $0xf0] sm:$0xf] %v328_v60 }
  0x4d   : > { %331 = vst [vmem:[%s1361_s30 + $0xf4] sm:$0xf] %v330_v61 }
  0x4e   : > { %333 = vst [vmem:[%s1361_s30 + $0xf8] sm:$0xf] %v332_v62 }
  0x4f   : > { %335 = vst [vmem:[%s1361_s30 + $0xfc] sm:$0xf] %v334_v63 }
  0x50 PF: > { %p1042_p6 = scmp.ge.s32.totalorder %s1287_s19, 1  ;;  %p503_p7 = scmp.lt.s32.totalorder %s1287_s19, 7 }
  0x52   : > { %p504_p8 = pnand %p1042_p6, %p503_p7 }
  0x53   : > { %s510_s5 = sand.u32 (!%p504_p8), 1, %s1271_s15   ;;  %p559_p9 = scmp.lt.s32.totalorder (!%p504_p8), %s1279_s17, 5 }
  0x54   : > { %507 = sbr.rel (%p504_p8) target bundleno = 264 (0x108), region = 73  ;;  %s1043_s6 = sshll.u32 (!%p504_p8), %s510_s5, 8 }
  0x55   : > { %s1492_s7 = scalar_lea.vmem (!%p504_p8), [#allocation2], %s1043_s6 }
  0x59   : > { %v1183_v0 = vld [vmem:[%s1492_s7 + $0x38] sm:$0xff]  ;;  %v1182_v4 = vld [vmem:[%s1492_s7 + $0x30] sm:$0xff]  ;;  %s1579_s17 = smov (!%p559_p9, %s1279_s17), 5  ;;  %v1181_v8 = vld [vmem:[%s1492_s7 + $0x28] sm:$0xff] }
  0x5a   : > { %v1191_v1 = vld [vmem:[%s1492_s7 + $0x78] sm:$0xff]  ;;  %854 = vmatpush.bf16.msra.mxu0 %v1183_v0  ;;  %v1190_v5 = vld [vmem:[%s1492_s7 + $0x70] sm:$0xff]  ;;  %v1189_v9 = vld [vmem:[%s1492_s7 + $0x68] sm:$0xff]  ;;  %s561_s10 = scalar_lea.vmem %s1569_s2, %s1579_s17  ;;  %s1044_s22 = sshll.u32 %s1579_s17, 3 }
  0x5b   : > { %v1199_v2 = vld [vmem:[%s1492_s7 + $0xb8] sm:$0xff]  ;;  %867 = vmatpush.bf16.msra.mxu1 %v1191_v1  ;;  %v1198_v6 = vld [vmem:[%s1492_s7 + $0xb0] sm:$0xff]  ;;  %v1197_v10 = vld [vmem:[%s1492_s7 + $0xa8] sm:$0xff]  ;;  %s569_s26 = scalar_lea.vmem %s1570_s3, %s1044_s22  ;;  %s577_s29 = scalar_lea.vmem %s1571_s4, %s1044_s22 }
  0x5c   : > { %v1207_v3 = vld [vmem:[%s1492_s7 + $0xf8] sm:$0xff]  ;;  %880 = vmatpush.bf16.msra.mxu2 %v1199_v2  ;;  %v1206_v7 = vld [vmem:[%s1492_s7 + $0xf0] sm:$0xff]  ;;  %v1205_v11 = vld [vmem:[%s1492_s7 + $0xe8] sm:$0xff] }
  0x5d   : > { %893 = vmatpush.bf16.msra.mxu3 %v1207_v3  ;;  %v1180_v12 = vld [vmem:[%s1492_s7 + $0x20] sm:$0xff]  ;;  %v1179_v16 = vld [vmem:[%s1492_s7 + $0x18] sm:$0xff]  ;;  %v1178_v20 = vld [vmem:[%s1492_s7 + $0x10] sm:$0xff] }
  0x5e   : > { %855 = vmatpush.bf16.msra.mxu0 %v1182_v4  ;;  %v1188_v13 = vld [vmem:[%s1492_s7 + $0x60] sm:$0xff]  ;;  %v1187_v17 = vld [vmem:[%s1492_s7 + $0x58] sm:$0xff]  ;;  %v1186_v21 = vld [vmem:[%s1492_s7 + $0x50] sm:$0xff] }
  0x5f   : > { %868 = vmatpush.bf16.msra.mxu1 %v1190_v5  ;;  %v1196_v14 = vld [vmem:[%s1492_s7 + $0xa0] sm:$0xff]  ;;  %v1195_v18 = vld [vmem:[%s1492_s7 + $0x98] sm:$0xff]  ;;  %v1194_v22 = vld [vmem:[%s1492_s7 + $0x90] sm:$0xff] }
  0x60   : > { %881 = vmatpush.bf16.msra.mxu2 %v1198_v6  ;;  %v1204_v15 = vld [vmem:[%s1492_s7 + $0xe0] sm:$0xff]  ;;  %v1203_v19 = vld [vmem:[%s1492_s7 + $0xd8] sm:$0xff]  ;;  %v1202_v23 = vld [vmem:[%s1492_s7 + $0xd0] sm:$0xff] }
  0x61   : > { %894 = vmatpush.bf16.msra.mxu3 %v1206_v7  ;;  %v1177_v24 = vld [vmem:[%s1492_s7 + $0x8] sm:$0xff]  ;;  %v578_v26 = vld [vmem:[%s1567_s0] sm:$0xff] }
  0x62   : > { %856 = vmatpush.bf16.msra.mxu0 %v1181_v8  ;;  %v1185_v25 = vld [vmem:[%s1492_s7 + $0x48] sm:$0xff]  ;;  %v650_v30 = vunpack.c.l.b16 %v578_v26  ;;  %v651_v31 = vunpack.c.h.b16 %v578_v26  ;;  %v1176_v32 = vld [vmem:[%s1492_s7] sm:$0xff] }
  0x63   : > { %869 = vmatpush.bf16.msra.mxu1 %v1189_v9  ;;  %v1193_v27 = vld [vmem:[%s1492_s7 + $0x88] sm:$0xff]  ;;  %v1184_v33 = vld [vmem:[%s1492_s7 + $0x40] sm:$0xff] }
  0x64   : > { %882 = vmatpush.bf16.msra.mxu2 %v1197_v10  ;;  %v1201_v28 = vld [vmem:[%s1492_s7 + $0xc8] sm:$0xff]  ;;  %v1192_v36 = vld [vmem:[%s1492_s7 + $0x80] sm:$0xff]  ;;  %v654_v38 = vpack.c.b16 %v650_v30, %v650_v30  ;;  %v655_v39 = vpack.c.b16 %v651_v31, %v651_v31 }
  0x65   : > { %895 = vmatpush.bf16.msra.mxu3 %v1205_v11  ;;  %v579_v29 = vld [vmem:[%s1567_s0 + $0x8] sm:$0xff]  ;;  %v1200_v37 = vld [vmem:[%s1492_s7 + $0xc0] sm:$0xff] }
  0x66   : > { %857 = vmatpush.bf16.msra.mxu0 %v1180_v12  ;;  %v652_v34 = vunpack.c.l.b16 %v579_v29  ;;  %v653_v35 = vunpack.c.h.b16 %v579_v29  ;;  %v1248_v42 = vld [vmem:[%s561_s10] ss:$0 sm:$0xff] }
  0x67   : > { %870 = vmatpush.bf16.msra.mxu1 %v1188_v13  ;;  %v906_v52 = vld [vmem:[%s569_s26] sm:$0xff] }
  0x68   : > { %883 = vmatpush.bf16.msra.mxu2 %v1196_v14  ;;  %v656_v40 = vpack.c.b16 %v652_v34, %v652_v34  ;;  %v657_v41 = vpack.c.b16 %v653_v35, %v653_v35 }
  0x69   : > { %896 = vmatpush.bf16.msra.mxu3 %v1204_v15 }
  0x6a   : > { %858 = vmatpush.bf16.msra.mxu0 %v1179_v16 }
  0x6b   : > { %871 = vmatpush.bf16.msra.mxu1 %v1187_v17 }
  0x6c   : > { %884 = vmatpush.bf16.msra.mxu2 %v1195_v18 }
  0x6d   : > { %897 = vmatpush.bf16.msra.mxu3 %v1203_v19 }
  0x6e   : > { %859 = vmatpush.bf16.msra.mxu0 %v1178_v20 }
  0x6f   : > { %872 = vmatpush.bf16.msra.mxu1 %v1186_v21 }
  0x70   : > { %885 = vmatpush.bf16.msra.mxu2 %v1194_v22 }
  0x71   : > { %898 = vmatpush.bf16.msra.mxu3 %v1202_v23 }
  0x72   : > { %860 = vmatpush.bf16.msra.mxu0 %v1177_v24 }
  0x73   : > { %873 = vmatpush.bf16.msra.mxu1 %v1185_v25 }
  0x74   : > { %886 = vmatpush.bf16.msra.mxu2 %v1193_v27 }
  0x75   : > { %899 = vmatpush.bf16.msra.mxu3 %v1201_v28 }
  0x76   : > { %861 = vmatpush.bf16.msra.mxu0 %v1176_v32 }
  0x77   : > { %874 = vmatpush.bf16.msra.mxu1 %v1184_v33 }
  0x78   : > { %887 = vmatpush.bf16.msra.mxu2 %v1192_v36 }
  0x79   : > { %900 = vmatpush.bf16.msra.mxu3 %v1200_v37  ;;  %862 = vmatmul.bf16.vlgmr.msra.gmra.mxu0 %v654_v38 }
  0x7a   : > { %875 = vmatmul.bf16.vlgmr.msra.gmra.mxu1 %v655_v39 }
  0x7b   : > { %888 = vmatmul.bf16.vlgmr.msra.gmra.mxu2 %v656_v40 }
  0x7c   : > { %901 = vmatmul.bf16.vlgmr.msra.gmra.mxu3 %v657_v41 }
  0xf6   : > { %v863_v43 = vpop.f32.mrf.mxu0 }
  0xf7   : > { %v876_v44 = vpop.f32.mrf.mxu1  ;;  %v864_v45 = vadd.f32 %v1248_v42, %v863_v43 }
  0xf9   : > { %v877_v46 = vadd.f32 %v876_v44, %v864_v45 }
  0xfe   : > { %v889_v47 = vpop.f32.mrf.mxu2  ;;  %v865_v50 = vpop.f32.mrf.mxu0 }
  0xff   : > { %v902_v48 = vpop.f32.mrf.mxu3  ;;  %v890_v49 = vadd.f32 %v889_v47, %v877_v46  ;;  %v878_v51 = vpop.f32.mrf.mxu1 }
 0x101   : > { %v903_v53 = vadd.f32 %v902_v48, %v890_v49 }
 0x103   : > { %v907_v54 = vadd.f32 %v906_v52, %v903_v53 }
 0x105   : > { %908 = vst [vmem:[%s577_s29] sm:$0xff] %v907_v54 }
 0x106   : > { %v891_v55 = vpop.f32.mrf.mxu2 }
 0x107   : > { %v904_v56 = vpop.f32.mrf.mxu3 }
 0x108 PF: > { %s14_s19 = sadd.s32 1, %s1287_s19   ;;  %s1572_s15 = smov %s1275_s16 }
 0x109   : > { %p11_p10 = scmp.ge.s32.totalorder %s14_s19, 8   ;;  %s1573_s16 = smov %s1349_s23 }
 0x10a   : > { %s1574_s17 = smov %s1283_s18  ;;  %s1575_s18 = smov %s1577_s20 }
 0x10b   :  { %13 = sbr.rel (!%p11_p10) target bundleno = 3 (0x3), region = 121 }

// kernel: textdiae_forward.42
= control target key start
LH: loop header
LB: loop body
LE: loop exit
PB: predicated region body
PF: predicated region fallthrough
CT: control target
= control target key end

     0   :  { %s1762_s18 = smov 0   ;;  %s1764_s19 = smov 0   ;;  %s2144_s0 = inlined_call_operand.vmem [shape: f32[8,768], index: 0, kind: input, shape index: {}]   ;;  %s2145_s1 = inlined_call_operand.vmem [shape: f32[1,768], index: 1, kind: input, shape index: {}]   ;;  %s2146_s2 = inlined_call_operand.vmem [shape: f32[1,768], index: 2, kind: input, shape index: {}]   ;;  %s2147_s3 = inlined_call_operand.vmem [shape: bf16[768,2048], index: 3, kind: input, shape index: {}]   ;;  %s2148_s4 = inlined_call_operand.vmem [shape: f32[1,2048], index: 4, kind: input, shape index: {}]   ;;  %s2149_s5 = inlined_call_operand.vmem [shape: bf16[8,2048], index: 5, kind: output, shape index: {}]  }
   0x1   :  { %s1766_s20 = smov 0   ;;  %s1768_s21 = smov 0  }
   0x2   :  { %s1770_s22 = smov 0  }
   0x3 LB: > { %s24_s23 = sadd.s32 1, %s1725_s21  ;;  %p109_p1 = scmp.ne.s32.totalorder %s1717_s19, %s1713_s18  ;;  %s1729_s22 = sphi %s1770_s22, %s15_s22   ;;  %s1725_s21 = sphi %s1768_s21, %s2153_s21   ;;  %s1721_s20 = sphi %s1766_s20, %s2152_s20   ;;  %s1717_s19 = sphi %s1764_s19, %s2151_s19   ;;  %s1713_s18 = sphi %s1762_s18, %s2150_s18  }
   0x4   : > { %p25_p0 = scmp.ge.s32.totalorder %s24_s23, 16  ;;  %p110_p2 = scmp.eq.s32.totalorder %s1729_s22, 0 }
   0x5   : > { %s102_s25 = sadd.s32 1, %s1717_s19  ;;  %p1395_p5 = scmp.ge.s32.totalorder %s1729_s22, 16 }
   0x6   : > { %s2155_s23 = smov (%p25_p0, %s24_s23), 0  ;;  %p111_p3 = por %p110_p2, %p109_p1 }
   0x7   : > { %s99_s24 = ssub.s32 %s1725_s21, %s2155_s23  ;;  %203 = sbr.rel (%p1395_p5) target bundleno = 112 (0x70), region = 28 }
   0x8   : > { %p100_p4 = scmp.eq.s32.totalorder %s99_s24, 0 }
   0xa   : > { %s1797_s26 = scalar_select %p100_p4, %s1717_s19, %s102_s25  }
   0xc   : > { %206 = sbr.rel (!%p111_p3) target bundleno = 112 (0x70), region = 32  ;;  %s208_s27 = sand.u32 (%p111_p3), 1, %s1717_s19  }
   0xd   : > { %s1396_s28 = sshll.u32 (%p111_p3), %s1725_s21, 2  ;;  %s1641_s29 = smul.u32 (%p111_p3), 384, %s208_s27 }
   0xe   : > { %s1805_s7 = scalar_lea.vmem (%p111_p3), %s2147_s3, %s1396_s28 }
   0xf   : > { %v229_v0 = vld [vmem:[%s1805_s7] sm:$0xf] (%p111_p3)  ;;  %s1810_s8 = scalar_lea.vmem (%p111_p3), [#allocation2], %s1641_s29 }
  0x10   : > { %v231_v1 = vld [vmem:[%s1805_s7 + $0x40] sm:$0xf] (%p111_p3)  ;;  %230 = vst [vmem:[%s1810_s8] sm:$0xf] (%p111_p3), %v229_v0 }
  0x11   : > { %v233_v2 = vld [vmem:[%s1805_s7 + $0x80] sm:$0xf]  ;;  %232 = vst [vmem:[%s1810_s8 + $0x4] sm:$0xf] %v231_v1 }
  0x12   : > { %v235_v3 = vld [vmem:[%s1805_s7 + $0xc0] sm:$0xf]  ;;  %234 = vst [vmem:[%s1810_s8 + $0x8] sm:$0xf] %v233_v2 }
  0x13   : > { %v237_v4 = vld [vmem:[%s1805_s7 + $0x100] sm:$0xf]  ;;  %236 = vst [vmem:[%s1810_s8 + $0xc] sm:$0xf] %v235_v3 }
  0x14   : > { %v239_v5 = vld [vmem:[%s1805_s7 + $0x140] sm:$0xf]  ;;  %238 = vst [vmem:[%s1810_s8 + $0x10] sm:$0xf] %v237_v4 }
  0x15   : > { %v241_v6 = vld [vmem:[%s1805_s7 + $0x180] sm:$0xf]  ;;  %240 = vst [vmem:[%s1810_s8 + $0x14] sm:$0xf] %v239_v5 }
  0x16   : > { %v243_v7 = vld [vmem:[%s1805_s7 + $0x1c0] sm:$0xf]  ;;  %242 = vst [vmem:[%s1810_s8 + $0x18] sm:$0xf] %v241_v6 }
  0x17   : > { %v245_v8 = vld [vmem:[%s1805_s7 + $0x200] sm:$0xf]  ;;  %244 = vst [vmem:[%s1810_s8 + $0x1c] sm:$0xf] %v243_v7 }
  0x18   : > { %v247_v9 = vld [vmem:[%s1805_s7 + $0x240] sm:$0xf]  ;;  %246 = vst [vmem:[%s1810_s8 + $0x20] sm:$0xf] %v245_v8 }
  0x19   : > { %v249_v10 = vld [vmem:[%s1805_s7 + $0x280] sm:$0xf]  ;;  %248 = vst [vmem:[%s1810_s8 + $0x24] sm:$0xf] %v247_v9 }
  0x1a   : > { %v251_v11 = vld [vmem:[%s1805_s7 + $0x2c0] sm:$0xf]  ;;  %250 = vst [vmem:[%s1810_s8 + $0x28] sm:$0xf] %v249_v10 }
  0x1b   : > { %v253_v12 = vld [vmem:[%s1805_s7 + $0x300] sm:$0xf]  ;;  %252 = vst [vmem:[%s1810_s8 + $0x2c] sm:$0xf] %v251_v11 }
  0x1c   : > { %v255_v13 = vld [vmem:[%s1805_s7 + $0x340] sm:$0xf]  ;;  %254 = vst [vmem:[%s1810_s8 + $0x30] sm:$0xf] %v253_v12 }
  0x1d   : > { %v257_v14 = vld [vmem:[%s1805_s7 + $0x380] sm:$0xf]  ;;  %256 = vst [vmem:[%s1810_s8 + $0x34] sm:$0xf] %v255_v13 }
  0x1e   : > { %v259_v15 = vld [vmem:[%s1805_s7 + $0x3c0] sm:$0xf]  ;;  %258 = vst [vmem:[%s1810_s8 + $0x38] sm:$0xf] %v257_v14 }
  0x1f   : > { %v261_v16 = vld [vmem:[%s1805_s7 + $0x400] sm:$0xf]  ;;  %260 = vst [vmem:[%s1810_s8 + $0x3c] sm:$0xf] %v259_v15 }
  0x20   : > { %v263_v17 = vld [vmem:[%s1805_s7 + $0x440] sm:$0xf]  ;;  %262 = vst [vmem:[%s1810_s8 + $0x40] sm:$0xf] %v261_v16 }
  0x21   : > { %v265_v18 = vld [vmem:[%s1805_s7 + $0x480] sm:$0xf]  ;;  %264 = vst [vmem:[%s1810_s8 + $0x44] sm:$0xf] %v263_v17 }
  0x22   : > { %v267_v19 = vld [vmem:[%s1805_s7 + $0x4c0] sm:$0xf]  ;;  %266 = vst [vmem:[%s1810_s8 + $0x48] sm:$0xf] %v265_v18 }
  0x23   : > { %v269_v20 = vld [vmem:[%s1805_s7 + $0x500] sm:$0xf]  ;;  %268 = vst [vmem:[%s1810_s8 + $0x4c] sm:$0xf] %v267_v19 }
  0x24   : > { %v271_v21 = vld [vmem:[%s1805_s7 + $0x540] sm:$0xf]  ;;  %270 = vst [vmem:[%s1810_s8 + $0x50] sm:$0xf] %v269_v20 }
  0x25   : > { %v273_v22 = vld [vmem:[%s1805_s7 + $0x580] sm:$0xf]  ;;  %272 = vst [vmem:[%s1810_s8 + $0x54] sm:$0xf] %v271_v21 }
  0x26   : > { %v275_v23 = vld [vmem:[%s1805_s7 + $0x5c0] sm:$0xf]  ;;  %274 = vst [vmem:[%s1810_s8 + $0x58] sm:$0xf] %v273_v22 }
  0x27   : > { %v277_v24 = vld [vmem:[%s1805_s7 + $0x600] sm:$0xf]  ;;  %276 = vst [vmem:[%s1810_s8 + $0x5c] sm:$0xf] %v275_v23 }
  0x28   : > { %v279_v25 = vld [vmem:[%s1805_s7 + $0x640] sm:$0xf]  ;;  %278 = vst [vmem:[%s1810_s8 + $0x60] sm:$0xf] %v277_v24 }
  0x29   : > { %v281_v26 = vld [vmem:[%s1805_s7 + $0x680] sm:$0xf]  ;;  %280 = vst [vmem:[%s1810_s8 + $0x64] sm:$0xf] %v279_v25 }
  0x2a   : > { %v283_v27 = vld [vmem:[%s1805_s7 + $0x6c0] sm:$0xf]  ;;  %282 = vst [vmem:[%s1810_s8 + $0x68] sm:$0xf] %v281_v26 }
  0x2b   : > { %v285_v28 = vld [vmem:[%s1805_s7 + $0x700] sm:$0xf]  ;;  %284 = vst [vmem:[%s1810_s8 + $0x6c] sm:$0xf] %v283_v27 }
  0x2c   : > { %v287_v29 = vld [vmem:[%s1805_s7 + $0x740] sm:$0xf]  ;;  %286 = vst [vmem:[%s1810_s8 + $0x70] sm:$0xf] %v285_v28 }
  0x2d   : > { %v289_v30 = vld [vmem:[%s1805_s7 + $0x780] sm:$0xf]  ;;  %288 = vst [vmem:[%s1810_s8 + $0x74] sm:$0xf] %v287_v29 }
  0x2e   : > { %v291_v31 = vld [vmem:[%s1805_s7 + $0x7c0] sm:$0xf]  ;;  %290 = vst [vmem:[%s1810_s8 + $0x78] sm:$0xf] %v289_v30 }
  0x2f   : > { %v293_v32 = vld [vmem:[%s1805_s7 + $0x800] sm:$0xf]  ;;  %292 = vst [vmem:[%s1810_s8 + $0x7c] sm:$0xf] %v291_v31 }
  0x30   : > { %v295_v33 = vld [vmem:[%s1805_s7 + $0x840] sm:$0xf]  ;;  %294 = vst [vmem:[%s1810_s8 + $0x80] sm:$0xf] %v293_v32 }
  0x31   : > { %v297_v34 = vld [vmem:[%s1805_s7 + $0x880] sm:$0xf]  ;;  %296 = vst [vmem:[%s1810_s8 + $0x84] sm:$0xf] %v295_v33 }
  0x32   : > { %v299_v35 = vld [vmem:[%s1805_s7 + $0x8c0] sm:$0xf]  ;;  %298 = vst [vmem:[%s1810_s8 + $0x88] sm:$0xf] %v297_v34 }
  0x33   : > { %v301_v36 = vld [vmem:[%s1805_s7 + $0x900] sm:$0xf]  ;;  %300 = vst [vmem:[%s1810_s8 + $0x8c] sm:$0xf] %v299_v35 }
  0x34   : > { %v303_v37 = vld [vmem:[%s1805_s7 + $0x940] sm:$0xf]  ;;  %302 = vst [vmem:[%s1810_s8 + $0x90] sm:$0xf] %v301_v36 }
  0x35   : > { %v305_v38 = vld [vmem:[%s1805_s7 + $0x980] sm:$0xf]  ;;  %304 = vst [vmem:[%s1810_s8 + $0x94] sm:$0xf] %v303_v37 }
  0x36   : > { %v307_v39 = vld [vmem:[%s1805_s7 + $0x9c0] sm:$0xf]  ;;  %306 = vst [vmem:[%s1810_s8 + $0x98] sm:$0xf] %v305_v38 }
  0x37   : > { %v309_v40 = vld [vmem:[%s1805_s7 + $0xa00] sm:$0xf]  ;;  %308 = vst [vmem:[%s1810_s8 + $0x9c] sm:$0xf] %v307_v39 }
  0x38   : > { %v311_v41 = vld [vmem:[%s1805_s7 + $0xa40] sm:$0xf]  ;;  %310 = vst [vmem:[%s1810_s8 + $0xa0] sm:$0xf] %v309_v40 }
  0x39   : > { %v313_v42 = vld [vmem:[%s1805_s7 + $0xa80] sm:$0xf]  ;;  %312 = vst [vmem:[%s1810_s8 + $0xa4] sm:$0xf] %v311_v41 }
  0x3a   : > { %v315_v43 = vld [vmem:[%s1805_s7 + $0xac0] sm:$0xf]  ;;  %314 = vst [vmem:[%s1810_s8 + $0xa8] sm:$0xf] %v313_v42 }
  0x3b   : > { %v317_v44 = vld [vmem:[%s1805_s7 + $0xb00] sm:$0xf]  ;;  %316 = vst [vmem:[%s1810_s8 + $0xac] sm:$0xf] %v315_v43 }
  0x3c   : > { %v319_v45 = vld [vmem:[%s1805_s7 + $0xb40] sm:$0xf]  ;;  %318 = vst [vmem:[%s1810_s8 + $0xb0] sm:$0xf] %v317_v44 }
  0x3d   : > { %v321_v46 = vld [vmem:[%s1805_s7 + $0xb80] sm:$0xf]  ;;  %320 = vst [vmem:[%s1810_s8 + $0xb4] sm:$0xf] %v319_v45 }
  0x3e   : > { %v323_v47 = vld [vmem:[%s1805_s7 + $0xbc0] sm:$0xf]  ;;  %322 = vst [vmem:[%s1810_s8 + $0xb8] sm:$0xf] %v321_v46 }
  0x3f   : > { %v325_v48 = vld [vmem:[%s1805_s7 + $0xc00] sm:$0xf]  ;;  %324 = vst [vmem:[%s1810_s8 + $0xbc] sm:$0xf] %v323_v47 }
  0x40   : > { %v327_v49 = vld [vmem:[%s1805_s7 + $0xc40] sm:$0xf]  ;;  %326 = vst [vmem:[%s1810_s8 + $0xc0] sm:$0xf] %v325_v48 }
  0x41   : > { %v329_v50 = vld [vmem:[%s1805_s7 + $0xc80] sm:$0xf]  ;;  %328 = vst [vmem:[%s1810_s8 + $0xc4] sm:$0xf] %v327_v49 }
  0x42   : > { %v331_v51 = vld [vmem:[%s1805_s7 + $0xcc0] sm:$0xf]  ;;  %330 = vst [vmem:[%s1810_s8 + $0xc8] sm:$0xf] %v329_v50 }
  0x43   : > { %v333_v52 = vld [vmem:[%s1805_s7 + $0xd00] sm:$0xf]  ;;  %332 = vst [vmem:[%s1810_s8 + $0xcc] sm:$0xf] %v331_v51 }
  0x44   : > { %v335_v53 = vld [vmem:[%s1805_s7 + $0xd40] sm:$0xf]  ;;  %334 = vst [vmem:[%s1810_s8 + $0xd0] sm:$0xf] %v333_v52 }
  0x45   : > { %v337_v54 = vld [vmem:[%s1805_s7 + $0xd80] sm:$0xf]  ;;  %336 = vst [vmem:[%s1810_s8 + $0xd4] sm:$0xf] %v335_v53 }
  0x46   : > { %v339_v55 = vld [vmem:[%s1805_s7 + $0xdc0] sm:$0xf]  ;;  %338 = vst [vmem:[%s1810_s8 + $0xd8] sm:$0xf] %v337_v54 }
  0x47   : > { %v341_v56 = vld [vmem:[%s1805_s7 + $0xe00] sm:$0xf]  ;;  %340 = vst [vmem:[%s1810_s8 + $0xdc] sm:$0xf] %v339_v55 }
  0x48   : > { %v343_v57 = vld [vmem:[%s1805_s7 + $0xe40] sm:$0xf]  ;;  %342 = vst [vmem:[%s1810_s8 + $0xe0] sm:$0xf] %v341_v56 }
  0x49   : > { %v345_v58 = vld [vmem:[%s1805_s7 + $0xe80] sm:$0xf]  ;;  %344 = vst [vmem:[%s1810_s8 + $0xe4] sm:$0xf] %v343_v57 }
  0x4a   : > { %v347_v59 = vld [vmem:[%s1805_s7 + $0xec0] sm:$0xf]  ;;  %346 = vst [vmem:[%s1810_s8 + $0xe8] sm:$0xf] %v345_v58 }
  0x4b   : > { %v349_v60 = vld [vmem:[%s1805_s7 + $0xf00] sm:$0xf]  ;;  %348 = vst [vmem:[%s1810_s8 + $0xec] sm:$0xf] %v347_v59 }
  0x4c   : > { %v351_v61 = vld [vmem:[%s1805_s7 + $0xf40] sm:$0xf]  ;;  %350 = vst [vmem:[%s1810_s8 + $0xf0] sm:$0xf] %v349_v60 }
  0x4d   : > { %v353_v62 = vld [vmem:[%s1805_s7 + $0xf80] sm:$0xf]  ;;  %352 = vst [vmem:[%s1810_s8 + $0xf4] sm:$0xf] %v351_v61 }
  0x4e   : > { %v355_v63 = vld [vmem:[%s1805_s7 + $0xfc0] sm:$0xf]  ;;  %354 = vst [vmem:[%s1810_s8 + $0xf8] sm:$0xf] %v353_v62 }
  0x4f   : > { %v357_v0 = vld [vmem:[%s1805_s7 + $0x1000] sm:$0xf]  ;;  %356 = vst [vmem:[%s1810_s8 + $0xfc] sm:$0xf] %v355_v63 }
  0x50   : > { %v359_v1 = vld [vmem:[%s1805_s7 + $0x1040] sm:$0xf]  ;;  %358 = vst [vmem:[%s1810_s8 + $0x100] sm:$0xf] %v357_v0 }
  0x51   : > { %v361_v2 = vld [vmem:[%s1805_s7 + $0x1080] sm:$0xf]  ;;  %360 = vst [vmem:[%s1810_s8 + $0x104] sm:$0xf] %v359_v1 }
  0x52   : > { %v363_v3 = vld [vmem:[%s1805_s7 + $0x10c0] sm:$0xf]  ;;  %362 = vst [vmem:[%s1810_s8 + $0x108] sm:$0xf] %v361_v2 }
  0x53   : > { %v365_v4 = vld [vmem:[%s1805_s7 + $0x1100] sm:$0xf]  ;;  %364 = vst [vmem:[%s1810_s8 + $0x10c] sm:$0xf] %v363_v3 }
  0x54   : > { %v367_v5 = vld [vmem:[%s1805_s7 + $0x1140] sm:$0xf]  ;;  %366 = vst [vmem:[%s1810_s8 + $0x110] sm:$0xf] %v365_v4 }
  0x55   : > { %v369_v6 = vld [vmem:[%s1805_s7 + $0x1180] sm:$0xf]  ;;  %368 = vst [vmem:[%s1810_s8 + $0x114] sm:$0xf] %v367_v5 }
  0x56   : > { %v371_v7 = vld [vmem:[%s1805_s7 + $0x11c0] sm:$0xf]  ;;  %370 = vst [vmem:[%s1810_s8 + $0x118] sm:$0xf] %v369_v6 }
  0x57   : > { %v373_v8 = vld [vmem:[%s1805_s7 + $0x1200] sm:$0xf]  ;;  %372 = vst [vmem:[%s1810_s8 + $0x11c] sm:$0xf] %v371_v7 }
  0x58   : > { %v375_v9 = vld [vmem:[%s1805_s7 + $0x1240] sm:$0xf]  ;;  %374 = vst [vmem:[%s1810_s8 + $0x120] sm:$0xf] %v373_v8 }
  0x59   : > { %v377_v10 = vld [vmem:[%s1805_s7 + $0x1280] sm:$0xf]  ;;  %376 = vst [vmem:[%s1810_s8 + $0x124] sm:$0xf] %v375_v9 }
  0x5a   : > { %v379_v11 = vld [vmem:[%s1805_s7 + $0x12c0] sm:$0xf]  ;;  %378 = vst [vmem:[%s1810_s8 + $0x128] sm:$0xf] %v377_v10 }
  0x5b   : > { %v381_v12 = vld [vmem:[%s1805_s7 + $0x1300] sm:$0xf]  ;;  %380 = vst [vmem:[%s1810_s8 + $0x12c] sm:$0xf] %v379_v11 }
  0x5c   : > { %v383_v13 = vld [vmem:[%s1805_s7 + $0x1340] sm:$0xf]  ;;  %382 = vst [vmem:[%s1810_s8 + $0x130] sm:$0xf] %v381_v12 }
  0x5d   : > { %v385_v14 = vld [vmem:[%s1805_s7 + $0x1380] sm:$0xf]  ;;  %384 = vst [vmem:[%s1810_s8 + $0x134] sm:$0xf] %v383_v13 }
  0x5e   : > { %v387_v15 = vld [vmem:[%s1805_s7 + $0x13c0] sm:$0xf]  ;;  %386 = vst [vmem:[%s1810_s8 + $0x138] sm:$0xf] %v385_v14 }
  0x5f   : > { %v389_v16 = vld [vmem:[%s1805_s7 + $0x1400] sm:$0xf]  ;;  %388 = vst [vmem:[%s1810_s8 + $0x13c] sm:$0xf] %v387_v15 }
  0x60   : > { %v391_v17 = vld [vmem:[%s1805_s7 + $0x1440] sm:$0xf]  ;;  %390 = vst [vmem:[%s1810_s8 + $0x140] sm:$0xf] %v389_v16 }
  0x61   : > { %v393_v18 = vld [vmem:[%s1805_s7 + $0x1480] sm:$0xf]  ;;  %392 = vst [vmem:[%s1810_s8 + $0x144] sm:$0xf] %v391_v17 }
  0x62   : > { %v395_v19 = vld [vmem:[%s1805_s7 + $0x14c0] sm:$0xf]  ;;  %394 = vst [vmem:[%s1810_s8 + $0x148] sm:$0xf] %v393_v18 }
  0x63   : > { %v397_v20 = vld [vmem:[%s1805_s7 + $0x1500] sm:$0xf]  ;;  %396 = vst [vmem:[%s1810_s8 + $0x14c] sm:$0xf] %v395_v19 }
  0x64   : > { %v399_v21 = vld [vmem:[%s1805_s7 + $0x1540] sm:$0xf]  ;;  %398 = vst [vmem:[%s1810_s8 + $0x150] sm:$0xf] %v397_v20 }
  0x65   : > { %v401_v22 = vld [vmem:[%s1805_s7 + $0x1580] sm:$0xf]  ;;  %400 = vst [vmem:[%s1810_s8 + $0x154] sm:$0xf] %v399_v21 }
  0x66   : > { %v403_v23 = vld [vmem:[%s1805_s7 + $0x15c0] sm:$0xf]  ;;  %402 = vst [vmem:[%s1810_s8 + $0x158] sm:$0xf] %v401_v22 }
  0x67   : > { %v405_v24 = vld [vmem:[%s1805_s7 + $0x1600] sm:$0xf]  ;;  %404 = vst [vmem:[%s1810_s8 + $0x15c] sm:$0xf] %v403_v23 }
  0x68   : > { %v407_v25 = vld [vmem:[%s1805_s7 + $0x1640] sm:$0xf]  ;;  %406 = vst [vmem:[%s1810_s8 + $0x160] sm:$0xf] %v405_v24 }
  0x69   : > { %v409_v26 = vld [vmem:[%s1805_s7 + $0x1680] sm:$0xf]  ;;  %408 = vst [vmem:[%s1810_s8 + $0x164] sm:$0xf] %v407_v25 }
  0x6a   : > { %v411_v27 = vld [vmem:[%s1805_s7 + $0x16c0] sm:$0xf]  ;;  %410 = vst [vmem:[%s1810_s8 + $0x168] sm:$0xf] %v409_v26 }
  0x6b   : > { %v413_v28 = vld [vmem:[%s1805_s7 + $0x1700] sm:$0xf]  ;;  %412 = vst [vmem:[%s1810_s8 + $0x16c] sm:$0xf] %v411_v27 }
  0x6c   : > { %v415_v29 = vld [vmem:[%s1805_s7 + $0x1740] sm:$0xf]  ;;  %414 = vst [vmem:[%s1810_s8 + $0x170] sm:$0xf] %v413_v28 }
  0x6d   : > { %v417_v30 = vld [vmem:[%s1805_s7 + $0x1780] sm:$0xf]  ;;  %416 = vst [vmem:[%s1810_s8 + $0x174] sm:$0xf] %v415_v29 }
  0x6e   : > { %v419_v31 = vld [vmem:[%s1805_s7 + $0x17c0] sm:$0xf]  ;;  %418 = vst [vmem:[%s1810_s8 + $0x178] sm:$0xf] %v417_v30 }
  0x6f   : > { %420 = vst [vmem:[%s1810_s8 + $0x17c] sm:$0xf] %v419_v31 }
  0x70 PF: > { %p1397_p6 = scmp.ge.s32.totalorder %s1729_s22, 1  ;;  %p641_p7 = scmp.lt.s32.totalorder %s1729_s22, 17 }
  0x72   : > { %p642_p8 = pnand %p1397_p6, %p641_p7 }
  0x73   : > { %s648_s28 = sand.u32 (!%p642_p8), 1, %s1713_s18   ;;  %p691_p9 = scmp.lt.s32.totalorder (!%p642_p8), %s1721_s20, 15 }
  0x74   : > { %645 = sbr.rel (%p642_p8) target bundleno = 580 (0x244), region = 77 }
  0x75   : > { %s1642_s29 = smul.u32 (!%p642_p8), 384, %s648_s28 }
  0x77   : > { %s2022_s30 = scalar_lea.vmem (!%p642_p8), [#allocation2], %s1642_s29 }
  0x79   : > { %v702_v32 = vld [vmem:[%s2144_s0] sm:$0xff]  ;;  %v703_v33 = vld [vmem:[%s2144_s0 + $0x8] sm:$0xff]  ;;  %v704_v34 = vld [vmem:[%s2144_s0 + $0x10] sm:$0xff]  ;;  %v1731_v43 = vmov 768.0   ;;  %s2157_s20 = smov (!%p691_p9, %s1721_s20), 15 }
  0x7a   : > { %v708_v35 = vadd.f32 %v703_v33, %v702_v32  ;;  %v705_v36 = vld [vmem:[%s2144_s0 + $0x18] sm:$0xff]  ;;  %v706_v38 = vld [vmem:[%s2144_s0 + $0x20] sm:$0xff]  ;;  %v707_v40 = vld [vmem:[%s2144_s0 + $0x28] sm:$0xff]  ;;  %1685 = vrcp.f32 %v1731_v43  ;;  %s693_s7 = scalar_lea.vmem %s2148_s4, %s2157_s20  ;;  %s1398_s14 = sshll.u32 %s2157_s20, 2 }
  0x7b   : > { %v1600_v46 = vld [vmem:[%s2022_s30 + $0x38] sm:$0xff]  ;;  %v1599_v49 = vld [vmem:[%s2022_s30 + $0x30] sm:$0xff]  ;;  %v1598_v52 = vld [vmem:[%s2022_s30 + $0x28] sm:$0xff]  ;;  %s701_s17 = scalar_lea.vmem %s2149_s5, %s1398_s14 }
  0x7c   : > { %v709_v37 = vadd.f32 %v708_v35, %v704_v34  ;;  %v1608_v47 = vld [vmem:[%s2022_s30 + $0x78] sm:$0xff]  ;;  %1194 = vmatpush.bf16.msra.mxu0 %v1600_v46  ;;  %v1607_v50 = vld [vmem:[%s2022_s30 + $0x70] sm:$0xff]  ;;  %v1606_v53 = vld [vmem:[%s2022_s30 + $0x68] sm:$0xff] }
  0x7d   : > { %1207 = vmatpush.bf16.msra.mxu1 %v1608_v47  ;;  %v1597_v55 = vld [vmem:[%s2022_s30 + $0x20] sm:$0xff]  ;;  %v1616_v13 = vld [vmem:[%s2022_s30 + $0xb8] sm:$0xff]  ;;  %v1615_v17 = vld [vmem:[%s2022_s30 + $0xb0] sm:$0xff] }
  0x7e   : > { %v710_v39 = vadd.f32 %v709_v37, %v705_v36  ;;  %v1605_v56 = vld [vmem:[%s2022_s30 + $0x60] sm:$0xff]  ;;  %v1624_v14 = vld [vmem:[%s2022_s30 + $0xf8] sm:$0xff]  ;;  %1220 = vmatpush.bf16.msra.mxu2 %v1616_v13  ;;  %v1623_v18 = vld [vmem:[%s2022_s30 + $0xf0] sm:$0xff] }
  0x7f   : > { %1233 = vmatpush.bf16.msra.mxu3 %v1624_v14  ;;  %v1596_v15 = vld [vmem:[%s2022_s30 + $0x18] sm:$0xff]  ;;  %v1595_v19 = vld [vmem:[%s2022_s30 + $0x10] sm:$0xff]  ;;  %v1614_v21 = vld [vmem:[%s2022_s30 + $0xa8] sm:$0xff] }
  0x80   : > { %v711_v41 = vadd.f32 %v710_v39, %v706_v38  ;;  %v1686_v44 = vpop.eup %1685  ;;  %1195 = vmatpush.bf16.msra.mxu0 %v1599_v49  ;;  %v1604_v16 = vld [vmem:[%s2022_s30 + $0x58] sm:$0xff]  ;;  %v1603_v20 = vld [vmem:[%s2022_s30 + $0x50] sm:$0xff]  ;;  %v1622_v22 = vld [vmem:[%s2022_s30 + $0xe8] sm:$0xff] }
  0x81   : > { %v716_v45 = vmul.f32 768.0, %v1686_v44  ;;  %1208 = vmatpush.bf16.msra.mxu1 %v1607_v50  ;;  %vm720_vm0 = vweird.f32 %v1686_v44  ;;  %v1594_v23 = vld [vmem:[%s2022_s30 + $0x8] sm:$0xff]  ;;  %v1613_v25 = vld [vmem:[%s2022_s30 + $0xa0] sm:$0xff]  ;;  %v1612_v29 = vld [vmem:[%s2022_s30 + $0x98] sm:$0xff] }
  0x82   : > { %v712_v42 = vadd.f32 %v711_v41, %v707_v40  ;;  %1221 = vmatpush.bf16.msra.mxu2 %v1615_v17  ;;  %v1602_v24 = vld [vmem:[%s2022_s30 + $0x48] sm:$0xff]  ;;  %v1621_v26 = vld [vmem:[%s2022_s30 + $0xe0] sm:$0xff]  ;;  %v1620_v30 = vld [vmem:[%s2022_s30 + $0xd8] sm:$0xff] }
  0x83   : > { %v717_v48 = vsub.f32 1.0, %v716_v45  ;;  %1234 = vmatpush.bf16.msra.mxu3 %v1623_v18  ;;  %v1593_v27 = vld [vmem:[%s2022_s30] sm:$0xff]  ;;  %v1632_v31 = vld [vmem:[%s2022_s30 + $0x138] sm:$0xff]  ;;  %v1631_v35 = vld [vmem:[%s2022_s30 + $0x130] sm:$0xff] }
  0x84   : > { %713 = vadd.xlane.f32.xlu0 %v712_v42  ;;  %1196 = vmatpush.bf16.msra.mxu0 %v1598_v52  ;;  %v1601_v28 = vld [vmem:[%s2022_s30 + $0x40] sm:$0xff]  ;;  %v1610_v37 = vld [vmem:[%s2022_s30 + $0x88] sm:$0xff]  ;;  %v1628_v45 = vld [vmem:[%s2022_s30 + $0x118] sm:$0xff] }
  0x85   : > { %v718_v51 = vmul.f32 %v1686_v44, %v717_v48  ;;  %1209 = vmatpush.bf16.msra.mxu1 %v1606_v53  ;;  %v1630_v39 = vld [vmem:[%s2022_s30 + $0x128] sm:$0xff]  ;;  %v1609_v41 = vld [vmem:[%s2022_s30 + $0x80] sm:$0xff]  ;;  %v1636_v46 = vld [vmem:[%s2022_s30 + $0x158] sm:$0xff] }
  0x86   : > { %1222 = vmatpush.bf16.msra.mxu2 %v1614_v21  ;;  %v1617_v42 = vld [vmem:[%s2022_s30 + $0xc0] sm:$0xff]  ;;  %v1627_v49 = vld [vmem:[%s2022_s30 + $0x110] sm:$0xff]  ;;  %v1626_v52 = vld [vmem:[%s2022_s30 + $0x108] sm:$0xff] }
  0x87   : > { %v719_v54 = vadd.f32 %v1686_v44, %v718_v51  ;;  %1235 = vmatpush.bf16.msra.mxu3 %v1622_v22  ;;  %v1629_v43 = vld [vmem:[%s2022_s30 + $0x120] sm:$0xff]  ;;  %v1635_v50 = vld [vmem:[%s2022_s30 + $0x150] sm:$0xff]  ;;  %v1634_v53 = vld [vmem:[%s2022_s30 + $0x148] sm:$0xff] }
  0x88   : > { %1197 = vmatpush.bf16.msra.mxu0 %v1597_v55  ;;  %v1633_v55 = vld [vmem:[%s2022_s30 + $0x140] sm:$0xff] }
  0x89   : > { %v2032_v57 = vsel %vm720_vm0, %v1686_v44, %v719_v54  ;;  %1210 = vmatpush.bf16.msra.mxu1 %v1605_v56  ;;  %v1637_v44 = vld [vmem:[%s2022_s30 + $0x160] sm:$0xff] }
  0x8a   : > { %1223 = vmatpush.bf16.msra.mxu2 %v1613_v25  ;;  %v1625_v54 = vld [vmem:[%s2022_s30 + $0x100] sm:$0xff] }
  0x8b   : > { %1236 = vmatpush.bf16.msra.mxu3 %v1621_v26 }
  0x8c   : > { %1198 = vmatpush.bf16.msra.mxu0 %v1596_v15 }
  0x8d   : > { %1211 = vmatpush.bf16.msra.mxu1 %v1604_v16 }
  0x8e   : > { %1224 = vmatpush.bf16.msra.mxu2 %v1612_v29 }
  0x8f   : > { %1237 = vmatpush.bf16.msra.mxu3 %v1620_v30 }
  0x90   : > { %1199 = vmatpush.bf16.msra.mxu0 %v1595_v19 }
  0x91   : > { %1212 = vmatpush.bf16.msra.mxu1 %v1603_v20 }
  0x94   : > { %1200 = vmatpush.bf16.msra.mxu0 %v1594_v23 }
  0x95   : > { %1213 = vmatpush.bf16.msra.mxu1 %v1602_v24 }
  0x98   : > { %1201 = vmatpush.bf16.msra.mxu0 %v1593_v27 }
  0x99   : > { %1214 = vmatpush.bf16.msra.mxu1 %v1601_v28 }
  0x9c   : > { %1246 = vmatpush.bf16.msrb.mxu0 %v1632_v31 }
  0xa0   : > { %1247 = vmatpush.bf16.msrb.mxu0 %v1631_v35 }
  0xa4   : > { %1248 = vmatpush.bf16.msrb.mxu0 %v1630_v39 }
  0xa8   : > { %1249 = vmatpush.bf16.msrb.mxu0 %v1629_v43 }
  0xac   : > { %1250 = vmatpush.bf16.msrb.mxu0 %v1628_v45 }
  0xb0   : > { %1251 = vmatpush.bf16.msrb.mxu0 %v1627_v49 }
  0xb4   : > { %1252 = vmatpush.bf16.msrb.mxu0 %v1626_v52 }
  0xb8   : > { %1253 = vmatpush.bf16.msrb.mxu0 %v1625_v54 }
  0xf7   : > { %v714_v58 = vpop.xlane.xlu0 %713 }
  0xf8   : > { %v722_v59 = vmul.f32 %v2032_v57, %v714_v58 }
  0xfa   : > { %v2035_v60 = vsub.f32 %v702_v32, %v722_v59  ;;  %v2037_v61 = vsub.f32 %v703_v33, %v722_v59  ;;  %v2039_v62 = vsub.f32 %v704_v34, %v722_v59  ;;  %v2041_v63 = vsub.f32 %v705_v36, %v722_v59  ;;  %v1640_v32 = vld [vmem:[%s2022_s30 + $0x178] sm:$0xff]  ;;  %v1611_v33 = vld [vmem:[%s2022_s30 + $0x90] sm:$0xff] }
  0xfb   : > { %v2047_v2 = vsub.f32 %v706_v38, %v722_v59  ;;  %v2051_v5 = vsub.f32 %v707_v40, %v722_v59  ;;  %1259 = vmatpush.bf16.msrb.mxu1 %v1640_v32  ;;  %v1619_v34 = vld [vmem:[%s2022_s30 + $0xd0] sm:$0xff]  ;;  %1225 = vmatpush.bf16.msra.mxu2 %v1611_v33  ;;  %v1618_v38 = vld [vmem:[%s2022_s30 + $0xc8] sm:$0xff] }
  0xfc   : > { %v729_v0 = vmul.f32 %v2035_v60, %v2035_v60  ;;  %v730_v1 = vmul.f32 %v2037_v61, %v2037_v61  ;;  %v731_v3 = vmul.f32 %v2039_v62, %v2039_v62  ;;  %v732_v6 = vmul.f32 %v2041_v63, %v2041_v63  ;;  %v1639_v36 = vld [vmem:[%s2022_s30 + $0x170] sm:$0xff]  ;;  %1238 = vmatpush.bf16.msra.mxu3 %v1619_v34  ;;  %v1638_v40 = vld [vmem:[%s2022_s30 + $0x168] sm:$0xff] }
  0xfd   : > { %v733_v8 = vmul.f32 %v2047_v2, %v2047_v2  ;;  %v734_v10 = vmul.f32 %v2051_v5, %v2051_v5 }
  0xfe   : > { %v735_v4 = vadd.f32 %v730_v1, %v729_v0  ;;  %v760_v0 = vld [vmem:[%s2145_s1] sm:$0x3f] }
  0xff   : > { %1260 = vmatpush.bf16.msrb.mxu1 %v1639_v36  ;;  %1226 = vmatpush.bf16.msra.mxu2 %v1610_v37 }
 0x100   : > { %v736_v7 = vadd.f32 %v735_v4, %v731_v3  ;;  %1239 = vmatpush.bf16.msra.mxu3 %v1618_v38  ;;  %v780_v3 = vld [vmem:[%s2146_s2] sm:$0x3f] }
 0x101   : > { %v784_v13 = vperm.slane %v780_v3, 2  ;;  %v785_v14 = vperm.slane %v780_v3, 3  ;;  %v786_v32 = vperm.slane %v780_v3, 4  ;;  %v787_v34 = vperm.slane %v780_v3, 5 }
 0x102   : > { %v737_v9 = vadd.f32 %v736_v7, %v732_v6  ;;  %v762_v6 = vperm.slane %v760_v0, 0  ;;  %v782_v7 = vperm.slane %v780_v3, 0 }
 0x103   : > { %1261 = vmatpush.bf16.msrb.mxu1 %v1638_v40  ;;  %1227 = vmatpush.bf16.msra.mxu2 %v1609_v41 }
 0x104   : > { %v738_v11 = vadd.f32 %v737_v9, %v733_v8  ;;  %1240 = vmatpush.bf16.msra.mxu3 %v1617_v42  ;;  %v763_v8 = vperm.slane %v760_v0, 1  ;;  %v764_v9 = vperm.slane %v760_v0, 2 }
 0x106   : > { %v739_v12 = vadd.f32 %v738_v11, %v734_v10  ;;  %v765_v10 = vperm.slane %v760_v0, 3 }
 0x107   : > { %1262 = vmatpush.bf16.msrb.mxu1 %v1637_v44 }
 0x108   : > { %740 = vadd.xlane.f32.xlu0 %v739_v12  ;;  %v783_v12 = vperm.slane %v780_v3, 1 }
 0x10b   : > { %1263 = vmatpush.bf16.msrb.mxu1 %v1636_v46 }
 0x10f   : > { %1264 = vmatpush.bf16.msrb.mxu1 %v1635_v50 }
 0x113   : > { %1265 = vmatpush.bf16.msrb.mxu1 %v1634_v53 }
 0x117   : > { %1266 = vmatpush.bf16.msrb.mxu1 %v1633_v55 }
 0x17b   : > { %v741_v47 = vpop.xlane.xlu0 %740 }
 0x17c   : > { %v742_v48 = vmul.f32 %v741_v47, %v2032_v57 }
 0x17e   : > { %v743_v51 = vadd.f32 1e-05, %v742_v48 }
 0x180   : > { %1687 = vrsqrt.f32 %v743_v51  ;;  %vm750_vm2 = vweird.f32 %v743_v51 }
 0x186   : > { %v1688_v56 = vpop.eup %1687 }
 0x187   : > { %v745_v58 = vmul.f32 %v1688_v56, %v743_v51  ;;  %vm751_vm1 = vweird.f32 %v1688_v56 }
 0x188   : > { %vm752_vm3 = vmor %vm750_vm2, %vm751_vm1 }
 0x189   : > { %v746_v59 = vmul.f32 %v1688_v56, %v745_v58 }
 0x18b   : > { %v747_v57 = vmul.f32 0.5, %v746_v59 }
 0x18d   : > { %v748_v1 = vsub.f32 1.5, %v747_v57 }
 0x18f   : > { %v749_v4 = vmul.f32 %v1688_v56, %v748_v1 }
 0x191   : > { %v753_v11 = vsel %vm752_vm3, %v1688_v56, %v749_v4 }
 0x192   : > { %v754_v15 = vmul.f32 %v753_v11, %v2035_v60  ;;  %v755_v16 = vmul.f32 %v753_v11, %v2037_v61  ;;  %v756_v17 = vmul.f32 %v753_v11, %v2039_v62  ;;  %v757_v18 = vmul.f32 %v753_v11, %v2041_v63 }
 0x193   : > { %v758_v60 = vmul.f32 %v753_v11, %v2047_v2  ;;  %v766_v61 = vperm.slane %v760_v0, 4  ;;  %v759_v62 = vmul.f32 %v753_v11, %v2051_v5  ;;  %v767_v63 = vperm.slane %v760_v0, 5  ;;  %v1684_v2 = vld [vmem:[%s693_s7] ss:$0 sm:$0xff] }
 0x194   : > { %v774_v19 = vmul.f32 %v762_v6, %v754_v15  ;;  %v775_v20 = vmul.f32 %v763_v8, %v755_v16  ;;  %v776_v21 = vmul.f32 %v764_v9, %v756_v17  ;;  %v777_v22 = vmul.f32 %v765_v10, %v757_v18 }
 0x195   : > { %v778_v31 = vmul.f32 %v766_v61, %v758_v60  ;;  %v779_v33 = vmul.f32 %v767_v63, %v759_v62 }
 0x196   : > { %v794_v23 = vadd.f32 %v782_v7, %v774_v19  ;;  %v795_v24 = vadd.f32 %v783_v12, %v775_v20  ;;  %v796_v25 = vadd.f32 %v784_v13, %v776_v21  ;;  %v797_v26 = vadd.f32 %v785_v14, %v777_v22 }
 0x197   : > { %v798_v35 = vadd.f32 %v786_v32, %v778_v31  ;;  %v799_v36 = vadd.f32 %v787_v34, %v779_v33 }
 0x198   : > { %v800_v27 = vpack.c.bf16 %v794_v23, %v794_v23  ;;  %v801_v28 = vpack.c.bf16 %v795_v24, %v795_v24  ;;  %v802_v29 = vpack.c.bf16 %v796_v25, %v796_v25  ;;  %v803_v30 = vpack.c.bf16 %v797_v26, %v797_v26 }
 0x199   : > { %v804_v37 = vpack.c.bf16 %v798_v35, %v798_v35  ;;  %v805_v38 = vpack.c.bf16 %v799_v36, %v799_v36 }
 0x19a   : > { %1202 = vmatmul.bf16.vlgmr.msra.gmra.mxu0 %v800_v27  ;;  %1215 = vmatmul.bf16.vlgmr.msra.gmra.mxu1 %v801_v28 }
 0x19b   : > { %1228 = vmatmul.bf16.vlgmr.msra.gmra.mxu2 %v802_v29  ;;  %1241 = vmatmul.bf16.vlgmr.msra.gmra.mxu3 %v803_v30 }
 0x1aa   : > { %1254 = vmatmul.bf16.vlgmr.msrb.gmra.mxu0 %v804_v37  ;;  %1267 = vmatmul.bf16.vlgmr.msrb.gmra.mxu1 %v805_v38 }
 0x217   : > { %v1203_v39 = vpop.f32.mrf.mxu0  ;;  %v1216_v40 = vpop.f32.mrf.mxu1 }
 0x218   : > { %v1204_v41 = vadd.f32 %v1684_v2, %v1203_v39 }
 0x21a   : > { %v1217_v45 = vadd.f32 %v1216_v40, %v1204_v41 }
 0x21e   : > { %v1229_v5 = vpop.f32.mrf.mxu2  ;;  %v1242_v42 = vpop.f32.mrf.mxu3 }
 0x21f   : > { %v1205_v43 = vpop.f32.mrf.mxu0  ;;  %v1218_v44 = vpop.f32.mrf.mxu1  ;;  %v1230_v46 = vadd.f32 %v1229_v5, %v1217_v45 }
 0x221   : > { %v1243_v47 = vadd.f32 %v1242_v42, %v1230_v46 }
 0x226   : > { %v1231_v48 = vpop.f32.mrf.mxu2  ;;  %v1244_v49 = vpop.f32.mrf.mxu3 }
 0x227   : > { %v1255_v50 = vpop.f32.mrf.mxu0  ;;  %v1268_v51 = vpop.f32.mrf.mxu1 }
 0x228   : > { %v1256_v52 = vadd.f32 %v1255_v50, %v1243_v47 }
 0x22a   : > { %v1269_v53 = vadd.f32 %v1268_v51, %v1256_v52 }
 0x22c   : > { %v1273_v54 = vmul.f32 0.044715, %v1269_v53  ;;  %v1272_v3 = vmul.f32 0.5, %v1269_v53 }
 0x22e   : > { %v1274_v55 = vmul.f32 %v1273_v54, %v1269_v53 }
 0x22f   : > { %v1257_v56 = vpop.f32.mrf.mxu0  ;;  %v1270_v58 = vpop.f32.mrf.mxu1 }
 0x230   : > { %v1275_v59 = vmul.f32 %v1274_v55, %v1269_v53 }
 0x232   : > { %v1276_v57 = vadd.f32 %v1275_v59, %v1269_v53 }
 0x234   : > { %v1277_v0 = vmul.f32 0.7978846, %v1276_v57 }
 0x236   : > { %1689 = vtanh.f32 %v1277_v0 }
 0x23c   : > { %v1690_v1 = vpop.eup %1689 }
 0x23d   : > { %v1279_v4 = vadd.f32 1.0, %v1690_v1 }
 0x23f   : > { %v1280_v6 = vmul.f32 %v1279_v4, %v1272_v3 }
 0x241   : > { %v1281_v7 = vpack.c.bf16 %v1280_v6, %v1280_v6 }
 0x243   : > { %1282 = vst [vmem:[%s701_s17] sm:$0xf] %v1281_v7 }
 0x244 PF: > { %s15_s22 = sadd.s32 1, %s1729_s22   ;;  %s2150_s18 = smov %s1717_s19 }
 0x245   : > { %p12_p10 = scmp.ge.s32.totalorder %s15_s22, 18   ;;  %s2151_s19 = smov %s1797_s26 }
 0x246   : > { %s2152_s20 = smov %s1725_s21  ;;  %s2153_s21 = smov %s2155_s23 }
 0x247   :  { %14 = sbr.rel (!%p12_p10) target bundleno = 3 (0x3), region = 122 }

// kernel: textdiae_forward.69
= control target key start
LH: loop header
LB: loop body
LE: loop exit
PB: predicated region body
PF: predicated region fallthrough
CT: control target
= control target key end

     0   :  { %s929_s1 = inlined_call_operand.vmem [shape: bf16[768,128], index: 1, kind: input, shape index: {}]   ;;  %s930_s2 = inlined_call_operand.vmem [shape: f32[1,128], index: 2, kind: input, shape index: {}]   ;;  %s931_s0 = inlined_call_operand.vmem [shape: bf16[8,768], index: 0, kind: input, shape index: {}]   ;;  %s932_s3 = inlined_call_operand.vmem [shape: f32[8,128], index: 3, kind: output, shape index: {}]  }
   0x1   :  { %v708_v0 = vld [vmem:[%s929_s1 + $0x38] sm:$0xff]  ;;  %v707_v2 = vld [vmem:[%s929_s1 + $0x30] sm:$0xff]  ;;  %v706_v8 = vld [vmem:[%s929_s1 + $0x28] sm:$0xff] }
   0x2   :  { %v716_v1 = vld [vmem:[%s929_s1 + $0x78] sm:$0xff]  ;;  %426 = vmatpush.bf16.msra.mxu0 %v708_v0  ;;  %v715_v3 = vld [vmem:[%s929_s1 + $0x70] sm:$0xff]  ;;  %v714_v9 = vld [vmem:[%s929_s1 + $0x68] sm:$0xff] }
   0x3   :  { %439 = vmatpush.bf16.msra.mxu1 %v716_v1  ;;  %v724_v4 = vld [vmem:[%s929_s1 + $0xb8] sm:$0xff]  ;;  %v723_v6 = vld [vmem:[%s929_s1 + $0xb0] sm:$0xff]  ;;  %v722_v10 = vld [vmem:[%s929_s1 + $0xa8] sm:$0xff] }
   0x4   :  { %v732_v5 = vld [vmem:[%s929_s1 + $0xf8] sm:$0xff]  ;;  %452 = vmatpush.bf16.msra.mxu2 %v724_v4  ;;  %v731_v7 = vld [vmem:[%s929_s1 + $0xf0] sm:$0xff]  ;;  %v730_v11 = vld [vmem:[%s929_s1 + $0xe8] sm:$0xff] }
   0x5   :  { %465 = vmatpush.bf16.msra.mxu3 %v732_v5  ;;  %v705_v12 = vld [vmem:[%s929_s1 + $0x20] sm:$0xff]  ;;  %v704_v16 = vld [vmem:[%s929_s1 + $0x18] sm:$0xff]  ;;  %v703_v20 = vld [vmem:[%s929_s1 + $0x10] sm:$0xff] }
   0x6   :  { %427 = vmatpush.bf16.msra.mxu0 %v707_v2  ;;  %v713_v13 = vld [vmem:[%s929_s1 + $0x60] sm:$0xff]  ;;  %v712_v17 = vld [vmem:[%s929_s1 + $0x58] sm:$0xff]  ;;  %v711_v21 = vld [vmem:[%s929_s1 + $0x50] sm:$0xff] }
   0x7   :  { %440 = vmatpush.bf16.msra.mxu1 %v715_v3  ;;  %v721_v14 = vld [vmem:[%s929_s1 + $0xa0] sm:$0xff]  ;;  %v720_v18 = vld [vmem:[%s929_s1 + $0x98] sm:$0xff]  ;;  %v719_v22 = vld [vmem:[%s929_s1 + $0x90] sm:$0xff] }
   0x8   :  { %453 = vmatpush.bf16.msra.mxu2 %v723_v6  ;;  %v729_v15 = vld [vmem:[%s929_s1 + $0xe0] sm:$0xff]  ;;  %v728_v19 = vld [vmem:[%s929_s1 + $0xd8] sm:$0xff]  ;;  %v727_v23 = vld [vmem:[%s929_s1 + $0xd0] sm:$0xff] }
   0x9   :  { %466 = vmatpush.bf16.msra.mxu3 %v731_v7  ;;  %v702_v24 = vld [vmem:[%s929_s1 + $0x8] sm:$0xff]  ;;  %v14_v26 = vld [vmem:[%s931_s0] sm:$0xff]  ;;  %v740_v34 = vld [vmem:[%s929_s1 + $0x138] sm:$0xff] }
   0xa   :  { %428 = vmatpush.bf16.msra.mxu0 %v706_v8  ;;  %v710_v25 = vld [vmem:[%s929_s1 + $0x48] sm:$0xff]  ;;  %v120_v29 = vunpack.c.l.b16 %v14_v26  ;;  %v121_v30 = vunpack.c.h.b16 %v14_v26  ;;  %v701_v32 = vld [vmem:[%s929_s1] sm:$0xff]  ;;  %v748_v35 = vld [vmem:[%s929_s1 + $0x178] sm:$0xff] }
   0xb   :  { %441 = vmatpush.bf16.msra.mxu1 %v714_v9  ;;  %v718_v27 = vld [vmem:[%s929_s1 + $0x88] sm:$0xff]  ;;  %v709_v33 = vld [vmem:[%s929_s1 + $0x40] sm:$0xff]  ;;  %v739_v42 = vld [vmem:[%s929_s1 + $0x130] sm:$0xff] }
   0xc   :  { %454 = vmatpush.bf16.msra.mxu2 %v722_v10  ;;  %v726_v28 = vld [vmem:[%s929_s1 + $0xc8] sm:$0xff]  ;;  %v717_v36 = vld [vmem:[%s929_s1 + $0x80] sm:$0xff]  ;;  %v126_v40 = vpack.c.b16 %v120_v29, %v120_v29  ;;  %v127_v41 = vpack.c.b16 %v121_v30, %v121_v30  ;;  %v747_v43 = vld [vmem:[%s929_s1 + $0x170] sm:$0xff] }
   0xd   :  { %467 = vmatpush.bf16.msra.mxu3 %v730_v11  ;;  %v15_v31 = vld [vmem:[%s931_s0 + $0x8] sm:$0xff]  ;;  %v725_v37 = vld [vmem:[%s929_s1 + $0xc0] sm:$0xff]  ;;  %v736_v50 = vld [vmem:[%s929_s1 + $0x118] sm:$0xff] }
   0xe   :  { %429 = vmatpush.bf16.msra.mxu0 %v705_v12  ;;  %v122_v38 = vunpack.c.l.b16 %v15_v31  ;;  %v123_v39 = vunpack.c.h.b16 %v15_v31  ;;  %v738_v46 = vld [vmem:[%s929_s1 + $0x128] sm:$0xff]  ;;  %v737_v48 = vld [vmem:[%s929_s1 + $0x120] sm:$0xff]  ;;  %v744_v51 = vld [vmem:[%s929_s1 + $0x158] sm:$0xff] }
   0xf   :  { %442 = vmatpush.bf16.msra.mxu1 %v713_v13  ;;  %v746_v47 = vld [vmem:[%s929_s1 + $0x168] sm:$0xff]  ;;  %v745_v49 = vld [vmem:[%s929_s1 + $0x160] sm:$0xff]  ;;  %v735_v52 = vld [vmem:[%s929_s1 + $0x110] sm:$0xff] }
  0x10   :  { %455 = vmatpush.bf16.msra.mxu2 %v721_v14  ;;  %v128_v44 = vpack.c.b16 %v122_v38, %v122_v38  ;;  %v129_v45 = vpack.c.b16 %v123_v39, %v123_v39  ;;  %v743_v53 = vld [vmem:[%s929_s1 + $0x150] sm:$0xff]  ;;  %v734_v54 = vld [vmem:[%s929_s1 + $0x108] sm:$0xff]  ;;  %v733_v59 = vld [vmem:[%s929_s1 + $0x100] sm:$0xff] }
  0x11   :  { %468 = vmatpush.bf16.msra.mxu3 %v729_v15  ;;  %v742_v55 = vld [vmem:[%s929_s1 + $0x148] sm:$0xff]  ;;  %v16_v56 = vld [vmem:[%s931_s0 + $0x10] sm:$0xff]  ;;  %v741_v60 = vld [vmem:[%s929_s1 + $0x140] sm:$0xff] }
  0x12   :  { %430 = vmatpush.bf16.msra.mxu0 %v704_v16  ;;  %v124_v57 = vunpack.c.l.b16 %v16_v56  ;;  %v125_v58 = vunpack.c.h.b16 %v16_v56  ;;  %v749_v5 = vld [vmem:[%s930_s2] ss:$0 sm:$0xff] }
  0x13   :  { %443 = vmatpush.bf16.msra.mxu1 %v712_v17 }
  0x14   :  { %456 = vmatpush.bf16.msra.mxu2 %v720_v18  ;;  %v130_v61 = vpack.c.b16 %v124_v57, %v124_v57  ;;  %v131_v62 = vpack.c.b16 %v125_v58, %v125_v58 }
  0x15   :  { %469 = vmatpush.bf16.msra.mxu3 %v728_v19 }
  0x16   :  { %431 = vmatpush.bf16.msra.mxu0 %v703_v20 }
  0x17   :  { %444 = vmatpush.bf16.msra.mxu1 %v711_v21 }
  0x18   :  { %457 = vmatpush.bf16.msra.mxu2 %v719_v22 }
  0x19   :  { %470 = vmatpush.bf16.msra.mxu3 %v727_v23 }
  0x1a   :  { %432 = vmatpush.bf16.msra.mxu0 %v702_v24 }
  0x1b   :  { %445 = vmatpush.bf16.msra.mxu1 %v710_v25 }
  0x1c   :  { %458 = vmatpush.bf16.msra.mxu2 %v718_v27 }
  0x1d   :  { %471 = vmatpush.bf16.msra.mxu3 %v726_v28 }
  0x1e   :  { %433 = vmatpush.bf16.msra.mxu0 %v701_v32 }
  0x1f   :  { %446 = vmatpush.bf16.msra.mxu1 %v709_v33 }
  0x20   :  { %459 = vmatpush.bf16.msra.mxu2 %v717_v36 }
  0x21   :  { %472 = vmatpush.bf16.msra.mxu3 %v725_v37  ;;  %434 = vmatmul.bf16.vlgmr.msra.gmra.mxu0 %v126_v40 }
  0x22   :  { %478 = vmatpush.bf16.msrb.mxu0 %v740_v34  ;;  %447 = vmatmul.bf16.vlgmr.msra.gmra.mxu1 %v127_v41 }
  0x23   :  { %491 = vmatpush.bf16.msrb.mxu1 %v748_v35  ;;  %460 = vmatmul.bf16.vlgmr.msra.gmra.mxu2 %v128_v44 }
  0x24   :  { %473 = vmatmul.bf16.vlgmr.msra.gmra.mxu3 %v129_v45 }
  0x26   :  { %479 = vmatpush.bf16.msrb.mxu0 %v739_v42 }
  0x27   :  { %492 = vmatpush.bf16.msrb.mxu1 %v747_v43 }
  0x2a   :  { %480 = vmatpush.bf16.msrb.mxu0 %v738_v46 }
  0x2b   :  { %493 = vmatpush.bf16.msrb.mxu1 %v746_v47 }
  0x2e   :  { %481 = vmatpush.bf16.msrb.mxu0 %v737_v48 }
  0x2f   :  { %494 = vmatpush.bf16.msrb.mxu1 %v745_v49 }
  0x32   :  { %482 = vmatpush.bf16.msrb.mxu0 %v736_v50 }
  0x33   :  { %495 = vmatpush.bf16.msrb.mxu1 %v744_v51 }
  0x36   :  { %483 = vmatpush.bf16.msrb.mxu0 %v735_v52 }
  0x37   :  { %496 = vmatpush.bf16.msrb.mxu1 %v743_v53 }
  0x3a   :  { %484 = vmatpush.bf16.msrb.mxu0 %v734_v54 }
  0x3b   :  { %497 = vmatpush.bf16.msrb.mxu1 %v742_v55 }
  0x3e   :  { %485 = vmatpush.bf16.msrb.mxu0 %v733_v59 }
  0x3f   :  { %498 = vmatpush.bf16.msrb.mxu1 %v741_v60 }
  0x41   :  { %486 = vmatmul.bf16.vlgmr.msrb.gmra.mxu0 %v130_v61 }
  0x42   :  { %499 = vmatmul.bf16.vlgmr.msrb.gmra.mxu1 %v131_v62 }
  0x9e   :  { %v435_v63 = vpop.f32.mrf.mxu0 }
  0x9f   :  { %v448_v0 = vpop.f32.mrf.mxu1  ;;  %v436_v6 = vadd.f32 %v749_v5, %v435_v63 }
  0xa1   :  { %v449_v9 = vadd.f32 %v448_v0, %v436_v6 }
  0xa6   :  { %v437_v1 = vpop.f32.mrf.mxu0  ;;  %v461_v3 = vpop.f32.mrf.mxu2 }
  0xa7   :  { %v450_v2 = vpop.f32.mrf.mxu1  ;;  %v474_v4 = vpop.f32.mrf.mxu3  ;;  %v462_v10 = vadd.f32 %v461_v3, %v449_v9 }
  0xa9   :  { %v475_v11 = vadd.f32 %v474_v4, %v462_v10 }
  0xae   :  { %v463_v7 = vpop.f32.mrf.mxu2 }
  0xaf   :  { %v476_v8 = vpop.f32.mrf.mxu3 }
  0xbe   :  { %v487_v12 = vpop.f32.mrf.mxu0 }
  0xbf   :  { %v500_v13 = vpop.f32.mrf.mxu1  ;;  %v488_v14 = vadd.f32 %v487_v12, %v475_v11 }
  0xc1   :  { %v501_v15 = vadd.f32 %v500_v13, %v488_v14 }
  0xc3   :  { %504 = vst [vmem:[%s932_s3] sm:$0xff] %v501_v15 }
  0xc6   :  { %v489_v16 = vpop.f32.mrf.mxu0 }
  0xc7   :  { %v502_v17 = vpop.f32.mrf.mxu1 }

// kernel: textdiae_forward.43
= control target key start
LH: loop header
LB: loop body
LE: loop exit
PB: predicated region body
PF: predicated region fallthrough
CT: control target
= control target key end

     0   :  { %s4592_s15 = smov 0   ;;  %s4594_s16 = smov 0   ;;  %s5343_s0 = inlined_call_operand.vmem [shape: bf16[8,2048], index: 0, kind: input, shape index: {}]   ;;  %s5344_s1 = inlined_call_operand.vmem [shape: bf16[2048,768], index: 1, kind: input, shape index: {}]   ;;  %s5345_s2 = inlined_call_operand.vmem [shape: f32[1,768], index: 2, kind: input, shape index: {}]   ;;  %s5346_s3 = inlined_call_operand.vmem [shape: f32[8,768], index: 3, kind: input, shape index: {}]   ;;  %s5347_s4 = inlined_call_operand.vmem [shape: f32[8,768], index: 4, kind: output, shape index: {}]  }
   0x1   :  { %s4596_s17 = smov 0   ;;  %s4598_s18 = smov 0  }
   0x2   :  { %s4600_s19 = smov 0  }
   0x3 LB: > { %s23_s20 = sadd.s32 1, %s4561_s18  ;;  %p66_p1 = scmp.ne.s32.totalorder %s4553_s16, %s4549_s15  ;;  %s4565_s19 = sphi %s4600_s19, %s14_s19   ;;  %s4561_s18 = sphi %s4598_s18, %s5351_s18   ;;  %s4557_s17 = sphi %s4596_s17, %s5350_s17   ;;  %s4553_s16 = sphi %s4594_s16, %s5349_s16   ;;  %s4549_s15 = sphi %s4592_s15, %s5348_s15  }
   0x4   : > { %p24_p0 = scmp.ge.s32.totalorder %s23_s20, 6  ;;  %p67_p2 = scmp.eq.s32.totalorder %s4565_s19, 0 }
   0x5   : > { %s59_s22 = sadd.s32 1, %s4553_s16  ;;  %p3837_p5 = scmp.ge.s32.totalorder %s4565_s19, 6 }
   0x6   : > { %s5353_s20 = smov (%p24_p0, %s23_s20), 0  ;;  %p68_p3 = por %p67_p2, %p66_p1 }
   0x7   : > { %s56_s21 = ssub.s32 %s4561_s18, %s5353_s20  ;;  %182 = sbr.rel (%p3837_p5) target bundleno = 272 (0x110), region = 20 }
   0x8   : > { %p57_p4 = scmp.eq.s32.totalorder %s56_s21, 0 }
   0xa   : > { %s4627_s23 = scalar_select %p57_p4, %s4553_s16, %s59_s22  }
   0xc   : > { %185 = sbr.rel (!%p68_p3) target bundleno = 272 (0x110), region = 24  ;;  %s187_s24 = sand.u32 (%p68_p3), 1, %s4553_s16  }
   0xd   : > { %s3839_s25 = sshll.u32 (%p68_p3), %s4561_s18, 2  ;;  %s3838_s26 = sshll.u32 (%p68_p3), %s187_s24, 10 }
   0xe   : > { %s4635_s29 = scalar_lea.vmem (%p68_p3), %s5344_s1, %s3839_s25  ;;  %s4639_s30 = scalar_lea.vmem (%p68_p3), [#allocation2], %s3838_s26 }
   0xf   : > { %v208_v0 = vld [vmem:[%s4635_s29] sm:$0xf] (%p68_p3)  ;;  %v210_v1 = vld [vmem:[%s4635_s29 + $0x18] sm:$0xf] (%p68_p3)  ;;  %v212_v2 = vld [vmem:[%s4635_s29 + $0x30] sm:$0xf] (%p68_p3) }
  0x10   : > { %209 = vst [vmem:[%s4639_s30] sm:$0xf] (%p68_p3), %v208_v0  ;;  %v214_v3 = vld [vmem:[%s4635_s29 + $0x48] sm:$0xf] (%p68_p3)  ;;  %v216_v4 = vld [vmem:[%s4635_s29 + $0x60] sm:$0xf] (%p68_p3) }
  0x11   : > { %211 = vst [vmem:[%s4639_s30 + $0x4] sm:$0xf] %v210_v1  ;;  %v218_v5 = vld [vmem:[%s4635_s29 + $0x78] sm:$0xf]  ;;  %v220_v6 = vld [vmem:[%s4635_s29 + $0x90] sm:$0xf] }
  0x12   : > { %213 = vst [vmem:[%s4639_s30 + $0x8] sm:$0xf] %v212_v2  ;;  %v222_v7 = vld [vmem:[%s4635_s29 + $0xa8] sm:$0xf]  ;;  %v224_v8 = vld [vmem:[%s4635_s29 + $0xc0] sm:$0xf] }
  0x13   : > { %215 = vst [vmem:[%s4639_s30 + $0xc] sm:$0xf] %v214_v3  ;;  %v226_v9 = vld [vmem:[%s4635_s29 + $0xd8] sm:$0xf]  ;;  %v228_v10 = vld [vmem:[%s4635_s29 + $0xf0] sm:$0xf] }
  0x14   : > { %217 = vst [vmem:[%s4639_s30 + $0x10] sm:$0xf] %v216_v4  ;;  %v230_v11 = vld [vmem:[%s4635_s29 + $0x108] sm:$0xf]  ;;  %v232_v12 = vld [vmem:[%s4635_s29 + $0x120] sm:$0xf] }
  0x15   : > { %219 = vst [vmem:[%s4639_s30 + $0x14] sm:$0xf] %v218_v5  ;;  %v234_v13 = vld [vmem:[%s4635_s29 + $0x138] sm:$0xf]  ;;  %v236_v14 = vld [vmem:[%s4635_s29 + $0x150] sm:$0xf] }
  0x16   : > { %221 = vst [vmem:[%s4639_s30 + $0x18] sm:$0xf] %v220_v6  ;;  %v238_v15 = vld [vmem:[%s4635_s29 + $0x168] sm:$0xf]  ;;  %v240_v16 = vld [vmem:[%s4635_s29 + $0x180] sm:$0xf] }
  0x17   : > { %223 = vst [vmem:[%s4639_s30 + $0x1c] sm:$0xf] %v222_v7  ;;  %v242_v17 = vld [vmem:[%s4635_s29 + $0x198] sm:$0xf]  ;;  %v244_v18 = vld [vmem:[%s4635_s29 + $0x1b0] sm:$0xf] }
  0x18   : > { %225 = vst [vmem:[%s4639_s30 + $0x20] sm:$0xf] %v224_v8  ;;  %v246_v19 = vld [vmem:[%s4635_s29 + $0x1c8] sm:$0xf]  ;;  %v248_v20 = vld [vmem:[%s4635_s29 + $0x1e0] sm:$0xf] }
  0x19   : > { %227 = vst [vmem:[%s4639_s30 + $0x24] sm:$0xf] %v226_v9  ;;  %v250_v21 = vld [vmem:[%s4635_s29 + $0x1f8] sm:$0xf]  ;;  %v252_v22 = vld [vmem:[%s4635_s29 + $0x210] sm:$0xf] }
  0x1a   : > { %229 = vst [vmem:[%s4639_s30 + $0x28] sm:$0xf] %v228_v10  ;;  %v254_v23 = vld [vmem:[%s4635_s29 + $0x228] sm:$0xf]  ;;  %v256_v24 = vld [vmem:[%s4635_s29 + $0x240] sm:$0xf] }
  0x1b   : > { %231 = vst [vmem:[%s4639_s30 + $0x2c] sm:$0xf] %v230_v11  ;;  %v258_v25 = vld [vmem:[%s4635_s29 + $0x258] sm:$0xf]  ;;  %v260_v26 = vld [vmem:[%s4635_s29 + $0x270] sm:$0xf] }
  0x1c   : > { %233 = vst [vmem:[%s4639_s30 + $0x30] sm:$0xf] %v232_v12  ;;  %v262_v27 = vld [vmem:[%s4635_s29 + $0x288] sm:$0xf]  ;;  %v264_v28 = vld [vmem:[%s4635_s29 + $0x2a0] sm:$0xf] }
  0x1d   : > { %235 = vst [vmem:[%s4639_s30 + $0x34] sm:$0xf] %v234_v13  ;;  %v266_v29 = vld [vmem:[%s4635_s29 + $0x2b8] sm:$0xf]  ;;  %v268_v30 = vld [vmem:[%s4635_s29 + $0x2d0] sm:$0xf] }
  0x1e   : > { %237 = vst [vmem:[%s4639_s30 + $0x38] sm:$0xf] %v236_v14  ;;  %v270_v31 = vld [vmem:[%s4635_s29 + $0x2e8] sm:$0xf]  ;;  %v272_v32 = vld [vmem:[%s4635_s29 + $0x300] sm:$0xf] }
  0x1f   : > { %239 = vst [vmem:[%s4639_s30 + $0x3c] sm:$0xf] %v238_v15  ;;  %v274_v33 = vld [vmem:[%s4635_s29 + $0x318] sm:$0xf]  ;;  %v276_v34 = vld [vmem:[%s4635_s29 + $0x330] sm:$0xf] }
  0x20   : > { %241 = vst [vmem:[%s4639_s30 + $0x40] sm:$0xf] %v240_v16  ;;  %v278_v35 = vld [vmem:[%s4635_s29 + $0x348] sm:$0xf]  ;;  %v280_v36 = vld [vmem:[%s4635_s29 + $0x360] sm:$0xf] }
  0x21   : > { %243 = vst [vmem:[%s4639_s30 + $0x44] sm:$0xf] %v242_v17  ;;  %v282_v37 = vld [vmem:[%s4635_s29 + $0x378] sm:$0xf]  ;;  %v284_v38 = vld [vmem:[%s4635_s29 + $0x390] sm:$0xf] }
  0x22   : > { %245 = vst [vmem:[%s4639_s30 + $0x48] sm:$0xf] %v244_v18  ;;  %v286_v39 = vld [vmem:[%s4635_s29 + $0x3a8] sm:$0xf]  ;;  %v288_v40 = vld [vmem:[%s4635_s29 + $0x3c0] sm:$0xf] }
  0x23   : > { %247 = vst [vmem:[%s4639_s30 + $0x4c] sm:$0xf] %v246_v19  ;;  %v290_v41 = vld [vmem:[%s4635_s29 + $0x3d8] sm:$0xf]  ;;  %v292_v42 = vld [vmem:[%s4635_s29 + $0x3f0] sm:$0xf] }
  0x24   : > { %249 = vst [vmem:[%s4639_s30 + $0x50] sm:$0xf] %v248_v20  ;;  %v294_v43 = vld [vmem:[%s4635_s29 + $0x408] sm:$0xf]  ;;  %v296_v44 = vld [vmem:[%s4635_s29 + $0x420] sm:$0xf] }
  0x25   : > { %251 = vst [vmem:[%s4639_s30 + $0x54] sm:$0xf] %v250_v21  ;;  %v298_v45 = vld [vmem:[%s4635_s29 + $0x438] sm:$0xf]  ;;  %v300_v46 = vld [vmem:[%s4635_s29 + $0x450] sm:$0xf] }
  0x26   : > { %253 = vst [vmem:[%s4639_s30 + $0x58] sm:$0xf] %v252_v22  ;;  %v302_v47 = vld [vmem:[%s4635_s29 + $0x468] sm:$0xf]  ;;  %v304_v48 = vld [vmem:[%s4635_s29 + $0x480] sm:$0xf] }
  0x27   : > { %255 = vst [vmem:[%s4639_s30 + $0x5c] sm:$0xf] %v254_v23  ;;  %v306_v49 = vld [vmem:[%s4635_s29 + $0x498] sm:$0xf]  ;;  %v308_v50 = vld [vmem:[%s4635_s29 + $0x4b0] sm:$0xf] }
  0x28   : > { %257 = vst [vmem:[%s4639_s30 + $0x60] sm:$0xf] %v256_v24  ;;  %v310_v51 = vld [vmem:[%s4635_s29 + $0x4c8] sm:$0xf]  ;;  %v312_v52 = vld [vmem:[%s4635_s29 + $0x4e0] sm:$0xf] }
  0x29   : > { %259 = vst [vmem:[%s4639_s30 + $0x64] sm:$0xf] %v258_v25  ;;  %v314_v53 = vld [vmem:[%s4635_s29 + $0x4f8] sm:$0xf]  ;;  %v316_v54 = vld [vmem:[%s4635_s29 + $0x510] sm:$0xf] }
  0x2a   : > { %261 = vst [vmem:[%s4639_s30 + $0x68] sm:$0xf] %v260_v26  ;;  %v318_v55 = vld [vmem:[%s4635_s29 + $0x528] sm:$0xf]  ;;  %v320_v56 = vld [vmem:[%s4635_s29 + $0x540] sm:$0xf] }
  0x2b   : > { %263 = vst [vmem:[%s4639_s30 + $0x6c] sm:$0xf] %v262_v27  ;;  %v322_v57 = vld [vmem:[%s4635_s29 + $0x558] sm:$0xf]  ;;  %v324_v58 = vld [vmem:[%s4635_s29 + $0x570] sm:$0xf] }
  0x2c   : > { %265 = vst [vmem:[%s4639_s30 + $0x70] sm:$0xf] %v264_v28  ;;  %v326_v59 = vld [vmem:[%s4635_s29 + $0x588] sm:$0xf]  ;;  %v328_v60 = vld [vmem:[%s4635_s29 + $0x5a0] sm:$0xf] }
  0x2d   : > { %267 = vst [vmem:[%s4639_s30 + $0x74] sm:$0xf] %v266_v29  ;;  %v330_v61 = vld [vmem:[%s4635_s29 + $0x5b8] sm:$0xf]  ;;  %v332_v62 = vld [vmem:[%s4635_s29 + $0x5d0] sm:$0xf] }
  0x2e   : > { %269 = vst [vmem:[%s4639_s30 + $0x78] sm:$0xf] %v268_v30  ;;  %v334_v63 = vld [vmem:[%s4635_s29 + $0x5e8] sm:$0xf]  ;;  %v336_v0 = vld [vmem:[%s4635_s29 + $0x600] sm:$0xf] }
  0x2f   : > { %271 = vst [vmem:[%s4639_s30 + $0x7c] sm:$0xf] %v270_v31  ;;  %v338_v1 = vld [vmem:[%s4635_s29 + $0x618] sm:$0xf]  ;;  %v340_v2 = vld [vmem:[%s4635_s29 + $0x630] sm:$0xf] }
  0x30   : > { %273 = vst [vmem:[%s4639_s30 + $0x80] sm:$0xf] %v272_v32  ;;  %v342_v3 = vld [vmem:[%s4635_s29 + $0x648] sm:$0xf]  ;;  %v344_v4 = vld [vmem:[%s4635_s29 + $0x660] sm:$0xf] }
  0x31   : > { %275 = vst [vmem:[%s4639_s30 + $0x84] sm:$0xf] %v274_v33  ;;  %v346_v5 = vld [vmem:[%s4635_s29 + $0x678] sm:$0xf]  ;;  %v348_v6 = vld [vmem:[%s4635_s29 + $0x690] sm:$0xf] }
  0x32   : > { %277 = vst [vmem:[%s4639_s30 + $0x88] sm:$0xf] %v276_v34  ;;  %v350_v7 = vld [vmem:[%s4635_s29 + $0x6a8] sm:$0xf]  ;;  %v352_v8 = vld [vmem:[%s4635_s29 + $0x6c0] sm:$0xf] }
  0x33   : > { %279 = vst [vmem:[%s4639_s30 + $0x8c] sm:$0xf] %v278_v35  ;;  %v354_v9 = vld [vmem:[%s4635_s29 + $0x6d8] sm:$0xf]  ;;  %v356_v10 = vld [vmem:[%s4635_s29 + $0x6f0] sm:$0xf] }
  0x34   : > { %281 = vst [vmem:[%s4639_s30 + $0x90] sm:$0xf] %v280_v36  ;;  %v358_v11 = vld [vmem:[%s4635_s29 + $0x708] sm:$0xf]  ;;  %v360_v12 = vld [vmem:[%s4635_s29 + $0x720] sm:$0xf] }
  0x35   : > { %283 = vst [vmem:[%s4639_s30 + $0x94] sm:$0xf] %v282_v37  ;;  %v362_v13 = vld [vmem:[%s4635_s29 + $0x738] sm:$0xf]  ;;  %v364_v14 = vld [vmem:[%s4635_s29 + $0x750] sm:$0xf] }
  0x36   : > { %285 = vst [vmem:[%s4639_s30 + $0x98] sm:$0xf] %v284_v38  ;;  %v366_v15 = vld [vmem:[%s4635_s29 + $0x768] sm:$0xf]  ;;  %v368_v16 = vld [vmem:[%s4635_s29 + $0x780] sm:$0xf] }
  0x37   : > { %287 = vst [vmem:[%s4639_s30 + $0x9c] sm:$0xf] %v286_v39  ;;  %v370_v17 = vld [vmem:[%s4635_s29 + $0x798] sm:$0xf]  ;;  %v372_v18 = vld [vmem:[%s4635_s29 + $0x7b0] sm:$0xf] }
  0x38   : > { %289 = vst [vmem:[%s4639_s30 + $0xa0] sm:$0xf] %v288_v40  ;;  %v374_v19 = vld [vmem:[%s4635_s29 + $0x7c8] sm:$0xf]  ;;  %v376_v20 = vld [vmem:[%s4635_s29 + $0x7e0] sm:$0xf] }
  0x39   : > { %291 = vst [vmem:[%s4639_s30 + $0xa4] sm:$0xf] %v290_v41  ;;  %v378_v21 = vld [vmem:[%s4635_s29 + $0x7f8] sm:$0xf]  ;;  %v380_v22 = vld [vmem:[%s4635_s29 + $0x810] sm:$0xf] }
  0x3a   : > { %293 = vst [vmem:[%s4639_s30 + $0xa8] sm:$0xf] %v292_v42  ;;  %v382_v23 = vld [vmem:[%s4635_s29 + $0x828] sm:$0xf]  ;;  %v384_v24 = vld [vmem:[%s4635_s29 + $0x840] sm:$0xf] }
  0x3b   : > { %295 = vst [vmem:[%s4639_s30 + $0xac] sm:$0xf] %v294_v43  ;;  %v386_v25 = vld [vmem:[%s4635_s29 + $0x858] sm:$0xf]  ;;  %v388_v26 = vld [vmem:[%s4635_s29 + $0x870] sm:$0xf] }
  0x3c   : > { %297 = vst [vmem:[%s4639_s30 + $0xb0] sm:$0xf] %v296_v44  ;;  %v390_v27 = vld [vmem:[%s4635_s29 + $0x888] sm:$0xf]  ;;  %v392_v28 = vld [vmem:[%s4635_s29 + $0x8a0] sm:$0xf] }
  0x3d   : > { %299 = vst [vmem:[%s4639_s30 + $0xb4] sm:$0xf] %v298_v45  ;;  %v394_v29 = vld [vmem:[%s4635_s29 + $0x8b8] sm:$0xf]  ;;  %v396_v30 = vld [vmem:[%s4635_s29 + $0x8d0] sm:$0xf] }
  0x3e   : > { %301 = vst [vmem:[%s4639_s30 + $0xb8] sm:$0xf] %v300_v46  ;;  %v398_v31 = vld [vmem:[%s4635_s29 + $0x8e8] sm:$0xf]  ;;  %v400_v32 = vld [vmem:[%s4635_s29 + $0x900] sm:$0xf] }
  0x3f   : > { %303 = vst [vmem:[%s4639_s30 + $0xbc] sm:$0xf] %v302_v47  ;;  %v402_v33 = vld [vmem:[%s4635_s29 + $0x918] sm:$0xf]  ;;  %v404_v34 = vld [vmem:[%s4635_s29 + $0x930] sm:$0xf] }
  0x40   : > { %305 = vst [vmem:[%s4639_s30 + $0xc0] sm:$0xf] %v304_v48  ;;  %v406_v35 = vld [vmem:[%s4635_s29 + $0x948] sm:$0xf]  ;;  %v408_v36 = vld [vmem:[%s4635_s29 + $0x960] sm:$0xf] }
  0x41   : > { %307 = vst [vmem:[%s4639_s30 + $0xc4] sm:$0xf] %v306_v49  ;;  %v410_v37 = vld [vmem:[%s4635_s29 + $0x978] sm:$0xf]  ;;  %v412_v38 = vld [vmem:[%s4635_s29 + $0x990] sm:$0xf] }
  0x42   : > { %309 = vst [vmem:[%s4639_s30 + $0xc8] sm:$0xf] %v308_v50  ;;  %v414_v39 = vld [vmem:[%s4635_s29 + $0x9a8] sm:$0xf]  ;;  %v416_v40 = vld [vmem:[%s4635_s29 + $0x9c0] sm:$0xf] }
  0x43   : > { %311 = vst [vmem:[%s4639_s30 + $0xcc] sm:$0xf] %v310_v51  ;;  %v418_v41 = vld [vmem:[%s4635_s29 + $0x9d8] sm:$0xf]  ;;  %v420_v42 = vld [vmem:[%s4635_s29 + $0x9f0] sm:$0xf] }
  0x44   : > { %313 = vst [vmem:[%s4639_s30 + $0xd0] sm:$0xf] %v312_v52  ;;  %v422_v43 = vld [vmem:[%s4635_s29 + $0xa08] sm:$0xf]  ;;  %v424_v44 = vld [vmem:[%s4635_s29 + $0xa20] sm:$0xf] }
  0x45   : > { %315 = vst [vmem:[%s4639_s30 + $0xd4] sm:$0xf] %v314_v53  ;;  %v426_v45 = vld [vmem:[%s4635_s29 + $0xa38] sm:$0xf]  ;;  %v428_v46 = vld [vmem:[%s4635_s29 + $0xa50] sm:$0xf] }
  0x46   : > { %317 = vst [vmem:[%s4639_s30 + $0xd8] sm:$0xf] %v316_v54  ;;  %v430_v47 = vld [vmem:[%s4635_s29 + $0xa68] sm:$0xf]  ;;  %v432_v48 = vld [vmem:[%s4635_s29 + $0xa80] sm:$0xf] }
  0x47   : > { %319 = vst [vmem:[%s4639_s30 + $0xdc] sm:$0xf] %v318_v55  ;;  %v434_v49 = vld [vmem:[%s4635_s29 + $0xa98] sm:$0xf]  ;;  %v436_v50 = vld [vmem:[%s4635_s29 + $0xab0] sm:$0xf] }
  0x48   : > { %321 = vst [vmem:[%s4639_s30 + $0xe0] sm:$0xf] %v320_v56  ;;  %v438_v51 = vld [vmem:[%s4635_s29 + $0xac8] sm:$0xf]  ;;  %v440_v52 = vld [vmem:[%s4635_s29 + $0xae0] sm:$0xf] }
  0x49   : > { %323 = vst [vmem:[%s4639_s30 + $0xe4] sm:$0xf] %v322_v57  ;;  %v442_v53 = vld [vmem:[%s4635_s29 + $0xaf8] sm:$0xf]  ;;  %v444_v54 = vld [vmem:[%s4635_s29 + $0xb10] sm:$0xf] }
  0x4a   : > { %325 = vst [vmem:[%s4639_s30 + $0xe8] sm:$0xf] %v324_v58  ;;  %v446_v55 = vld [vmem:[%s4635_s29 + $0xb28] sm:$0xf]  ;;  %v448_v56 = vld [vmem:[%s4635_s29 + $0xb40] sm:$0xf] }
  0x4b   : > { %327 = vst [vmem:[%s4639_s30 + $0xec] sm:$0xf] %v326_v59  ;;  %v450_v57 = vld [vmem:[%s4635_s29 + $0xb58] sm:$0xf]  ;;  %v452_v58 = vld [vmem:[%s4635_s29 + $0xb70] sm:$0xf] }
  0x4c   : > { %329 = vst [vmem:[%s4639_s30 + $0xf0] sm:$0xf] %v328_v60  ;;  %v454_v59 = vld [vmem:[%s4635_s29 + $0xb88] sm:$0xf]  ;;  %v456_v60 = vld [vmem:[%s4635_s29 + $0xba0] sm:$0xf] }
  0x4d   : > { %331 = vst [vmem:[%s4639_s30 + $0xf4] sm:$0xf] %v330_v61  ;;  %v458_v61 = vld [vmem:[%s4635_s29 + $0xbb8] sm:$0xf] }
  0x4e   : > { %333 = vst [vmem:[%s4639_s30 + $0xf8] sm:$0xf] %v332_v62  ;;  %v460_v62 = vld [vmem:[%s4635_s29 + $0xbd0] sm:$0xf] }
  0x4f   : > { %335 = vst [vmem:[%s4639_s30 + $0xfc] sm:$0xf] %v334_v63  ;;  %v462_v63 = vld [vmem:[%s4635_s29 + $0xbe8] sm:$0xf] }
  0x50   : > { %337 = vst [vmem:[%s4639_s30 + $0x100] sm:$0xf] %v336_v0  ;;  %v464_v0 = vld [vmem:[%s4635_s29 + $0xc00] sm:$0xf] }
  0x51   : > { %339 = vst [vmem:[%s4639_s30 + $0x104] sm:$0xf] %v338_v1  ;;  %v466_v1 = vld [vmem:[%s4635_s29 + $0xc18] sm:$0xf] }
  0x52   : > { %341 = vst [vmem:[%s4639_s30 + $0x108] sm:$0xf] %v340_v2  ;;  %v468_v2 = vld [vmem:[%s4635_s29 + $0xc30] sm:$0xf] }
  0x53   : > { %343 = vst [vmem:[%s4639_s30 + $0x10c] sm:$0xf] %v342_v3  ;;  %v470_v3 = vld [vmem:[%s4635_s29 + $0xc48] sm:$0xf] }
  0x54   : > { %345 = vst [vmem:[%s4639_s30 + $0x110] sm:$0xf] %v344_v4  ;;  %v472_v4 = vld [vmem:[%s4635_s29 + $0xc60] sm:$0xf] }
  0x55   : > { %347 = vst [vmem:[%s4639_s30 + $0x114] sm:$0xf] %v346_v5  ;;  %v474_v5 = vld [vmem:[%s4635_s29 + $0xc78] sm:$0xf] }
  0x56   : > { %349 = vst [vmem:[%s4639_s30 + $0x118] sm:$0xf] %v348_v6  ;;  %v476_v6 = vld [vmem:[%s4635_s29 + $0xc90] sm:$0xf] }
  0x57   : > { %351 = vst [vmem:[%s4639_s30 + $0x11c] sm:$0xf] %v350_v7  ;;  %v478_v7 = vld [vmem:[%s4635_s29 + $0xca8] sm:$0xf] }
  0x58   : > { %353 = vst [vmem:[%s4639_s30 + $0x120] sm:$0xf] %v352_v8  ;;  %v480_v8 = vld [vmem:[%s4635_s29 + $0xcc0] sm:$0xf] }
  0x59   : > { %355 = vst [vmem:[%s4639_s30 + $0x124] sm:$0xf] %v354_v9  ;;  %v482_v9 = vld [vmem:[%s4635_s29 + $0xcd8] sm:$0xf] }
  0x5a   : > { %357 = vst [vmem:[%s4639_s30 + $0x128] sm:$0xf] %v356_v10  ;;  %v484_v10 = vld [vmem:[%s4635_s29 + $0xcf0] sm:$0xf] }
  0x5b   : > { %359 = vst [vmem:[%s4639_s30 + $0x12c] sm:$0xf] %v358_v11  ;;  %v486_v11 = vld [vmem:[%s4635_s29 + $0xd08] sm:$0xf] }
  0x5c   : > { %361 = vst [vmem:[%s4639_s30 + $0x130] sm:$0xf] %v360_v12  ;;  %v488_v12 = vld [vmem:[%s4635_s29 + $0xd20] sm:$0xf] }
  0x5d   : > { %363 = vst [vmem:[%s4639_s30 + $0x134] sm:$0xf] %v362_v13  ;;  %v490_v13 = vld [vmem:[%s4635_s29 + $0xd38] sm:$0xf] }
  0x5e   : > { %365 = vst [vmem:[%s4639_s30 + $0x138] sm:$0xf] %v364_v14  ;;  %v492_v14 = vld [vmem:[%s4635_s29 + $0xd50] sm:$0xf] }
  0x5f   : > { %367 = vst [vmem:[%s4639_s30 + $0x13c] sm:$0xf] %v366_v15  ;;  %v494_v15 = vld [vmem:[%s4635_s29 + $0xd68] sm:$0xf] }
  0x60   : > { %369 = vst [vmem:[%s4639_s30 + $0x140] sm:$0xf] %v368_v16  ;;  %v496_v16 = vld [vmem:[%s4635_s29 + $0xd80] sm:$0xf] }
  0x61   : > { %371 = vst [vmem:[%s4639_s30 + $0x144] sm:$0xf] %v370_v17  ;;  %v498_v17 = vld [vmem:[%s4635_s29 + $0xd98] sm:$0xf] }
  0x62   : > { %373 = vst [vmem:[%s4639_s30 + $0x148] sm:$0xf] %v372_v18  ;;  %v500_v18 = vld [vmem:[%s4635_s29 + $0xdb0] sm:$0xf] }
  0x63   : > { %375 = vst [vmem:[%s4639_s30 + $0x14c] sm:$0xf] %v374_v19  ;;  %v502_v19 = vld [vmem:[%s4635_s29 + $0xdc8] sm:$0xf] }
  0x64   : > { %377 = vst [vmem:[%s4639_s30 + $0x150] sm:$0xf] %v376_v20  ;;  %v504_v20 = vld [vmem:[%s4635_s29 + $0xde0] sm:$0xf] }
  0x65   : > { %379 = vst [vmem:[%s4639_s30 + $0x154] sm:$0xf] %v378_v21  ;;  %v506_v21 = vld [vmem:[%s4635_s29 + $0xdf8] sm:$0xf] }
  0x66   : > { %381 = vst [vmem:[%s4639_s30 + $0x158] sm:$0xf] %v380_v22  ;;  %v508_v22 = vld [vmem:[%s4635_s29 + $0xe10] sm:$0xf] }
  0x67   : > { %383 = vst [vmem:[%s4639_s30 + $0x15c] sm:$0xf] %v382_v23  ;;  %v510_v23 = vld [vmem:[%s4635_s29 + $0xe28] sm:$0xf] }
  0x68   : > { %385 = vst [vmem:[%s4639_s30 + $0x160] sm:$0xf] %v384_v24  ;;  %v512_v24 = vld [vmem:[%s4635_s29 + $0xe40] sm:$0xf] }
  0x69   : > { %387 = vst [vmem:[%s4639_s30 + $0x164] sm:$0xf] %v386_v25  ;;  %v514_v25 = vld [vmem:[%s4635_s29 + $0xe58] sm:$0xf] }
  0x6a   : > { %389 = vst [vmem:[%s4639_s30 + $0x168] sm:$0xf] %v388_v26  ;;  %v516_v26 = vld [vmem:[%s4635_s29 + $0xe70] sm:$0xf] }
  0x6b   : > { %391 = vst [vmem:[%s4639_s30 + $0x16c] sm:$0xf] %v390_v27  ;;  %v518_v27 = vld [vmem:[%s4635_s29 + $0xe88] sm:$0xf] }
  0x6c   : > { %393 = vst [vmem:[%s4639_s30 + $0x170] sm:$0xf] %v392_v28  ;;  %v520_v28 = vld [vmem:[%s4635_s29 + $0xea0] sm:$0xf] }
  0x6d   : > { %395 = vst [vmem:[%s4639_s30 + $0x174] sm:$0xf] %v394_v29  ;;  %v522_v29 = vld [vmem:[%s4635_s29 + $0xeb8] sm:$0xf] }
  0x6e   : > { %397 = vst [vmem:[%s4639_s30 + $0x178] sm:$0xf] %v396_v30  ;;  %v524_v30 = vld [vmem:[%s4635_s29 + $0xed0] sm:$0xf] }
  0x6f   : > { %399 = vst [vmem:[%s4639_s30 + $0x17c] sm:$0xf] %v398_v31  ;;  %v526_v31 = vld [vmem:[%s4635_s29 + $0xee8] sm:$0xf] }
  0x70   : > { %401 = vst [vmem:[%s4639_s30 + $0x180] sm:$0xf] %v400_v32  ;;  %v528_v32 = vld [vmem:[%s4635_s29 + $0xf00] sm:$0xf] }
  0x71   : > { %403 = vst [vmem:[%s4639_s30 + $0x184] sm:$0xf] %v402_v33  ;;  %v530_v33 = vld [vmem:[%s4635_s29 + $0xf18] sm:$0xf] }
  0x72   : > { %405 = vst [vmem:[%s4639_s30 + $0x188] sm:$0xf] %v404_v34  ;;  %v532_v34 = vld [vmem:[%s4635_s29 + $0xf30] sm:$0xf] }
  0x73   : > { %407 = vst [vmem:[%s4639_s30 + $0x18c] sm:$0xf] %v406_v35  ;;  %v534_v35 = vld [vmem:[%s4635_s29 + $0xf48] sm:$0xf] }
  0x74   : > { %409 = vst [vmem:[%s4639_s30 + $0x190] sm:$0xf] %v408_v36  ;;  %v536_v36 = vld [vmem:[%s4635_s29 + $0xf60] sm:$0xf] }
  0x75   : > { %411 = vst [vmem:[%s4639_s30 + $0x194] sm:$0xf] %v410_v37  ;;  %v538_v37 = vld [vmem:[%s4635_s29 + $0xf78] sm:$0xf] }
  0x76   : > { %413 = vst [vmem:[%s4639_s30 + $0x198] sm:$0xf] %v412_v38  ;;  %v540_v38 = vld [vmem:[%s4635_s29 + $0xf90] sm:$0xf] }
  0x77   : > { %415 = vst [vmem:[%s4639_s30 + $0x19c] sm:$0xf] %v414_v39  ;;  %v542_v39 = vld [vmem:[%s4635_s29 + $0xfa8] sm:$0xf] }
  0x78   : > { %417 = vst [vmem:[%s4639_s30 + $0x1a0] sm:$0xf] %v416_v40  ;;  %v544_v40 = vld [vmem:[%s4635_s29 + $0xfc0] sm:$0xf] }
  0x79   : > { %419 = vst [vmem:[%s4639_s30 + $0x1a4] sm:$0xf] %v418_v41  ;;  %v546_v41 = vld [vmem:[%s4635_s29 + $0xfd8] sm:$0xf] }
  0x7a   : > { %421 = vst [vmem:[%s4639_s30 + $0x1a8] sm:$0xf] %v420_v42  ;;  %v548_v42 = vld [vmem:[%s4635_s29 + $0xff0] sm:$0xf] }
  0x7b   : > { %423 = vst [vmem:[%s4639_s30 + $0x1ac] sm:$0xf] %v422_v43  ;;  %v550_v43 = vld [vmem:[%s4635_s29 + $0x1008] sm:$0xf] }
  0x7c   : > { %425 = vst [vmem:[%s4639_s30 + $0x1b0] sm:$0xf] %v424_v44  ;;  %v552_v44 = vld [vmem:[%s4635_s29 + $0x1020] sm:$0xf] }
  0x7d   : > { %427 = vst [vmem:[%s4639_s30 + $0x1b4] sm:$0xf] %v426_v45  ;;  %v554_v45 = vld [vmem:[%s4635_s29 + $0x1038] sm:$0xf] }
  0x7e   : > { %429 = vst [vmem:[%s4639_s30 + $0x1b8] sm:$0xf] %v428_v46  ;;  %v556_v46 = vld [vmem:[%s4635_s29 + $0x1050] sm:$0xf] }
  0x7f   : > { %431 = vst [vmem:[%s4639_s30 + $0x1bc] sm:$0xf] %v430_v47  ;;  %v558_v47 = vld [vmem:[%s4635_s29 + $0x1068] sm:$0xf] }
  0x80   : > { %433 = vst [vmem:[%s4639_s30 + $0x1c0] sm:$0xf] %v432_v48  ;;  %v560_v48 = vld [vmem:[%s4635_s29 + $0x1080] sm:$0xf] }
  0x81   : > { %435 = vst [vmem:[%s4639_s30 + $0x1c4] sm:$0xf] %v434_v49  ;;  %v562_v49 = vld [vmem:[%s4635_s29 + $0x1098] sm:$0xf] }
  0x82   : > { %437 = vst [vmem:[%s4639_s30 + $0x1c8] sm:$0xf] %v436_v50  ;;  %v564_v50 = vld [vmem:[%s4635_s29 + $0x10b0] sm:$0xf] }
  0x83   : > { %439 = vst [vmem:[%s4639_s30 + $0x1cc] sm:$0xf] %v438_v51  ;;  %v566_v51 = vld [vmem:[%s4635_s29 + $0x10c8] sm:$0xf] }
  0x84   : > { %441 = vst [vmem:[%s4639_s30 + $0x1d0] sm:$0xf] %v440_v52  ;;  %v568_v52 = vld [vmem:[%s4635_s29 + $0x10e0] sm:$0xf] }
  0x85   : > { %443 = vst [vmem:[%s4639_s30 + $0x1d4] sm:$0xf] %v442_v53  ;;  %v570_v53 = vld [vmem:[%s4635_s29 + $0x10f8] sm:$0xf] }
  0x86   : > { %445 = vst [vmem:[%s4639_s30 + $0x1d8] sm:$0xf] %v444_v54  ;;  %v572_v54 = vld [vmem:[%s4635_s29 + $0x1110] sm:$0xf] }
  0x87   : > { %447 = vst [vmem:[%s4639_s30 + $0x1dc] sm:$0xf] %v446_v55  ;;  %v574_v55 = vld [vmem:[%s4635_s29 + $0x1128] sm:$0xf] }
  0x88   : > { %449 = vst [vmem:[%s4639_s30 + $0x1e0] sm:$0xf] %v448_v56  ;;  %v576_v56 = vld [vmem:[%s4635_s29 + $0x1140] sm:$0xf] }
  0x89   : > { %451 = vst [vmem:[%s4639_s30 + $0x1e4] sm:$0xf] %v450_v57  ;;  %v578_v57 = vld [vmem:[%s4635_s29 + $0x1158] sm:$0xf] }
  0x8a   : > { %453 = vst [vmem:[%s4639_s30 + $0x1e8] sm:$0xf] %v452_v58  ;;  %v580_v58 = vld [vmem:[%s4635_s29 + $0x1170] sm:$0xf] }
  0x8b   : > { %455 = vst [vmem:[%s4639_s30 + $0x1ec] sm:$0xf] %v454_v59  ;;  %v582_v59 = vld [vmem:[%s4635_s29 + $0x1188] sm:$0xf] }
  0x8c   : > { %457 = vst [vmem:[%s4639_s30 + $0x1f0] sm:$0xf] %v456_v60  ;;  %v584_v60 = vld [vmem:[%s4635_s29 + $0x11a0] sm:$0xf] }
  0x8d   : > { %459 = vst [vmem:[%s4639_s30 + $0x1f4] sm:$0xf] %v458_v61  ;;  %v586_v61 = vld [vmem:[%s4635_s29 + $0x11b8] sm:$0xf] }
  0x8e   : > { %461 = vst [vmem:[%s4639_s30 + $0x1f8] sm:$0xf] %v460_v62  ;;  %v588_v62 = vld [vmem:[%s4635_s29 + $0x11d0] sm:$0xf] }
  0x8f   : > { %463 = vst [vmem:[%s4639_s30 + $0x1fc] sm:$0xf] %v462_v63  ;;  %v590_v63 = vld [vmem:[%s4635_s29 + $0x11e8] sm:$0xf] }
  0x90   : > { %465 = vst [vmem:[%s4639_s30 + $0x200] sm:$0xf] %v464_v0  ;;  %v592_v0 = vld [vmem:[%s4635_s29 + $0x1200] sm:$0xf] }
  0x91   : > { %467 = vst [vmem:[%s4639_s30 + $0x204] sm:$0xf] %v466_v1  ;;  %v594_v1 = vld [vmem:[%s4635_s29 + $0x1218] sm:$0xf] }
  0x92   : > { %469 = vst [vmem:[%s4639_s30 + $0x208] sm:$0xf] %v468_v2  ;;  %v596_v2 = vld [vmem:[%s4635_s29 + $0x1230] sm:$0xf] }
  0x93   : > { %471 = vst [vmem:[%s4639_s30 + $0x20c] sm:$0xf] %v470_v3  ;;  %v598_v3 = vld [vmem:[%s4635_s29 + $0x1248] sm:$0xf] }
  0x94   : > { %473 = vst [vmem:[%s4639_s30 + $0x210] sm:$0xf] %v472_v4  ;;  %v600_v4 = vld [vmem:[%s4635_s29 + $0x1260] sm:$0xf] }
  0x95   : > { %475 = vst [vmem:[%s4639_s30 + $0x214] sm:$0xf] %v474_v5  ;;  %v602_v5 = vld [vmem:[%s4635_s29 + $0x1278] sm:$0xf] }
  0x96   : > { %477 = vst [vmem:[%s4639_s30 + $0x218] sm:$0xf] %v476_v6  ;;  %v604_v6 = vld [vmem:[%s4635_s29 + $0x1290] sm:$0xf] }
  0x97   : > { %479 = vst [vmem:[%s4639_s30 + $0x21c] sm:$0xf] %v478_v7  ;;  %v606_v7 = vld [vmem:[%s4635_s29 + $0x12a8] sm:$0xf] }
  0x98   : > { %481 = vst [vmem:[%s4639_s30 + $0x220] sm:$0xf] %v480_v8  ;;  %v608_v8 = vld [vmem:[%s4635_s29 + $0x12c0] sm:$0xf] }
  0x99   : > { %483 = vst [vmem:[%s4639_s30 + $0x224] sm:$0xf] %v482_v9  ;;  %v610_v9 = vld [vmem:[%s4635_s29 + $0x12d8] sm:$0xf] }
  0x9a   : > { %485 = vst [vmem:[%s4639_s30 + $0x228] sm:$0xf] %v484_v10  ;;  %v612_v10 = vld [vmem:[%s4635_s29 + $0x12f0] sm:$0xf] }
  0x9b   : > { %487 = vst [vmem:[%s4639_s30 + $0x22c] sm:$0xf] %v486_v11  ;;  %v614_v11 = vld [vmem:[%s4635_s29 + $0x1308] sm:$0xf] }
  0x9c   : > { %489 = vst [vmem:[%s4639_s30 + $0x230] sm:$0xf] %v488_v12  ;;  %v616_v12 = vld [vmem:[%s4635_s29 + $0x1320] sm:$0xf] }
  0x9d   : > { %491 = vst [vmem:[%s4639_s30 + $0x234] sm:$0xf] %v490_v13  ;;  %v618_v13 = vld [vmem:[%s4635_s29 + $0x1338] sm:$0xf] }
  0x9e   : > { %493 = vst [vmem:[%s4639_s30 + $0x238] sm:$0xf] %v492_v14  ;;  %v620_v14 = vld [vmem:[%s4635_s29 + $0x1350] sm:$0xf] }
  0x9f   : > { %495 = vst [vmem:[%s4639_s30 + $0x23c] sm:$0xf] %v494_v15  ;;  %v622_v15 = vld [vmem:[%s4635_s29 + $0x1368] sm:$0xf] }
  0xa0   : > { %497 = vst [vmem:[%s4639_s30 + $0x240] sm:$0xf] %v496_v16  ;;  %v624_v16 = vld [vmem:[%s4635_s29 + $0x1380] sm:$0xf] }
  0xa1   : > { %499 = vst [vmem:[%s4639_s30 + $0x244] sm:$0xf] %v498_v17  ;;  %v626_v17 = vld [vmem:[%s4635_s29 + $0x1398] sm:$0xf] }
  0xa2   : > { %501 = vst [vmem:[%s4639_s30 + $0x248] sm:$0xf] %v500_v18  ;;  %v628_v18 = vld [vmem:[%s4635_s29 + $0x13b0] sm:$0xf] }
  0xa3   : > { %503 = vst [vmem:[%s4639_s30 + $0x24c] sm:$0xf] %v502_v19  ;;  %v630_v19 = vld [vmem:[%s4635_s29 + $0x13c8] sm:$0xf] }
  0xa4   : > { %505 = vst [vmem:[%s4639_s30 + $0x250] sm:$0xf] %v504_v20  ;;  %v632_v20 = vld [vmem:[%s4635_s29 + $0x13e0] sm:$0xf] }
  0xa5   : > { %507 = vst [vmem:[%s4639_s30 + $0x254] sm:$0xf] %v506_v21  ;;  %v634_v21 = vld [vmem:[%s4635_s29 + $0x13f8] sm:$0xf] }
  0xa6   : > { %509 = vst [vmem:[%s4639_s30 + $0x258] sm:$0xf] %v508_v22  ;;  %v636_v22 = vld [vmem:[%s4635_s29 + $0x1410] sm:$0xf] }
  0xa7   : > { %511 = vst [vmem:[%s4639_s30 + $0x25c] sm:$0xf] %v510_v23  ;;  %v638_v23 = vld [vmem:[%s4635_s29 + $0x1428] sm:$0xf] }
  0xa8   : > { %513 = vst [vmem:[%s4639_s30 + $0x260] sm:$0xf] %v512_v24  ;;  %v640_v24 = vld [vmem:[%s4635_s29 + $0x1440] sm:$0xf] }
  0xa9   : > { %515 = vst [vmem:[%s4639_s30 + $0x264] sm:$0xf] %v514_v25  ;;  %v642_v25 = vld [vmem:[%s4635_s29 + $0x1458] sm:$0xf] }
  0xaa   : > { %517 = vst [vmem:[%s4639_s30 + $0x268] sm:$0xf] %v516_v26  ;;  %v644_v26 = vld [vmem:[%s4635_s29 + $0x1470] sm:$0xf] }
  0xab   : > { %519 = vst [vmem:[%s4639_s30 + $0x26c] sm:$0xf] %v518_v27  ;;  %v646_v27 = vld [vmem:[%s4635_s29 + $0x1488] sm:$0xf] }
  0xac   : > { %521 = vst [vmem:[%s4639_s30 + $0x270] sm:$0xf] %v520_v28  ;;  %v648_v28 = vld [vmem:[%s4635_s29 + $0x14a0] sm:$0xf] }
  0xad   : > { %523 = vst [vmem:[%s4639_s30 + $0x274] sm:$0xf] %v522_v29  ;;  %v650_v29 = vld [vmem:[%s4635_s29 + $0x14b8] sm:$0xf] }
  0xae   : > { %525 = vst [vmem:[%s4639_s30 + $0x278] sm:$0xf] %v524_v30  ;;  %v652_v30 = vld [vmem:[%s4635_s29 + $0x14d0] sm:$0xf] }
  0xaf   : > { %527 = vst [vmem:[%s4639_s30 + $0x27c] sm:$0xf] %v526_v31  ;;  %v654_v31 = vld [vmem:[%s4635_s29 + $0x14e8] sm:$0xf] }
  0xb0   : > { %529 = vst [vmem:[%s4639_s30 + $0x280] sm:$0xf] %v528_v32  ;;  %v656_v32 = vld [vmem:[%s4635_s29 + $0x1500] sm:$0xf] }
  0xb1   : > { %531 = vst [vmem:[%s4639_s30 + $0x284] sm:$0xf] %v530_v33  ;;  %v658_v33 = vld [vmem:[%s4635_s29 + $0x1518] sm:$0xf] }
  0xb2   : > { %533 = vst [vmem:[%s4639_s30 + $0x288] sm:$0xf] %v532_v34  ;;  %v660_v34 = vld [vmem:[%s4635_s29 + $0x1530] sm:$0xf] }
  0xb3   : > { %535 = vst [vmem:[%s4639_s30 + $0x28c] sm:$0xf] %v534_v35  ;;  %v662_v35 = vld [vmem:[%s4635_s29 + $0x1548] sm:$0xf] }
  0xb4   : > { %537 = vst [vmem:[%s4639_s30 + $0x290] sm:$0xf] %v536_v36  ;;  %v664_v36 = vld [vmem:[%s4635_s29 + $0x1560] sm:$0xf] }
  0xb5   : > { %539 = vst [vmem:[%s4639_s30 + $0x294] sm:$0xf] %v538_v37  ;;  %v666_v37 = vld [vmem:[%s4635_s29 + $0x1578] sm:$0xf] }
  0xb6   : > { %541 = vst [vmem:[%s4639_s30 + $0x298] sm:$0xf] %v540_v38  ;;  %v668_v38 = vld [vmem:[%s4635_s29 + $0x1590] sm:$0xf] }
  0xb7   : > { %543 = vst [vmem:[%s4639_s30 + $0x29c] sm:$0xf] %v542_v39  ;;  %v670_v39 = vld [vmem:[%s4635_s29 + $0x15a8] sm:$0xf] }
  0xb8   : > { %545 = vst [vmem:[%s4639_s30 + $0x2a0] sm:$0xf] %v544_v40  ;;  %v672_v40 = vld [vmem:[%s4635_s29 + $0x15c0] sm:$0xf] }
  0xb9   : > { %547 = vst [vmem:[%s4639_s30 + $0x2a4] sm:$0xf] %v546_v41  ;;  %v674_v41 = vld [vmem:[%s4635_s29 + $0x15d8] sm:$0xf] }
  0xba   : > { %549 = vst [vmem:[%s4639_s30 + $0x2a8] sm:$0xf] %v548_v42  ;;  %v676_v42 = vld [vmem:[%s4635_s29 + $0x15f0] sm:$0xf] }
  0xbb   : > { %551 = vst [vmem:[%s4639_s30 + $0x2ac] sm:$0xf] %v550_v43  ;;  %v678_v43 = vld [vmem:[%s4635_s29 + $0x1608] sm:$0xf] }
  0xbc   : > { %553 = vst [vmem:[%s4639_s30 + $0x2b0] sm:$0xf] %v552_v44  ;;  %v680_v44 = vld [vmem:[%s4635_s29 + $0x1620] sm:$0xf] }
  0xbd   : > { %555 = vst [vmem:[%s4639_s30 + $0x2b4] sm:$0xf] %v554_v45  ;;  %v682_v45 = vld [vmem:[%s4635_s29 + $0x1638] sm:$0xf] }
  0xbe   : > { %557 = vst [vmem:[%s4639_s30 + $0x2b8] sm:$0xf] %v556_v46  ;;  %v684_v46 = vld [vmem:[%s4635_s29 + $0x1650] sm:$0xf] }
  0xbf   : > { %559 = vst [vmem:[%s4639_s30 + $0x2bc] sm:$0xf] %v558_v47  ;;  %v686_v47 = vld [vmem:[%s4635_s29 + $0x1668] sm:$0xf] }
  0xc0   : > { %561 = vst [vmem:[%s4639_s30 + $0x2c0] sm:$0xf] %v560_v48  ;;  %v688_v48 = vld [vmem:[%s4635_s29 + $0x1680] sm:$0xf] }
  0xc1   : > { %563 = vst [vmem:[%s4639_s30 + $0x2c4] sm:$0xf] %v562_v49  ;;  %v690_v49 = vld [vmem:[%s4635_s29 + $0x1698] sm:$0xf] }
  0xc2   : > { %565 = vst [vmem:[%s4639_s30 + $0x2c8] sm:$0xf] %v564_v50  ;;  %v692_v50 = vld [vmem:[%s4635_s29 + $0x16b0] sm:$0xf] }
  0xc3   : > { %567 = vst [vmem:[%s4639_s30 + $0x2cc] sm:$0xf] %v566_v51  ;;  %v694_v51 = vld [vmem:[%s4635_s29 + $0x16c8] sm:$0xf] }
  0xc4   : > { %569 = vst [vmem:[%s4639_s30 + $0x2d0] sm:$0xf] %v568_v52  ;;  %v696_v52 = vld [vmem:[%s4635_s29 + $0x16e0] sm:$0xf] }
  0xc5   : > { %571 = vst [vmem:[%s4639_s30 + $0x2d4] sm:$0xf] %v570_v53  ;;  %v698_v53 = vld [vmem:[%s4635_s29 + $0x16f8] sm:$0xf] }
  0xc6   : > { %573 = vst [vmem:[%s4639_s30 + $0x2d8] sm:$0xf] %v572_v54  ;;  %v700_v54 = vld [vmem:[%s4635_s29 + $0x1710] sm:$0xf] }
  0xc7   : > { %575 = vst [vmem:[%s4639_s30 + $0x2dc] sm:$0xf] %v574_v55  ;;  %v702_v55 = vld [vmem:[%s4635_s29 + $0x1728] sm:$0xf] }
  0xc8   : > { %577 = vst [vmem:[%s4639_s30 + $0x2e0] sm:$0xf] %v576_v56  ;;  %v704_v56 = vld [vmem:[%s4635_s29 + $0x1740] sm:$0xf] }
  0xc9   : > { %579 = vst [vmem:[%s4639_s30 + $0x2e4] sm:$0xf] %v578_v57  ;;  %v706_v57 = vld [vmem:[%s4635_s29 + $0x1758] sm:$0xf] }
  0xca   : > { %581 = vst [vmem:[%s4639_s30 + $0x2e8] sm:$0xf] %v580_v58  ;;  %v708_v58 = vld [vmem:[%s4635_s29 + $0x1770] sm:$0xf] }
  0xcb   : > { %583 = vst [vmem:[%s4639_s30 + $0x2ec] sm:$0xf] %v582_v59  ;;  %v710_v59 = vld [vmem:[%s4635_s29 + $0x1788] sm:$0xf] }
  0xcc   : > { %585 = vst [vmem:[%s4639_s30 + $0x2f0] sm:$0xf] %v584_v60  ;;  %v712_v60 = vld [vmem:[%s4635_s29 + $0x17a0] sm:$0xf] }
  0xcd   : > { %587 = vst [vmem:[%s4639_s30 + $0x2f4] sm:$0xf] %v586_v61  ;;  %v714_v61 = vld [vmem:[%s4635_s29 + $0x17b8] sm:$0xf] }
  0xce   : > { %589 = vst [vmem:[%s4639_s30 + $0x2f8] sm:$0xf] %v588_v62  ;;  %v716_v62 = vld [vmem:[%s4635_s29 + $0x17d0] sm:$0xf] }
  0xcf   : > { %591 = vst [vmem:[%s4639_s30 + $0x2fc] sm:$0xf] %v590_v63  ;;  %v718_v63 = vld [vmem:[%s4635_s29 + $0x17e8] sm:$0xf] }
  0xd0   : > { %593 = vst [vmem:[%s4639_s30 + $0x300] sm:$0xf] %v592_v0 }
  0xd1   : > { %595 = vst [vmem:[%s4639_s30 + $0x304] sm:$0xf] %v594_v1 }
  0xd2   : > { %597 = vst [vmem:[%s4639_s30 + $0x308] sm:$0xf] %v596_v2 }
  0xd3   : > { %599 = vst [vmem:[%s4639_s30 + $0x30c] sm:$0xf] %v598_v3 }
  0xd4   : > { %601 = vst [vmem:[%s4639_s30 + $0x310] sm:$0xf] %v600_v4 }
  0xd5   : > { %603 = vst [vmem:[%s4639_s30 + $0x314] sm:$0xf] %v602_v5 }
  0xd6   : > { %605 = vst [vmem:[%s4639_s30 + $0x318] sm:$0xf] %v604_v6 }
  0xd7   : > { %607 = vst [vmem:[%s4639_s30 + $0x31c] sm:$0xf] %v606_v7 }
  0xd8   : > { %609 = vst [vmem:[%s4639_s30 + $0x320] sm:$0xf] %v608_v8 }
  0xd9   : > { %611 = vst [vmem:[%s4639_s30 + $0x324] sm:$0xf] %v610_v9 }
  0xda   : > { %613 = vst [vmem:[%s4639_s30 + $0x328] sm:$0xf] %v612_v10 }
  0xdb   : > { %615 = vst [vmem:[%s4639_s30 + $0x32c] sm:$0xf] %v614_v11 }
  0xdc   : > { %617 = vst [vmem:[%s4639_s30 + $0x330] sm:$0xf] %v616_v12 }
  0xdd   : > { %619 = vst [vmem:[%s4639_s30 + $0x334] sm:$0xf] %v618_v13 }
  0xde   : > { %621 = vst [vmem:[%s4639_s30 + $0x338] sm:$0xf] %v620_v14 }
  0xdf   : > { %623 = vst [vmem:[%s4639_s30 + $0x33c] sm:$0xf] %v622_v15 }
  0xe0   : > { %625 = vst [vmem:[%s4639_s30 + $0x340] sm:$0xf] %v624_v16 }
  0xe1   : > { %627 = vst [vmem:[%s4639_s30 + $0x344] sm:$0xf] %v626_v17 }
  0xe2   : > { %629 = vst [vmem:[%s4639_s30 + $0x348] sm:$0xf] %v628_v18 }
  0xe3   : > { %631 = vst [vmem:[%s4639_s30 + $0x34c] sm:$0xf] %v630_v19 }
  0xe4   : > { %633 = vst [vmem:[%s4639_s30 + $0x350] sm:$0xf] %v632_v20 }
  0xe5   : > { %635 = vst [vmem:[%s4639_s30 + $0x354] sm:$0xf] %v634_v21 }
  0xe6   : > { %637 = vst [vmem:[%s4639_s30 + $0x358] sm:$0xf] %v636_v22 }
  0xe7   : > { %639 = vst [vmem:[%s4639_s30 + $0x35c] sm:$0xf] %v638_v23 }
  0xe8   : > { %641 = vst [vmem:[%s4639_s30 + $0x360] sm:$0xf] %v640_v24 }
  0xe9   : > { %643 = vst [vmem:[%s4639_s30 + $0x364] sm:$0xf] %v642_v25 }
  0xea   : > { %645 = vst [vmem:[%s4639_s30 + $0x368] sm:$0xf] %v644_v26 }
  0xeb   : > { %647 = vst [vmem:[%s4639_s30 + $0x36c] sm:$0xf] %v646_v27 }
  0xec   : > { %649 = vst [vmem:[%s4639_s30 + $0x370] sm:$0xf] %v648_v28 }
  0xed   : > { %651 = vst [vmem:[%s4639_s30 + $0x374] sm:$0xf] %v650_v29 }
  0xee   : > { %653 = vst [vmem:[%s4639_s30 + $0x378] sm:$0xf] %v652_v30 }
  0xef   : > { %655 = vst [vmem:[%s4639_s30 + $0x37c] sm:$0xf] %v654_v31 }
  0xf0   : > { %657 = vst [vmem:[%s4639_s30 + $0x380] sm:$0xf] %v656_v32 }
  0xf1   : > { %659 = vst [vmem:[%s4639_s30 + $0x384] sm:$0xf] %v658_v33 }
  0xf2   : > { %661 = vst [vmem:[%s4639_s30 + $0x388] sm:$0xf] %v660_v34 }
  0xf3   : > { %663 = vst [vmem:[%s4639_s30 + $0x38c] sm:$0xf] %v662_v35 }
  0xf4   : > { %665 = vst [vmem:[%s4639_s30 + $0x390] sm:$0xf] %v664_v36 }
  0xf5   : > { %667 = vst [vmem:[%s4639_s30 + $0x394] sm:$0xf] %v666_v37 }
  0xf6   : > { %669 = vst [vmem:[%s4639_s30 + $0x398] sm:$0xf] %v668_v38 }
  0xf7   : > { %671 = vst [vmem:[%s4639_s30 + $0x39c] sm:$0xf] %v670_v39 }
  0xf8   : > { %673 = vst [vmem:[%s4639_s30 + $0x3a0] sm:$0xf] %v672_v40 }
  0xf9   : > { %675 = vst [vmem:[%s4639_s30 + $0x3a4] sm:$0xf] %v674_v41 }
  0xfa   : > { %677 = vst [vmem:[%s4639_s30 + $0x3a8] sm:$0xf] %v676_v42 }
  0xfb   : > { %679 = vst [vmem:[%s4639_s30 + $0x3ac] sm:$0xf] %v678_v43 }
  0xfc   : > { %681 = vst [vmem:[%s4639_s30 + $0x3b0] sm:$0xf] %v680_v44 }
  0xfd   : > { %683 = vst [vmem:[%s4639_s30 + $0x3b4] sm:$0xf] %v682_v45 }
  0xfe   : > { %685 = vst [vmem:[%s4639_s30 + $0x3b8] sm:$0xf] %v684_v46 }
  0xff   : > { %687 = vst [vmem:[%s4639_s30 + $0x3bc] sm:$0xf] %v686_v47 }
 0x100   : > { %689 = vst [vmem:[%s4639_s30 + $0x3c0] sm:$0xf] %v688_v48 }
 0x101   : > { %691 = vst [vmem:[%s4639_s30 + $0x3c4] sm:$0xf] %v690_v49 }
 0x102   : > { %693 = vst [vmem:[%s4639_s30 + $0x3c8] sm:$0xf] %v692_v50 }
 0x103   : > { %695 = vst [vmem:[%s4639_s30 + $0x3cc] sm:$0xf] %v694_v51 }
 0x104   : > { %697 = vst [vmem:[%s4639_s30 + $0x3d0] sm:$0xf] %v696_v52 }
 0x105   : > { %699 = vst [vmem:[%s4639_s30 + $0x3d4] sm:$0xf] %v698_v53 }
 0x106   : > { %701 = vst [vmem:[%s4639_s30 + $0x3d8] sm:$0xf] %v700_v54 }
 0x107   : > { %703 = vst [vmem:[%s4639_s30 + $0x3dc] sm:$0xf] %v702_v55 }
 0x108   : > { %705 = vst [vmem:[%s4639_s30 + $0x3e0] sm:$0xf] %v704_v56 }
 0x109   : > { %707 = vst [vmem:[%s4639_s30 + $0x3e4] sm:$0xf] %v706_v57 }
 0x10a   : > { %709 = vst [vmem:[%s4639_s30 + $0x3e8] sm:$0xf] %v708_v58 }
 0x10b   : > { %711 = vst [vmem:[%s4639_s30 + $0x3ec] sm:$0xf] %v710_v59 }
 0x10c   : > { %713 = vst [vmem:[%s4639_s30 + $0x3f0] sm:$0xf] %v712_v60 }
 0x10d   : > { %715 = vst [vmem:[%s4639_s30 + $0x3f4] sm:$0xf] %v714_v61 }
 0x10e   : > { %717 = vst [vmem:[%s4639_s30 + $0x3f8] sm:$0xf] %v716_v62 }
 0x10f   : > { %719 = vst [vmem:[%s4639_s30 + $0x3fc] sm:$0xf] %v718_v63 }
 0x110 PF: > { %p3840_p6 = scmp.ge.s32.totalorder %s4565_s19, 1  ;;  %p2321_p7 = scmp.lt.s32.totalorder %s4565_s19, 7 }
 0x112   : > { %p2322_p8 = pnand %p3840_p6, %p2321_p7 }
 0x113   : > { %s2328_s5 = sand.u32 (!%p2322_p8), 1, %s4549_s15   ;;  %p2377_p9 = scmp.lt.s32.totalorder (!%p2322_p8), %s4557_s17, 5 }
 0x114   : > { %2325 = sbr.rel (%p2322_p8) target bundleno = 552 (0x228), region = 84  ;;  %s3841_s6 = sshll.u32 (!%p2322_p8), %s2328_s5, 10 }
 0x115   : > { %s5154_s7 = scalar_lea.vmem (!%p2322_p8), [#allocation2], %s3841_s6 }
 0x119   : > { %v4365_v0 = vld [vmem:[%s5154_s7 + $0x38] sm:$0xff]  ;;  %v4364_v4 = vld [vmem:[%s5154_s7 + $0x30] sm:$0xff]  ;;  %v4363_v8 = vld [vmem:[%s5154_s7 + $0x28] sm:$0xff]  ;;  %s5355_s17 = smov (!%p2377_p9, %s4557_s17), 5 }
 0x11a   : > { %v4373_v1 = vld [vmem:[%s5154_s7 + $0x78] sm:$0xff]  ;;  %3488 = vmatpush.bf16.msra.mxu0 %v4365_v0  ;;  %v4372_v5 = vld [vmem:[%s5154_s7 + $0x70] sm:$0xff]  ;;  %v4371_v9 = vld [vmem:[%s5154_s7 + $0x68] sm:$0xff]  ;;  %s2379_s10 = scalar_lea.vmem %s5345_s2, %s5355_s17 }
 0x11b   : > { %v4381_v2 = vld [vmem:[%s5154_s7 + $0xb8] sm:$0xff]  ;;  %3501 = vmatpush.bf16.msra.mxu1 %v4373_v1  ;;  %v4380_v6 = vld [vmem:[%s5154_s7 + $0xb0] sm:$0xff]  ;;  %v4379_v10 = vld [vmem:[%s5154_s7 + $0xa8] sm:$0xff] }
 0x11c   : > { %v4389_v3 = vld [vmem:[%s5154_s7 + $0xf8] sm:$0xff]  ;;  %3514 = vmatpush.bf16.msra.mxu2 %v4381_v2  ;;  %v4388_v7 = vld [vmem:[%s5154_s7 + $0xf0] sm:$0xff]  ;;  %v4387_v11 = vld [vmem:[%s5154_s7 + $0xe8] sm:$0xff] }
 0x11d   : > { %3527 = vmatpush.bf16.msra.mxu3 %v4389_v3  ;;  %v4362_v12 = vld [vmem:[%s5154_s7 + $0x20] sm:$0xff]  ;;  %v4361_v16 = vld [vmem:[%s5154_s7 + $0x18] sm:$0xff]  ;;  %v4360_v20 = vld [vmem:[%s5154_s7 + $0x10] sm:$0xff] }
 0x11e   : > { %3489 = vmatpush.bf16.msra.mxu0 %v4364_v4  ;;  %v4370_v13 = vld [vmem:[%s5154_s7 + $0x60] sm:$0xff]  ;;  %v4369_v17 = vld [vmem:[%s5154_s7 + $0x58] sm:$0xff]  ;;  %v4368_v21 = vld [vmem:[%s5154_s7 + $0x50] sm:$0xff] }
 0x11f   : > { %3502 = vmatpush.bf16.msra.mxu1 %v4372_v5  ;;  %v4378_v14 = vld [vmem:[%s5154_s7 + $0xa0] sm:$0xff]  ;;  %v4377_v18 = vld [vmem:[%s5154_s7 + $0x98] sm:$0xff]  ;;  %v4376_v22 = vld [vmem:[%s5154_s7 + $0x90] sm:$0xff] }
 0x120   : > { %3515 = vmatpush.bf16.msra.mxu2 %v4380_v6  ;;  %v4386_v15 = vld [vmem:[%s5154_s7 + $0xe0] sm:$0xff]  ;;  %v4385_v19 = vld [vmem:[%s5154_s7 + $0xd8] sm:$0xff]  ;;  %v4384_v23 = vld [vmem:[%s5154_s7 + $0xd0] sm:$0xff] }
 0x121   : > { %3528 = vmatpush.bf16.msra.mxu3 %v4388_v7  ;;  %v4359_v24 = vld [vmem:[%s5154_s7 + $0x8] sm:$0xff]  ;;  %v2396_v29 = vld [vmem:[%s5343_s0] sm:$0xff]  ;;  %v4397_v38 = vld [vmem:[%s5154_s7 + $0x138] sm:$0xff] }
 0x122   : > { %3490 = vmatpush.bf16.msra.mxu0 %v4363_v8  ;;  %v4367_v25 = vld [vmem:[%s5154_s7 + $0x48] sm:$0xff]  ;;  %v4358_v30 = vld [vmem:[%s5154_s7] sm:$0xff]  ;;  %v2672_v33 = vunpack.c.l.b16 %v2396_v29  ;;  %v2673_v37 = vunpack.c.h.b16 %v2396_v29  ;;  %v4405_v39 = vld [vmem:[%s5154_s7 + $0x178] sm:$0xff] }
 0x123   : > { %3503 = vmatpush.bf16.msra.mxu1 %v4371_v9  ;;  %v4375_v26 = vld [vmem:[%s5154_s7 + $0x88] sm:$0xff]  ;;  %v4366_v31 = vld [vmem:[%s5154_s7 + $0x40] sm:$0xff]  ;;  %v4413_v40 = vld [vmem:[%s5154_s7 + $0x1b8] sm:$0xff] }
 0x124   : > { %3516 = vmatpush.bf16.msra.mxu2 %v4379_v10  ;;  %v4383_v27 = vld [vmem:[%s5154_s7 + $0xc8] sm:$0xff]  ;;  %v4374_v34 = vld [vmem:[%s5154_s7 + $0x80] sm:$0xff]  ;;  %v4421_v41 = vld [vmem:[%s5154_s7 + $0x1f8] sm:$0xff]  ;;  %v2688_v43 = vpack.c.b16 %v2672_v33, %v2672_v33  ;;  %v2689_v45 = vpack.c.b16 %v2673_v37, %v2673_v37 }
 0x125   : > { %3529 = vmatpush.bf16.msra.mxu3 %v4387_v11  ;;  %v2397_v28 = vld [vmem:[%s5343_s0 + $0x8] sm:$0xff]  ;;  %v4382_v35 = vld [vmem:[%s5154_s7 + $0xc0] sm:$0xff]  ;;  %v4396_v46 = vld [vmem:[%s5154_s7 + $0x130] sm:$0xff] }
 0x126   : > { %3491 = vmatpush.bf16.msra.mxu0 %v4362_v12  ;;  %v2674_v32 = vunpack.c.l.b16 %v2397_v28  ;;  %v2675_v36 = vunpack.c.h.b16 %v2397_v28  ;;  %v4404_v47 = vld [vmem:[%s5154_s7 + $0x170] sm:$0xff]  ;;  %v4395_v50 = vld [vmem:[%s5154_s7 + $0x128] sm:$0xff]  ;;  %v4394_v54 = vld [vmem:[%s5154_s7 + $0x120] sm:$0xff] }
 0x127   : > { %3504 = vmatpush.bf16.msra.mxu1 %v4370_v13  ;;  %v4412_v48 = vld [vmem:[%s5154_s7 + $0x1b0] sm:$0xff]  ;;  %v4403_v51 = vld [vmem:[%s5154_s7 + $0x168] sm:$0xff]  ;;  %v4402_v55 = vld [vmem:[%s5154_s7 + $0x160] sm:$0xff] }
 0x128   : > { %3517 = vmatpush.bf16.msra.mxu2 %v4378_v14  ;;  %v2690_v42 = vpack.c.b16 %v2674_v32, %v2674_v32  ;;  %v2691_v44 = vpack.c.b16 %v2675_v36, %v2675_v36  ;;  %v4420_v49 = vld [vmem:[%s5154_s7 + $0x1f0] sm:$0xff]  ;;  %v4411_v52 = vld [vmem:[%s5154_s7 + $0x1a8] sm:$0xff]  ;;  %v4410_v56 = vld [vmem:[%s5154_s7 + $0x1a0] sm:$0xff] }
 0x129   : > { %3530 = vmatpush.bf16.msra.mxu3 %v4386_v15  ;;  %v4419_v53 = vld [vmem:[%s5154_s7 + $0x1e8] sm:$0xff]  ;;  %v4418_v57 = vld [vmem:[%s5154_s7 + $0x1e0] sm:$0xff]  ;;  %v4393_v58 = vld [vmem:[%s5154_s7 + $0x118] sm:$0xff] }
 0x12a   : > { %3492 = vmatpush.bf16.msra.mxu0 %v4361_v16  ;;  %v4401_v59 = vld [vmem:[%s5154_s7 + $0x158] sm:$0xff]  ;;  %v4392_v62 = vld [vmem:[%s5154_s7 + $0x110] sm:$0xff]  ;;  %v4391_v2 = vld [vmem:[%s5154_s7 + $0x108] sm:$0xff] }
 0x12b   : > { %3505 = vmatpush.bf16.msra.mxu1 %v4369_v17  ;;  %v4409_v60 = vld [vmem:[%s5154_s7 + $0x198] sm:$0xff]  ;;  %v4400_v63 = vld [vmem:[%s5154_s7 + $0x150] sm:$0xff]  ;;  %v4399_v3 = vld [vmem:[%s5154_s7 + $0x148] sm:$0xff] }
 0x12c   : > { %3518 = vmatpush.bf16.msra.mxu2 %v4377_v18  ;;  %v4417_v61 = vld [vmem:[%s5154_s7 + $0x1d8] sm:$0xff]  ;;  %v4408_v0 = vld [vmem:[%s5154_s7 + $0x190] sm:$0xff]  ;;  %v4407_v4 = vld [vmem:[%s5154_s7 + $0x188] sm:$0xff] }
 0x12d   : > { %3531 = vmatpush.bf16.msra.mxu3 %v4385_v19  ;;  %v4416_v1 = vld [vmem:[%s5154_s7 + $0x1d0] sm:$0xff]  ;;  %v4415_v5 = vld [vmem:[%s5154_s7 + $0x1c8] sm:$0xff]  ;;  %v2399_v6 = vld [vmem:[%s5343_s0 + $0x18] sm:$0xff] }
 0x12e   : > { %3493 = vmatpush.bf16.msra.mxu0 %v4360_v20  ;;  %v2398_v7 = vld [vmem:[%s5343_s0 + $0x10] sm:$0xff]  ;;  %v4390_v8 = vld [vmem:[%s5154_s7 + $0x100] sm:$0xff]  ;;  %v2678_v10 = vunpack.c.l.b16 %v2399_v6  ;;  %v2679_v14 = vunpack.c.h.b16 %v2399_v6  ;;  %v4429_v16 = vld [vmem:[%s5154_s7 + $0x238] sm:$0xff] }
 0x12f   : > { %3506 = vmatpush.bf16.msra.mxu1 %v4368_v21  ;;  %v4398_v9 = vld [vmem:[%s5154_s7 + $0x140] sm:$0xff]  ;;  %v2676_v11 = vunpack.c.l.b16 %v2398_v7  ;;  %v2677_v15 = vunpack.c.h.b16 %v2398_v7  ;;  %v4437_v17 = vld [vmem:[%s5154_s7 + $0x278] sm:$0xff]  ;;  %v4427_v28 = vld [vmem:[%s5154_s7 + $0x228] sm:$0xff] }
 0x130   : > { %3519 = vmatpush.bf16.msra.mxu2 %v4376_v22  ;;  %v4406_v12 = vld [vmem:[%s5154_s7 + $0x180] sm:$0xff]  ;;  %v4445_v18 = vld [vmem:[%s5154_s7 + $0x2b8] sm:$0xff]  ;;  %v2694_v20 = vpack.c.b16 %v2678_v10, %v2678_v10  ;;  %v2695_v22 = vpack.c.b16 %v2679_v14, %v2679_v14  ;;  %v4435_v29 = vld [vmem:[%s5154_s7 + $0x268] sm:$0xff] }
 0x131   : > { %3532 = vmatpush.bf16.msra.mxu3 %v4384_v23  ;;  %v4414_v13 = vld [vmem:[%s5154_s7 + $0x1c0] sm:$0xff]  ;;  %v4453_v19 = vld [vmem:[%s5154_s7 + $0x2f8] sm:$0xff]  ;;  %v2692_v21 = vpack.c.b16 %v2676_v11, %v2676_v11  ;;  %v2693_v23 = vpack.c.b16 %v2677_v15, %v2677_v15  ;;  %v4459_v6 = vld [vmem:[%s5154_s7 + $0x328] sm:$0xff] }
 0x132   : > { %3494 = vmatpush.bf16.msra.mxu0 %v4359_v24  ;;  %v4428_v24 = vld [vmem:[%s5154_s7 + $0x230] sm:$0xff]  ;;  %v4426_v32 = vld [vmem:[%s5154_s7 + $0x220] sm:$0xff]  ;;  %v4425_v36 = vld [vmem:[%s5154_s7 + $0x218] sm:$0xff] }
 0x133   : > { %3507 = vmatpush.bf16.msra.mxu1 %v4367_v25  ;;  %v4436_v25 = vld [vmem:[%s5154_s7 + $0x270] sm:$0xff]  ;;  %v4434_v33 = vld [vmem:[%s5154_s7 + $0x260] sm:$0xff]  ;;  %v4433_v37 = vld [vmem:[%s5154_s7 + $0x258] sm:$0xff] }
 0x134   : > { %3520 = vmatpush.bf16.msra.mxu2 %v4375_v26  ;;  %v4444_v26 = vld [vmem:[%s5154_s7 + $0x2b0] sm:$0xff]  ;;  %v4467_v7 = vld [vmem:[%s5154_s7 + $0x368] sm:$0xff]  ;;  %v4458_v10 = vld [vmem:[%s5154_s7 + $0x320] sm:$0xff] }
 0x135   : > { %3533 = vmatpush.bf16.msra.mxu3 %v4383_v27  ;;  %v4452_v27 = vld [vmem:[%s5154_s7 + $0x2f0] sm:$0xff]  ;;  %v4466_v11 = vld [vmem:[%s5154_s7 + $0x360] sm:$0xff]  ;;  %v4457_v14 = vld [vmem:[%s5154_s7 + $0x318] sm:$0xff] }
 0x136   : > { %3495 = vmatpush.bf16.msra.mxu0 %v4358_v30  ;;  %v4443_v30 = vld [vmem:[%s5154_s7 + $0x2a8] sm:$0xff]  ;;  %v4465_v15 = vld [vmem:[%s5154_s7 + $0x358] sm:$0xff] }
 0x137   : > { %3508 = vmatpush.bf16.msra.mxu1 %v4366_v31  ;;  %v4451_v31 = vld [vmem:[%s5154_s7 + $0x2e8] sm:$0xff] }
 0x138   : > { %3521 = vmatpush.bf16.msra.mxu2 %v4374_v34  ;;  %v4442_v34 = vld [vmem:[%s5154_s7 + $0x2a0] sm:$0xff] }
 0x139   : > { %3534 = vmatpush.bf16.msra.mxu3 %v4382_v35  ;;  %3496 = vmatmul.bf16.vlgmr.msra.gmra.mxu0 %v2688_v43  ;;  %v4450_v35 = vld [vmem:[%s5154_s7 + $0x2e0] sm:$0xff]  ;;  %v4448_v43 = vld [vmem:[%s5154_s7 + $0x2d0] sm:$0xff] }
 0x13a   : > { %3540 = vmatpush.bf16.msrb.mxu0 %v4397_v38  ;;  %3509 = vmatmul.bf16.vlgmr.msra.gmra.mxu1 %v2689_v45  ;;  %v4441_v38 = vld [vmem:[%s5154_s7 + $0x298] sm:$0xff]  ;;  %v4431_v45 = vld [vmem:[%s5154_s7 + $0x248] sm:$0xff] }
 0x13b   : > { %3553 = vmatpush.bf16.msrb.mxu1 %v4405_v39  ;;  %3522 = vmatmul.bf16.vlgmr.msra.gmra.mxu2 %v2690_v42  ;;  %v4449_v39 = vld [vmem:[%s5154_s7 + $0x2d8] sm:$0xff]  ;;  %v4440_v42 = vld [vmem:[%s5154_s7 + $0x290] sm:$0xff] }
 0x13c   : > { %3566 = vmatpush.bf16.msrb.mxu2 %v4413_v40  ;;  %3535 = vmatmul.bf16.vlgmr.msra.gmra.mxu3 %v2691_v44  ;;  %v4424_v40 = vld [vmem:[%s5154_s7 + $0x210] sm:$0xff]  ;;  %v4423_v44 = vld [vmem:[%s5154_s7 + $0x208] sm:$0xff] }
 0x13d   : > { %3579 = vmatpush.bf16.msrb.mxu3 %v4421_v41  ;;  %v4432_v41 = vld [vmem:[%s5154_s7 + $0x250] sm:$0xff] }
 0x13e   : > { %3541 = vmatpush.bf16.msrb.mxu0 %v4396_v46  ;;  %v4439_v46 = vld [vmem:[%s5154_s7 + $0x288] sm:$0xff] }
 0x13f   : > { %3554 = vmatpush.bf16.msrb.mxu1 %v4404_v47  ;;  %v4447_v47 = vld [vmem:[%s5154_s7 + $0x2c8] sm:$0xff] }
 0x140   : > { %3567 = vmatpush.bf16.msrb.mxu2 %v4412_v48  ;;  %v2400_v48 = vld [vmem:[%s5343_s0 + $0x20] sm:$0xff] }
 0x141   : > { %3580 = vmatpush.bf16.msrb.mxu3 %v4420_v49  ;;  %v2401_v49 = vld [vmem:[%s5343_s0 + $0x28] sm:$0xff] }
 0x142   : > { %3542 = vmatpush.bf16.msrb.mxu0 %v4395_v50  ;;  %v4422_v50 = vld [vmem:[%s5154_s7 + $0x200] sm:$0xff] }
 0x143   : > { %3555 = vmatpush.bf16.msrb.mxu1 %v4403_v51  ;;  %v4430_v51 = vld [vmem:[%s5154_s7 + $0x240] sm:$0xff] }
 0x144   : > { %3568 = vmatpush.bf16.msrb.mxu2 %v4411_v52  ;;  %v2680_v52 = vunpack.c.l.b16 %v2400_v48 }
 0x145   : > { %3581 = vmatpush.bf16.msrb.mxu3 %v4419_v53  ;;  %v2682_v53 = vunpack.c.l.b16 %v2401_v49 }
 0x146   : > { %3543 = vmatpush.bf16.msrb.mxu0 %v4394_v54  ;;  %v4438_v54 = vld [vmem:[%s5154_s7 + $0x280] sm:$0xff] }
 0x147   : > { %3556 = vmatpush.bf16.msrb.mxu1 %v4402_v55  ;;  %v4446_v55 = vld [vmem:[%s5154_s7 + $0x2c0] sm:$0xff] }
 0x148   : > { %3569 = vmatpush.bf16.msrb.mxu2 %v4410_v56  ;;  %v2681_v56 = vunpack.c.h.b16 %v2400_v48 }
 0x149   : > { %3582 = vmatpush.bf16.msrb.mxu3 %v4418_v57  ;;  %v2683_v57 = vunpack.c.h.b16 %v2401_v49 }
 0x14a   : > { %3544 = vmatpush.bf16.msrb.mxu0 %v4393_v58  ;;  %v4461_v58 = vld [vmem:[%s5154_s7 + $0x338] sm:$0xff] }
 0x14b   : > { %3557 = vmatpush.bf16.msrb.mxu1 %v4401_v59  ;;  %v4469_v59 = vld [vmem:[%s5154_s7 + $0x378] sm:$0xff] }
 0x14c   : > { %3570 = vmatpush.bf16.msrb.mxu2 %v4409_v60  ;;  %v4477_v60 = vld [vmem:[%s5154_s7 + $0x3b8] sm:$0xff] }
 0x14d   : > { %3583 = vmatpush.bf16.msrb.mxu3 %v4417_v61  ;;  %v4485_v61 = vld [vmem:[%s5154_s7 + $0x3f8] sm:$0xff] }
 0x14e   : > { %3545 = vmatpush.bf16.msrb.mxu0 %v4392_v62  ;;  %v2696_v62 = vpack.c.b16 %v2680_v52, %v2680_v52 }
 0x14f   : > { %3558 = vmatpush.bf16.msrb.mxu1 %v4400_v63  ;;  %v2698_v63 = vpack.c.b16 %v2682_v53, %v2682_v53 }
 0x150   : > { %3571 = vmatpush.bf16.msrb.mxu2 %v4408_v0  ;;  %v2697_v0 = vpack.c.b16 %v2681_v56, %v2681_v56 }
 0x151   : > { %3584 = vmatpush.bf16.msrb.mxu3 %v4416_v1  ;;  %v2699_v1 = vpack.c.b16 %v2683_v57, %v2683_v57 }
 0x152   : > { %3546 = vmatpush.bf16.msrb.mxu0 %v4391_v2  ;;  %v4460_v2 = vld [vmem:[%s5154_s7 + $0x330] sm:$0xff] }
 0x153   : > { %3559 = vmatpush.bf16.msrb.mxu1 %v4399_v3  ;;  %v4468_v3 = vld [vmem:[%s5154_s7 + $0x370] sm:$0xff] }
 0x154   : > { %3572 = vmatpush.bf16.msrb.mxu2 %v4407_v4  ;;  %v4476_v4 = vld [vmem:[%s5154_s7 + $0x3b0] sm:$0xff] }
 0x155   : > { %3585 = vmatpush.bf16.msrb.mxu3 %v4415_v5  ;;  %v4484_v5 = vld [vmem:[%s5154_s7 + $0x3f0] sm:$0xff] }
 0x156   : > { %3547 = vmatpush.bf16.msrb.mxu0 %v4390_v8  ;;  %v4475_v8 = vld [vmem:[%s5154_s7 + $0x3a8] sm:$0xff] }
 0x157   : > { %3560 = vmatpush.bf16.msrb.mxu1 %v4398_v9  ;;  %v4483_v9 = vld [vmem:[%s5154_s7 + $0x3e8] sm:$0xff] }
 0x158   : > { %3573 = vmatpush.bf16.msrb.mxu2 %v4406_v12  ;;  %v4474_v12 = vld [vmem:[%s5154_s7 + $0x3a0] sm:$0xff] }
 0x159   : > { %3586 = vmatpush.bf16.msrb.mxu3 %v4414_v13  ;;  %3548 = vmatmul.bf16.vlgmr.msrb.gmra.mxu0 %v2692_v21  ;;  %v4482_v13 = vld [vmem:[%s5154_s7 + $0x3e0] sm:$0xff]  ;;  %v4480_v21 = vld [vmem:[%s5154_s7 + $0x3d0] sm:$0xff] }
 0x15a   : > { %3592 = vmatpush.bf16.msra.mxu0 %v4429_v16  ;;  %3561 = vmatmul.bf16.vlgmr.msrb.gmra.mxu1 %v2693_v23  ;;  %v4473_v16 = vld [vmem:[%s5154_s7 + $0x398] sm:$0xff]  ;;  %v4463_v23 = vld [vmem:[%s5154_s7 + $0x348] sm:$0xff] }
 0x15b   : > { %3605 = vmatpush.bf16.msra.mxu1 %v4437_v17  ;;  %3574 = vmatmul.bf16.vlgmr.msrb.gmra.mxu2 %v2694_v20  ;;  %v4481_v17 = vld [vmem:[%s5154_s7 + $0x3d8] sm:$0xff]  ;;  %v4472_v20 = vld [vmem:[%s5154_s7 + $0x390] sm:$0xff] }
 0x15c   : > { %3618 = vmatpush.bf16.msra.mxu2 %v4445_v18  ;;  %3587 = vmatmul.bf16.vlgmr.msrb.gmra.mxu3 %v2695_v22  ;;  %v4456_v18 = vld [vmem:[%s5154_s7 + $0x310] sm:$0xff]  ;;  %v4455_v22 = vld [vmem:[%s5154_s7 + $0x308] sm:$0xff] }
 0x15d   : > { %3631 = vmatpush.bf16.msra.mxu3 %v4453_v19  ;;  %v4464_v19 = vld [vmem:[%s5154_s7 + $0x350] sm:$0xff] }
 0x15e   : > { %3593 = vmatpush.bf16.msra.mxu0 %v4428_v24  ;;  %v2402_v24 = vld [vmem:[%s5343_s0 + $0x30] sm:$0xff] }
 0x15f   : > { %3606 = vmatpush.bf16.msra.mxu1 %v4436_v25  ;;  %v4471_v25 = vld [vmem:[%s5154_s7 + $0x388] sm:$0xff] }
 0x160   : > { %3619 = vmatpush.bf16.msra.mxu2 %v4444_v26  ;;  %v4479_v26 = vld [vmem:[%s5154_s7 + $0x3c8] sm:$0xff] }
 0x161   : > { %3632 = vmatpush.bf16.msra.mxu3 %v4452_v27  ;;  %v2403_v27 = vld [vmem:[%s5343_s0 + $0x38] sm:$0xff] }
 0x162   : > { %3594 = vmatpush.bf16.msra.mxu0 %v4427_v28  ;;  %v2684_v28 = vunpack.c.l.b16 %v2402_v24 }
 0x163   : > { %3607 = vmatpush.bf16.msra.mxu1 %v4435_v29  ;;  %v2685_v29 = vunpack.c.h.b16 %v2402_v24 }
 0x164   : > { %3620 = vmatpush.bf16.msra.mxu2 %v4443_v30  ;;  %v4454_v30 = vld [vmem:[%s5154_s7 + $0x300] sm:$0xff] }
 0x165   : > { %3633 = vmatpush.bf16.msra.mxu3 %v4451_v31  ;;  %v4462_v31 = vld [vmem:[%s5154_s7 + $0x340] sm:$0xff] }
 0x166   : > { %3595 = vmatpush.bf16.msra.mxu0 %v4426_v32  ;;  %v2686_v32 = vunpack.c.l.b16 %v2403_v27 }
 0x167   : > { %3608 = vmatpush.bf16.msra.mxu1 %v4434_v33  ;;  %v2687_v33 = vunpack.c.h.b16 %v2403_v27 }
 0x168   : > { %3621 = vmatpush.bf16.msra.mxu2 %v4442_v34  ;;  %v4470_v34 = vld [vmem:[%s5154_s7 + $0x380] sm:$0xff] }
 0x169   : > { %3634 = vmatpush.bf16.msra.mxu3 %v4450_v35  ;;  %v4478_v35 = vld [vmem:[%s5154_s7 + $0x3c0] sm:$0xff]  ;;  %s3842_s7 = sshll.u32 %s5355_s17, 3 }
 0x16a   : > { %3596 = vmatpush.bf16.msra.mxu0 %v4425_v36  ;;  %v2700_v36 = vpack.c.b16 %v2684_v28, %v2684_v28  ;;  %s2387_s12 = scalar_lea.vmem %s5346_s3, %s3842_s7  ;;  %s2395_s15 = scalar_lea.vmem %s5347_s4, %s3842_s7 }
 0x16b   : > { %3609 = vmatpush.bf16.msra.mxu1 %v4433_v37  ;;  %v2701_v37 = vpack.c.b16 %v2685_v29, %v2685_v29 }
 0x16c   : > { %3622 = vmatpush.bf16.msra.mxu2 %v4441_v38  ;;  %v2702_v38 = vpack.c.b16 %v2686_v32, %v2686_v32 }
 0x16d   : > { %3635 = vmatpush.bf16.msra.mxu3 %v4449_v39  ;;  %v2703_v39 = vpack.c.b16 %v2687_v33, %v2687_v33 }
 0x16e   : > { %3597 = vmatpush.bf16.msra.mxu0 %v4424_v40  ;;  %v4526_v40 = vld [vmem:[%s2379_s10] ss:$0 sm:$0xff] }
 0x16f   : > { %3610 = vmatpush.bf16.msra.mxu1 %v4432_v41 }
 0x170   : > { %3623 = vmatpush.bf16.msra.mxu2 %v4440_v42 }
 0x171   : > { %3636 = vmatpush.bf16.msra.mxu3 %v4448_v43 }
 0x172   : > { %3598 = vmatpush.bf16.msra.mxu0 %v4423_v44 }
 0x173   : > { %3611 = vmatpush.bf16.msra.mxu1 %v4431_v45 }
 0x174   : > { %3624 = vmatpush.bf16.msra.mxu2 %v4439_v46 }
 0x175   : > { %3637 = vmatpush.bf16.msra.mxu3 %v4447_v47 }
 0x176   : > { %3599 = vmatpush.bf16.msra.mxu0 %v4422_v50 }
 0x177   : > { %3612 = vmatpush.bf16.msra.mxu1 %v4430_v51 }
 0x178   : > { %3625 = vmatpush.bf16.msra.mxu2 %v4438_v54 }
 0x179   : > { %3638 = vmatpush.bf16.msra.mxu3 %v4446_v55  ;;  %3600 = vmatmul.bf16.vlgmr.msra.gmra.mxu0 %v2696_v62 }
 0x17a   : > { %3644 = vmatpush.bf16.msrb.mxu0 %v4461_v58  ;;  %3613 = vmatmul.bf16.vlgmr.msra.gmra.mxu1 %v2697_v0 }
 0x17b   : > { %3657 = vmatpush.bf16.msrb.mxu1 %v4469_v59  ;;  %3626 = vmatmul.bf16.vlgmr.msra.gmra.mxu2 %v2698_v63 }
 0x17c   : > { %3670 = vmatpush.bf16.msrb.mxu2 %v4477_v60  ;;  %3639 = vmatmul.bf16.vlgmr.msra.gmra.mxu3 %v2699_v1 }
 0x17d   : > { %3683 = vmatpush.bf16.msrb.mxu3 %v4485_v61 }
 0x17e   : > { %3645 = vmatpush.bf16.msrb.mxu0 %v4460_v2 }
 0x17f   : > { %3658 = vmatpush.bf16.msrb.mxu1 %v4468_v3 }
 0x180   : > { %3671 = vmatpush.bf16.msrb.mxu2 %v4476_v4 }
 0x181   : > { %3684 = vmatpush.bf16.msrb.mxu3 %v4484_v5 }
 0x182   : > { %3646 = vmatpush.bf16.msrb.mxu0 %v4459_v6 }
 0x183   : > { %3659 = vmatpush.bf16.msrb.mxu1 %v4467_v7 }
 0x184   : > { %3672 = vmatpush.bf16.msrb.mxu2 %v4475_v8 }
 0x185   : > { %3685 = vmatpush.bf16.msrb.mxu3 %v4483_v9 }
 0x186   : > { %3647 = vmatpush.bf16.msrb.mxu0 %v4458_v10 }
 0x187   : > { %3660 = vmatpush.bf16.msrb.mxu1 %v4466_v11 }
 0x188   : > { %3673 = vmatpush.bf16.msrb.mxu2 %v4474_v12 }
 0x189   : > { %3686 = vmatpush.bf16.msrb.mxu3 %v4482_v13 }
 0x18a   : > { %3648 = vmatpush.bf16.msrb.mxu0 %v4457_v14 }
 0x18b   : > { %3661 = vmatpush.bf16.msrb.mxu1 %v4465_v15 }
 0x18c   : > { %3674 = vmatpush.bf16.msrb.mxu2 %v4473_v16 }
 0x18d   : > { %3687 = vmatpush.bf16.msrb.mxu3 %v4481_v17 }
 0x18e   : > { %3649 = vmatpush.bf16.msrb.mxu0 %v4456_v18 }
 0x18f   : > { %3662 = vmatpush.bf16.msrb.mxu1 %v4464_v19 }
 0x190   : > { %3675 = vmatpush.bf16.msrb.mxu2 %v4472_v20 }
 0x191   : > { %3688 = vmatpush.bf16.msrb.mxu3 %v4480_v21 }
 0x192   : > { %3650 = vmatpush.bf16.msrb.mxu0 %v4455_v22  ;;  %v3696_v22 = vld [vmem:[%s2387_s12] sm:$0xff] }
 0x193   : > { %3663 = vmatpush.bf16.msrb.mxu1 %v4463_v23 }
 0x194   : > { %3676 = vmatpush.bf16.msrb.mxu2 %v4471_v25 }
 0x195   : > { %3689 = vmatpush.bf16.msrb.mxu3 %v4479_v26 }
 0x196   : > { %3651 = vmatpush.bf16.msrb.mxu0 %v4454_v30 }
 0x197   : > { %3664 = vmatpush.bf16.msrb.mxu1 %v4462_v31 }
 0x198   : > { %3677 = vmatpush.bf16.msrb.mxu2 %v4470_v34 }
 0x199   : > { %3690 = vmatpush.bf16.msrb.mxu3 %v4478_v35  ;;  %3652 = vmatmul.bf16.vlgmr.msrb.gmra.mxu0 %v2700_v36 }
 0x19a   : > { %3665 = vmatmul.bf16.vlgmr.msrb.gmra.mxu1 %v2701_v37 }
 0x19b   : > { %3678 = vmatmul.bf16.vlgmr.msrb.gmra.mxu2 %v2702_v38 }
 0x19c   : > { %3691 = vmatmul.bf16.vlgmr.msrb.gmra.mxu3 %v2703_v39 }
 0x1b6   : > { %v3497_v41 = vpop.f32.mrf.mxu0 }
 0x1b7   : > { %v3498_v42 = vadd.f32 %v4526_v40, %v3497_v41  ;;  %v3510_v43 = vpop.f32.mrf.mxu1 }
 0x1b9   : > { %v3511_v44 = vadd.f32 %v3510_v43, %v3498_v42 }
 0x1be   : > { %v3523_v45 = vpop.f32.mrf.mxu2  ;;  %v3499_v48 = vpop.f32.mrf.mxu0 }
 0x1bf   : > { %v3524_v46 = vadd.f32 %v3523_v45, %v3511_v44  ;;  %v3536_v47 = vpop.f32.mrf.mxu3  ;;  %v3512_v50 = vpop.f32.mrf.mxu1 }
 0x1c1   : > { %v3537_v49 = vadd.f32 %v3536_v47, %v3524_v46 }
 0x1c6   : > { %v3525_v51 = vpop.f32.mrf.mxu2 }
 0x1c7   : > { %v3538_v52 = vpop.f32.mrf.mxu3 }
 0x1d6   : > { %v3549_v53 = vpop.f32.mrf.mxu0 }
 0x1d7   : > { %v3562_v54 = vpop.f32.mrf.mxu1  ;;  %v3550_v63 = vadd.f32 %v3549_v53, %v3537_v49 }
 0x1d9   : > { %v3563_v3 = vadd.f32 %v3562_v54, %v3550_v63 }
 0x1de   : > { %v3575_v55 = vpop.f32.mrf.mxu2  ;;  %v3551_v57 = vpop.f32.mrf.mxu0 }
 0x1df   : > { %v3588_v56 = vpop.f32.mrf.mxu3  ;;  %v3564_v58 = vpop.f32.mrf.mxu1  ;;  %v3576_v5 = vadd.f32 %v3575_v55, %v3563_v3 }
 0x1e1   : > { %v3589_v8 = vadd.f32 %v3588_v56, %v3576_v5 }
 0x1e6   : > { %v3577_v59 = vpop.f32.mrf.mxu2 }
 0x1e7   : > { %v3590_v60 = vpop.f32.mrf.mxu3 }
 0x1f6   : > { %v3601_v61 = vpop.f32.mrf.mxu0 }
 0x1f7   : > { %v3614_v62 = vpop.f32.mrf.mxu1  ;;  %v3602_v9 = vadd.f32 %v3601_v61, %v3589_v8 }
 0x1f9   : > { %v3615_v10 = vadd.f32 %v3614_v62, %v3602_v9 }
 0x1fe   : > { %v3627_v0 = vpop.f32.mrf.mxu2  ;;  %v3603_v2 = vpop.f32.mrf.mxu0 }
 0x1ff   : > { %v3640_v1 = vpop.f32.mrf.mxu3  ;;  %v3616_v4 = vpop.f32.mrf.mxu1  ;;  %v3628_v11 = vadd.f32 %v3627_v0, %v3615_v10 }
 0x201   : > { %v3641_v12 = vadd.f32 %v3640_v1, %v3628_v11 }
 0x206   : > { %v3629_v6 = vpop.f32.mrf.mxu2 }
 0x207   : > { %v3642_v7 = vpop.f32.mrf.mxu3 }
 0x216   : > { %v3653_v13 = vpop.f32.mrf.mxu0 }
 0x217   : > { %v3666_v14 = vpop.f32.mrf.mxu1  ;;  %v3654_v15 = vadd.f32 %v3653_v13, %v3641_v12 }
 0x219   : > { %v3667_v16 = vadd.f32 %v3666_v14, %v3654_v15 }
 0x21e   : > { %v3679_v17 = vpop.f32.mrf.mxu2  ;;  %v3655_v20 = vpop.f32.mrf.mxu0 }
 0x21f   : > { %v3692_v18 = vpop.f32.mrf.mxu3  ;;  %v3680_v19 = vadd.f32 %v3679_v17, %v3667_v16  ;;  %v3668_v21 = vpop.f32.mrf.mxu1 }
 0x221   : > { %v3693_v23 = vadd.f32 %v3692_v18, %v3680_v19 }
 0x223   : > { %v3697_v24 = vadd.f32 %v3696_v22, %v3693_v23 }
 0x225   : > { %3698 = vst [vmem:[%s2395_s15] sm:$0xff] %v3697_v24 }
 0x226   : > { %v3681_v25 = vpop.f32.mrf.mxu2 }
 0x227   : > { %v3694_v26 = vpop.f32.mrf.mxu3 }
 0x228 PF: > { %s14_s19 = sadd.s32 1, %s4565_s19   ;;  %s5348_s15 = smov %s4553_s16 }
 0x229   : > { %p11_p10 = scmp.ge.s32.totalorder %s14_s19, 8   ;;  %s5349_s16 = smov %s4627_s23 }
 0x22a   : > { %s5350_s17 = smov %s4561_s18  ;;  %s5351_s18 = smov %s5353_s20 }
 0x22b   :  { %13 = sbr.rel (!%p11_p10) target bundleno = 3 (0x3), region = 136 }

// kernel: textdiae_forward.70
= control target key start
LH: loop header
LB: loop body
LE: loop exit
PB: predicated region body
PF: predicated region fallthrough
CT: control target
= control target key end

     0   :  { %s931_s18 = smov 0   ;;  %s933_s19 = smov 0   ;;  %s1076_s0 = inlined_call_operand.vmem [shape: f32[32,128], index: 0, kind: input, shape index: {}]   ;;  %s1077_s1 = inlined_call_operand.vmem [shape: f32[1,128], index: 1, kind: input, shape index: {}]   ;;  %s1078_s2 = inlined_call_operand.vmem [shape: f32[1,128], index: 2, kind: input, shape index: {}]   ;;  %s1079_s3 = inlined_call_operand.vmem [shape: bf16[128,1536], index: 3, kind: input, shape index: {}]   ;;  %s1080_s4 = inlined_call_operand.vmem [shape: f32[1,1536], index: 4, kind: input, shape index: {}]   ;;  %s1081_s5 = inlined_call_operand.vmem [shape: bf16[32,1536], index: 5, kind: output, shape index: {}]  }
   0x1   :  { %s935_s20 = smov 0   ;;  %s937_s21 = smov 0  }
   0x2   :  { %s939_s22 = smov 0  }
   0x3 LB: > { %s24_s23 = sadd.s32 1, %s894_s21  ;;  %s733_s24 = sadd.s32 4294967295, %s898_s22   ;;  %s898_s22 = sphi %s939_s22, %s15_s22   ;;  %s894_s21 = sphi %s937_s21, %s1086_s21   ;;  %s890_s20 = sphi %s935_s20, %s1085_s20   ;;  %s886_s19 = sphi %s933_s19, %s1084_s19   ;;  %s882_s18 = sphi %s931_s18, %s1083_s18  }
   0x4   : > { %p25_p0 = scmp.ge.s32.totalorder %s24_s23, 12  ;;  %p109_p1 = scmp.ne.s32.totalorder %s886_s19, %s882_s18 }
   0x5   : > { %p110_p2 = scmp.eq.s32.totalorder %s898_s22, 0  ;;  %p167_p4 = scmp.eq.s32.totalorder %s733_s24, 11 }
   0x6   : > { %s1088_s23 = smov (%p25_p0, %s24_s23), 0  ;;  %s102_s26 = sadd.s32 1, %s886_s19 }
   0x7   : > { %p111_p3 = por %p110_p2, %p109_p1  ;;  %s99_s25 = ssub.s32 %s894_s21, %s1088_s23 }
   0x8   : > { %p100_p5 = scmp.eq.s32.totalorder %s99_s25, 0  ;;  %p966_p6 = por %p167_p4, %p109_p1 }
   0x9   : > { %p737_p7 = scmp.ge.s32.totalorder %s898_s22, 12 }
   0xa   : > { %s971_s28 = scalar_select %p100_p5, %s886_s19, %s102_s26  }
   0xb   : > { %204 = sbr.rel (%p737_p7) target bundleno = 36 (0x24), region = 28 }
  0x10   : > { %207 = sbr.rel (!%p111_p3) target bundleno = 36 (0x24), region = 32  ;;  %s209_s29 = sand.u32 (%p111_p3), 1, %s886_s19  }
  0x11   : > { %s739_s30 = sshll.u32 (%p111_p3), %s894_s21, 2  ;;  %s738_s6 = sshll.u32 (%p111_p3), %s209_s29, 6 }
  0x12   : > { %s979_s9 = scalar_lea.vmem (%p111_p3), %s1079_s3, %s739_s30  ;;  %s211_s10 = scalar_lea.vmem (%p111_p3), [#allocation2], %s738_s6 }
  0x13   : > { %v230_v0 = vld [vmem:[%s979_s9] sm:$0xf] (%p111_p3)  ;;  %v232_v1 = vld [vmem:[%s979_s9 + $0x30] sm:$0xf] (%p111_p3) }
  0x14   : > { %231 = vst [vmem:[%s211_s10] sm:$0xf] (%p111_p3), %v230_v0  ;;  %v234_v2 = vld [vmem:[%s979_s9 + $0x60] sm:$0xf] (%p111_p3)  ;;  %v236_v3 = vld [vmem:[%s979_s9 + $0x90] sm:$0xf] (%p111_p3) }
  0x15   : > { %233 = vst [vmem:[%s211_s10 + $0x4] sm:$0xf] %v232_v1  ;;  %v238_v4 = vld [vmem:[%s979_s9 + $0xc0] sm:$0xf]  ;;  %v240_v5 = vld [vmem:[%s979_s9 + $0xf0] sm:$0xf] }
  0x16   : > { %235 = vst [vmem:[%s211_s10 + $0x8] sm:$0xf] %v234_v2  ;;  %v242_v6 = vld [vmem:[%s979_s9 + $0x120] sm:$0xf]  ;;  %v244_v7 = vld [vmem:[%s979_s9 + $0x150] sm:$0xf] }
  0x17   : > { %237 = vst [vmem:[%s211_s10 + $0xc] sm:$0xf] %v236_v3  ;;  %v246_v8 = vld [vmem:[%s979_s9 + $0x180] sm:$0xf]  ;;  %v248_v9 = vld [vmem:[%s979_s9 + $0x1b0] sm:$0xf] }
  0x18   : > { %239 = vst [vmem:[%s211_s10 + $0x10] sm:$0xf] %v238_v4  ;;  %v250_v10 = vld [vmem:[%s979_s9 + $0x1e0] sm:$0xf]  ;;  %v252_v11 = vld [vmem:[%s979_s9 + $0x210] sm:$0xf] }
  0x19   : > { %241 = vst [vmem:[%s211_s10 + $0x14] sm:$0xf] %v240_v5  ;;  %v254_v12 = vld [vmem:[%s979_s9 + $0x240] sm:$0xf]  ;;  %v256_v13 = vld [vmem:[%s979_s9 + $0x270] sm:$0xf] }
  0x1a   : > { %243 = vst [vmem:[%s211_s10 + $0x18] sm:$0xf] %v242_v6  ;;  %v258_v14 = vld [vmem:[%s979_s9 + $0x2a0] sm:$0xf]  ;;  %v260_v15 = vld [vmem:[%s979_s9 + $0x2d0] sm:$0xf] }
  0x1b   : > { %245 = vst [vmem:[%s211_s10 + $0x1c] sm:$0xf] %v244_v7 }
  0x1c   : > { %247 = vst [vmem:[%s211_s10 + $0x20] sm:$0xf] %v246_v8 }
  0x1d   : > { %249 = vst [vmem:[%s211_s10 + $0x24] sm:$0xf] %v248_v9 }
  0x1e   : > { %251 = vst [vmem:[%s211_s10 + $0x28] sm:$0xf] %v250_v10 }
  0x1f   : > { %253 = vst [vmem:[%s211_s10 + $0x2c] sm:$0xf] %v252_v11 }
  0x20   : > { %255 = vst [vmem:[%s211_s10 + $0x30] sm:$0xf] %v254_v12 }
  0x21   : > { %257 = vst [vmem:[%s211_s10 + $0x34] sm:$0xf] %v256_v13 }
  0x22   : > { %259 = vst [vmem:[%s211_s10 + $0x38] sm:$0xf] %v258_v14 }
  0x23   : > { %261 = vst [vmem:[%s211_s10 + $0x3c] sm:$0xf] %v260_v15 }
  0x24 PF: > { %p740_p8 = scmp.ge.s32.totalorder %s898_s22, 1  ;;  %p322_p9 = scmp.lt.s32.totalorder %s898_s22, 13 }
  0x26   : > { %p323_p10 = pnand %p740_p8, %p322_p9 }
  0x27   : > { %p369_p11 = scmp.lt.s32.totalorder (!%p323_p10), %s890_s20, 11  ;;  %s329_s6 = sand.u32 (!%p323_p10), 1, %s882_s18  }
  0x28   : > { %326 = sbr.rel (%p323_p10) target bundleno = 472 (0x1d8), region = 77  ;;  %s741_s7 = sshll.u32 (!%p323_p10), %s329_s6, 6 }
  0x29   : > { %s331_s8 = scalar_lea.vmem (!%p323_p10), [#allocation2], %s741_s7  ;;  %s742_s15 = sshll.u32 (!%p323_p10), %s329_s6, 4 }
  0x2a   : > { %s362_s16 = scalar_lea.vmem (!%p323_p10), [#allocation3], %s742_s15 }
  0x2d   : > { %v375_v16 = vld [vmem:[%s1076_s0 + $0x10] sm:$0xff]  ;;  %v373_v17 = vld [vmem:[%s1076_s0] sm:$0xff]  ;;  %v376_v18 = vld [vmem:[%s1076_s0 + $0x18] sm:$0xff]  ;;  %v900_v20 = vmov 128.0   ;;  %s1029_s25 = scalar_select %p369_p11, %s890_s20, 11 }
  0x2e   : > { %381 = vadd.xlane.f32.xlu1 %v375_v16  ;;  %377 = vadd.xlane.f32.xlu0 %v373_v17  ;;  %v374_v19 = vld [vmem:[%s1076_s0 + $0x8] sm:$0xff]  ;;  %850 = vrcp.f32 %v900_v20  ;;  %v786_v43 = vld [vmem:[%s331_s8 + $0x38] sm:$0xff]  ;;  %v785_v44 = vld [vmem:[%s331_s8 + $0x30] sm:$0xff]  ;;  %s776_s17 = sshll.u32 (%p966_p6), %s890_s20, 2 }
  0x2f   : > { %s371_s30 = scalar_lea.vmem %s1080_s4, %s1029_s25  ;;  %550 = vmatpush.bf16.msra.mxu0 %v786_v43  ;;  %798 = vmatpush.bf16.msra.mxu1 %v786_v43  ;;  %v784_v45 = vld [vmem:[%s331_s8 + $0x28] sm:$0xff]  ;;  %v783_v46 = vld [vmem:[%s331_s8 + $0x20] sm:$0xff]  ;;  %v782_v47 = vld [vmem:[%s331_s8 + $0x18] sm:$0xff]  ;;  %s588_s25 = scalar_lea.vmem (%p966_p6), %s1081_s5, %s776_s17 }
  0x30   : > { %v781_v48 = vld [vmem:[%s331_s8 + $0x10] sm:$0xff]  ;;  %v780_v49 = vld [vmem:[%s331_s8 + $0x8] sm:$0xff]  ;;  %v779_v54 = vld [vmem:[%s331_s8] sm:$0xff] }
  0x33   : > { %551 = vmatpush.bf16.msra.mxu0 %v785_v44  ;;  %799 = vmatpush.bf16.msra.mxu1 %v785_v44 }
  0x34   : > { %v851_v21 = vpop.eup %850 }
  0x35   : > { %v386_v22 = vmul.f32 128.0, %v851_v21  ;;  %vm390_vm0 = vweird.f32 %v851_v21 }
  0x36   : > { %383 = vadd.xlane.f32.xlu1 %v376_v18  ;;  %379 = vadd.xlane.f32.xlu0 %v374_v19 }
  0x37   : > { %v387_v23 = vsub.f32 1.0, %v386_v22  ;;  %552 = vmatpush.bf16.msra.mxu0 %v784_v45  ;;  %800 = vmatpush.bf16.msra.mxu1 %v784_v45 }
  0x39   : > { %v388_v24 = vmul.f32 %v851_v21, %v387_v23  ;;  %v847_v23 = vld [vmem:[%s1077_s1] ss:$0 sm:$0xff] }
  0x3b   : > { %v389_v25 = vadd.f32 %v851_v21, %v388_v24  ;;  %553 = vmatpush.bf16.msra.mxu0 %v783_v46  ;;  %801 = vmatpush.bf16.msra.mxu1 %v783_v46 }
  0x3d   : > { %v391_v26 = vsel %vm390_vm0, %v851_v21, %v389_v25 }
  0x3f   : > { %554 = vmatpush.bf16.msra.mxu0 %v782_v47  ;;  %802 = vmatpush.bf16.msra.mxu1 %v782_v47 }
  0x43   : > { %555 = vmatpush.bf16.msra.mxu0 %v781_v48  ;;  %803 = vmatpush.bf16.msra.mxu1 %v781_v48 }
  0x47   : > { %556 = vmatpush.bf16.msra.mxu0 %v780_v49  ;;  %804 = vmatpush.bf16.msra.mxu1 %v780_v49 }
  0x4b   : > { %557 = vmatpush.bf16.msra.mxu0 %v779_v54  ;;  %805 = vmatpush.bf16.msra.mxu1 %v779_v54 }
  0xa1   : > { %v382_v27 = vpop.xlane.xlu1 %381  ;;  %v378_v28 = vpop.xlane.xlu0 %377 }
  0xa2   : > { %v394_v29 = vmul.f32 %v391_v26, %v382_v27  ;;  %v392_v30 = vmul.f32 %v391_v26, %v378_v28 }
  0xa4   : > { %v1011_v31 = vsub.f32 %v375_v16, %v394_v29  ;;  %v1013_v32 = vsub.f32 %v373_v17, %v392_v30  ;;  %v848_v30 = vld [vmem:[%s1078_s2] ss:$0 sm:$0xff] }
  0xa6   : > { %v402_v33 = vmul.f32 %v1011_v31, %v1011_v31  ;;  %v400_v34 = vmul.f32 %v1013_v32, %v1013_v32 }
  0xa8   : > { %408 = vadd.xlane.f32.xlu0 %v402_v33  ;;  %404 = vadd.xlane.f32.xlu2 %v400_v34 }
  0xa9   : > { %v384_v35 = vpop.xlane.xlu1 %383  ;;  %v380_v36 = vpop.xlane.xlu0 %379 }
  0xaa   : > { %v395_v37 = vmul.f32 %v391_v26, %v384_v35  ;;  %v393_v38 = vmul.f32 %v391_v26, %v380_v36 }
  0xac   : > { %v1019_v39 = vsub.f32 %v376_v18, %v395_v37  ;;  %v1021_v40 = vsub.f32 %v374_v19, %v393_v38 }
  0xae   : > { %v403_v41 = vmul.f32 %v1019_v39, %v1019_v39  ;;  %v401_v42 = vmul.f32 %v1021_v40, %v1021_v40 }
  0xb0   : > { %410 = vadd.xlane.f32.xlu1 %v403_v41  ;;  %406 = vadd.xlane.f32.xlu2 %v401_v42 }
 0x11b   : > { %v405_v50 = vpop.xlane.xlu2 %404  ;;  %v409_v51 = vpop.xlane.xlu0 %408 }
 0x11c   : > { %v412_v52 = vmul.f32 %v405_v50, %v391_v26  ;;  %v414_v53 = vmul.f32 %v409_v51, %v391_v26 }
 0x11e   : > { %v416_v55 = vadd.f32 1e-05, %v412_v52  ;;  %v418_v56 = vadd.f32 1e-05, %v414_v53 }
 0x120   : > { %852 = vrsqrt.f32 %v416_v55  ;;  %vm446_vm3 = vweird.f32 %v418_v56  ;;  %vm426_vm4 = vweird.f32 %v416_v55 }
 0x121   : > { %854 = vrsqrt.f32 %v418_v56 }
 0x123   : > { %v411_v57 = vpop.xlane.xlu1 %410  ;;  %v407_v58 = vpop.xlane.xlu2 %406 }
 0x124   : > { %v415_v59 = vmul.f32 %v411_v57, %v391_v26  ;;  %v413_v60 = vmul.f32 %v407_v58, %v391_v26 }
 0x126   : > { %v853_v61 = vpop.eup %852  ;;  %v419_v62 = vadd.f32 1e-05, %v415_v59  ;;  %v417_v63 = vadd.f32 1e-05, %v413_v60 }
 0x127   : > { %v855_v0 = vpop.eup %854  ;;  %v421_v1 = vmul.f32 %v853_v61, %v416_v55  ;;  %vm427_vm2 = vweird.f32 %v853_v61 }
 0x128   : > { %v441_v2 = vmul.f32 %v855_v0, %v418_v56  ;;  %856 = vrsqrt.f32 %v419_v62  ;;  %vm447_vm1 = vweird.f32 %v855_v0  ;;  %vm428_vm6 = vmor %vm426_vm4, %vm427_vm2  ;;  %vm456_vm9 = vweird.f32 %v419_v62 }
 0x129   : > { %v422_v3 = vmul.f32 %v853_v61, %v421_v1  ;;  %858 = vrsqrt.f32 %v417_v63  ;;  %vm448_vm5 = vmor %vm446_vm3, %vm447_vm1  ;;  %vm436_vm11 = vweird.f32 %v417_v63 }
 0x12a   : > { %v442_v4 = vmul.f32 %v855_v0, %v441_v2 }
 0x12b   : > { %v423_v5 = vmul.f32 0.5, %v422_v3 }
 0x12c   : > { %v443_v6 = vmul.f32 0.5, %v442_v4 }
 0x12d   : > { %v424_v7 = vsub.f32 1.5, %v423_v5 }
 0x12e   : > { %v857_v8 = vpop.eup %856  ;;  %v444_v9 = vsub.f32 1.5, %v443_v6 }
 0x12f   : > { %v859_v10 = vpop.eup %858  ;;  %v451_v11 = vmul.f32 %v857_v8, %v419_v62  ;;  %v425_v12 = vmul.f32 %v853_v61, %v424_v7  ;;  %vm457_vm7 = vweird.f32 %v857_v8 }
 0x130   : > { %v445_v13 = vmul.f32 %v855_v0, %v444_v9  ;;  %v431_v14 = vmul.f32 %v859_v10, %v417_v63  ;;  %vm437_vm8 = vweird.f32 %v859_v10  ;;  %vm458_vm10 = vmor %vm456_vm9, %vm457_vm7 }
 0x131   : > { %v452_v15 = vmul.f32 %v857_v8, %v451_v11  ;;  %v429_v20 = vsel %vm428_vm6, %v853_v61, %v425_v12  ;;  %vm438_vm12 = vmor %vm436_vm11, %vm437_vm8 }
 0x132   : > { %v432_v16 = vmul.f32 %v859_v10, %v431_v14  ;;  %v449_v18 = vsel %vm448_vm5, %v855_v0, %v445_v13  ;;  %v460_v26 = vmul.f32 %v429_v20, %v1013_v32 }
 0x133   : > { %v453_v17 = vmul.f32 0.5, %v452_v15  ;;  %v462_v24 = vmul.f32 %v449_v18, %v1011_v31 }
 0x134   : > { %v433_v19 = vmul.f32 0.5, %v432_v16  ;;  %v468_v35 = vmul.f32 %v847_v23, %v460_v26 }
 0x135   : > { %v454_v21 = vsub.f32 1.5, %v453_v17  ;;  %v470_v34 = vmul.f32 %v847_v23, %v462_v24 }
 0x136   : > { %v434_v22 = vsub.f32 1.5, %v433_v19  ;;  %v476_v41 = vadd.f32 %v848_v30, %v468_v35 }
 0x137   : > { %v455_v25 = vmul.f32 %v857_v8, %v454_v21  ;;  %v478_v37 = vadd.f32 %v848_v30, %v470_v34 }
 0x138   : > { %v435_v27 = vmul.f32 %v859_v10, %v434_v22 }
 0x139   : > { %v459_v28 = vsel %vm458_vm10, %v857_v8, %v455_v25 }
 0x13a   : > { %v439_v29 = vsel %vm438_vm12, %v859_v10, %v435_v27  ;;  %v463_v33 = vmul.f32 %v459_v28, %v1019_v39  ;;  %v849_v39 = vld [vmem:[%s371_s30] ss:$0 sm:$0xff] }
 0x13b   : > { %v461_v31 = vmul.f32 %v439_v29, %v1021_v40 }
 0x13c   : > { %v471_v36 = vmul.f32 %v847_v23, %v463_v33 }
 0x13d   : > { %v469_v32 = vmul.f32 %v847_v23, %v461_v31 }
 0x13e   : > { %v479_v38 = vadd.f32 %v848_v30, %v471_v36 }
 0x13f   : > { %v477_v42 = vadd.f32 %v848_v30, %v469_v32 }
 0x140   : > { %v481_v43 = vpack.c.bf16 %v479_v38, %v478_v37 }
 0x141   : > { %v480_v44 = vpack.c.bf16 %v477_v42, %v476_v41 }
 0x142   : > { %563 = vmatmul.bf16.vlgmr.msra.gmra.mxu1 %v481_v43 }
 0x143   : > { %558 = vmatmul.bf16.vlgmr.msra.gmra.mxu0 %v480_v44 }
 0x1bf   : > { %v564_v45 = vpop.f32.mrf.mxu1 }
 0x1c0   : > { %v559_v46 = vpop.f32.mrf.mxu0  ;;  %v565_v47 = vadd.f32 %v849_v39, %v564_v45 }
 0x1c1   : > { %v560_v50 = vadd.f32 %v849_v39, %v559_v46 }
 0x1c7   : > { %v566_v40 = vpop.f32.mrf.mxu1 }
 0x1c8   : > { %v561_v48 = vpop.f32.mrf.mxu0  ;;  %v567_v49 = vadd.f32 %v849_v39, %v566_v40 }
 0x1c9   : > { %v562_v51 = vadd.f32 %v849_v39, %v561_v48  ;;  %583 = sbr.rel (!%p966_p6) target bundleno = 472 (0x1d8), region = 85 }
 0x1ca   : > { %v795_v52 = vpack.c.bf16 %v567_v49, %v565_v47 }
 0x1cb   : > { %v790_v53 = vpack.c.bf16 %v562_v51, %v560_v50 }
 0x1cc   : > { %797 = vst [vmem:[%s362_s16 + $0x8] sm:$0xff] %v795_v52  }
 0x1cd   : > { %791 = vst [vmem:[%s362_s16] sm:$0xff] %v790_v53  }
 0x1d3   : > { %v609_v56 = vld [vmem:[%s362_s16 + $0x8] sm:$0xf]  ;;  %v611_v57 = vld [vmem:[%s362_s16 + $0xc] sm:$0xf] }
 0x1d4   : > { %v605_v54 = vld [vmem:[%s362_s16] sm:$0xf]  ;;  %v607_v55 = vld [vmem:[%s362_s16 + $0x4] sm:$0xf]  ;;  %610 = vst [vmem:[%s588_s25 + $0x60] sm:$0xf] %v609_v56 }
 0x1d5   : > { %606 = vst [vmem:[%s588_s25] sm:$0xf] %v605_v54 }
 0x1d6   : > { %608 = vst [vmem:[%s588_s25 + $0x30] sm:$0xf] %v607_v55 }
 0x1d7   : > { %612 = vst [vmem:[%s588_s25 + $0x90] sm:$0xf] %v611_v57 }
 0x1d8 PF: > { %s15_s22 = sadd.s32 1, %s898_s22   ;;  %s1083_s18 = smov %s886_s19 }
 0x1d9   : > { %p12_p12 = scmp.ge.s32.totalorder %s15_s22, 14   ;;  %s1084_s19 = smov %s971_s28 }
 0x1da   : > { %s1085_s20 = smov %s894_s21  ;;  %s1086_s21 = smov %s1088_s23 }
 0x1db   :  { %14 = sbr.rel (!%p12_p12) target bundleno = 3 (0x3), region = 163 }

// kernel: textdiae_forward.71
= control target key start
LH: loop header
LB: loop body
LE: loop exit
PB: predicated region body
PF: predicated region fallthrough
CT: control target
= control target key end

     0   :  { %s1332_s12 = smov 0   ;;  %s1593_s0 = inlined_call_operand.vmem [shape: bf16[2,8,16,64], index: 0, kind: input, shape index: {}]   ;;  %s1594_s1 = inlined_call_operand.vmem [shape: bf16[2,8,16,64], index: 1, kind: input, shape index: {}]   ;;  %s1595_s2 = inlined_call_operand.vmem [shape: bf16[2,8,16,64], index: 2, kind: input, shape index: {}]   ;;  %s1596_s3 = inlined_call_operand.vmem [shape: bf16[2,8,16,64], index: 3, kind: output, shape index: {}]  }
   0x1 LB: > { %s1078_s13 = sadd.s32 4294967295, %s1310_s12   ;;  %p1082_p0 = scmp.ge.s32.totalorder %s1310_s12, 1  ;;  %s1310_s12 = sphi %s1332_s12, %s13_s12  }
   0x2   : > { %p157_p1 = scmp.lt.s32.totalorder %s1310_s12, 3 }
   0x4   : > { %p158_p2 = pnand %p1082_p0, %p157_p1 }
   0x5   : > { %p191_p3 = scmp.lt.s32.totalorder (!%p158_p2), %s1078_s13, 1 }
   0x6   : > { %161 = sbr.rel (%p158_p2) target bundleno = 592 (0x250), region = 32 }
   0xb   : > { %s1598_s13 = smov (!%p191_p3, %s1078_s13), 1  ;;  %vm318_vm0 = vcmask 523264   ;;  %vm549_vm1 = vcmask 130048   ;;  %vm982_vm2 = vcmask 519168  }
   0xc   : > { %s1340_s14 = sshll.u32 %s1598_s13, 6 }
   0xd   : > { %s1346_s17 = scalar_lea.vmem %s1594_s1, %s1340_s14  ;;  %s1352_s20 = scalar_lea.vmem %s1593_s0, %s1340_s14 }
   0xe   : > { %v1177_v0 = vld [vmem:[%s1346_s17] sm:$0xff]  ;;  %v1178_v1 = vld [vmem:[%s1346_s17 + $0x8] sm:$0xff]  ;;  %v1179_v2 = vld [vmem:[%s1346_s17 + $0x10] sm:$0xff]  ;;  %s1518_s23 = scalar_lea.vmem %s1595_s2, %s1340_s14  ;;  %s1556_s26 = scalar_lea.vmem %s1596_s3, %s1340_s14 }
   0xf   : > { %v1180_v3 = vld [vmem:[%s1346_s17 + $0x18] sm:$0xff]  ;;  %v1194_v4 = vld [vmem:[%s1352_s20] sm:$0xff]   ;;  %v1225_v5 = vld [vmem:[%s1352_s20 + $0x8] sm:$0xff]   ;;  %v323_v6 = vsel %vm318_vm0, %v1177_v0, 0  ;;  %v353_v7 = vsel %vm318_vm0, %v1178_v1, 0  ;;  %v383_v8 = vsel %vm318_vm0, %v1179_v2, 0 }
  0x10   : > { %v1195_v9 = vunpack.c.l.bf16 %v1194_v4  ;;  %v1226_v10 = vld [vmem:[%s1352_s20 + $0x10] sm:$0xff]   ;;  %v1227_v11 = vld [vmem:[%s1352_s20 + $0x18] sm:$0xff]   ;;  %332 = vmatpush.bf16.xpose.msra.mxu0 %v323_v6  ;;  %362 = vmatpush.bf16.xpose.msra.mxu1 %v353_v7  ;;  %v413_v12 = vsel %vm318_vm0, %v1180_v3, 0  ;;  %v1196_v13 = vunpack.c.h.bf16 %v1194_v4  ;;  %v1199_v14 = vunpack.c.l.bf16 %v1225_v5  ;;  %v1181_v38 = vld [vmem:[%s1346_s17 + $0x20] sm:$0xff] }
  0x11   : > { %v1200_v15 = vunpack.c.h.bf16 %v1225_v5  ;;  %392 = vmatpush.bf16.xpose.msra.mxu2 %v383_v8  ;;  %422 = vmatpush.bf16.xpose.msra.mxu3 %v413_v12  ;;  %v1203_v17 = vunpack.c.l.bf16 %v1226_v10  ;;  %v1204_v18 = vunpack.c.h.bf16 %v1226_v10  ;;  %v1207_v19 = vunpack.c.l.bf16 %v1227_v11  ;;  %v1183_v28 = vld [vmem:[%s1346_s17 + $0x30] sm:$0xff]  ;;  %v1184_v33 = vld [vmem:[%s1346_s17 + $0x38] sm:$0xff]  ;;  %v1228_v43 = vld [vmem:[%s1352_s20 + $0x20] sm:$0xff]  }
  0x12   : > { %v244_v16 = vmul.f32 0.125, %v1195_v9  ;;  %v245_v20 = vmul.f32 0.125, %v1196_v13  ;;  %v246_v21 = vmul.f32 0.125, %v1199_v14  ;;  %v1208_v23 = vunpack.c.h.bf16 %v1227_v11  ;;  %v1182_v44 = vld [vmem:[%s1346_s17 + $0x28] sm:$0xff]  ;;  %v1230_v49 = vld [vmem:[%s1352_s20 + $0x30] sm:$0xff]   ;;  %v1231_v54 = vld [vmem:[%s1352_s20 + $0x38] sm:$0xff]  }
  0x13   : > { %v247_v22 = vmul.f32 0.125, %v1200_v15  ;;  %v248_v25 = vmul.f32 0.125, %v1203_v17  ;;  %v249_v26 = vmul.f32 0.125, %v1204_v18  ;;  %v250_v27 = vmul.f32 0.125, %v1207_v19  ;;  %v1229_v59 = vld [vmem:[%s1352_s20 + $0x28] sm:$0xff]  }
  0x14   : > { %v260_v24 = vpack.c.bf16 %v244_v16, %v244_v16  ;;  %v261_v29 = vpack.c.bf16 %v245_v20, %v245_v20  ;;  %v262_v30 = vpack.c.bf16 %v246_v21, %v246_v21  ;;  %v251_v32 = vmul.f32 0.125, %v1208_v23 }
  0x15   : > { %v263_v31 = vpack.c.bf16 %v247_v22, %v247_v22  ;;  %v264_v35 = vpack.c.bf16 %v248_v25, %v248_v25  ;;  %v265_v36 = vpack.c.bf16 %v249_v26, %v249_v26  ;;  %v266_v37 = vpack.c.bf16 %v250_v27, %v250_v27 }
  0x16   : > { %v310_v34 = vunpack.c.l.b16 %v260_v24  ;;  %v311_v39 = vunpack.c.l.b16 %v261_v29  ;;  %v341_v40 = vunpack.c.l.b16 %v262_v30  ;;  %v267_v42 = vpack.c.bf16 %v251_v32, %v251_v32 }
  0x17   : > { %v342_v41 = vunpack.c.l.b16 %v263_v31  ;;  %v371_v45 = vunpack.c.l.b16 %v264_v35  ;;  %v372_v46 = vunpack.c.l.b16 %v265_v36  ;;  %v401_v47 = vunpack.c.l.b16 %v266_v37 }
  0x18   : > { %v503_v48 = vsel %vm318_vm0, %v1183_v28, 0  ;;  %v312_v50 = vpack.c.b16 %v311_v39, %v310_v34  ;;  %v402_v52 = vunpack.c.l.b16 %v267_v42  ;;  %v533_v53 = vsel %vm318_vm0, %v1184_v33, 0 }
  0x19   : > { %v343_v51 = vpack.c.b16 %v342_v41, %v341_v40  ;;  %512 = vmatpush.bf16.xpose.msrb.mxu2 %v503_v48  ;;  %v373_v55 = vpack.c.b16 %v372_v46, %v371_v45  ;;  %542 = vmatpush.bf16.xpose.msrb.mxu3 %v533_v53  ;;  %v443_v56 = vsel %vm318_vm0, %v1181_v38, 0  ;;  %v1211_v57 = vunpack.c.l.bf16 %v1228_v43 }
  0x1a   : > { %v1212_v58 = vunpack.c.h.bf16 %v1228_v43  ;;  %1095 = vmatmul.msk.bf16.vlgmr.msra.gmra.mxu0 %vm318_vm0, %v312_v50  ;;  %v403_v60 = vpack.c.b16 %v402_v52, %v401_v47  ;;  %v473_v61 = vsel %vm318_vm0, %v1182_v44, 0  ;;  %v1219_v62 = vunpack.c.l.bf16 %v1230_v49 }
  0x1b   : > { %1100 = vmatmul.msk.bf16.vlgmr.msra.gmra.mxu1 %vm318_vm0, %v343_v51  ;;  %v1220_v63 = vunpack.c.h.bf16 %v1230_v49  ;;  %1105 = vmatmul.msk.bf16.vlgmr.msra.gmra.mxu2 %vm318_vm0, %v373_v55  ;;  %v252_v0 = vmul.f32 0.125, %v1211_v57  ;;  %v1223_v2 = vunpack.c.l.bf16 %v1231_v54  ;;  %v1224_v3 = vunpack.c.h.bf16 %v1231_v54 }
  0x1c   : > { %452 = vmatpush.bf16.xpose.msrb.mxu0 %v443_v56  ;;  %v253_v1 = vmul.f32 0.125, %v1212_v58  ;;  %1110 = vmatmul.msk.bf16.vlgmr.msra.gmra.mxu3 %vm318_vm0, %v403_v60  ;;  %v256_v4 = vmul.f32 0.125, %v1219_v62  ;;  %v1215_v6 = vunpack.c.l.bf16 %v1229_v59  ;;  %v1216_v7 = vunpack.c.h.bf16 %v1229_v59 }
  0x1d   : > { %482 = vmatpush.bf16.xpose.msrb.mxu1 %v473_v61  ;;  %v257_v5 = vmul.f32 0.125, %v1220_v63  ;;  %v258_v8 = vmul.f32 0.125, %v1223_v2  ;;  %v259_v9 = vmul.f32 0.125, %v1224_v3  ;;  %v268_v10 = vpack.c.bf16 %v252_v0, %v252_v0 }
  0x1e   : > { %v269_v11 = vpack.c.bf16 %v253_v1, %v253_v1  ;;  %v254_v12 = vmul.f32 0.125, %v1215_v6  ;;  %v255_v13 = vmul.f32 0.125, %v1216_v7  ;;  %v272_v14 = vpack.c.bf16 %v256_v4, %v256_v4 }
  0x1f   : > { %v273_v15 = vpack.c.bf16 %v257_v5, %v257_v5  ;;  %v274_v16 = vpack.c.bf16 %v258_v8, %v258_v8  ;;  %v275_v17 = vpack.c.bf16 %v259_v9, %v259_v9  ;;  %v431_v20 = vunpack.c.l.b16 %v268_v10 }
  0x20   : > { %v270_v18 = vpack.c.bf16 %v254_v12, %v254_v12  ;;  %v271_v19 = vpack.c.bf16 %v255_v13, %v255_v13  ;;  %v432_v21 = vunpack.c.l.b16 %v269_v11  ;;  %v491_v24 = vunpack.c.l.b16 %v272_v14 }
  0x21   : > { %v492_v25 = vunpack.c.l.b16 %v273_v15  ;;  %v521_v26 = vunpack.c.l.b16 %v274_v16  ;;  %v522_v27 = vunpack.c.l.b16 %v275_v17 }
  0x22   : > { %v461_v22 = vunpack.c.l.b16 %v270_v18  ;;  %v462_v23 = vunpack.c.l.b16 %v271_v19  ;;  %v433_v28 = vpack.c.b16 %v432_v21, %v431_v20 }
  0x23   : > { %v493_v30 = vpack.c.b16 %v492_v25, %v491_v24  ;;  %v523_v31 = vpack.c.b16 %v522_v27, %v521_v26 }
  0x24   : > { %v463_v29 = vpack.c.b16 %v462_v23, %v461_v22 }
  0x2a   : > { %1115 = vmatmul.msk.bf16.vlgmr.msrb.gmra.mxu0 %vm318_vm0, %v433_v28 }
  0x2b   : > { %1120 = vmatmul.msk.bf16.vlgmr.msrb.gmra.mxu1 %vm318_vm0, %v463_v29  ;;  %1125 = vmatmul.msk.bf16.vlgmr.msrb.gmra.mxu2 %vm318_vm0, %v493_v30 }
  0x2c   : > { %1130 = vmatmul.msk.bf16.vlgmr.msrb.gmra.mxu3 %vm318_vm0, %v523_v31 }
  0x97   : > { %v334_v32 = vpop.f32.mrf.mxu0 }
  0x98   : > { %v364_v33 = vpop.f32.mrf.mxu1  ;;  %v550_v35 = vsel %vm549_vm1, %v334_v32, -inf }
  0x99   : > { %v556_v34 = vsel %vm549_vm1, %v364_v33, -inf  ;;  %551 = vmax.xlane.f32.xlu2 %v550_v35 }
  0x9a   : > { %557 = vmax.xlane.f32.xlu0 %v556_v34 }
  0x9e   : > { %v394_v36 = vpop.f32.mrf.mxu2 }
  0x9f   : > { %v424_v37 = vpop.f32.mrf.mxu3  ;;  %v1388_v38 = vpop.f32.mrf.mxu0  ;;  %v562_v39 = vsel %vm549_vm1, %v394_v36, -inf }
  0xa0   : > { %v568_v40 = vsel %vm549_vm1, %v424_v37, -inf  ;;  %v553_v41 = vsel %vm549_vm1, %v1388_v38, -inf  ;;  %v1402_v46 = vpop.f32.mrf.mxu1 }
  0xa1   : > { %569 = vmax.xlane.f32.xlu1 %v568_v40  ;;  %554 = vmax.xlane.f32.xlu2 %v553_v41  ;;  %v559_v52 = vsel %vm549_vm1, %v1402_v46, -inf }
  0xa2   : > { %563 = vmax.xlane.f32.xlu0 %v562_v39 }
  0xa6   : > { %v1394_v42 = vpop.f32.mrf.mxu2 }
  0xa7   : > { %v1396_v43 = vpop.f32.mrf.mxu3  ;;  %v565_v45 = vsel %vm549_vm1, %v1394_v42, -inf  ;;  %v1404_v47 = vpop.f32.mrf.mxu0 }
  0xa8   : > { %v571_v44 = vsel %vm549_vm1, %v1396_v43, -inf  ;;  %v574_v49 = vsel %vm549_vm1, %v1404_v47, -inf  ;;  %v1416_v53 = vpop.f32.mrf.mxu1 }
  0xa9   : > { %572 = vmax.xlane.f32.xlu1 %v571_v44  ;;  %v580_v61 = vsel %vm549_vm1, %v1416_v53, -inf }
  0xaa   : > { %566 = vmax.xlane.f32.xlu0 %v565_v45 }
  0xae   : > { %v1406_v48 = vpop.f32.mrf.mxu2 }
  0xaf   : > { %v1410_v50 = vpop.f32.mrf.mxu3  ;;  %v586_v51 = vsel %vm549_vm1, %v1406_v48, -inf  ;;  %v1428_v59 = vpop.f32.mrf.mxu0 }
  0xb0   : > { %587 = vmax.xlane.f32.xlu2 %v586_v51  ;;  %v592_v56 = vsel %vm549_vm1, %v1410_v50, -inf  ;;  %v1430_v60 = vpop.f32.mrf.mxu1  ;;  %v577_v62 = vsel %vm549_vm1, %v1428_v59, -inf }
  0xb1   : > { %560 = vmax.xlane.f32.xlu1 %v559_v52  ;;  %v583_v63 = vsel %vm549_vm1, %v1430_v60, -inf }
  0xb2   : > { %575 = vmax.xlane.f32.xlu0 %v574_v49 }
  0xb6   : > { %v1418_v54 = vpop.f32.mrf.mxu2 }
  0xb7   : > { %v1420_v55 = vpop.f32.mrf.mxu3  ;;  %v589_v58 = vsel %vm549_vm1, %v1418_v54, -inf }
  0xb8   : > { %v595_v57 = vsel %vm549_vm1, %v1420_v55, -inf }
  0xb9   : > { %593 = vmax.xlane.f32.xlu1 %v592_v56  ;;  %596 = vmax.xlane.f32.xlu2 %v595_v57 }
  0xba   : > { %590 = vmax.xlane.f32.xlu0 %v589_v58 }
  0xc1   : > { %581 = vmax.xlane.f32.xlu2 %v580_v61  ;;  %578 = vmax.xlane.f32.xlu1 %v577_v62 }
  0xc2   : > { %584 = vmax.xlane.f32.xlu0 %v583_v63 }
 0x10c   : > { %v552_v1 = vpop.xlane.xlu2 %551 }
 0x10d   : > { %v558_v0 = vpop.xlane.xlu0 %557  ;;  %v598_v3 = vsub.f32 %v334_v32, %v552_v1 }
 0x10e   : > { %v600_v2 = vsub.f32 %v364_v33, %v558_v0 }
 0x10f   : > { %v614_v5 = vmul.f32 1.442695, %v598_v3 }
 0x110   : > { %v618_v4 = vmul.f32 1.442695, %v600_v2 }
 0x112   : > { %1240 = vpow2.f32 %v618_v4 }
 0x113   : > { %1242 = vpow2.f32 %v614_v5 }
 0x114   : > { %v570_v6 = vpop.xlane.xlu1 %569  ;;  %v555_v10 = vpop.xlane.xlu2 %554 }
 0x115   : > { %v564_v7 = vpop.xlane.xlu0 %563  ;;  %v604_v8 = vsub.f32 %v424_v37, %v570_v6  ;;  %v599_v14 = vsub.f32 %v1388_v38, %v555_v10 }
 0x116   : > { %v602_v9 = vsub.f32 %v394_v36, %v564_v7 }
 0x117   : > { %v626_v12 = vmul.f32 1.442695, %v604_v8  ;;  %v616_v18 = vmul.f32 1.442695, %v599_v14 }
 0x118   : > { %v1438_v11 = vpop.eup %1240  ;;  %v622_v13 = vmul.f32 1.442695, %v602_v9 }
 0x119   : > { %v1441_v15 = vpop.eup %1242  ;;  %v652_v16 = vsel %vm549_vm1, %v1438_v11, 0.0  ;;  %1244 = vpow2.f32 %v626_v12 }
 0x11a   : > { %v646_v17 = vsel %vm549_vm1, %v1441_v15, 0.0  ;;  %653 = vadd.xlane.f32.xlu1 %v652_v16  ;;  %1246 = vpow2.f32 %v622_v13 }
 0x11b   : > { %647 = vadd.xlane.f32.xlu2 %v646_v17  ;;  %1248 = vpow2.f32 %v616_v18  ;;  %v1185_v18 = vld [vmem:[%s1518_s23] sm:$0xff] }
 0x11c   : > { %v573_v19 = vpop.xlane.xlu1 %572  ;;  %763 = vmatpush.bf16.msra.mxu0 %v1185_v18 }
 0x11d   : > { %v567_v20 = vpop.xlane.xlu0 %566  ;;  %v605_v21 = vsub.f32 %v1396_v43, %v573_v19  ;;  %v1187_v19 = vld [vmem:[%s1518_s23 + $0x10] sm:$0xff] }
 0x11e   : > { %v603_v22 = vsub.f32 %v1394_v42, %v567_v20  ;;  %v1188_v20 = vld [vmem:[%s1518_s23 + $0x18] sm:$0xff]  ;;  %819 = vmatpush.bf16.msra.mxu2 %v1187_v19 }
 0x11f   : > { %v1449_v23 = vpop.eup %1244  ;;  %v628_v24 = vmul.f32 1.442695, %v605_v21  ;;  %847 = vmatpush.bf16.msra.mxu3 %v1188_v20 }
 0x120   : > { %v624_v25 = vmul.f32 1.442695, %v603_v22  ;;  %v1451_v26 = vpop.eup %1246  ;;  %v664_v27 = vsel %vm549_vm1, %v1449_v23, 0.0  ;;  %v1186_v22 = vld [vmem:[%s1518_s23 + $0x8] sm:$0xff] }
 0x121   : > { %1250 = vpow2.f32 %v628_v24  ;;  %665 = vadd.xlane.f32.xlu0 %v664_v27  ;;  %v658_v28 = vsel %vm549_vm1, %v1451_v26, 0.0  ;;  %v1458_v33 = vpop.eup %1248  ;;  %791 = vmatpush.bf16.msra.mxu1 %v1186_v22 }
 0x122   : > { %1252 = vpow2.f32 %v624_v25  ;;  %659 = vadd.xlane.f32.xlu1 %v658_v28  ;;  %v649_v41 = vsel %vm549_vm1, %v1458_v33, 0.0  ;;  %v1191_v28 = vld [vmem:[%s1518_s23 + $0x30] sm:$0xff] }
 0x123   : > { %v588_v29 = vpop.xlane.xlu2 %587  ;;  %931 = vmatpush.bf16.msrb.mxu2 %v1191_v28 }
 0x124   : > { %v561_v30 = vpop.xlane.xlu1 %560  ;;  %v610_v31 = vsub.f32 %v1406_v48, %v588_v29  ;;  %v1192_v29 = vld [vmem:[%s1518_s23 + $0x38] sm:$0xff] }
 0x125   : > { %v576_v32 = vpop.xlane.xlu0 %575  ;;  %v601_v34 = vsub.f32 %v1402_v46, %v561_v30  ;;  %959 = vmatpush.bf16.msrb.mxu3 %v1192_v29 }
 0x126   : > { %v606_v35 = vsub.f32 %v1404_v47, %v576_v32  ;;  %v638_v36 = vmul.f32 1.442695, %v610_v31 }
 0x127   : > { %v1462_v37 = vpop.eup %1250  ;;  %v620_v38 = vmul.f32 1.442695, %v601_v34 }
 0x128   : > { %v630_v39 = vmul.f32 1.442695, %v606_v35  ;;  %v1464_v40 = vpop.eup %1252  ;;  %1254 = vpow2.f32 %v638_v36  ;;  %v667_v43 = vsel %vm549_vm1, %v1462_v37, 0.0 }
 0x129   : > { %1256 = vpow2.f32 %v620_v38  ;;  %650 = vadd.xlane.f32.xlu0 %v649_v41  ;;  %v661_v42 = vsel %vm549_vm1, %v1464_v40, 0.0  ;;  %v1189_v41 = vld [vmem:[%s1518_s23 + $0x20] sm:$0xff] }
 0x12a   : > { %1258 = vpow2.f32 %v630_v39  ;;  %662 = vadd.xlane.f32.xlu2 %v661_v42  ;;  %668 = vadd.xlane.f32.xlu1 %v667_v43  ;;  %v1190_v42 = vld [vmem:[%s1518_s23 + $0x28] sm:$0xff] }
 0x12b   : > { %875 = vmatpush.bf16.msrb.mxu0 %v1189_v41  ;;  %903 = vmatpush.bf16.msrb.mxu1 %v1190_v42 }
 0x12c   : > { %v594_v44 = vpop.xlane.xlu1 %593  ;;  %v597_v45 = vpop.xlane.xlu2 %596 }
 0x12d   : > { %v612_v46 = vsub.f32 %v1410_v50, %v594_v44  ;;  %v613_v47 = vsub.f32 %v1420_v55, %v597_v45  ;;  %v591_v48 = vpop.xlane.xlu0 %590 }
 0x12e   : > { %v1474_v49 = vpop.eup %1254  ;;  %v611_v51 = vsub.f32 %v1418_v54, %v591_v48 }
 0x12f   : > { %v1477_v52 = vpop.eup %1256  ;;  %v642_v56 = vmul.f32 1.442695, %v612_v46  ;;  %v644_v57 = vmul.f32 1.442695, %v613_v47  ;;  %v682_v58 = vsel %vm549_vm1, %v1474_v49, 0.0 }
 0x130   : > { %v1481_v61 = vpop.eup %1258  ;;  %v640_v62 = vmul.f32 1.442695, %v611_v51  ;;  %v655_v50 = vsel %vm549_vm1, %v1477_v52, 0.0 }
 0x131   : > { %1260 = vpow2.f32 %v642_v56  ;;  %683 = vadd.xlane.f32.xlu0 %v682_v58  ;;  %v670_v55 = vsel %vm549_vm1, %v1481_v61, 0.0 }
 0x132   : > { %1262 = vpow2.f32 %v644_v57  ;;  %656 = vadd.xlane.f32.xlu2 %v655_v50  ;;  %671 = vadd.xlane.f32.xlu1 %v670_v55 }
 0x133   : > { %1264 = vpow2.f32 %v640_v62 }
 0x134   : > { %v582_v54 = vpop.xlane.xlu2 %581  ;;  %v579_v63 = vpop.xlane.xlu1 %578 }
 0x135   : > { %v608_v0 = vsub.f32 %v1416_v53, %v582_v54  ;;  %v607_v1 = vsub.f32 %v1428_v59, %v579_v63  ;;  %v585_v2 = vpop.xlane.xlu0 %584 }
 0x136   : > { %v609_v3 = vsub.f32 %v1430_v60, %v585_v2 }
 0x137   : > { %v1490_v4 = vpop.eup %1260  ;;  %v634_v5 = vmul.f32 1.442695, %v608_v0  ;;  %v632_v6 = vmul.f32 1.442695, %v607_v1 }
 0x138   : > { %v1492_v7 = vpop.eup %1262  ;;  %v636_v8 = vmul.f32 1.442695, %v609_v3  ;;  %v688_v53 = vsel %vm549_vm1, %v1490_v4, 0.0 }
 0x139   : > { %v1494_v9 = vpop.eup %1264  ;;  %1266 = vpow2.f32 %v634_v5  ;;  %v691_v10 = vsel %vm549_vm1, %v1492_v7, 0.0 }
 0x13a   : > { %1268 = vpow2.f32 %v632_v6  ;;  %692 = vadd.xlane.f32.xlu0 %v691_v10  ;;  %689 = vadd.xlane.f32.xlu2 %v688_v53  ;;  %v685_v59 = vsel %vm549_vm1, %v1494_v9, 0.0 }
 0x13b   : > { %1270 = vpow2.f32 %v636_v8  ;;  %686 = vadd.xlane.f32.xlu1 %v685_v59 }
 0x13f   : > { %v1502_v60 = vpop.eup %1266 }
 0x140   : > { %v1504_v12 = vpop.eup %1268  ;;  %v676_v13 = vsel %vm549_vm1, %v1502_v60, 0.0 }
 0x141   : > { %v1508_v14 = vpop.eup %1270  ;;  %v673_v16 = vsel %vm549_vm1, %v1504_v12, 0.0 }
 0x142   : > { %677 = vadd.xlane.f32.xlu0 %v676_v13  ;;  %v679_v17 = vsel %vm549_vm1, %v1508_v14, 0.0  ;;  %674 = vadd.xlane.f32.xlu2 %v673_v16 }
 0x143   : > { %680 = vadd.xlane.f32.xlu1 %v679_v17 }
 0x18d   : > { %v654_v21 = vpop.xlane.xlu1 %653 }
 0x18e   : > { %v648_v24 = vpop.xlane.xlu2 %647 }
 0x18f   : > { %1272 = vrcp.f32 %v648_v24 }
 0x194   : > { %v666_v25 = vpop.xlane.xlu0 %665 }
 0x195   : > { %v660_v27 = vpop.xlane.xlu1 %659  ;;  %v1273_v31 = vpop.eup %1272 }
 0x196   : > { %1274 = vrcp.f32 %v660_v27  ;;  %v710_v38 = vmul.f32 %v1273_v31, %v1441_v15 }
 0x197   : > { %1276 = vrcp.f32 %v666_v25 }
 0x198   : > { %v726_v46 = vpack.c.bf16 %v710_v38, %v710_v38 }
 0x19a   : > { %v744_v54 = vunpack.c.l.b16 %v726_v46 }
 0x19c   : > { %v651_v30 = vpop.xlane.xlu0 %650  ;;  %v1275_v35 = vpop.eup %1274 }
 0x19d   : > { %1278 = vrcp.f32 %v651_v30  ;;  %v663_v32 = vpop.xlane.xlu2 %662  ;;  %v669_v34 = vpop.xlane.xlu1 %668  ;;  %v714_v39 = vmul.f32 %v1275_v35, %v1451_v26 }
 0x19e   : > { %1280 = vrcp.f32 %v663_v32  ;;  %v1277_v36 = vpop.eup %1276 }
 0x19f   : > { %1282 = vrcp.f32 %v669_v34  ;;  %v716_v43 = vmul.f32 %v1277_v36, %v1449_v23  ;;  %v730_v56 = vpack.c.bf16 %v714_v39, %v714_v39 }
 0x1a0   : > { %1284 = vrcp.f32 %v654_v21 }
 0x1a1   : > { %v732_v26 = vpack.c.bf16 %v716_v43, %v716_v43 }
 0x1a3   : > { %v1279_v44 = vpop.eup %1278  ;;  %v828_v3 = vunpack.c.l.b16 %v732_v26 }
 0x1a4   : > { %v1281_v45 = vpop.eup %1280  ;;  %v711_v47 = vmul.f32 %v1279_v44, %v1458_v33  ;;  %v684_v48 = vpop.xlane.xlu0 %683  ;;  %v800_v33 = vunpack.c.l.b16 %v730_v56 }
 0x1a5   : > { %v1283_v51 = vpop.eup %1282  ;;  %v715_v57 = vmul.f32 %v1281_v45, %v1464_v40  ;;  %v657_v15 = vpop.xlane.xlu2 %656 }
 0x1a6   : > { %v672_v58 = vpop.xlane.xlu1 %671  ;;  %v1285_v62 = vpop.eup %1284  ;;  %v727_v50 = vpack.c.bf16 %v711_v47, %v711_v47  ;;  %v717_v55 = vmul.f32 %v1283_v51, %v1462_v37  ;;  %1286 = vrcp.f32 %v657_v15 }
 0x1a7   : > { %v731_v23 = vpack.c.bf16 %v715_v57, %v715_v57  ;;  %v712_v1 = vmul.f32 %v1285_v62, %v1438_v11  ;;  %1288 = vrcp.f32 %v684_v48 }
 0x1a8   : > { %v745_v63 = vunpack.c.l.b16 %v727_v50  ;;  %v733_v0 = vpack.c.bf16 %v717_v55, %v717_v55 }
 0x1a9   : > { %v801_v2 = vunpack.c.l.b16 %v731_v23  ;;  %v728_v53 = vpack.c.bf16 %v712_v1, %v712_v1 }
 0x1aa   : > { %v746_v5 = vpack.c.b16 %v745_v63, %v744_v54  ;;  %v829_v6 = vunpack.c.l.b16 %v733_v0 }
 0x1ab   : > { %v802_v40 = vpack.c.b16 %v801_v2, %v800_v33  ;;  %v772_v18 = vunpack.c.l.b16 %v728_v53 }
 0x1ac   : > { %v1287_v8 = vpop.eup %1286  ;;  %v830_v10 = vpack.c.b16 %v829_v6, %v828_v3  ;;  %1135 = vmatmul.msk.bf16.vlgmr.msra.gmra.mxu0 %vm549_vm1, %v746_v5 }
 0x1ad   : > { %v713_v37 = vmul.f32 %v1287_v8, %v1477_v52  ;;  %v693_v59 = vpop.xlane.xlu0 %692  ;;  %v690_v13 = vpop.xlane.xlu2 %689  ;;  %1145 = vmatmul.msk.bf16.vlgmr.msra.gmra.mxu2 %vm549_vm1, %v802_v40 }
 0x1ae   : > { %1290 = vrcp.f32 %v693_v59  ;;  %1150 = vmatmul.msk.bf16.vlgmr.msra.gmra.mxu3 %vm549_vm1, %v830_v10  ;;  %v687_v11 = vpop.xlane.xlu1 %686  ;;  %v1289_v17 = vpop.eup %1288 }
 0x1af   : > { %v729_v16 = vpack.c.bf16 %v713_v37, %v713_v37  ;;  %1292 = vrcp.f32 %v690_v13  ;;  %v722_v20 = vmul.f32 %v1289_v17, %v1474_v49 }
 0x1b0   : > { %1294 = vrcp.f32 %v687_v11 }
 0x1b1   : > { %v773_v19 = vunpack.c.l.b16 %v729_v16  ;;  %1296 = vrcp.f32 %v672_v58  ;;  %v738_v32 = vpack.c.bf16 %v722_v20, %v722_v20 }
 0x1b3   : > { %v774_v21 = vpack.c.b16 %v773_v19, %v772_v18  ;;  %v912_v41 = vunpack.c.l.b16 %v738_v32 }
 0x1b4   : > { %v1291_v22 = vpop.eup %1290 }
 0x1b5   : > { %v1293_v52 = vpop.eup %1292  ;;  %v725_v24 = vmul.f32 %v1291_v22, %v1492_v7  ;;  %v678_v25 = vpop.xlane.xlu0 %677  ;;  %1140 = vmatmul.msk.bf16.vlgmr.msra.gmra.mxu1 %vm549_vm1, %v774_v21 }
 0x1b6   : > { %v675_v27 = vpop.xlane.xlu2 %674  ;;  %v1295_v28 = vpop.eup %1294  ;;  %v724_v29 = vmul.f32 %v1293_v52, %v1490_v4  ;;  %1298 = vrcp.f32 %v678_v25 }
 0x1b7   : > { %v681_v30 = vpop.xlane.xlu1 %680  ;;  %v1297_v31 = vpop.eup %1296  ;;  %v741_v34 = vpack.c.bf16 %v725_v24, %v725_v24  ;;  %v723_v35 = vmul.f32 %v1295_v28, %v1494_v9  ;;  %1300 = vrcp.f32 %v675_v27 }
 0x1b8   : > { %v740_v49 = vpack.c.bf16 %v724_v29, %v724_v29  ;;  %1302 = vrcp.f32 %v681_v30  ;;  %v718_v7 = vmul.f32 %v1297_v31, %v1481_v61 }
 0x1b9   : > { %v739_v36 = vpack.c.bf16 %v723_v35, %v723_v35  ;;  %v941_v38 = vunpack.c.l.b16 %v741_v34 }
 0x1ba   : > { %v940_v39 = vunpack.c.l.b16 %v740_v49  ;;  %v734_v48 = vpack.c.bf16 %v718_v7, %v718_v7 }
 0x1bb   : > { %v913_v42 = vunpack.c.l.b16 %v739_v36 }
 0x1bc   : > { %v1299_v43 = vpop.eup %1298  ;;  %v942_v44 = vpack.c.b16 %v941_v38, %v940_v39  ;;  %v856_v15 = vunpack.c.l.b16 %v734_v48 }
 0x1bd   : > { %v1301_v4 = vpop.eup %1300  ;;  %v914_v45 = vpack.c.b16 %v913_v42, %v912_v41  ;;  %v720_v46 = vmul.f32 %v1299_v43, %v1502_v60 }
 0x1be   : > { %v1303_v47 = vpop.eup %1302  ;;  %v719_v9 = vmul.f32 %v1301_v4, %v1504_v12  ;;  %1170 = vmatmul.msk.bf16.vlgmr.msrb.gmra.mxu3 %vm549_vm1, %v942_v44 }
 0x1bf   : > { %v736_v51 = vpack.c.bf16 %v720_v46, %v720_v46  ;;  %v721_v61 = vmul.f32 %v1303_v47, %v1508_v14  ;;  %1165 = vmatmul.msk.bf16.vlgmr.msrb.gmra.mxu2 %vm549_vm1, %v914_v45 }
 0x1c0   : > { %v735_v56 = vpack.c.bf16 %v719_v9, %v719_v9 }
 0x1c1   : > { %v737_v57 = vpack.c.bf16 %v721_v61, %v721_v61  ;;  %v884_v62 = vunpack.c.l.b16 %v736_v51 }
 0x1c2   : > { %v857_v58 = vunpack.c.l.b16 %v735_v56 }
 0x1c3   : > { %v885_v26 = vunpack.c.l.b16 %v737_v57 }
 0x1c4   : > { %v858_v50 = vpack.c.b16 %v857_v58, %v856_v15 }
 0x1c5   : > { %v886_v60 = vpack.c.b16 %v885_v26, %v884_v62 }
 0x1c6   : > { %1155 = vmatmul.msk.bf16.vlgmr.msrb.gmra.mxu0 %vm549_vm1, %v858_v50 }
 0x1c7   : > { %1160 = vmatmul.msk.bf16.vlgmr.msrb.gmra.mxu1 %vm549_vm1, %v886_v60 }
 0x229   : > { %v765_v12 = vpop.f32.mrf.mxu0 }
 0x22a   : > { %v966_v14 = vpack.c.bf16 %v765_v12, %v765_v12 }
 0x22c   : > { %983 = vst.msk [vmem:[%s1556_s26] sm:$0xf] %vm982_vm2, %v966_v14 }
 0x230   : > { %v821_v55 = vpop.f32.mrf.mxu2 }
 0x231   : > { %v767_v23 = vpop.f32.mrf.mxu0  ;;  %v970_v54 = vpack.c.bf16 %v821_v55, %v821_v55  ;;  %v849_v63 = vpop.f32.mrf.mxu3 }
 0x232   : > { %v967_v0 = vpack.c.bf16 %v767_v23, %v767_v23  ;;  %v972_v1 = vpack.c.bf16 %v849_v63, %v849_v63  ;;  %v793_v33 = vpop.f32.mrf.mxu1 }
 0x233   : > { %987 = vst.msk [vmem:[%s1556_s26 + $0x10] sm:$0xf] %vm982_vm2, %v970_v54  ;;  %v968_v2 = vpack.c.bf16 %v793_v33, %v793_v33 }
 0x234   : > { %984 = vst.msk [vmem:[%s1556_s26 + $0x4] sm:$0xf] %vm982_vm2, %v967_v0 }
 0x235   : > { %989 = vst.msk [vmem:[%s1556_s26 + $0x18] sm:$0xf] %vm982_vm2, %v972_v1 }
 0x236   : > { %985 = vst.msk [vmem:[%s1556_s26 + $0x8] sm:$0xf] %vm982_vm2, %v968_v2 }
 0x238   : > { %v823_v3 = vpop.f32.mrf.mxu2 }
 0x239   : > { %v971_v5 = vpack.c.bf16 %v823_v3, %v823_v3  ;;  %v851_v6 = vpop.f32.mrf.mxu3 }
 0x23a   : > { %v973_v40 = vpack.c.bf16 %v851_v6, %v851_v6  ;;  %v795_v8 = vpop.f32.mrf.mxu1 }
 0x23b   : > { %988 = vst.msk [vmem:[%s1556_s26 + $0x14] sm:$0xf] %vm982_vm2, %v971_v5  ;;  %v969_v10 = vpack.c.bf16 %v795_v8, %v795_v8 }
 0x23c   : > { %990 = vst.msk [vmem:[%s1556_s26 + $0x1c] sm:$0xf] %vm982_vm2, %v973_v40 }
 0x23d   : > { %986 = vst.msk [vmem:[%s1556_s26 + $0xc] sm:$0xf] %vm982_vm2, %v969_v10 }
 0x241   : > { %v961_v53 = vpop.f32.mrf.mxu3 }
 0x242   : > { %v933_v37 = vpop.f32.mrf.mxu2  ;;  %v980_v59 = vpack.c.bf16 %v961_v53, %v961_v53 }
 0x243   : > { %v978_v13 = vpack.c.bf16 %v933_v37, %v933_v37  ;;  %v877_v11 = vpop.f32.mrf.mxu0 }
 0x244   : > { %997 = vst.msk [vmem:[%s1556_s26 + $0x38] sm:$0xf] %vm982_vm2, %v980_v59  ;;  %v974_v16 = vpack.c.bf16 %v877_v11, %v877_v11  ;;  %v905_v17 = vpop.f32.mrf.mxu1 }
 0x245   : > { %995 = vst.msk [vmem:[%s1556_s26 + $0x30] sm:$0xf] %vm982_vm2, %v978_v13  ;;  %v976_v18 = vpack.c.bf16 %v905_v17, %v905_v17 }
 0x246   : > { %991 = vst.msk [vmem:[%s1556_s26 + $0x20] sm:$0xf] %vm982_vm2, %v974_v16 }
 0x247   : > { %993 = vst.msk [vmem:[%s1556_s26 + $0x28] sm:$0xf] %vm982_vm2, %v976_v18 }
 0x249   : > { %v963_v19 = vpop.f32.mrf.mxu3 }
 0x24a   : > { %v935_v20 = vpop.f32.mrf.mxu2  ;;  %v981_v21 = vpack.c.bf16 %v963_v19, %v963_v19 }
 0x24b   : > { %v979_v22 = vpack.c.bf16 %v935_v20, %v935_v20  ;;  %v879_v52 = vpop.f32.mrf.mxu0 }
 0x24c   : > { %998 = vst.msk [vmem:[%s1556_s26 + $0x3c] sm:$0xf] %vm982_vm2, %v981_v21  ;;  %v975_v24 = vpack.c.bf16 %v879_v52, %v879_v52  ;;  %v907_v25 = vpop.f32.mrf.mxu1 }
 0x24d   : > { %996 = vst.msk [vmem:[%s1556_s26 + $0x34] sm:$0xf] %vm982_vm2, %v979_v22  ;;  %v977_v27 = vpack.c.bf16 %v907_v25, %v907_v25 }
 0x24e   : > { %992 = vst.msk [vmem:[%s1556_s26 + $0x24] sm:$0xf] %vm982_vm2, %v975_v24 }
 0x24f   : > { %994 = vst.msk [vmem:[%s1556_s26 + $0x2c] sm:$0xf] %vm982_vm2, %v977_v27 }
 0x250 PF: > { %s13_s12 = sadd.s32 1, %s1310_s12  }
 0x251   : > { %p10_p4 = scmp.ge.s32.totalorder %s13_s12, 4  }
 0x253   :  { %12 = sbr.rel (!%p10_p4) target bundleno = 1 (0x1), region = 68 }

// kernel: textdiae_forward.72
= control target key start
LH: loop header
LB: loop body
LE: loop exit
PB: predicated region body
PF: predicated region fallthrough
CT: control target
= control target key end

     0   :  { %s814_s1 = inlined_call_operand.vmem [shape: bf16[512,128], index: 1, kind: input, shape index: {}]   ;;  %s815_s2 = inlined_call_operand.vmem [shape: f32[1,128], index: 2, kind: input, shape index: {}]   ;;  %s816_s0 = inlined_call_operand.vmem [shape: bf16[32,512], index: 0, kind: input, shape index: {}]   ;;  %s817_s3 = inlined_call_operand.vmem [shape: f32[32,128], index: 3, kind: input, shape index: {}]   ;;  %s818_s4 = inlined_call_operand.vmem [shape: f32[32,128], index: 4, kind: output, shape index: {}]  }
   0x1   :  { %v592_v0 = vld [vmem:[%s814_s1 + $0x38] sm:$0xff]  ;;  %v591_v4 = vld [vmem:[%s814_s1 + $0x30] sm:$0xff]  ;;  %v590_v8 = vld [vmem:[%s814_s1 + $0x28] sm:$0xff] }
   0x2   :  { %v600_v1 = vld [vmem:[%s814_s1 + $0x78] sm:$0xff]  ;;  %325 = vmatpush.bf16.msra.mxu0 %v592_v0  ;;  %v599_v5 = vld [vmem:[%s814_s1 + $0x70] sm:$0xff]  ;;  %v598_v9 = vld [vmem:[%s814_s1 + $0x68] sm:$0xff] }
   0x3   :  { %v608_v2 = vld [vmem:[%s814_s1 + $0xb8] sm:$0xff]  ;;  %344 = vmatpush.bf16.msra.mxu1 %v600_v1  ;;  %v607_v6 = vld [vmem:[%s814_s1 + $0xb0] sm:$0xff]  ;;  %v606_v10 = vld [vmem:[%s814_s1 + $0xa8] sm:$0xff] }
   0x4   :  { %v616_v3 = vld [vmem:[%s814_s1 + $0xf8] sm:$0xff]  ;;  %363 = vmatpush.bf16.msra.mxu2 %v608_v2  ;;  %v615_v7 = vld [vmem:[%s814_s1 + $0xf0] sm:$0xff]  ;;  %v614_v11 = vld [vmem:[%s814_s1 + $0xe8] sm:$0xff] }
   0x5   :  { %382 = vmatpush.bf16.msra.mxu3 %v616_v3  ;;  %v589_v12 = vld [vmem:[%s814_s1 + $0x20] sm:$0xff]  ;;  %v588_v16 = vld [vmem:[%s814_s1 + $0x18] sm:$0xff]  ;;  %v587_v20 = vld [vmem:[%s814_s1 + $0x10] sm:$0xff] }
   0x6   :  { %326 = vmatpush.bf16.msra.mxu0 %v591_v4  ;;  %v597_v13 = vld [vmem:[%s814_s1 + $0x60] sm:$0xff]  ;;  %v596_v17 = vld [vmem:[%s814_s1 + $0x58] sm:$0xff]  ;;  %v595_v21 = vld [vmem:[%s814_s1 + $0x50] sm:$0xff] }
   0x7   :  { %345 = vmatpush.bf16.msra.mxu1 %v599_v5  ;;  %v605_v14 = vld [vmem:[%s814_s1 + $0xa0] sm:$0xff]  ;;  %v604_v18 = vld [vmem:[%s814_s1 + $0x98] sm:$0xff]  ;;  %v603_v22 = vld [vmem:[%s814_s1 + $0x90] sm:$0xff] }
   0x8   :  { %364 = vmatpush.bf16.msra.mxu2 %v607_v6  ;;  %v613_v15 = vld [vmem:[%s814_s1 + $0xe0] sm:$0xff]  ;;  %v612_v19 = vld [vmem:[%s814_s1 + $0xd8] sm:$0xff]  ;;  %v611_v23 = vld [vmem:[%s814_s1 + $0xd0] sm:$0xff] }
   0x9   :  { %383 = vmatpush.bf16.msra.mxu3 %v615_v7  ;;  %v586_v24 = vld [vmem:[%s814_s1 + $0x8] sm:$0xff]  ;;  %v585_v28 = vld [vmem:[%s814_s1] sm:$0xff]  ;;  %v579_v33 = vld [vmem:[%s816_s0 + $0xc] sm:$0xf0] }
   0xa   :  { %327 = vmatpush.bf16.msra.mxu0 %v590_v8  ;;  %v594_v25 = vld [vmem:[%s814_s1 + $0x48] sm:$0xff]  ;;  %v593_v29 = vld [vmem:[%s814_s1 + $0x40] sm:$0xff]  ;;  %v421_v35 = vld [vmem:[%s816_s0 + $0x10] sm:$0xf0] }
   0xb   :  { %346 = vmatpush.bf16.msra.mxu1 %v598_v9  ;;  %v602_v26 = vld [vmem:[%s814_s1 + $0x88] sm:$0xff]  ;;  %v601_v30 = vld [vmem:[%s814_s1 + $0x80] sm:$0xff]  ;;  %v580_v37 = vld [vmem:[%s816_s0 + $0x14] sm:$0xf0] }
   0xc   :  { %365 = vmatpush.bf16.msra.mxu2 %v606_v10  ;;  %v610_v27 = vld [vmem:[%s814_s1 + $0xc8] sm:$0xff]  ;;  %v609_v31 = vld [vmem:[%s814_s1 + $0xc0] sm:$0xff]  ;;  %v429_v39 = vld [vmem:[%s816_s0 + $0x18] sm:$0xf0] }
   0xd   :  { %384 = vmatpush.bf16.msra.mxu3 %v614_v11  ;;  %v419_v32 = vld [vmem:[%s816_s0] sm:$0xf]  ;;  %v577_v34 = vld [vmem:[%s816_s0 + $0x4] sm:$0xf]  ;;  %v427_v36 = vld [vmem:[%s816_s0 + $0x8] sm:$0xf] }
   0xe   :  { %328 = vmatpush.bf16.msra.mxu0 %v589_v12  ;;  %v578_v38 = vld [vmem:[%s816_s0 + $0xc] sm:$0xf]  ;;  %v420_v40 = vor.u32 %v579_v33, %v419_v32  ;;  %v424_v41 = vor.u32 %v577_v34, %v421_v35  ;;  %v428_v42 = vor.u32 %v580_v37, %v427_v36  ;;  %v435_v44 = vld [vmem:[%s816_s0 + $0x20] sm:$0xf]  ;;  %v583_v45 = vld [vmem:[%s816_s0 + $0x2c] sm:$0xf0] }
   0xf   :  { %347 = vmatpush.bf16.msra.mxu1 %v597_v13  ;;  %v432_v43 = vor.u32 %v578_v38, %v429_v39  ;;  %v581_v46 = vld [vmem:[%s816_s0 + $0x24] sm:$0xf]  ;;  %v437_v47 = vld [vmem:[%s816_s0 + $0x30] sm:$0xf0]  ;;  %v443_v48 = vld [vmem:[%s816_s0 + $0x28] sm:$0xf]  ;;  %v436_v52 = vor.u32 %v583_v45, %v435_v44 }
  0x10   :  { %366 = vmatpush.bf16.msra.mxu2 %v605_v14  ;;  %v584_v49 = vld [vmem:[%s816_s0 + $0x34] sm:$0xf0]  ;;  %v582_v50 = vld [vmem:[%s816_s0 + $0x2c] sm:$0xf]  ;;  %v445_v51 = vld [vmem:[%s816_s0 + $0x38] sm:$0xf0]  ;;  %v440_v53 = vor.u32 %v581_v46, %v437_v47 }
  0x11   :  { %385 = vmatpush.bf16.msra.mxu3 %v613_v15  ;;  %v444_v54 = vor.u32 %v584_v49, %v443_v48  ;;  %v448_v55 = vor.u32 %v582_v50, %v445_v51  ;;  %v617_v56 = vld [vmem:[%s815_s2] ss:$0 sm:$0xff]  ;;  %v402_v11 = vld [vmem:[%s817_s3 + $0x8] sm:$0xff] }
  0x12   :  { %329 = vmatpush.bf16.msra.mxu0 %v588_v16  ;;  %v401_v1 = vld [vmem:[%s817_s3] sm:$0xff] }
  0x13   :  { %348 = vmatpush.bf16.msra.mxu1 %v596_v17 }
  0x14   :  { %367 = vmatpush.bf16.msra.mxu2 %v604_v18 }
  0x15   :  { %386 = vmatpush.bf16.msra.mxu3 %v612_v19 }
  0x16   :  { %330 = vmatpush.bf16.msra.mxu0 %v587_v20 }
  0x17   :  { %349 = vmatpush.bf16.msra.mxu1 %v595_v21  ;;  %v403_v21 = vld [vmem:[%s817_s3 + $0x10] sm:$0xff] }
  0x18   :  { %368 = vmatpush.bf16.msra.mxu2 %v603_v22 }
  0x19   :  { %387 = vmatpush.bf16.msra.mxu3 %v611_v23 }
  0x1a   :  { %331 = vmatpush.bf16.msra.mxu0 %v586_v24 }
  0x1b   :  { %350 = vmatpush.bf16.msra.mxu1 %v594_v25 }
  0x1c   :  { %369 = vmatpush.bf16.msra.mxu2 %v602_v26 }
  0x1d   :  { %388 = vmatpush.bf16.msra.mxu3 %v610_v27 }
  0x1e   :  { %332 = vmatpush.bf16.msra.mxu0 %v585_v28 }
  0x1f   :  { %351 = vmatpush.bf16.msra.mxu1 %v593_v29 }
  0x20   :  { %370 = vmatpush.bf16.msra.mxu2 %v601_v30  ;;  %v404_v30 = vld [vmem:[%s817_s3 + $0x18] sm:$0xff] }
  0x21   :  { %389 = vmatpush.bf16.msra.mxu3 %v609_v31  ;;  %333 = vmatmul.bf16.vlgmr.msra.gmra.mxu0 %v420_v40 }
  0x22   :  { %352 = vmatmul.bf16.vlgmr.msra.gmra.mxu1 %v424_v41 }
  0x23   :  { %371 = vmatmul.bf16.vlgmr.msra.gmra.mxu2 %v428_v42 }
  0x24   :  { %390 = vmatmul.bf16.vlgmr.msra.gmra.mxu3 %v432_v43 }
  0x31   :  { %338 = vmatmul.bf16.gmra.mxu0 %v436_v52 }
  0x32   :  { %357 = vmatmul.bf16.gmra.mxu1 %v440_v53 }
  0x33   :  { %376 = vmatmul.bf16.gmra.mxu2 %v444_v54 }
  0x34   :  { %395 = vmatmul.bf16.gmra.mxu3 %v448_v55 }
  0x9e   :  { %v334_v57 = vpop.f32.mrf.mxu0 }
  0x9f   :  { %v353_v58 = vpop.f32.mrf.mxu1  ;;  %v335_v59 = vadd.f32 %v617_v56, %v334_v57 }
  0xa1   :  { %v354_v60 = vadd.f32 %v353_v58, %v335_v59 }
  0xa6   :  { %v372_v61 = vpop.f32.mrf.mxu2  ;;  %v336_v0 = vpop.f32.mrf.mxu0 }
  0xa7   :  { %v391_v62 = vpop.f32.mrf.mxu3  ;;  %v373_v63 = vadd.f32 %v372_v61, %v354_v60  ;;  %v355_v2 = vpop.f32.mrf.mxu1  ;;  %v337_v4 = vadd.f32 %v617_v56, %v336_v0 }
  0xa9   :  { %v392_v3 = vadd.f32 %v391_v62, %v373_v63  ;;  %v356_v6 = vadd.f32 %v355_v2, %v337_v4 }
  0xab   :  { %v405_v5 = vadd.f32 %v401_v1, %v392_v3 }
  0xad   :  { %409 = vst [vmem:[%s818_s4] sm:$0xff] %v405_v5 }
  0xae   :  { %v374_v7 = vpop.f32.mrf.mxu2  ;;  %v339_v10 = vpop.f32.mrf.mxu0 }
  0xaf   :  { %v393_v8 = vpop.f32.mrf.mxu3  ;;  %v375_v9 = vadd.f32 %v374_v7, %v356_v6  ;;  %v340_v12 = vadd.f32 %v617_v56, %v339_v10  ;;  %v358_v14 = vpop.f32.mrf.mxu1 }
  0xb1   :  { %v394_v13 = vadd.f32 %v393_v8, %v375_v9  ;;  %v359_v16 = vadd.f32 %v358_v14, %v340_v12 }
  0xb3   :  { %v406_v15 = vadd.f32 %v402_v11, %v394_v13 }
  0xb5   :  { %410 = vst [vmem:[%s818_s4 + $0x8] sm:$0xff] %v406_v15 }
  0xb6   :  { %v377_v17 = vpop.f32.mrf.mxu2  ;;  %v341_v20 = vpop.f32.mrf.mxu0 }
  0xb7   :  { %v396_v18 = vpop.f32.mrf.mxu3  ;;  %v378_v19 = vadd.f32 %v377_v17, %v359_v16  ;;  %v342_v23 = vadd.f32 %v617_v56, %v341_v20  ;;  %v360_v25 = vpop.f32.mrf.mxu1 }
  0xb9   :  { %v397_v22 = vadd.f32 %v396_v18, %v378_v19  ;;  %v361_v26 = vadd.f32 %v360_v25, %v342_v23 }
  0xbb   :  { %v407_v24 = vadd.f32 %v403_v21, %v397_v22 }
  0xbd   :  { %411 = vst [vmem:[%s818_s4 + $0x10] sm:$0xff] %v407_v24 }
  0xbe   :  { %v379_v27 = vpop.f32.mrf.mxu2 }
  0xbf   :  { %v380_v28 = vadd.f32 %v379_v27, %v361_v26  ;;  %v398_v29 = vpop.f32.mrf.mxu3 }
  0xc1   :  { %v399_v31 = vadd.f32 %v398_v29, %v380_v28 }
  0xc3   :  { %v408_v32 = vadd.f32 %v404_v30, %v399_v31 }
  0xc5   :  { %412 = vst [vmem:[%s818_s4 + $0x18] sm:$0xff] %v408_v32 }

// kernel: textdiae_forward.73
= control target key start
LH: loop header
LB: loop body
LE: loop exit
PB: predicated region body
PF: predicated region fallthrough
CT: control target
= control target key end

     0   :  { %s975_s18 = smov 0   ;;  %s977_s19 = smov 0   ;;  %s1120_s0 = inlined_call_operand.vmem [shape: f32[32,128], index: 0, kind: input, shape index: {}]   ;;  %s1121_s1 = inlined_call_operand.vmem [shape: f32[1,128], index: 1, kind: input, shape index: {}]   ;;  %s1122_s2 = inlined_call_operand.vmem [shape: f32[1,128], index: 2, kind: input, shape index: {}]   ;;  %s1123_s3 = inlined_call_operand.vmem [shape: bf16[128,512], index: 3, kind: input, shape index: {}]   ;;  %s1124_s4 = inlined_call_operand.vmem [shape: f32[1,512], index: 4, kind: input, shape index: {}]   ;;  %s1125_s5 = inlined_call_operand.vmem [shape: bf16[32,512], index: 5, kind: output, shape index: {}]  }
   0x1   :  { %s979_s20 = smov 0   ;;  %s981_s21 = smov 0  }
   0x2   :  { %s983_s22 = smov 0  }
   0x3 LB: > { %s24_s23 = sadd.s32 1, %s938_s21  ;;  %s769_s24 = sadd.s32 4294967295, %s942_s22   ;;  %s942_s22 = sphi %s983_s22, %s15_s22   ;;  %s938_s21 = sphi %s981_s21, %s1130_s21   ;;  %s934_s20 = sphi %s979_s20, %s1129_s20   ;;  %s930_s19 = sphi %s977_s19, %s1128_s19   ;;  %s926_s18 = sphi %s975_s18, %s1127_s18  }
   0x4   : > { %p25_p0 = scmp.ge.s32.totalorder %s24_s23, 4  ;;  %p109_p1 = scmp.ne.s32.totalorder %s930_s19, %s926_s18 }
   0x5   : > { %p110_p2 = scmp.eq.s32.totalorder %s942_s22, 0  ;;  %p167_p4 = scmp.eq.s32.totalorder %s769_s24, 3 }
   0x6   : > { %s1132_s23 = smov (%p25_p0, %s24_s23), 0  ;;  %s102_s26 = sadd.s32 1, %s930_s19 }
   0x7   : > { %p111_p3 = por %p110_p2, %p109_p1  ;;  %s99_s25 = ssub.s32 %s938_s21, %s1132_s23 }
   0x8   : > { %p100_p5 = scmp.eq.s32.totalorder %s99_s25, 0  ;;  %p1010_p6 = por %p167_p4, %p109_p1 }
   0x9   : > { %p773_p7 = scmp.ge.s32.totalorder %s942_s22, 4 }
   0xa   : > { %s1015_s28 = scalar_select %p100_p5, %s930_s19, %s102_s26  }
   0xb   : > { %204 = sbr.rel (%p773_p7) target bundleno = 36 (0x24), region = 28 }
  0x10   : > { %207 = sbr.rel (!%p111_p3) target bundleno = 36 (0x24), region = 32  ;;  %s209_s29 = sand.u32 (%p111_p3), 1, %s930_s19  }
  0x11   : > { %s775_s30 = sshll.u32 (%p111_p3), %s938_s21, 2  ;;  %s774_s6 = sshll.u32 (%p111_p3), %s209_s29, 6 }
  0x12   : > { %s1023_s9 = scalar_lea.vmem (%p111_p3), %s1123_s3, %s775_s30  ;;  %s211_s10 = scalar_lea.vmem (%p111_p3), [#allocation2], %s774_s6 }
  0x13   : > { %v230_v0 = vld [vmem:[%s1023_s9] sm:$0xf] (%p111_p3)  ;;  %v232_v1 = vld [vmem:[%s1023_s9 + $0x10] sm:$0xf] (%p111_p3) }
  0x14   : > { %231 = vst [vmem:[%s211_s10] sm:$0xf] (%p111_p3), %v230_v0  ;;  %v234_v2 = vld [vmem:[%s1023_s9 + $0x20] sm:$0xf] (%p111_p3)  ;;  %v236_v3 = vld [vmem:[%s1023_s9 + $0x30] sm:$0xf] (%p111_p3) }
  0x15   : > { %233 = vst [vmem:[%s211_s10 + $0x4] sm:$0xf] %v232_v1  ;;  %v238_v4 = vld [vmem:[%s1023_s9 + $0x40] sm:$0xf]  ;;  %v240_v5 = vld [vmem:[%s1023_s9 + $0x50] sm:$0xf] }
  0x16   : > { %235 = vst [vmem:[%s211_s10 + $0x8] sm:$0xf] %v234_v2  ;;  %v242_v6 = vld [vmem:[%s1023_s9 + $0x60] sm:$0xf]  ;;  %v244_v7 = vld [vmem:[%s1023_s9 + $0x70] sm:$0xf] }
  0x17   : > { %237 = vst [vmem:[%s211_s10 + $0xc] sm:$0xf] %v236_v3  ;;  %v246_v8 = vld [vmem:[%s1023_s9 + $0x80] sm:$0xf]  ;;  %v248_v9 = vld [vmem:[%s1023_s9 + $0x90] sm:$0xf] }
  0x18   : > { %239 = vst [vmem:[%s211_s10 + $0x10] sm:$0xf] %v238_v4  ;;  %v250_v10 = vld [vmem:[%s1023_s9 + $0xa0] sm:$0xf]  ;;  %v252_v11 = vld [vmem:[%s1023_s9 + $0xb0] sm:$0xf] }
  0x19   : > { %241 = vst [vmem:[%s211_s10 + $0x14] sm:$0xf] %v240_v5  ;;  %v254_v12 = vld [vmem:[%s1023_s9 + $0xc0] sm:$0xf]  ;;  %v256_v13 = vld [vmem:[%s1023_s9 + $0xd0] sm:$0xf] }
  0x1a   : > { %243 = vst [vmem:[%s211_s10 + $0x18] sm:$0xf] %v242_v6  ;;  %v258_v14 = vld [vmem:[%s1023_s9 + $0xe0] sm:$0xf]  ;;  %v260_v15 = vld [vmem:[%s1023_s9 + $0xf0] sm:$0xf] }
  0x1b   : > { %245 = vst [vmem:[%s211_s10 + $0x1c] sm:$0xf] %v244_v7 }
  0x1c   : > { %247 = vst [vmem:[%s211_s10 + $0x20] sm:$0xf] %v246_v8 }
  0x1d   : > { %249 = vst [vmem:[%s211_s10 + $0x24] sm:$0xf] %v248_v9 }
  0x1e   : > { %251 = vst [vmem:[%s211_s10 + $0x28] sm:$0xf] %v250_v10 }
  0x1f   : > { %253 = vst [vmem:[%s211_s10 + $0x2c] sm:$0xf] %v252_v11 }
  0x20   : > { %255 = vst [vmem:[%s211_s10 + $0x30] sm:$0xf] %v254_v12 }
  0x21   : > { %257 = vst [vmem:[%s211_s10 + $0x34] sm:$0xf] %v256_v13 }
  0x22   : > { %259 = vst [vmem:[%s211_s10 + $0x38] sm:$0xf] %v258_v14 }
  0x23   : > { %261 = vst [vmem:[%s211_s10 + $0x3c] sm:$0xf] %v260_v15 }
  0x24 PF: > { %p776_p8 = scmp.ge.s32.totalorder %s942_s22, 1  ;;  %p322_p9 = scmp.lt.s32.totalorder %s942_s22, 5 }
  0x26   : > { %p323_p10 = pnand %p776_p8, %p322_p9 }
  0x27   : > { %p369_p11 = scmp.lt.s32.totalorder (!%p323_p10), %s934_s20, 3  ;;  %s329_s6 = sand.u32 (!%p323_p10), 1, %s926_s18  }
  0x28   : > { %326 = sbr.rel (%p323_p10) target bundleno = 493 (0x1ed), region = 77  ;;  %s777_s7 = sshll.u32 (!%p323_p10), %s329_s6, 6 }
  0x29   : > { %s331_s8 = scalar_lea.vmem (!%p323_p10), [#allocation2], %s777_s7  ;;  %s778_s15 = sshll.u32 (!%p323_p10), %s329_s6, 4 }
  0x2a   : > { %s362_s16 = scalar_lea.vmem (!%p323_p10), [#allocation3], %s778_s15 }
  0x2d   : > { %v375_v16 = vld [vmem:[%s1120_s0 + $0x10] sm:$0xff]  ;;  %v373_v17 = vld [vmem:[%s1120_s0] sm:$0xff]  ;;  %v376_v18 = vld [vmem:[%s1120_s0 + $0x18] sm:$0xff]  ;;  %v944_v20 = vmov 128.0   ;;  %s1073_s25 = scalar_select %p369_p11, %s934_s20, 3 }
  0x2e   : > { %381 = vadd.xlane.f32.xlu1 %v375_v16  ;;  %377 = vadd.xlane.f32.xlu0 %v373_v17  ;;  %v374_v19 = vld [vmem:[%s1120_s0 + $0x8] sm:$0xff]  ;;  %886 = vrcp.f32 %v944_v20  ;;  %v822_v43 = vld [vmem:[%s331_s8 + $0x38] sm:$0xff]  ;;  %v821_v44 = vld [vmem:[%s331_s8 + $0x30] sm:$0xff]  ;;  %s812_s18 = sshll.u32 (%p1010_p6), %s934_s20, 2 }
  0x2f   : > { %s371_s30 = scalar_lea.vmem %s1124_s4, %s1073_s25  ;;  %550 = vmatpush.bf16.msra.mxu0 %v822_v43  ;;  %834 = vmatpush.bf16.msra.mxu1 %v822_v43  ;;  %v820_v45 = vld [vmem:[%s331_s8 + $0x28] sm:$0xff]  ;;  %v819_v46 = vld [vmem:[%s331_s8 + $0x20] sm:$0xff]  ;;  %v818_v47 = vld [vmem:[%s331_s8 + $0x18] sm:$0xff]  ;;  %s624_s25 = scalar_lea.vmem (%p1010_p6), %s1125_s5, %s812_s18 }
  0x30   : > { %v817_v48 = vld [vmem:[%s331_s8 + $0x10] sm:$0xff]  ;;  %v816_v49 = vld [vmem:[%s331_s8 + $0x8] sm:$0xff]  ;;  %v815_v54 = vld [vmem:[%s331_s8] sm:$0xff] }
  0x33   : > { %551 = vmatpush.bf16.msra.mxu0 %v821_v44  ;;  %835 = vmatpush.bf16.msra.mxu1 %v821_v44 }
  0x34   : > { %v887_v21 = vpop.eup %886 }
  0x35   : > { %v386_v22 = vmul.f32 128.0, %v887_v21  ;;  %vm390_vm0 = vweird.f32 %v887_v21 }
  0x36   : > { %383 = vadd.xlane.f32.xlu1 %v376_v18  ;;  %379 = vadd.xlane.f32.xlu0 %v374_v19 }
  0x37   : > { %v387_v23 = vsub.f32 1.0, %v386_v22  ;;  %552 = vmatpush.bf16.msra.mxu0 %v820_v45  ;;  %836 = vmatpush.bf16.msra.mxu1 %v820_v45  ;;  %v885_v45 = vld [vmem:[%s371_s30] ss:$0 sm:$0xff] }
  0x39   : > { %v388_v24 = vmul.f32 %v887_v21, %v387_v23  ;;  %v883_v23 = vld [vmem:[%s1121_s1] ss:$0 sm:$0xff] }
  0x3b   : > { %v389_v25 = vadd.f32 %v887_v21, %v388_v24  ;;  %553 = vmatpush.bf16.msra.mxu0 %v819_v46  ;;  %837 = vmatpush.bf16.msra.mxu1 %v819_v46 }
  0x3d   : > { %v391_v26 = vsel %vm390_vm0, %v887_v21, %v389_v25 }
  0x3f   : > { %554 = vmatpush.bf16.msra.mxu0 %v818_v47  ;;  %838 = vmatpush.bf16.msra.mxu1 %v818_v47 }
  0x43   : > { %555 = vmatpush.bf16.msra.mxu0 %v817_v48  ;;  %839 = vmatpush.bf16.msra.mxu1 %v817_v48 }
  0x47   : > { %556 = vmatpush.bf16.msra.mxu0 %v816_v49  ;;  %840 = vmatpush.bf16.msra.mxu1 %v816_v49 }
  0x4b   : > { %557 = vmatpush.bf16.msra.mxu0 %v815_v54  ;;  %841 = vmatpush.bf16.msra.mxu1 %v815_v54 }
  0xa1   : > { %v382_v27 = vpop.xlane.xlu1 %381  ;;  %v378_v28 = vpop.xlane.xlu0 %377 }
  0xa2   : > { %v394_v29 = vmul.f32 %v391_v26, %v382_v27  ;;  %v392_v30 = vmul.f32 %v391_v26, %v378_v28 }
  0xa4   : > { %v1055_v31 = vsub.f32 %v375_v16, %v394_v29  ;;  %v1057_v32 = vsub.f32 %v373_v17, %v392_v30  ;;  %v884_v30 = vld [vmem:[%s1122_s2] ss:$0 sm:$0xff] }
  0xa6   : > { %v402_v33 = vmul.f32 %v1055_v31, %v1055_v31  ;;  %v400_v34 = vmul.f32 %v1057_v32, %v1057_v32 }
  0xa8   : > { %408 = vadd.xlane.f32.xlu0 %v402_v33  ;;  %404 = vadd.xlane.f32.xlu2 %v400_v34 }
  0xa9   : > { %v384_v35 = vpop.xlane.xlu1 %383  ;;  %v380_v36 = vpop.xlane.xlu0 %379 }
  0xaa   : > { %v395_v37 = vmul.f32 %v391_v26, %v384_v35  ;;  %v393_v38 = vmul.f32 %v391_v26, %v380_v36 }
  0xac   : > { %v1063_v39 = vsub.f32 %v376_v18, %v395_v37  ;;  %v1065_v40 = vsub.f32 %v374_v19, %v393_v38 }
  0xae   : > { %v403_v41 = vmul.f32 %v1063_v39, %v1063_v39  ;;  %v401_v42 = vmul.f32 %v1065_v40, %v1065_v40 }
  0xb0   : > { %410 = vadd.xlane.f32.xlu1 %v403_v41  ;;  %406 = vadd.xlane.f32.xlu2 %v401_v42 }
 0x11b   : > { %v405_v50 = vpop.xlane.xlu2 %404  ;;  %v409_v51 = vpop.xlane.xlu0 %408 }
 0x11c   : > { %v412_v52 = vmul.f32 %v405_v50, %v391_v26  ;;  %v414_v53 = vmul.f32 %v409_v51, %v391_v26 }
 0x11e   : > { %v416_v55 = vadd.f32 1e-05, %v412_v52  ;;  %v418_v56 = vadd.f32 1e-05, %v414_v53 }
 0x120   : > { %888 = vrsqrt.f32 %v416_v55  ;;  %vm446_vm3 = vweird.f32 %v418_v56  ;;  %vm426_vm4 = vweird.f32 %v416_v55 }
 0x121   : > { %890 = vrsqrt.f32 %v418_v56 }
 0x123   : > { %v411_v57 = vpop.xlane.xlu1 %410  ;;  %v407_v58 = vpop.xlane.xlu2 %406 }
 0x124   : > { %v415_v59 = vmul.f32 %v411_v57, %v391_v26  ;;  %v413_v60 = vmul.f32 %v407_v58, %v391_v26 }
 0x126   : > { %v889_v61 = vpop.eup %888  ;;  %v419_v62 = vadd.f32 1e-05, %v415_v59  ;;  %v417_v63 = vadd.f32 1e-05, %v413_v60 }
 0x127   : > { %v891_v0 = vpop.eup %890  ;;  %v421_v1 = vmul.f32 %v889_v61, %v416_v55  ;;  %vm427_vm2 = vweird.f32 %v889_v61 }
 0x128   : > { %v441_v2 = vmul.f32 %v891_v0, %v418_v56  ;;  %892 = vrsqrt.f32 %v419_v62  ;;  %vm447_vm1 = vweird.f32 %v891_v0  ;;  %vm428_vm6 = vmor %vm426_vm4, %vm427_vm2  ;;  %vm456_vm9 = vweird.f32 %v419_v62 }
 0x129   : > { %v422_v3 = vmul.f32 %v889_v61, %v421_v1  ;;  %894 = vrsqrt.f32 %v417_v63  ;;  %vm448_vm5 = vmor %vm446_vm3, %vm447_vm1  ;;  %vm436_vm11 = vweird.f32 %v417_v63 }
 0x12a   : > { %v442_v4 = vmul.f32 %v891_v0, %v441_v2 }
 0x12b   : > { %v423_v5 = vmul.f32 0.5, %v422_v3 }
 0x12c   : > { %v443_v6 = vmul.f32 0.5, %v442_v4 }
 0x12d   : > { %v424_v7 = vsub.f32 1.5, %v423_v5 }
 0x12e   : > { %v893_v8 = vpop.eup %892  ;;  %v444_v9 = vsub.f32 1.5, %v443_v6 }
 0x12f   : > { %v895_v10 = vpop.eup %894  ;;  %v451_v11 = vmul.f32 %v893_v8, %v419_v62  ;;  %v425_v12 = vmul.f32 %v889_v61, %v424_v7  ;;  %vm457_vm7 = vweird.f32 %v893_v8 }
 0x130   : > { %v445_v13 = vmul.f32 %v891_v0, %v444_v9  ;;  %v431_v14 = vmul.f32 %v895_v10, %v417_v63  ;;  %vm437_vm8 = vweird.f32 %v895_v10  ;;  %vm458_vm10 = vmor %vm456_vm9, %vm457_vm7 }
 0x131   : > { %v452_v15 = vmul.f32 %v893_v8, %v451_v11  ;;  %v429_v20 = vsel %vm428_vm6, %v889_v61, %v425_v12  ;;  %vm438_vm12 = vmor %vm436_vm11, %vm437_vm8 }
 0x132   : > { %v432_v16 = vmul.f32 %v895_v10, %v431_v14  ;;  %v449_v18 = vsel %vm448_vm5, %v891_v0, %v445_v13  ;;  %v460_v26 = vmul.f32 %v429_v20, %v1057_v32 }
 0x133   : > { %v453_v17 = vmul.f32 0.5, %v452_v15  ;;  %v462_v24 = vmul.f32 %v449_v18, %v1055_v31 }
 0x134   : > { %v433_v19 = vmul.f32 0.5, %v432_v16  ;;  %v468_v35 = vmul.f32 %v883_v23, %v460_v26 }
 0x135   : > { %v454_v21 = vsub.f32 1.5, %v453_v17  ;;  %v470_v34 = vmul.f32 %v883_v23, %v462_v24 }
 0x136   : > { %v434_v22 = vsub.f32 1.5, %v433_v19  ;;  %v476_v41 = vadd.f32 %v884_v30, %v468_v35 }
 0x137   : > { %v455_v25 = vmul.f32 %v893_v8, %v454_v21  ;;  %v478_v32 = vadd.f32 %v884_v30, %v470_v34 }
 0x138   : > { %v435_v27 = vmul.f32 %v895_v10, %v434_v22 }
 0x139   : > { %v459_v28 = vsel %vm458_vm10, %v893_v8, %v455_v25 }
 0x13a   : > { %v439_v29 = vsel %vm438_vm12, %v895_v10, %v435_v27  ;;  %v463_v33 = vmul.f32 %v459_v28, %v1063_v39 }
 0x13b   : > { %v461_v31 = vmul.f32 %v439_v29, %v1065_v40 }
 0x13c   : > { %v471_v36 = vmul.f32 %v883_v23, %v463_v33 }
 0x13d   : > { %v469_v37 = vmul.f32 %v883_v23, %v461_v31 }
 0x13e   : > { %v479_v38 = vadd.f32 %v884_v30, %v471_v36 }
 0x13f   : > { %v477_v42 = vadd.f32 %v884_v30, %v469_v37 }
 0x140   : > { %v481_v43 = vpack.c.bf16 %v479_v38, %v478_v32 }
 0x141   : > { %v480_v44 = vpack.c.bf16 %v477_v42, %v476_v41 }
 0x142   : > { %563 = vmatmul.bf16.vlgmr.msra.gmra.mxu1 %v481_v43 }
 0x143   : > { %558 = vmatmul.bf16.vlgmr.msra.gmra.mxu0 %v480_v44 }
 0x1bf   : > { %v564_v39 = vpop.f32.mrf.mxu1 }
 0x1c0   : > { %v559_v46 = vpop.f32.mrf.mxu0  ;;  %v565_v47 = vadd.f32 %v885_v45, %v564_v39 }
 0x1c1   : > { %v560_v40 = vadd.f32 %v885_v45, %v559_v46 }
 0x1c2   : > { %v575_v48 = vmul.f32 0.044715, %v565_v47  ;;  %v571_v14 = vmul.f32 0.5, %v565_v47 }
 0x1c3   : > { %v573_v49 = vmul.f32 0.044715, %v560_v40  ;;  %v569_v17 = vmul.f32 0.5, %v560_v40 }
 0x1c4   : > { %v579_v50 = vmul.f32 %v575_v48, %v565_v47 }
 0x1c5   : > { %v577_v51 = vmul.f32 %v573_v49, %v560_v40 }
 0x1c6   : > { %v583_v52 = vmul.f32 %v579_v50, %v565_v47 }
 0x1c7   : > { %v581_v53 = vmul.f32 %v577_v51, %v560_v40  ;;  %v566_v54 = vpop.f32.mrf.mxu1 }
 0x1c8   : > { %v587_v55 = vadd.f32 %v583_v52, %v565_v47  ;;  %v561_v56 = vpop.f32.mrf.mxu0  ;;  %v567_v57 = vadd.f32 %v885_v45, %v566_v54 }
 0x1c9   : > { %v585_v58 = vadd.f32 %v581_v53, %v560_v40  ;;  %v562_v59 = vadd.f32 %v885_v45, %v561_v56 }
 0x1ca   : > { %v576_v60 = vmul.f32 0.044715, %v567_v57  ;;  %v591_v62 = vmul.f32 0.7978846, %v587_v55  ;;  %v572_v15 = vmul.f32 0.5, %v567_v57 }
 0x1cb   : > { %v574_v61 = vmul.f32 0.044715, %v562_v59  ;;  %v589_v0 = vmul.f32 0.7978846, %v585_v58  ;;  %v570_v18 = vmul.f32 0.5, %v562_v59 }
 0x1cc   : > { %v580_v63 = vmul.f32 %v576_v60, %v567_v57  ;;  %896 = vtanh.f32 %v591_v62 }
 0x1cd   : > { %v578_v1 = vmul.f32 %v574_v61, %v562_v59  ;;  %898 = vtanh.f32 %v589_v0 }
 0x1ce   : > { %v584_v2 = vmul.f32 %v580_v63, %v567_v57 }
 0x1cf   : > { %v582_v3 = vmul.f32 %v578_v1, %v562_v59 }
 0x1d0   : > { %v588_v4 = vadd.f32 %v584_v2, %v567_v57 }
 0x1d1   : > { %v586_v5 = vadd.f32 %v582_v3, %v562_v59 }
 0x1d2   : > { %v592_v6 = vmul.f32 0.7978846, %v588_v4  ;;  %v897_v8 = vpop.eup %896 }
 0x1d3   : > { %v590_v7 = vmul.f32 0.7978846, %v586_v5  ;;  %v899_v9 = vpop.eup %898  ;;  %v599_v10 = vadd.f32 1.0, %v897_v8 }
 0x1d4   : > { %900 = vtanh.f32 %v592_v6  ;;  %v597_v12 = vadd.f32 1.0, %v899_v9 }
 0x1d5   : > { %902 = vtanh.f32 %v590_v7  ;;  %v603_v20 = vmul.f32 %v599_v10, %v571_v14 }
 0x1d6   : > { %v601_v22 = vmul.f32 %v597_v12, %v569_v17 }
 0x1da   : > { %v901_v11 = vpop.eup %900 }
 0x1db   : > { %v903_v13 = vpop.eup %902  ;;  %v600_v16 = vadd.f32 1.0, %v901_v11 }
 0x1dc   : > { %v598_v19 = vadd.f32 1.0, %v903_v13 }
 0x1dd   : > { %v604_v21 = vmul.f32 %v600_v16, %v572_v15 }
 0x1de   : > { %v602_v23 = vmul.f32 %v598_v19, %v570_v18  ;;  %619 = sbr.rel (!%p1010_p6) target bundleno = 493 (0x1ed), region = 85 }
 0x1df   : > { %v831_v24 = vpack.c.bf16 %v604_v21, %v603_v20 }
 0x1e0   : > { %v826_v25 = vpack.c.bf16 %v602_v23, %v601_v22 }
 0x1e1   : > { %833 = vst [vmem:[%s362_s16 + $0x8] sm:$0xff] %v831_v24  }
 0x1e2   : > { %827 = vst [vmem:[%s362_s16] sm:$0xff] %v826_v25  }
 0x1e8   : > { %v645_v28 = vld [vmem:[%s362_s16 + $0x8] sm:$0xf]  ;;  %v647_v29 = vld [vmem:[%s362_s16 + $0xc] sm:$0xf] }
 0x1e9   : > { %v641_v26 = vld [vmem:[%s362_s16] sm:$0xf]  ;;  %v643_v27 = vld [vmem:[%s362_s16 + $0x4] sm:$0xf]  ;;  %646 = vst [vmem:[%s624_s25 + $0x20] sm:$0xf] %v645_v28 }
 0x1ea   : > { %642 = vst [vmem:[%s624_s25] sm:$0xf] %v641_v26 }
 0x1eb   : > { %644 = vst [vmem:[%s624_s25 + $0x10] sm:$0xf] %v643_v27 }
 0x1ec   : > { %648 = vst [vmem:[%s624_s25 + $0x30] sm:$0xf] %v647_v29 }
 0x1ed PF: > { %s15_s22 = sadd.s32 1, %s942_s22   ;;  %s1127_s18 = smov %s930_s19 }
 0x1ee   : > { %p12_p12 = scmp.ge.s32.totalorder %s15_s22, 6   ;;  %s1128_s19 = smov %s1015_s28 }
 0x1ef   : > { %s1129_s20 = smov %s938_s21  ;;  %s1130_s21 = smov %s1132_s23 }
 0x1f0   :  { %14 = sbr.rel (!%p12_p12) target bundleno = 3 (0x3), region = 163 }

// kernel: textdiae_forward.75
= control target key start
LH: loop header
LB: loop body
LE: loop exit
PB: predicated region body
PF: predicated region fallthrough
CT: control target
= control target key end

     0   :  { %vm166_vm0 = vcmask 523264   ;;  %s420_s1 = inlined_call_operand.vmem [shape: bf16[128,192], index: 1, kind: input, shape index: {}]   ;;  %s421_s0 = inlined_call_operand.vmem [shape: bf16[24,128], index: 0, kind: input, shape index: {}]   ;;  %s422_s2 = inlined_call_operand.vmem [shape: f32[1,192], index: 2, kind: input, shape index: {}]   ;;  %s423_s3 = inlined_call_operand.vmem [shape: f32[24,192], index: 3, kind: output, shape index: {}]  }
   0x1   :  { %v238_v0 = vld [vmem:[%s420_s1 + $0x70] sm:$0xf]  ;;  %v260_v1 = vld [vmem:[%s420_s1 + $0x74] sm:$0xf0]  ;;  %v259_v2 = vld [vmem:[%s420_s1 + $0x74] sm:$0xf] }
   0x2   :  { %v239_v3 = vor.u32 %v260_v1, %v238_v0  ;;  %v240_v4 = vld [vmem:[%s420_s1 + $0x78] sm:$0xf0]  ;;  %v230_v5 = vld [vmem:[%s420_s1 + $0x60] sm:$0xf]  ;;  %v258_v6 = vld [vmem:[%s420_s1 + $0x64] sm:$0xf0] }
   0x3   :  { %v243_v7 = vor.u32 %v259_v2, %v240_v4  ;;  %v257_v8 = vld [vmem:[%s420_s1 + $0x64] sm:$0xf]  ;;  %v232_v9 = vld [vmem:[%s420_s1 + $0x68] sm:$0xf0]  ;;  %v231_v10 = vor.u32 %v258_v6, %v230_v5  ;;  %v222_v12 = vld [vmem:[%s420_s1 + $0x50] sm:$0xf] }
   0x4   :  { %129 = vmatpush.bf16.msra.mxu0 %v239_v3  ;;  %261 = vmatpush.bf16.msra.mxu2 %v239_v3  ;;  %v235_v11 = vor.u32 %v257_v8, %v232_v9  ;;  %v256_v13 = vld [vmem:[%s420_s1 + $0x54] sm:$0xf0]  ;;  %v255_v14 = vld [vmem:[%s420_s1 + $0x54] sm:$0xf]  ;;  %v224_v15 = vld [vmem:[%s420_s1 + $0x58] sm:$0xf0] }
   0x5   :  { %147 = vmatpush.bf16.msra.mxu1 %v243_v7  ;;  %269 = vmatpush.bf16.msra.mxu3 %v243_v7  ;;  %v223_v16 = vor.u32 %v256_v13, %v222_v12  ;;  %v227_v17 = vor.u32 %v255_v14, %v224_v15  ;;  %v214_v18 = vld [vmem:[%s420_s1 + $0x40] sm:$0xf]  ;;  %v254_v19 = vld [vmem:[%s420_s1 + $0x44] sm:$0xf0]  ;;  %v253_v20 = vld [vmem:[%s420_s1 + $0x44] sm:$0xf] }
   0x6   :  { %v216_v21 = vld [vmem:[%s420_s1 + $0x48] sm:$0xf0]  ;;  %v215_v22 = vor.u32 %v254_v19, %v214_v18  ;;  %v206_v24 = vld [vmem:[%s420_s1 + $0x30] sm:$0xf]  ;;  %v252_v25 = vld [vmem:[%s420_s1 + $0x34] sm:$0xf0] }
   0x7   :  { %v219_v23 = vor.u32 %v253_v20, %v216_v21  ;;  %v251_v26 = vld [vmem:[%s420_s1 + $0x34] sm:$0xf]  ;;  %v208_v27 = vld [vmem:[%s420_s1 + $0x38] sm:$0xf0]  ;;  %v207_v28 = vor.u32 %v252_v25, %v206_v24  ;;  %v198_v30 = vld [vmem:[%s420_s1 + $0x20] sm:$0xf] }
   0x8   :  { %130 = vmatpush.bf16.msra.mxu0 %v231_v10  ;;  %262 = vmatpush.bf16.msra.mxu2 %v231_v10  ;;  %v211_v29 = vor.u32 %v251_v26, %v208_v27  ;;  %v250_v31 = vld [vmem:[%s420_s1 + $0x24] sm:$0xf0]  ;;  %v249_v32 = vld [vmem:[%s420_s1 + $0x24] sm:$0xf]  ;;  %v200_v33 = vld [vmem:[%s420_s1 + $0x28] sm:$0xf0] }
   0x9   :  { %148 = vmatpush.bf16.msra.mxu1 %v235_v11  ;;  %270 = vmatpush.bf16.msra.mxu3 %v235_v11  ;;  %v199_v34 = vor.u32 %v250_v31, %v198_v30  ;;  %v203_v35 = vor.u32 %v249_v32, %v200_v33  ;;  %v190_v36 = vld [vmem:[%s420_s1 + $0x10] sm:$0xf]  ;;  %v248_v37 = vld [vmem:[%s420_s1 + $0x14] sm:$0xf0]  ;;  %v247_v38 = vld [vmem:[%s420_s1 + $0x14] sm:$0xf] }
   0xa   :  { %v192_v39 = vld [vmem:[%s420_s1 + $0x18] sm:$0xf0]  ;;  %v191_v40 = vor.u32 %v248_v37, %v190_v36  ;;  %v16_v41 = vld [vmem:[%s421_s0 + $0x8] sm:$0xf]  ;;  %v182_v43 = vld [vmem:[%s420_s1] sm:$0xf] }
   0xb   :  { %v195_v42 = vor.u32 %v247_v38, %v192_v39  ;;  %v246_v44 = vld [vmem:[%s420_s1 + $0x4] sm:$0xf0]  ;;  %v245_v45 = vld [vmem:[%s420_s1 + $0x4] sm:$0xf]  ;;  %v184_v46 = vld [vmem:[%s420_s1 + $0x8] sm:$0xf0]  ;;  %v44_v47 = vunpack.c.l.b16 %v16_v41 }
   0xc   :  { %131 = vmatpush.bf16.msra.mxu0 %v223_v16  ;;  %263 = vmatpush.bf16.msra.mxu2 %v223_v16  ;;  %v183_v48 = vor.u32 %v246_v44, %v182_v43  ;;  %v187_v49 = vor.u32 %v245_v45, %v184_v46  ;;  %v244_v50 = vld [vmem:[%s421_s0] sm:$0xff] }
   0xd   :  { %149 = vmatpush.bf16.msra.mxu1 %v227_v17  ;;  %271 = vmatpush.bf16.msra.mxu3 %v227_v17  ;;  %v46_v51 = vpack.c.b16 %v44_v47, %v44_v47  ;;  %v33_v52 = vld [vmem:[%s422_s2] sm:$0x3] }
   0xe   :  { %v35_v53 = vperm.slane %v33_v52, 0  ;;  %v36_v54 = vperm.slane %v33_v52, 1 }
  0x10   :  { %132 = vmatpush.bf16.msra.mxu0 %v215_v22  ;;  %264 = vmatpush.bf16.msra.mxu2 %v215_v22 }
  0x11   :  { %150 = vmatpush.bf16.msra.mxu1 %v219_v23  ;;  %272 = vmatpush.bf16.msra.mxu3 %v219_v23 }
  0x14   :  { %133 = vmatpush.bf16.msra.mxu0 %v207_v28  ;;  %265 = vmatpush.bf16.msra.mxu2 %v207_v28 }
  0x15   :  { %151 = vmatpush.bf16.msra.mxu1 %v211_v29  ;;  %273 = vmatpush.bf16.msra.mxu3 %v211_v29 }
  0x18   :  { %134 = vmatpush.bf16.msra.mxu0 %v199_v34  ;;  %266 = vmatpush.bf16.msra.mxu2 %v199_v34 }
  0x19   :  { %152 = vmatpush.bf16.msra.mxu1 %v203_v35  ;;  %274 = vmatpush.bf16.msra.mxu3 %v203_v35 }
  0x1c   :  { %135 = vmatpush.bf16.msra.mxu0 %v191_v40  ;;  %267 = vmatpush.bf16.msra.mxu2 %v191_v40 }
  0x1d   :  { %153 = vmatpush.bf16.msra.mxu1 %v195_v42  ;;  %275 = vmatpush.bf16.msra.mxu3 %v195_v42 }
  0x20   :  { %136 = vmatpush.bf16.msra.mxu0 %v183_v48  ;;  %268 = vmatpush.bf16.msra.mxu2 %v183_v48 }
  0x21   :  { %154 = vmatpush.bf16.msra.mxu1 %v187_v49  ;;  %276 = vmatpush.bf16.msra.mxu3 %v187_v49 }
  0x23   :  { %137 = vmatmul.bf16.vlgmr.msra.gmra.mxu0 %v244_v50  ;;  %142 = vmatmul.bf16.vlgmr.msra.gmra.mxu2 %v46_v51 }
  0x24   :  { %155 = vmatmul.bf16.vlgmr.msra.gmra.mxu1 %v244_v50  ;;  %160 = vmatmul.bf16.vlgmr.msra.gmra.mxu3 %v46_v51 }
  0xa0   :  { %v138_v55 = vpop.f32.mrf.mxu0 }
  0xa1   :  { %v139_v56 = vadd.f32 %v138_v55, %v35_v53  ;;  %v156_v57 = vpop.f32.mrf.mxu1 }
  0xa2   :  { %v157_v58 = vadd.f32 %v156_v57, %v36_v54 }
  0xa3   :  { %165 = vst [vmem:[%s423_s3] sm:$0xff] %v139_v56 }
  0xa4   :  { %167 = vst.msk [vmem:[%s423_s3 + $0x8] sm:$0xff] %vm166_vm0, %v157_v58 }
  0xa6   :  { %v143_v59 = vpop.f32.mrf.mxu2 }
  0xa7   :  { %v144_v60 = vadd.f32 %v143_v59, %v35_v53  ;;  %v161_v61 = vpop.f32.mrf.mxu3 }
  0xa8   :  { %v162_v62 = vadd.f32 %v161_v61, %v36_v54  ;;  %v140_v63 = vpop.f32.mrf.mxu0 }
  0xa9   :  { %170 = vst [vmem:[%s423_s3 + $0x20] sm:$0xff] %v144_v60  ;;  %v141_v0 = vadd.f32 %v140_v63, %v35_v53  ;;  %v158_v1 = vpop.f32.mrf.mxu1 }
  0xaa   :  { %171 = vst.msk [vmem:[%s423_s3 + $0x28] sm:$0xff] %vm166_vm0, %v162_v62  ;;  %v159_v2 = vadd.f32 %v158_v1, %v36_v54 }
  0xab   :  { %168 = vst [vmem:[%s423_s3 + $0x10] sm:$0xff] %v141_v0 }
  0xac   :  { %169 = vst.msk [vmem:[%s423_s3 + $0x18] sm:$0xff] %vm166_vm0, %v159_v2 }
  0xae   :  { %v145_v3 = vpop.f32.mrf.mxu2 }
  0xaf   :  { %v163_v4 = vpop.f32.mrf.mxu3 }

</bundles_post_ra>
